<compile_context>
chip_gen: v7x
topology: tpu7x:2x2x1
jax: 0.10.0
libtpu: 0.0.40
codegen_flags: <defaults>
</compile_context>

<pallas_src>
import numpy as np

import jax
import jax.numpy as jnp
from jax.experimental import pallas as pl
from jax.experimental.pallas import tpu as pltpu


R1 = 6 * 28    # conv1 output rows per kernel-column block: (co, ho)
R2 = 16 * 10   # conv2 output rows per kernel-column block: (co, ho)


# ------------------------------ kernel helpers ------------------------------ #

def _pull(x, k, axis):
    """result[..., i, ...] = x[..., i + k, ...]  (static k, wrap-around).

    Implemented as a static slice + concatenate so the semantics are explicit.
    The wrapped-around tail entries only ever land in rows/lanes that are
    never consumed by a valid output (proved per use-site below).
    """
    if k == 0:
        return x
    if axis == 0:
        return jnp.concatenate([x[k:, :], x[:k, :]], axis=0)
    return jnp.concatenate([x[:, k:], x[:, :k]], axis=1)


def _lenet_kernel(x0_ref, a1_ref, b1_ref, a2_ref, b2_ref, g_ref, f1_ref,
                  fb1_ref, w2_ref, fb2_ref, w3_ref, fb3_ref, out_ref):
    f32 = jnp.float32
    bf16 = jnp.bfloat16

    # x0: rows (ci, h) = ci*32 + h, lanes (b, w) = b*32 + w.
    x0 = x0_ref[...].astype(bf16)                      # (96, L)

    # ---- conv1 (5x5 valid) + bias + ReLU ---------------------------------- #
    # a1 is 5 stacked banded matrices (one per kernel column kj):
    #   a1[kj*R1 + (co,ho), (ci,h)] = w1[co,ci,h-ho,kj] for 0 <= h-ho < 5.
    # One matmul computes all 5 partial convolutions; pulling partial kj by kj
    # lanes aligns input column w = wo+kj with output column wo; summing over
    # kj gives the full conv.  Lanes with w in [28,32) hold don't-care values
    # (never consumed).  Row slices below are vreg-aligned (R1 = 21*8).
    p_all = jnp.dot(a1_ref[...], x0, preferred_element_type=f32)   # (5*R1, L)
    s = None
    for kj in range(5):
        p = _pull(p_all[kj * R1:(kj + 1) * R1, :], kj, axis=1)
        s = p if s is None else s + p
    h1 = jnp.maximum(s + b1_ref[...], 0.0)    # (R1, L) f32, rows co*28+ho

    # ---- maxpool 2x2 #1 (fused epilogue) ---------------------------------- #
    # Pooled value (co, hp, b, wp) ends up at row co*28 + 2*hp, lane b*32+2*wp
    # (2*hp <= 26, 2*wp <= 26, so the +1 row/lane never crosses a block).
    m = jnp.maximum(h1, _pull(h1, 1, axis=1))                # column-pair max
    x1 = jnp.maximum(m, _pull(m, 1, axis=0)).astype(bf16)    # row-pair max

    # ---- conv2 (5x5 valid) + bias + ReLU ---------------------------------- #
    # Same banded trick; pool-1 rows live at even rows (folded into a2) and
    # pool-1 columns at even lanes, hence the lane pull is 2*kj
    # (reads lane 2*(wo+kj) <= 26: stays inside the image's 32-lane block).
    p_all = jnp.dot(a2_ref[...], x1, preferred_element_type=f32)   # (5*R2, L)
    s = None
    for kj in range(5):
        p = _pull(p_all[kj * R2:(kj + 1) * R2, :], 2 * kj, axis=1)
        s = p if s is None else s + p
    h2 = jnp.maximum(s + b2_ref[...], 0.0)    # rows co*10+ho, valid lanes b*32+2*wo

    # ---- maxpool 2x2 #2 ---------------------------------------------------- #
    # conv2 columns sit on even lanes -> the column pair is 2 lanes apart.
    # Pooled value (c2, hq, b, wq) ends at row c2*10 + 2*hq, lane b*32 + 4*wq.
    m = jnp.maximum(h2, _pull(h2, 2, axis=1))
    x2 = jnp.maximum(m, _pull(m, 1, axis=0)).astype(bf16)    # (R2, L)

    # ---- fc1: 0/1 selection matmuls gather the 5 valid columns per image --- #
    # (x2 @ g[wq])[:, b] = x2[:, b*32 + 4*wq]  (exact: one nonzero per column),
    # and f1[wq] holds the fc1 weights regrouped to that 160-row layout, so
    # summing over wq reproduces fc1 on PyTorch's view(-1, 16*5*5) ordering
    # (feature index c2*25 + hq*5 + wq).
    y = None
    for wq in range(5):
        col = jnp.dot(x2, g_ref[wq], preferred_element_type=f32)       # (160, TB)
        t = jnp.dot(f1_ref[wq], col.astype(bf16), preferred_element_type=f32)
        y = t if y is None else y + t                                   # (120, TB)
    z1 = jnp.maximum(y + fb1_ref[...], 0.0).astype(bf16)

    # ---- fc2 + ReLU, fc3 --------------------------------------------------- #
    z2 = jnp.maximum(jnp.dot(w2_ref[...], z1, preferred_element_type=f32)
                     + fb2_ref[...], 0.0).astype(bf16)
    y3 = jnp.dot(w3_ref[...], z2, preferred_element_type=f32) + fb3_ref[...]

    out_ref[...] = y3[None].astype(out_ref.dtype)     # (1, 10, TB) logits^T


# ------------------------- host-side constant prep -------------------------- #

def init_params(key):
    """Deterministic synthetic parameters, PyTorch layouts/shapes."""
    ks = jax.random.split(key, 10)

    def u(k, shape, fan_in):
        bound = 1.0 / np.sqrt(float(fan_in))
        return jax.random.uniform(k, shape, jnp.float32, -bound, bound)

    return {
        "conv1_w": u(ks[0], (6, 3, 5, 5), 3 * 5 * 5),
        "conv1_b": u(ks[1], (6,), 3 * 5 * 5),
        "conv2_w": u(ks[2], (16, 6, 5, 5), 6 * 5 * 5),
        "conv2_b": u(ks[3], (16,), 6 * 5 * 5),
        "fc1_w": u(ks[4], (120, 16 * 5 * 5), 16 * 5 * 5),
        "fc1_b": u(ks[5], (120,), 16 * 5 * 5),
        "fc2_w": u(ks[6], (84, 120), 120),
        "fc2_b": u(ks[7], (84,), 120),
        "fc3_w": u(ks[8], (10, 84), 84),
        "fc3_b": u(ks[9], (10,), 84),
    }


def prepare_constants(params, batch_tile=8):
    """Build the constant matrices consumed by the fused kernel (one-time,
    host side).  All layout bookkeeping of the network lives here."""
    TB = int(batch_tile)
    assert TB % 4 == 0, "batch_tile must be a multiple of 4 (lane width % 128)"
    L = TB * 32                      # lanes per batch tile (32 columns / image)

    w1 = np.asarray(params["conv1_w"], np.float32)    # (6, 3, 5, 5)
    b1 = np.asarray(params["conv1_b"], np.float32)
    w2 = np.asarray(params["conv2_w"], np.float32)    # (16, 6, 5, 5)
    b2 = np.asarray(params["conv2_b"], np.float32)
    fw1 = np.asarray(params["fc1_w"], np.float32)     # (120, 400)
    fb1 = np.asarray(params["fc1_b"], np.float32)
    fw2 = np.asarray(params["fc2_w"], np.float32)     # (84, 120)
    fb2 = np.asarray(params["fc2_b"], np.float32)
    fw3 = np.asarray(params["fc3_w"], np.float32)     # (10, 84)
    fb3 = np.asarray(params["fc3_b"], np.float32)

    # conv1 banded matrices, one per kernel column kj:
    #   a1[kj][(co,ho), (ci,h)] = w1[co, ci, h - ho, kj]  for h - ho in [0, 5).
    a1 = np.zeros((5, R1, 3 * 32), np.float32)
    for kj in range(5):
        for co in range(6):
            for ci in range(3):
                for ki in range(5):
                    for ho in range(28):
                        a1[kj, co * 28 + ho, ci * 32 + ho + ki] = w1[co, ci, ki, kj]

    # conv2 banded matrices.  Its input rows are conv1-slab rows (c1*28 + h);
    # the pool-1 output for pooled row hp = ho + ki sits at h = 2*hp.
    a2 = np.zeros((5, R2, 6 * 28), np.float32)
    for kj in range(5):
        for co in range(16):
            for c1 in range(6):
                for ki in range(5):
                    for ho in range(10):
                        a2[kj, co * 10 + ho, c1 * 28 + 2 * (ho + ki)] = w2[co, c1, ki, kj]

    # Lane-selection matrices for the fc stage: after pool-2, pixel
    # (c2, hq, wq) of image b sits at row c2*10 + 2*hq, lane b*32 + 4*wq.
    g = np.zeros((5, L, TB), np.float32)
    for wq in range(5):
        for b in range(TB):
            g[wq, b * 32 + 4 * wq, b] = 1.0

    # fc1 weights regrouped to the 160-row slab layout (PyTorch view(-1,400)
    # flattening index is c2*25 + hq*5 + wq).
    f1 = np.zeros((5, 120, R2), np.float32)
    for wq in range(5):
        for c2 in range(16):
            for hq in range(5):
                f1[wq, :, c2 * 10 + 2 * hq] = fw1[:, c2 * 25 + hq * 5 + wq]

    bf16 = jnp.bfloat16
    return {
        # Stacked along rows so each conv is ONE MXU matmul in the kernel.
        "a1": jnp.asarray(a1.reshape(5 * R1, 3 * 32), bf16),
        "b1c": jnp.asarray(np.repeat(b1, 28).reshape(R1, 1)),
        "a2": jnp.asarray(a2.reshape(5 * R2, 6 * 28), bf16),
        "b2c": jnp.asarray(np.repeat(b2, 10).reshape(R2, 1)),
        "g": jnp.asarray(g, bf16),
        "f1": jnp.asarray(f1, bf16),
        "fb1c": jnp.asarray(fb1.reshape(120, 1)),
        "w2fc": jnp.asarray(fw2, bf16),
        "fb2c": jnp.asarray(fb2.reshape(84, 1)),
        "w3fc": jnp.asarray(fw3, bf16),
        "fb3c": jnp.asarray(fb3.reshape(10, 1)),
    }


# -------------------------------- forward ----------------------------------- #

def net_forward(x, consts):
    """x: (N, 3, 32, 32) float32 NCHW -> logits (N, 10)."""
    TB = consts["g"].shape[2]
    L = TB * 32
    n = x.shape[0]
    ntiles = (n + TB - 1) // TB
    n_pad = ntiles * TB

    xp = jnp.pad(x.astype(jnp.float32),
                 ((0, n_pad - n), (0, 0), (0, 0), (0, 0)))
    # One-time layout change at the network input:
    # rows = (ci, h) -> ci*32 + h, lanes = (b, w) -> b*32 + w.
    x0 = jnp.transpose(xp, (1, 2, 0, 3)).reshape(3 * 32, n_pad * 32)

    def full(shape):
        return pl.BlockSpec(shape, lambda i, _s=shape: (0,) * len(_s))

    out = pl.pallas_call(
        _lenet_kernel,
        out_shape=jax.ShapeDtypeStruct((ntiles, 10, TB), jnp.float32),
        grid=(ntiles,),
        in_specs=[
            pl.BlockSpec((3 * 32, L), lambda i: (0, i)),   # batch-tiled input
            full(consts["a1"].shape),
            full(consts["b1c"].shape),
            full(consts["a2"].shape),
            full(consts["b2c"].shape),
            full(consts["g"].shape),
            full(consts["f1"].shape),
            full(consts["fb1c"].shape),
            full(consts["w2fc"].shape),
            full(consts["fb2c"].shape),
            full(consts["w3fc"].shape),
            full(consts["fb3c"].shape),
        ],
        out_specs=pl.BlockSpec((1, 10, TB), lambda i: (i, 0, 0)),
        compiler_params=pltpu.CompilerParams(
            dimension_semantics=("parallel",)),
    )(x0, consts["a1"], consts["b1c"], consts["a2"], consts["b2c"],
      consts["g"], consts["f1"], consts["fb1c"], consts["w2fc"],
      consts["fb2c"], consts["w3fc"], consts["fb3c"])

    # (ntiles, 10, TB) -> (N, 10)
    return out.transpose(0, 2, 1).reshape(n_pad, 10)[:n]


# --------------------------- pure-JAX reference ------------------------------ #

def net_forward_ref(x, params):
    """Straightforward f32 reference matching the PyTorch module."""
    dn = ("NCHW", "OIHW", "NCHW")

    def pool2(y):
        n, c, h, w = y.shape
        return y.reshape(n, c, h // 2, 2, w // 2, 2).max(axis=(3, 5))

    y = jax.lax.conv_general_dilated(x, params["conv1_w"], (1, 1), "VALID",
                                     dimension_numbers=dn)
    y = pool2(jax.nn.relu(y + params["conv1_b"][None, :, None, None]))
    y = jax.lax.conv_general_dilated(y, params["conv2_w"], (1, 1), "VALID",
                                     dimension_numbers=dn)
    y = pool2(jax.nn.relu(y + params["conv2_b"][None, :, None, None]))
    y = y.reshape(y.shape[0], -1)                       # (N, 16*5*5)
    y = jax.nn.relu(y @ params["fc1_w"].T + params["fc1_b"])
    y = jax.nn.relu(y @ params["fc2_w"].T + params["fc2_b"])
    return y @ params["fc3_w"].T + params["fc3_b"]


if __name__ == "__main__":
    key = jax.random.PRNGKey(0)
    pkey, xkey = jax.random.split(key)
    params = init_params(pkey)
    consts = prepare_constants(params, batch_tile=8)

    # The module's view(-1, 16*5*5) implies a 32x32 spatial input (CIFAR-sized).
    x = jax.random.normal(xkey, (2, 3, 32, 32), dtype=jnp.float32)

    fwd = jax.jit(net_forward)
    out = jax.block_until_ready(fwd(x, consts))
    assert out.shape == (2, 10) and out.dtype == jnp.float32
    assert bool(jnp.all(jnp.isfinite(out)))

    # Correctness vs. f32 reference (kernel matmuls are bf16 -> loose tol).
    ref = net_forward_ref(x, params)
    err = float(jnp.max(jnp.abs(out - ref)))
    assert err < 8e-2, f"kernel/reference mismatch: max|diff|={err}"

    print("KERNEL_OK")
</pallas_src>

<mosaic_0001>
module attributes {stable_mosaic.version = 11 : i64} {
  func.func @_lenet_kernel(%arg0: i32, %arg1: memref<96x256xf32, #tpu.memory_space<vmem>>, %arg2: memref<840x96xbf16, #tpu.memory_space<vmem>>, %arg3: memref<168x1xf32, #tpu.memory_space<vmem>>, %arg4: memref<800x168xbf16, #tpu.memory_space<vmem>>, %arg5: memref<160x1xf32, #tpu.memory_space<vmem>>, %arg6: memref<5x256x8xbf16, #tpu.memory_space<vmem>>, %arg7: memref<5x120x160xbf16, #tpu.memory_space<vmem>>, %arg8: memref<120x1xf32, #tpu.memory_space<vmem>>, %arg9: memref<84x120xbf16, #tpu.memory_space<vmem>>, %arg10: memref<84x1xf32, #tpu.memory_space<vmem>>, %arg11: memref<10x84xbf16, #tpu.memory_space<vmem>>, %arg12: memref<10x1xf32, #tpu.memory_space<vmem>>, %arg13: memref<1x10x8xf32, #tpu.memory_space<vmem>>) attributes {dimension_semantics = [#tpu.dimension_semantics<parallel>], iteration_bounds = array<i64: 1>, scalar_prefetch = 0 : i64, scratch_operands = 0 : i64, tpu.core_type = #tpu.core_type<tc>, window_params = [{transform_indices = @transform_0, window_bounds = array<i64: 96, 256>}, {pipeline_mode = #tpu.pipeline_mode<synchronous>, transform_indices = @transform_1, window_bounds = array<i64: 840, 96>}, {pipeline_mode = #tpu.pipeline_mode<synchronous>, transform_indices = @transform_2, window_bounds = array<i64: 168, 1>}, {pipeline_mode = #tpu.pipeline_mode<synchronous>, transform_indices = @transform_3, window_bounds = array<i64: 800, 168>}, {pipeline_mode = #tpu.pipeline_mode<synchronous>, transform_indices = @transform_4, window_bounds = array<i64: 160, 1>}, {pipeline_mode = #tpu.pipeline_mode<synchronous>, transform_indices = @transform_5, window_bounds = array<i64: 5, 256, 8>}, {pipeline_mode = #tpu.pipeline_mode<synchronous>, transform_indices = @transform_6, window_bounds = array<i64: 5, 120, 160>}, {pipeline_mode = #tpu.pipeline_mode<synchronous>, transform_indices = @transform_7, window_bounds = array<i64: 120, 1>}, {pipeline_mode = #tpu.pipeline_mode<synchronous>, transform_indices = @transform_8, window_bounds = array<i64: 84, 120>}, {pipeline_mode = #tpu.pipeline_mode<synchronous>, transform_indices = @transform_9, window_bounds = array<i64: 84, 1>}, {pipeline_mode = #tpu.pipeline_mode<synchronous>, transform_indices = @transform_10, window_bounds = array<i64: 10, 84>}, {pipeline_mode = #tpu.pipeline_mode<synchronous>, transform_indices = @transform_11, window_bounds = array<i64: 10, 1>}, {transform_indices = @transform_12, window_bounds = array<i64: 1, 10, 8>}]} {
    %c0 = arith.constant 0 : index
    %c0_0 = arith.constant 0 : index
    %0 = vector.load %arg1[%c0, %c0_0] : memref<96x256xf32, #tpu.memory_space<vmem>>, vector<96x256xf32>
    %1 = arith.truncf %0 : vector<96x256xf32> to vector<96x256xbf16>
    %c0_1 = arith.constant 0 : index
    %c0_2 = arith.constant 0 : index
    %2 = vector.load %arg2[%c0_1, %c0_2] : memref<840x96xbf16, #tpu.memory_space<vmem>>, vector<840x96xbf16>
    %cst = arith.constant dense<0.000000e+00> : vector<840x256xf32>
    %3 = tpu.matmul %2, %1, %cst {dimension_numbers = #tpu.dot_dimension_numbers<[1], [0], [0], [1], [0, 0, 1, 1], [], []>} : vector<840x96xbf16>, vector<96x256xbf16>, vector<840x256xf32> -> vector<840x256xf32>
    %4 = vector.extract_strided_slice %3 {offsets = [0, 0], sizes = [168, 256], strides = [1, 1]} : vector<840x256xf32> to vector<168x256xf32>
    %5 = vector.extract_strided_slice %3 {offsets = [168, 0], sizes = [168, 256], strides = [1, 1]} : vector<840x256xf32> to vector<168x256xf32>
    %6 = vector.extract_strided_slice %5 {offsets = [0, 1], sizes = [168, 255], strides = [1, 1]} : vector<168x256xf32> to vector<168x255xf32>
    %7 = vector.extract_strided_slice %5 {offsets = [0, 0], sizes = [168, 1], strides = [1, 1]} : vector<168x256xf32> to vector<168x1xf32>
    %8 = tpu.concatenate %6, %7 in 1 : vector<168x255xf32>, vector<168x1xf32> -> vector<168x256xf32>
    %9 = arith.addf %4, %8 : vector<168x256xf32>
    %10 = vector.extract_strided_slice %3 {offsets = [336, 0], sizes = [168, 256], strides = [1, 1]} : vector<840x256xf32> to vector<168x256xf32>
    %11 = vector.extract_strided_slice %10 {offsets = [0, 2], sizes = [168, 254], strides = [1, 1]} : vector<168x256xf32> to vector<168x254xf32>
    %12 = vector.extract_strided_slice %10 {offsets = [0, 0], sizes = [168, 2], strides = [1, 1]} : vector<168x256xf32> to vector<168x2xf32>
    %13 = tpu.concatenate %11, %12 in 1 : vector<168x254xf32>, vector<168x2xf32> -> vector<168x256xf32>
    %14 = arith.addf %9, %13 : vector<168x256xf32>
    %15 = vector.extract_strided_slice %3 {offsets = [504, 0], sizes = [168, 256], strides = [1, 1]} : vector<840x256xf32> to vector<168x256xf32>
    %16 = vector.extract_strided_slice %15 {offsets = [0, 3], sizes = [168, 253], strides = [1, 1]} : vector<168x256xf32> to vector<168x253xf32>
    %17 = vector.extract_strided_slice %15 {offsets = [0, 0], sizes = [168, 3], strides = [1, 1]} : vector<168x256xf32> to vector<168x3xf32>
    %18 = tpu.concatenate %16, %17 in 1 : vector<168x253xf32>, vector<168x3xf32> -> vector<168x256xf32>
    %19 = arith.addf %14, %18 : vector<168x256xf32>
    %20 = vector.extract_strided_slice %3 {offsets = [672, 0], sizes = [168, 256], strides = [1, 1]} : vector<840x256xf32> to vector<168x256xf32>
    %21 = vector.extract_strided_slice %20 {offsets = [0, 4], sizes = [168, 252], strides = [1, 1]} : vector<168x256xf32> to vector<168x252xf32>
    %22 = vector.extract_strided_slice %20 {offsets = [0, 0], sizes = [168, 4], strides = [1, 1]} : vector<168x256xf32> to vector<168x4xf32>
    %23 = tpu.concatenate %21, %22 in 1 : vector<168x252xf32>, vector<168x4xf32> -> vector<168x256xf32>
    %24 = arith.addf %19, %23 : vector<168x256xf32>
    %c0_3 = arith.constant 0 : index
    %c0_4 = arith.constant 0 : index
    %25 = vector.load %arg3[%c0_3, %c0_4] : memref<168x1xf32, #tpu.memory_space<vmem>>, vector<168x1xf32>
    %26 = vector.broadcast %25 : vector<168x1xf32> to vector<168x256xf32>
    %27 = arith.addf %24, %26 : vector<168x256xf32>
    %cst_5 = arith.constant 0.000000e+00 : f32
    %28 = vector.broadcast %cst_5 : f32 to vector<168x256xf32>
    %29 = arith.maximumf %27, %28 : vector<168x256xf32>
    %30 = vector.extract_strided_slice %29 {offsets = [0, 1], sizes = [168, 255], strides = [1, 1]} : vector<168x256xf32> to vector<168x255xf32>
    %31 = vector.extract_strided_slice %29 {offsets = [0, 0], sizes = [168, 1], strides = [1, 1]} : vector<168x256xf32> to vector<168x1xf32>
    %32 = tpu.concatenate %30, %31 in 1 : vector<168x255xf32>, vector<168x1xf32> -> vector<168x256xf32>
    %33 = arith.maximumf %29, %32 : vector<168x256xf32>
    %34 = vector.extract_strided_slice %33 {offsets = [1, 0], sizes = [167, 256], strides = [1, 1]} : vector<168x256xf32> to vector<167x256xf32>
    %35 = vector.extract_strided_slice %33 {offsets = [0, 0], sizes = [1, 256], strides = [1, 1]} : vector<168x256xf32> to vector<1x256xf32>
    %36 = tpu.concatenate %34, %35 in 0 : vector<167x256xf32>, vector<1x256xf32> -> vector<168x256xf32>
    %37 = arith.maximumf %33, %36 : vector<168x256xf32>
    %38 = arith.truncf %37 : vector<168x256xf32> to vector<168x256xbf16>
    %c0_6 = arith.constant 0 : index
    %c0_7 = arith.constant 0 : index
    %39 = vector.load %arg4[%c0_6, %c0_7] : memref<800x168xbf16, #tpu.memory_space<vmem>>, vector<800x168xbf16>
    %cst_8 = arith.constant dense<0.000000e+00> : vector<800x256xf32>
    %40 = tpu.matmul %39, %38, %cst_8 {dimension_numbers = #tpu.dot_dimension_numbers<[1], [0], [0], [1], [0, 0, 1, 1], [], []>} : vector<800x168xbf16>, vector<168x256xbf16>, vector<800x256xf32> -> vector<800x256xf32>
    %41 = vector.extract_strided_slice %40 {offsets = [0, 0], sizes = [160, 256], strides = [1, 1]} : vector<800x256xf32> to vector<160x256xf32>
    %42 = vector.extract_strided_slice %40 {offsets = [160, 0], sizes = [160, 256], strides = [1, 1]} : vector<800x256xf32> to vector<160x256xf32>
    %43 = vector.extract_strided_slice %42 {offsets = [0, 2], sizes = [160, 254], strides = [1, 1]} : vector<160x256xf32> to vector<160x254xf32>
    %44 = vector.extract_strided_slice %42 {offsets = [0, 0], sizes = [160, 2], strides = [1, 1]} : vector<160x256xf32> to vector<160x2xf32>
    %45 = tpu.concatenate %43, %44 in 1 : vector<160x254xf32>, vector<160x2xf32> -> vector<160x256xf32>
    %46 = arith.addf %41, %45 : vector<160x256xf32>
    %47 = vector.extract_strided_slice %40 {offsets = [320, 0], sizes = [160, 256], strides = [1, 1]} : vector<800x256xf32> to vector<160x256xf32>
    %48 = vector.extract_strided_slice %47 {offsets = [0, 4], sizes = [160, 252], strides = [1, 1]} : vector<160x256xf32> to vector<160x252xf32>
    %49 = vector.extract_strided_slice %47 {offsets = [0, 0], sizes = [160, 4], strides = [1, 1]} : vector<160x256xf32> to vector<160x4xf32>
    %50 = tpu.concatenate %48, %49 in 1 : vector<160x252xf32>, vector<160x4xf32> -> vector<160x256xf32>
    %51 = arith.addf %46, %50 : vector<160x256xf32>
    %52 = vector.extract_strided_slice %40 {offsets = [480, 0], sizes = [160, 256], strides = [1, 1]} : vector<800x256xf32> to vector<160x256xf32>
    %53 = vector.extract_strided_slice %52 {offsets = [0, 6], sizes = [160, 250], strides = [1, 1]} : vector<160x256xf32> to vector<160x250xf32>
    %54 = vector.extract_strided_slice %52 {offsets = [0, 0], sizes = [160, 6], strides = [1, 1]} : vector<160x256xf32> to vector<160x6xf32>
    %55 = tpu.concatenate %53, %54 in 1 : vector<160x250xf32>, vector<160x6xf32> -> vector<160x256xf32>
    %56 = arith.addf %51, %55 : vector<160x256xf32>
    %57 = vector.extract_strided_slice %40 {offsets = [640, 0], sizes = [160, 256], strides = [1, 1]} : vector<800x256xf32> to vector<160x256xf32>
    %58 = vector.extract_strided_slice %57 {offsets = [0, 8], sizes = [160, 248], strides = [1, 1]} : vector<160x256xf32> to vector<160x248xf32>
    %59 = vector.extract_strided_slice %57 {offsets = [0, 0], sizes = [160, 8], strides = [1, 1]} : vector<160x256xf32> to vector<160x8xf32>
    %60 = tpu.concatenate %58, %59 in 1 : vector<160x248xf32>, vector<160x8xf32> -> vector<160x256xf32>
    %61 = arith.addf %56, %60 : vector<160x256xf32>
    %c0_9 = arith.constant 0 : index
    %c0_10 = arith.constant 0 : index
    %62 = vector.load %arg5[%c0_9, %c0_10] : memref<160x1xf32, #tpu.memory_space<vmem>>, vector<160x1xf32>
    %63 = vector.broadcast %62 : vector<160x1xf32> to vector<160x256xf32>
    %64 = arith.addf %61, %63 : vector<160x256xf32>
    %cst_11 = arith.constant 0.000000e+00 : f32
    %65 = vector.broadcast %cst_11 : f32 to vector<160x256xf32>
    %66 = arith.maximumf %64, %65 : vector<160x256xf32>
    %67 = vector.extract_strided_slice %66 {offsets = [0, 2], sizes = [160, 254], strides = [1, 1]} : vector<160x256xf32> to vector<160x254xf32>
    %68 = vector.extract_strided_slice %66 {offsets = [0, 0], sizes = [160, 2], strides = [1, 1]} : vector<160x256xf32> to vector<160x2xf32>
    %69 = tpu.concatenate %67, %68 in 1 : vector<160x254xf32>, vector<160x2xf32> -> vector<160x256xf32>
    %70 = arith.maximumf %66, %69 : vector<160x256xf32>
    %71 = vector.extract_strided_slice %70 {offsets = [1, 0], sizes = [159, 256], strides = [1, 1]} : vector<160x256xf32> to vector<159x256xf32>
    %72 = vector.extract_strided_slice %70 {offsets = [0, 0], sizes = [1, 256], strides = [1, 1]} : vector<160x256xf32> to vector<1x256xf32>
    %73 = tpu.concatenate %71, %72 in 0 : vector<159x256xf32>, vector<1x256xf32> -> vector<160x256xf32>
    %74 = arith.maximumf %70, %73 : vector<160x256xf32>
    %75 = arith.truncf %74 : vector<160x256xf32> to vector<160x256xbf16>
    %c0_12 = arith.constant 0 : index
    %c0_13 = arith.constant 0 : index
    %c0_14 = arith.constant 0 : index
    %76 = vector.load %arg6[%c0_12, %c0_13, %c0_14] : memref<5x256x8xbf16, #tpu.memory_space<vmem>>, vector<1x256x8xbf16>
    %77 = vector.shape_cast %76 : vector<1x256x8xbf16> to vector<256x8xbf16>
    %cst_15 = arith.constant dense<0.000000e+00> : vector<160x8xf32>
    %78 = tpu.matmul %75, %77, %cst_15 {dimension_numbers = #tpu.dot_dimension_numbers<[1], [0], [0], [1], [0, 0, 1, 1], [], []>} : vector<160x256xbf16>, vector<256x8xbf16>, vector<160x8xf32> -> vector<160x8xf32>
    %c0_16 = arith.constant 0 : index
    %c0_17 = arith.constant 0 : index
    %c0_18 = arith.constant 0 : index
    %79 = vector.load %arg7[%c0_16, %c0_17, %c0_18] : memref<5x120x160xbf16, #tpu.memory_space<vmem>>, vector<1x120x160xbf16>
    %80 = vector.shape_cast %79 : vector<1x120x160xbf16> to vector<120x160xbf16>
    %81 = arith.truncf %78 : vector<160x8xf32> to vector<160x8xbf16>
    %cst_19 = arith.constant dense<0.000000e+00> : vector<120x8xf32>
    %82 = tpu.matmul %80, %81, %cst_19 {dimension_numbers = #tpu.dot_dimension_numbers<[1], [0], [0], [1], [0, 0, 1, 1], [], []>} : vector<120x160xbf16>, vector<160x8xbf16>, vector<120x8xf32> -> vector<120x8xf32>
    %c1 = arith.constant 1 : index
    %c0_20 = arith.constant 0 : index
    %c0_21 = arith.constant 0 : index
    %83 = vector.load %arg6[%c1, %c0_20, %c0_21] : memref<5x256x8xbf16, #tpu.memory_space<vmem>>, vector<1x256x8xbf16>
    %84 = vector.shape_cast %83 : vector<1x256x8xbf16> to vector<256x8xbf16>
    %cst_22 = arith.constant dense<0.000000e+00> : vector<160x8xf32>
    %85 = tpu.matmul %75, %84, %cst_22 {dimension_numbers = #tpu.dot_dimension_numbers<[1], [0], [0], [1], [0, 0, 1, 1], [], []>} : vector<160x256xbf16>, vector<256x8xbf16>, vector<160x8xf32> -> vector<160x8xf32>
    %c1_23 = arith.constant 1 : index
    %c0_24 = arith.constant 0 : index
    %c0_25 = arith.constant 0 : index
    %86 = vector.load %arg7[%c1_23, %c0_24, %c0_25] : memref<5x120x160xbf16, #tpu.memory_space<vmem>>, vector<1x120x160xbf16>
    %87 = vector.shape_cast %86 : vector<1x120x160xbf16> to vector<120x160xbf16>
    %88 = arith.truncf %85 : vector<160x8xf32> to vector<160x8xbf16>
    %cst_26 = arith.constant dense<0.000000e+00> : vector<120x8xf32>
    %89 = tpu.matmul %87, %88, %cst_26 {dimension_numbers = #tpu.dot_dimension_numbers<[1], [0], [0], [1], [0, 0, 1, 1], [], []>} : vector<120x160xbf16>, vector<160x8xbf16>, vector<120x8xf32> -> vector<120x8xf32>
    %90 = arith.addf %82, %89 : vector<120x8xf32>
    %c2 = arith.constant 2 : index
    %c0_27 = arith.constant 0 : index
    %c0_28 = arith.constant 0 : index
    %91 = vector.load %arg6[%c2, %c0_27, %c0_28] : memref<5x256x8xbf16, #tpu.memory_space<vmem>>, vector<1x256x8xbf16>
    %92 = vector.shape_cast %91 : vector<1x256x8xbf16> to vector<256x8xbf16>
    %cst_29 = arith.constant dense<0.000000e+00> : vector<160x8xf32>
    %93 = tpu.matmul %75, %92, %cst_29 {dimension_numbers = #tpu.dot_dimension_numbers<[1], [0], [0], [1], [0, 0, 1, 1], [], []>} : vector<160x256xbf16>, vector<256x8xbf16>, vector<160x8xf32> -> vector<160x8xf32>
    %c2_30 = arith.constant 2 : index
    %c0_31 = arith.constant 0 : index
    %c0_32 = arith.constant 0 : index
    %94 = vector.load %arg7[%c2_30, %c0_31, %c0_32] : memref<5x120x160xbf16, #tpu.memory_space<vmem>>, vector<1x120x160xbf16>
    %95 = vector.shape_cast %94 : vector<1x120x160xbf16> to vector<120x160xbf16>
    %96 = arith.truncf %93 : vector<160x8xf32> to vector<160x8xbf16>
    %cst_33 = arith.constant dense<0.000000e+00> : vector<120x8xf32>
    %97 = tpu.matmul %95, %96, %cst_33 {dimension_numbers = #tpu.dot_dimension_numbers<[1], [0], [0], [1], [0, 0, 1, 1], [], []>} : vector<120x160xbf16>, vector<160x8xbf16>, vector<120x8xf32> -> vector<120x8xf32>
    %98 = arith.addf %90, %97 : vector<120x8xf32>
    %c3 = arith.constant 3 : index
    %c0_34 = arith.constant 0 : index
    %c0_35 = arith.constant 0 : index
    %99 = vector.load %arg6[%c3, %c0_34, %c0_35] : memref<5x256x8xbf16, #tpu.memory_space<vmem>>, vector<1x256x8xbf16>
    %100 = vector.shape_cast %99 : vector<1x256x8xbf16> to vector<256x8xbf16>
    %cst_36 = arith.constant dense<0.000000e+00> : vector<160x8xf32>
    %101 = tpu.matmul %75, %100, %cst_36 {dimension_numbers = #tpu.dot_dimension_numbers<[1], [0], [0], [1], [0, 0, 1, 1], [], []>} : vector<160x256xbf16>, vector<256x8xbf16>, vector<160x8xf32> -> vector<160x8xf32>
    %c3_37 = arith.constant 3 : index
    %c0_38 = arith.constant 0 : index
    %c0_39 = arith.constant 0 : index
    %102 = vector.load %arg7[%c3_37, %c0_38, %c0_39] : memref<5x120x160xbf16, #tpu.memory_space<vmem>>, vector<1x120x160xbf16>
    %103 = vector.shape_cast %102 : vector<1x120x160xbf16> to vector<120x160xbf16>
    %104 = arith.truncf %101 : vector<160x8xf32> to vector<160x8xbf16>
    %cst_40 = arith.constant dense<0.000000e+00> : vector<120x8xf32>
    %105 = tpu.matmul %103, %104, %cst_40 {dimension_numbers = #tpu.dot_dimension_numbers<[1], [0], [0], [1], [0, 0, 1, 1], [], []>} : vector<120x160xbf16>, vector<160x8xbf16>, vector<120x8xf32> -> vector<120x8xf32>
    %106 = arith.addf %98, %105 : vector<120x8xf32>
    %c4 = arith.constant 4 : index
    %c0_41 = arith.constant 0 : index
    %c0_42 = arith.constant 0 : index
    %107 = vector.load %arg6[%c4, %c0_41, %c0_42] : memref<5x256x8xbf16, #tpu.memory_space<vmem>>, vector<1x256x8xbf16>
    %108 = vector.shape_cast %107 : vector<1x256x8xbf16> to vector<256x8xbf16>
    %cst_43 = arith.constant dense<0.000000e+00> : vector<160x8xf32>
    %109 = tpu.matmul %75, %108, %cst_43 {dimension_numbers = #tpu.dot_dimension_numbers<[1], [0], [0], [1], [0, 0, 1, 1], [], []>} : vector<160x256xbf16>, vector<256x8xbf16>, vector<160x8xf32> -> vector<160x8xf32>
    %c4_44 = arith.constant 4 : index
    %c0_45 = arith.constant 0 : index
    %c0_46 = arith.constant 0 : index
    %110 = vector.load %arg7[%c4_44, %c0_45, %c0_46] : memref<5x120x160xbf16, #tpu.memory_space<vmem>>, vector<1x120x160xbf16>
    %111 = vector.shape_cast %110 : vector<1x120x160xbf16> to vector<120x160xbf16>
    %112 = arith.truncf %109 : vector<160x8xf32> to vector<160x8xbf16>
    %cst_47 = arith.constant dense<0.000000e+00> : vector<120x8xf32>
    %113 = tpu.matmul %111, %112, %cst_47 {dimension_numbers = #tpu.dot_dimension_numbers<[1], [0], [0], [1], [0, 0, 1, 1], [], []>} : vector<120x160xbf16>, vector<160x8xbf16>, vector<120x8xf32> -> vector<120x8xf32>
    %114 = arith.addf %106, %113 : vector<120x8xf32>
    %c0_48 = arith.constant 0 : index
    %c0_49 = arith.constant 0 : index
    %115 = vector.load %arg8[%c0_48, %c0_49] : memref<120x1xf32, #tpu.memory_space<vmem>>, vector<120x1xf32>
    %116 = vector.broadcast %115 : vector<120x1xf32> to vector<120x8xf32>
    %117 = arith.addf %114, %116 : vector<120x8xf32>
    %cst_50 = arith.constant 0.000000e+00 : f32
    %118 = vector.broadcast %cst_50 : f32 to vector<120x8xf32>
    %119 = arith.maximumf %117, %118 : vector<120x8xf32>
    %120 = arith.truncf %119 : vector<120x8xf32> to vector<120x8xbf16>
    %c0_51 = arith.constant 0 : index
    %c0_52 = arith.constant 0 : index
    %121 = vector.load %arg9[%c0_51, %c0_52] : memref<84x120xbf16, #tpu.memory_space<vmem>>, vector<84x120xbf16>
    %cst_53 = arith.constant dense<0.000000e+00> : vector<84x8xf32>
    %122 = tpu.matmul %121, %120, %cst_53 {dimension_numbers = #tpu.dot_dimension_numbers<[1], [0], [0], [1], [0, 0, 1, 1], [], []>} : vector<84x120xbf16>, vector<120x8xbf16>, vector<84x8xf32> -> vector<84x8xf32>
    %c0_54 = arith.constant 0 : index
    %c0_55 = arith.constant 0 : index
    %123 = vector.load %arg10[%c0_54, %c0_55] : memref<84x1xf32, #tpu.memory_space<vmem>>, vector<84x1xf32>
    %124 = vector.broadcast %123 : vector<84x1xf32> to vector<84x8xf32>
    %125 = arith.addf %122, %124 : vector<84x8xf32>
    %cst_56 = arith.constant 0.000000e+00 : f32
    %126 = vector.broadcast %cst_56 : f32 to vector<84x8xf32>
    %127 = arith.maximumf %125, %126 : vector<84x8xf32>
    %128 = arith.truncf %127 : vector<84x8xf32> to vector<84x8xbf16>
    %c0_57 = arith.constant 0 : index
    %c0_58 = arith.constant 0 : index
    %129 = vector.load %arg11[%c0_57, %c0_58] : memref<10x84xbf16, #tpu.memory_space<vmem>>, vector<10x84xbf16>
    %cst_59 = arith.constant dense<0.000000e+00> : vector<10x8xf32>
    %130 = tpu.matmul %129, %128, %cst_59 {dimension_numbers = #tpu.dot_dimension_numbers<[1], [0], [0], [1], [0, 0, 1, 1], [], []>} : vector<10x84xbf16>, vector<84x8xbf16>, vector<10x8xf32> -> vector<10x8xf32>
    %c0_60 = arith.constant 0 : index
    %c0_61 = arith.constant 0 : index
    %131 = vector.load %arg12[%c0_60, %c0_61] : memref<10x1xf32, #tpu.memory_space<vmem>>, vector<10x1xf32>
    %132 = vector.broadcast %131 : vector<10x1xf32> to vector<10x8xf32>
    %133 = arith.addf %130, %132 : vector<10x8xf32>
    %134 = vector.shape_cast %133 : vector<10x8xf32> to vector<1x10x8xf32>
    %c0_62 = arith.constant 0 : index
    %c0_63 = arith.constant 0 : index
    %c0_64 = arith.constant 0 : index
    %135 = vector.load %arg13[%c0_62, %c0_63, %c0_64] : memref<1x10x8xf32, #tpu.memory_space<vmem>>, vector<1x10x8xf32>
    tpu.vector_store %arg13[%c0_62, %c0_63, %c0_64], %134 {strides = array<i32>} : memref<1x10x8xf32, #tpu.memory_space<vmem>>, vector<1x10x8xf32>,
    return
  }
  func.func @transform_0(%arg0: i32) -> (i32, i32) {
    %c0_i32 = arith.constant 0 : i32
    %c0_i32_0 = arith.constant 0 : i32
    return %c0_i32, %arg0 : i32, i32
  }
  func.func @transform_1(%arg0: i32) -> (i32, i32) {
    %c0_i32 = arith.constant 0 : i32
    %c0_i32_0 = arith.constant 0 : i32
    %c0_i32_1 = arith.constant 0 : i32
    return %c0_i32, %c0_i32_0 : i32, i32
  }
  func.func @transform_2(%arg0: i32) -> (i32, i32) {
    %c0_i32 = arith.constant 0 : i32
    %c0_i32_0 = arith.constant 0 : i32
    %c0_i32_1 = arith.constant 0 : i32
    return %c0_i32, %c0_i32_0 : i32, i32
  }
  func.func @transform_3(%arg0: i32) -> (i32, i32) {
    %c0_i32 = arith.constant 0 : i32
    %c0_i32_0 = arith.constant 0 : i32
    %c0_i32_1 = arith.constant 0 : i32
    return %c0_i32, %c0_i32_0 : i32, i32
  }
  func.func @transform_4(%arg0: i32) -> (i32, i32) {
    %c0_i32 = arith.constant 0 : i32
    %c0_i32_0 = arith.constant 0 : i32
    %c0_i32_1 = arith.constant 0 : i32
    return %c0_i32, %c0_i32_0 : i32, i32
  }
  func.func @transform_5(%arg0: i32) -> (i32, i32, i32) {
    %c0_i32 = arith.constant 0 : i32
    %c0_i32_0 = arith.constant 0 : i32
    %c0_i32_1 = arith.constant 0 : i32
    %c0_i32_2 = arith.constant 0 : i32
    return %c0_i32, %c0_i32_0, %c0_i32_1 : i32, i32, i32
  }
  func.func @transform_6(%arg0: i32) -> (i32, i32, i32) {
    %c0_i32 = arith.constant 0 : i32
    %c0_i32_0 = arith.constant 0 : i32
    %c0_i32_1 = arith.constant 0 : i32
    %c0_i32_2 = arith.constant 0 : i32
    return %c0_i32, %c0_i32_0, %c0_i32_1 : i32, i32, i32
  }
  func.func @transform_7(%arg0: i32) -> (i32, i32) {
    %c0_i32 = arith.constant 0 : i32
    %c0_i32_0 = arith.constant 0 : i32
    %c0_i32_1 = arith.constant 0 : i32
    return %c0_i32, %c0_i32_0 : i32, i32
  }
  func.func @transform_8(%arg0: i32) -> (i32, i32) {
    %c0_i32 = arith.constant 0 : i32
    %c0_i32_0 = arith.constant 0 : i32
    %c0_i32_1 = arith.constant 0 : i32
    return %c0_i32, %c0_i32_0 : i32, i32
  }
  func.func @transform_9(%arg0: i32) -> (i32, i32) {
    %c0_i32 = arith.constant 0 : i32
    %c0_i32_0 = arith.constant 0 : i32
    %c0_i32_1 = arith.constant 0 : i32
    return %c0_i32, %c0_i32_0 : i32, i32
  }
  func.func @transform_10(%arg0: i32) -> (i32, i32) {
    %c0_i32 = arith.constant 0 : i32
    %c0_i32_0 = arith.constant 0 : i32
    %c0_i32_1 = arith.constant 0 : i32
    return %c0_i32, %c0_i32_0 : i32, i32
  }
  func.func @transform_11(%arg0: i32) -> (i32, i32) {
    %c0_i32 = arith.constant 0 : i32
    %c0_i32_0 = arith.constant 0 : i32
    %c0_i32_1 = arith.constant 0 : i32
    return %c0_i32, %c0_i32_0 : i32, i32
  }
  func.func @transform_12(%arg0: i32) -> (i32, i32, i32) {
    %c0_i32 = arith.constant 0 : i32
    %c0_i32_0 = arith.constant 0 : i32
    %c0_i32_1 = arith.constant 0 : i32
    return %arg0, %c0_i32, %c0_i32_0 : i32, i32, i32
  }
}

</mosaic_0001>

<bundles_post_ra>
// kernel: net_forward.1
= control target key start
LH: loop header
LB: loop body
LE: loop exit
PB: predicated region body
PF: predicated region fallthrough
CT: control target
= control target key end

     0   :  { %v15510_v3 = vmov 0   ;;  %vm446_vm0 = vcmask 785408   ;;  %s10430_s19 = smov 126   ;;  %s10432_s28 = smov 124   ;;  %vm1293_vm1 = vcmask 1039360   ;;  %vm1567_vm2 = vcmask 1031168   ;;  %s15489_s0 = inlined_call_operand.vmem [shape: f32[96,256], index: 0, kind: input, shape index: {}]   ;;  %s15490_s1 = inlined_call_operand.vmem [shape: bf16[840,96], index: 1, kind: input, shape index: {}]   ;;  %s15491_s2 = inlined_call_operand.vmem [shape: f32[168,1], index: 2, kind: input, shape index: {}]   ;;  %s15492_s4 = inlined_call_operand.vmem [shape: f32[160,1], index: 4, kind: input, shape index: {}]   ;;  %s15493_s3 = inlined_call_operand.vmem [shape: bf16[800,168], index: 3, kind: input, shape index: {}]   ;;  %s15494_s5 = inlined_call_operand.vmem [shape: bf16[5,256,8], index: 5, kind: input, shape index: {}]   ;;  %s15495_s7 = inlined_call_operand.vmem [shape: f32[120,1], index: 7, kind: input, shape index: {}]   ;;  %s15496_s9 = inlined_call_operand.vmem [shape: f32[84,1], index: 9, kind: input, shape index: {}]   ;;  %s15497_s11 = inlined_call_operand.vmem [shape: f32[10,1], index: 11, kind: input, shape index: {}]   ;;  %s15498_s6 = inlined_call_operand.vmem [shape: bf16[5,120,160], index: 6, kind: input, shape index: {}]   ;;  %s15499_s8 = inlined_call_operand.vmem [shape: bf16[84,120], index: 8, kind: input, shape index: {}]   ;;  %s15500_s10 = inlined_call_operand.vmem [shape: bf16[10,84], index: 10, kind: input, shape index: {}]   ;;  %s15501_s12 = inlined_call_operand.vmem [shape: f32[1,10,8], index: 12, kind: output, shape index: {}]  }
   0x1   :  { %v43_v0 = vld [vmem:[%s15489_s0 + $0x8] sm:$0xff]  ;;  %v45_v1 = vld [vmem:[%s15489_s0 + $0x18] sm:$0xff]  ;;  %v42_v2 = vld [vmem:[%s15489_s0] sm:$0xff]  ;;  %638 = vmatprep.mubr.bf16.mxu0 %v15510_v3  ;;  %9817 = vset.pattern.permute.xlu1 %v15510_v3  ;;  %vm1841_vm3 = vcmask 1022976   ;;  %vm2115_vm4 = vcmask 1014784   ;;  %vm3531_vm5 = vcmask 326656  }
   0x2   :  { %v67_v4 = vpack.c.bf16 %v45_v1, %v43_v0  ;;  %v44_v5 = vld [vmem:[%s15489_s0 + $0x10] sm:$0xff]  ;;  %v47_v6 = vld [vmem:[%s15489_s0 + $0x28] sm:$0xff]  ;;  %v49_v7 = vld [vmem:[%s15489_s0 + $0x38] sm:$0xff]  ;;  %9816 = vset.pattern.permute.xlu0 %v15510_v3  ;;  %vm2788_vm6 = vcmask 1046528   ;;  %vm3682_vm7 = vcmask 1043456   ;;  %s10434_s26 = smov 120  }
   0x3   :  { %v66_v8 = vpack.c.bf16 %v44_v5, %v42_v2  ;;  %v69_v9 = vpack.c.bf16 %v49_v7, %v47_v6  ;;  %v46_v10 = vld [vmem:[%s15489_s0 + $0x20] sm:$0xff]  ;;  %v48_v11 = vld [vmem:[%s15489_s0 + $0x30] sm:$0xff]  ;;  %v51_v12 = vld [vmem:[%s15489_s0 + $0x48] sm:$0xff]  ;;  %vm4862_vm8 = vcmask 998400   ;;  %vm5123_vm9 = vcmask 982016  }
   0x4   :  { %606 = vmatprep.subr.bf16.mxu0 %v67_v4  ;;  %v53_v13 = vld [vmem:[%s15489_s0 + $0x58] sm:$0xff]  ;;  %v68_v14 = vpack.c.bf16 %v48_v11, %v46_v10  ;;  %v50_v16 = vld [vmem:[%s15489_s0 + $0x40] sm:$0xff]  ;;  %v52_v17 = vld [vmem:[%s15489_s0 + $0x50] sm:$0xff]  ;;  %vm6549_vm10 = vcmask 261120   ;;  %vm10436_vm11 = vmmov 0   ;;  %vm8649_vm12 = vcmask 1041408  }
   0x5   :  { %607 = vmatpush1.bf16.msra.mxu0 %v66_v8  ;;  %v71_v15 = vpack.c.bf16 %v53_v13, %v51_v12  ;;  %v55_v18 = vld [vmem:[%s15489_s0 + $0x68] sm:$0xff]  ;;  %v57_v19 = vld [vmem:[%s15489_s0 + $0x78] sm:$0xff]  ;;  %v54_v20 = vld [vmem:[%s15489_s0 + $0x60] sm:$0xff]  ;;  %v70_v21 = vpack.c.bf16 %v52_v17, %v50_v16  ;;  %vm8645_vm13 = vcmask 687104   ;;  %vm8694_vm14 = vcmask 64512  }
   0x6   :  { %608 = vmatprep.subr.bf16.mxu0 %v69_v9  ;;  %v56_v22 = vld [vmem:[%s15489_s0 + $0x70] sm:$0xff]  ;;  %v73_v23 = vpack.c.bf16 %v57_v19, %v55_v18  ;;  %v59_v24 = vld [vmem:[%s15489_s0 + $0x88] sm:$0xff]  ;;  %v61_v25 = vld [vmem:[%s15489_s0 + $0x98] sm:$0xff]  ;;  %vm8696_vm15 = vcmask 58368  }
   0x7   :  { %v58_v26 = vld [vmem:[%s15489_s0 + $0x80] sm:$0xff]  ;;  %v72_v27 = vpack.c.bf16 %v56_v22, %v54_v20  ;;  %v60_v28 = vld [vmem:[%s15489_s0 + $0x90] sm:$0xff]  ;;  %v75_v29 = vpack.c.bf16 %v61_v25, %v59_v24  ;;  %v63_v30 = vld [vmem:[%s15489_s0 + $0xa8] sm:$0xff] }
   0x8   :  { %v65_v31 = vld [vmem:[%s15489_s0 + $0xb8] sm:$0xff]  ;;  %v74_v32 = vpack.c.bf16 %v60_v28, %v58_v26  ;;  %v62_v33 = vld [vmem:[%s15489_s0 + $0xa0] sm:$0xff]  ;;  %v64_v35 = vld [vmem:[%s15489_s0 + $0xb0] sm:$0xff]  ;;  %s10433_s0 = smov 122  }
   0x9   :  { %609 = vmatpush1.bf16.msra.mxu0 %v68_v14  ;;  %v77_v34 = vpack.c.bf16 %v65_v31, %v63_v30  ;;  %v76_v36 = vpack.c.bf16 %v64_v35, %v62_v33  ;;  %v10023_v37 = vld [vmem:[%s15490_s1] sm:$0xff]   ;;  %v10024_v38 = vld [vmem:[%s15490_s1 + $0x8] sm:$0xff]   ;;  %v10025_v39 = vld [vmem:[%s15490_s1 + $0x10] sm:$0xff]  }
   0xa   :  { %610 = vmatprep.subr.bf16.mxu0 %v71_v15  ;;  %v10026_v40 = vld [vmem:[%s15490_s1 + $0x18] sm:$0xff]   ;;  %v10027_v41 = vld [vmem:[%s15490_s1 + $0x20] sm:$0xff]   ;;  %v10028_v42 = vld [vmem:[%s15490_s1 + $0x28] sm:$0xff]  }
   0xb   :  { %v10029_v43 = vld [vmem:[%s15490_s1 + $0x30] sm:$0xff]   ;;  %v10030_v44 = vld [vmem:[%s15490_s1 + $0x38] sm:$0xff]   ;;  %v10031_v45 = vld [vmem:[%s15490_s1 + $0x40] sm:$0xff]  }
   0xc   :  { %v10032_v46 = vld [vmem:[%s15490_s1 + $0x48] sm:$0xff]   ;;  %v2265_v48 = vld [vmem:[%s15491_s2 + $0x10] sm:$0xff]  ;;  %v2267_v50 = vld [vmem:[%s15491_s2 + $0x20] sm:$0xff] }
   0xd   :  { %611 = vmatpush1.bf16.msra.mxu0 %v70_v21  ;;  %v2264_v47 = vld [vmem:[%s15491_s2 + $0x8] sm:$0xff]  ;;  %v10033_v49 = vld [vmem:[%s15490_s1 + $0x50] sm:$0xff]   ;;  %v2263_v51 = vld [vmem:[%s15491_s2] sm:$0xff] }
   0xe   :  { %612 = vmatprep.subr.bf16.mxu0 %v73_v23  ;;  %2291 = vperm.xlu1 %9817, %v2264_v47   ;;  %v10034_v52 = vld [vmem:[%s15490_s1 + $0x58] sm:$0xff]   ;;  %v2269_v53 = vld [vmem:[%s15491_s2 + $0x30] sm:$0xff]  ;;  %v2271_v55 = vld [vmem:[%s15491_s2 + $0x40] sm:$0xff] }
   0xf   :  { %2286 = vperm.xlu0 %9816, %v2263_v51   ;;  %v2266_v54 = vld [vmem:[%s15491_s2 + $0x18] sm:$0xff]  ;;  %v2268_v56 = vld [vmem:[%s15491_s2 + $0x28] sm:$0xff]  ;;  %v10035_v57 = vld [vmem:[%s15490_s1 + $0x60] sm:$0xff]  }
  0x10   :  { %v2273_v58 = vld [vmem:[%s15491_s2 + $0x50] sm:$0xff]  ;;  %v2270_v59 = vld [vmem:[%s15491_s2 + $0x38] sm:$0xff]  ;;  %v2275_v60 = vld [vmem:[%s15491_s2 + $0x60] sm:$0xff] }
  0x11   :  { %613 = vmatpush1.bf16.msra.mxu0 %v72_v27  ;;  %v2272_v61 = vld [vmem:[%s15491_s2 + $0x48] sm:$0xff]  ;;  %v2277_v63 = vld [vmem:[%s15491_s2 + $0x70] sm:$0xff]  ;;  %v2274_v0 = vld [vmem:[%s15491_s2 + $0x58] sm:$0xff] }
  0x12   :  { %614 = vmatprep.subr.bf16.mxu0 %v75_v29  ;;  %2296 = vperm.xlu1 %9817, %v2265_v48   ;;  %v10036_v62 = vld [vmem:[%s15490_s1 + $0x68] sm:$0xff]   ;;  %v2279_v1 = vld [vmem:[%s15491_s2 + $0x80] sm:$0xff]  ;;  %v10037_v4 = vld [vmem:[%s15490_s1 + $0x70] sm:$0xff]  }
  0x13   :  { %2301 = vperm.xlu0 %9816, %v2266_v54   ;;  %v2276_v2 = vld [vmem:[%s15491_s2 + $0x68] sm:$0xff]  ;;  %v2281_v5 = vld [vmem:[%s15491_s2 + $0x90] sm:$0xff]  ;;  %v2278_v6 = vld [vmem:[%s15491_s2 + $0x78] sm:$0xff] }
  0x14   :  { %v2283_v7 = vld [vmem:[%s15491_s2 + $0xa0] sm:$0xff]  ;;  %v2280_v8 = vld [vmem:[%s15491_s2 + $0x88] sm:$0xff]  ;;  %v10038_v9 = vld [vmem:[%s15490_s1 + $0x78] sm:$0xff]  }
  0x15   :  { %615 = vmatpush1.bf16.msra.mxu0 %v74_v32  ;;  %v2282_v10 = vld [vmem:[%s15491_s2 + $0x98] sm:$0xff]  ;;  %v10039_v11 = vld [vmem:[%s15490_s1 + $0x80] sm:$0xff]   ;;  %v10040_v12 = vld [vmem:[%s15490_s1 + $0x88] sm:$0xff]   ;;  %s10429_s2 = smov 127  }
  0x16   :  { %616 = vmatprep.subr.bf16.mxu0 %v77_v34  ;;  %2306 = vperm.xlu1 %9817, %v2267_v50   ;;  %v10041_v13 = vld [vmem:[%s15490_s1 + $0x90] sm:$0xff]   ;;  %v10042_v14 = vld [vmem:[%s15490_s1 + $0x98] sm:$0xff]   ;;  %v10043_v15 = vld [vmem:[%s15490_s1 + $0xa0] sm:$0xff]  }
  0x17   :  { %2311 = vperm.xlu0 %9816, %v2268_v56   ;;  %v10044_v16 = vld [vmem:[%s15490_s1 + $0xa8] sm:$0xff]   ;;  %v10045_v17 = vld [vmem:[%s15490_s1 + $0xb0] sm:$0xff]   ;;  %v10046_v18 = vld [vmem:[%s15490_s1 + $0xb8] sm:$0xff]  }
  0x18   :  { %v10047_v19 = vld [vmem:[%s15490_s1 + $0xc0] sm:$0xff]   ;;  %v10048_v20 = vld [vmem:[%s15490_s1 + $0xc8] sm:$0xff]   ;;  %v10049_v21 = vld [vmem:[%s15490_s1 + $0xd0] sm:$0xff]  }
  0x19   :  { %617 = vmatpush1.bf16.msra.mxu0 %v76_v36  ;;  %v10050_v24 = vld [vmem:[%s15490_s1 + $0xd8] sm:$0xff]   ;;  %v10051_v29 = vld [vmem:[%s15490_s1 + $0xe0] sm:$0xff]   ;;  %v10052_v34 = vld [vmem:[%s15490_s1 + $0xe8] sm:$0xff]  }
  0x1a   :  { %2316 = vperm.xlu1 %9817, %v2269_v53   ;;  %v10056_v54 = vld [vmem:[%s15490_s1 + $0x108] sm:$0xff]  }
  0x1b   :  { %2321 = vperm.xlu0 %9816, %v2270_v59   ;;  %v10057_v59 = vld [vmem:[%s15490_s1 + $0x110] sm:$0xff]  }
  0x1c   :  { %8755 = vmatmul.mubr.msk.bf16.vlgmr.msra.gmra.mrb[0].mxu0 %vm446_vm0, %v10023_v37 }
  0x1d   :  { %648 = vmatprep.mubr.bf16.mxu0 %v15510_v3 }
  0x1e   :  { %2326 = vperm.xlu1 %9817, %v2271_v55  }
  0x1f   :  { %2331 = vperm.xlu0 %9816, %v2272_v61  }
  0x22   :  { %2336 = vperm.xlu1 %9817, %v2273_v58  }
  0x23   :  { %2341 = vperm.xlu0 %9816, %v2274_v0   ;;  %v10058_v0 = vld [vmem:[%s15490_s1 + $0x118] sm:$0xff]  }
  0x24   :  { %8756 = vmatmul.mubr.msk.bf16.gmra.mrb[4].mxu0 %vm446_vm0, %v10024_v38 }
  0x25   :  { %658 = vmatprep.mubr.bf16.mxu0 %v15510_v3 }
  0x26   :  { %2346 = vperm.xlu1 %9817, %v2275_v60  }
  0x27   :  { %2351 = vperm.xlu0 %9816, %v2276_v2  }
  0x2a   :  { %2356 = vperm.xlu1 %9817, %v2277_v63  }
  0x2b   :  { %2361 = vperm.xlu0 %9816, %v2278_v6   ;;  %v10059_v6 = vld [vmem:[%s15490_s1 + $0x120] sm:$0xff]  }
  0x2c   :  { %8757 = vmatmul.mubr.msk.bf16.gmra.mrb[8].mxu0 %vm446_vm0, %v10025_v39  ;;  %v10053_v39 = vld [vmem:[%s15490_s1 + $0xf0] sm:$0xff]  }
  0x2d   :  { %668 = vmatprep.mubr.bf16.mxu0 %v15510_v3 }
  0x2e   :  { %2366 = vperm.xlu1 %9817, %v2279_v1  }
  0x2f   :  { %2371 = vperm.xlu0 %9816, %v2280_v8  }
  0x32   :  { %2376 = vperm.xlu1 %9817, %v2281_v5  }
  0x33   :  { %2381 = vperm.xlu0 %9816, %v2282_v10  }
  0x34   :  { %8758 = vmatmul.mubr.msk.bf16.gmra.mrb[12].mxu0 %vm446_vm0, %v10026_v40 }
  0x35   :  { %678 = vmatprep.mubr.bf16.mxu0 %v15510_v3 }
  0x36   :  { %2386 = vperm.xlu1 %9817, %v2283_v7  }
  0x3c   :  { %8759 = vmatmul.mubr.msk.bf16.gmra.mrb[16].mxu0 %vm446_vm0, %v10027_v41 }
  0x3d   :  { %688 = vmatprep.mubr.bf16.mxu0 %v15510_v3 }
  0x44   :  { %8760 = vmatmul.mubr.msk.bf16.gmra.mrb[20].mxu0 %vm446_vm0, %v10028_v42 }
  0x45   :  { %698 = vmatprep.mubr.bf16.mxu0 %v15510_v3 }
  0x4c   :  { %8761 = vmatmul.mubr.msk.bf16.gmra.mrb[24].mxu0 %vm446_vm0, %v10029_v43 }
  0x4d   :  { %708 = vmatprep.mubr.bf16.mxu0 %v15510_v3 }
  0x54   :  { %8762 = vmatmul.mubr.msk.bf16.gmra.mrb[28].mxu0 %vm446_vm0, %v10030_v44  ;;  %v10054_v44 = vld [vmem:[%s15490_s1 + $0xf8] sm:$0xff]  }
  0x55   :  { %718 = vmatprep.mubr.bf16.mxu0 %v15510_v3 }
  0x5c   :  { %8763 = vmatmul.mubr.msk.bf16.gmra.mrb[32].mxu0 %vm446_vm0, %v10031_v45 }
  0x5d   :  { %728 = vmatprep.mubr.bf16.mxu0 %v15510_v3 }
  0x64   :  { %8764 = vmatmul.mubr.msk.bf16.gmra.mrb[36].mxu0 %vm446_vm0, %v10032_v46 }
  0x65   :  { %738 = vmatprep.mubr.bf16.mxu0 %v15510_v3 }
  0x6c   :  { %8765 = vmatmul.mubr.msk.bf16.gmra.mrb[40].mxu0 %vm446_vm0, %v10033_v49  ;;  %v10055_v49 = vld [vmem:[%s15490_s1 + $0x100] sm:$0xff]  }
  0x6d   :  { %748 = vmatprep.mubr.bf16.mxu0 %v15510_v3 }
  0x74   :  { %8766 = vmatmul.mubr.msk.bf16.gmra.mrb[44].mxu0 %vm446_vm0, %v10034_v52 }
  0x75   :  { %758 = vmatprep.mubr.bf16.mxu0 %v15510_v3 }
  0x7c   :  { %8767 = vmatmul.mubr.msk.bf16.gmra.mrb[48].mxu0 %vm446_vm0, %v10035_v57 }
  0x7d   :  { %768 = vmatprep.mubr.bf16.mxu0 %v15510_v3 }
  0x84   :  { %8768 = vmatmul.mubr.msk.bf16.gmra.mrb[52].mxu0 %vm446_vm0, %v10036_v62 }
  0x85   :  { %778 = vmatprep.mubr.bf16.mxu0 %v15510_v3 }
  0x8c   :  { %8769 = vmatmul.mubr.msk.bf16.gmra.mrb[56].mxu0 %vm446_vm0, %v10037_v4 }
  0x8d   :  { %788 = vmatprep.mubr.bf16.mxu0 %v15510_v3 }
  0x94   :  { %8770 = vmatmul.mubr.msk.bf16.gmra.mrb[60].mxu0 %vm446_vm0, %v10038_v9 }
  0x95   :  { %798 = vmatprep.mubr.bf16.mxu0 %v15510_v3 }
  0x9c   :  { %8771 = vmatmul.mubr.msk.bf16.gmra.mrb[64].mxu0 %vm446_vm0, %v10039_v11  ;;  %v10060_v11 = vld [vmem:[%s15490_s1 + $0x128] sm:$0xff]  }
  0x9d   :  { %808 = vmatprep.mubr.bf16.mxu0 %v15510_v3 }
  0xa4   :  { %8772 = vmatmul.mubr.msk.bf16.gmra.mrb[68].mxu0 %vm446_vm0, %v10040_v12 }
  0xa5   :  { %818 = vmatprep.mubr.bf16.mxu0 %v15510_v3 }
  0xac   :  { %8773 = vmatmul.mubr.msk.bf16.gmra.mrb[72].mxu0 %vm446_vm0, %v10041_v13 }
  0xad   :  { %828 = vmatprep.mubr.bf16.mxu0 %v15510_v3 }
  0xb4   :  { %8774 = vmatmul.mubr.msk.bf16.gmra.mrb[76].mxu0 %vm446_vm0, %v10042_v14 }
  0xb5   :  { %838 = vmatprep.mubr.bf16.mxu0 %v15510_v3 }
  0xbc   :  { %8775 = vmatmul.mubr.msk.bf16.gmra.mrb[80].mxu0 %vm446_vm0, %v10043_v15 }
  0xbd   :  { %848 = vmatprep.mubr.bf16.mxu0 %v15510_v3 }
  0xc4   :  { %8776 = vmatmul.mubr.msk.bf16.gmra.mrb[84].mxu0 %vm446_vm0, %v10044_v16  ;;  %v10061_v16 = vld [vmem:[%s15490_s1 + $0x130] sm:$0xff]  }
  0xc5   :  { %858 = vmatprep.mubr.bf16.mxu0 %v15510_v3 }
  0xcc   :  { %8777 = vmatmul.mubr.msk.bf16.gmra.mrb[88].mxu0 %vm446_vm0, %v10045_v17 }
  0xcd   :  { %868 = vmatprep.mubr.bf16.mxu0 %v15510_v3 }
  0xd4   :  { %8778 = vmatmul.mubr.msk.bf16.gmra.mrb[92].mxu0 %vm446_vm0, %v10046_v18 }
  0xd5   :  { %878 = vmatprep.mubr.bf16.mxu0 %v15510_v3 }
  0xdc   :  { %8779 = vmatmul.mubr.msk.bf16.gmra.mrb[96].mxu0 %vm446_vm0, %v10047_v19 }
  0xdd   :  { %888 = vmatprep.mubr.bf16.mxu0 %v15510_v3 }
  0xe4   :  { %8780 = vmatmul.mubr.msk.bf16.gmra.mrb[100].mxu0 %vm446_vm0, %v10048_v20 }
  0xe5   :  { %898 = vmatprep.mubr.bf16.mxu0 %v15510_v3 }
  0xec   :  { %8781 = vmatmul.mubr.msk.bf16.gmra.mrb[104].mxu0 %vm446_vm0, %v10049_v21  ;;  %v10062_v21 = vld [vmem:[%s15490_s1 + $0x138] sm:$0xff]  }
  0xed   :  { %908 = vmatprep.mubr.bf16.mxu0 %v15510_v3 }
  0xef   :  { %v10775_v22 = vpop.f32.mrb[0].mxu0 }
  0xf0   :  { %v10777_v23 = vpop.f32.mrb[1].mxu0 }
  0xf1   :  { %v10782_v25 = vpop.f32.mrb[2].mxu0 }
  0xf2   :  { %v10784_v26 = vpop.f32.mrb[3].mxu0 }
  0xf4   :  { %8782 = vmatmul.mubr.msk.bf16.gmra.mrb[108].mxu0 %vm446_vm0, %v10050_v24 }
  0xf5   :  { %918 = vmatprep.mubr.bf16.mxu0 %v15510_v3 }
  0xf7   :  { %v10788_v27 = vpop.f32.mrb[4].mxu0 }
  0xf8   :  { %v10790_v28 = vpop.f32.mrb[5].mxu0 }
  0xf9   :  { %v10795_v30 = vpop.f32.mrb[6].mxu0 }
  0xfa   :  { %v10797_v31 = vpop.f32.mrb[7].mxu0 }
  0xfc   :  { %8783 = vmatmul.mubr.msk.bf16.gmra.mrb[112].mxu0 %vm446_vm0, %v10051_v29 }
  0xfd   :  { %928 = vmatprep.mubr.bf16.mxu0 %v15510_v3 }
  0xff   :  { %v10801_v32 = vpop.f32.mrb[8].mxu0 }
 0x100   :  { %v10803_v33 = vpop.f32.mrb[9].mxu0 }
 0x101   :  { %v10808_v35 = vpop.f32.mrb[10].mxu0 }
 0x102   :  { %v10810_v36 = vpop.f32.mrb[11].mxu0 }
 0x104   :  { %8784 = vmatmul.mubr.msk.bf16.gmra.mrb[116].mxu0 %vm446_vm0, %v10052_v34 }
 0x105   :  { %938 = vmatprep.mubr.bf16.mxu0 %v15510_v3 }
 0x107   :  { %v10814_v37 = vpop.f32.mrb[12].mxu0 }
 0x108   :  { %v10816_v38 = vpop.f32.mrb[13].mxu0 }
 0x109   :  { %v10821_v40 = vpop.f32.mrb[14].mxu0 }
 0x10a   :  { %v10823_v41 = vpop.f32.mrb[15].mxu0 }
 0x10c   :  { %8785 = vmatmul.mubr.msk.bf16.gmra.mrb[120].mxu0 %vm446_vm0, %v10053_v39 }
 0x10d   :  { %948 = vmatprep.mubr.bf16.mxu0 %v15510_v3 }
 0x10f   :  { %v10827_v42 = vpop.f32.mrb[16].mxu0 }
 0x110   :  { %v10829_v43 = vpop.f32.mrb[17].mxu0 }
 0x111   :  { %v10834_v45 = vpop.f32.mrb[18].mxu0 }
 0x112   :  { %v10836_v46 = vpop.f32.mrb[19].mxu0 }
 0x114   :  { %8786 = vmatmul.mubr.msk.bf16.gmra.mrb[124].mxu0 %vm446_vm0, %v10054_v44  ;;  %v10063_v44 = vld [vmem:[%s15490_s1 + $0x140] sm:$0xff]  }
 0x115   :  { %958 = vmatprep.mubr.bf16.mxu0 %v15510_v3 }
 0x117   :  { %v10840_v47 = vpop.f32.mrb[20].mxu0 }
 0x118   :  { %v10842_v48 = vpop.f32.mrb[21].mxu0 }
 0x119   :  { %v10847_v50 = vpop.f32.mrb[22].mxu0 }
 0x11a   :  { %v10849_v51 = vpop.f32.mrb[23].mxu0 }
 0x11c   :  { %8787 = vmatmul.mubr.msk.bf16.gmra.mrb[128].mxu0 %vm446_vm0, %v10055_v49 }
 0x11d   :  { %968 = vmatprep.mubr.bf16.mxu0 %v15510_v3 }
 0x11f   :  { %v10853_v52 = vpop.f32.mrb[24].mxu0 }
 0x120   :  { %15795 = vst [vmem:[#allocation2_spill] sm:$0xff] %v10853_v52  ;;  %v10855_v53 = vpop.f32.mrb[25].mxu0 }
 0x121   :  { %15796 = vst [vmem:[#allocation3_spill] sm:$0xff] %v10855_v53  ;;  %v10860_v55 = vpop.f32.mrb[26].mxu0 }
 0x122   :  { %15797 = vst [vmem:[#allocation4_spill] sm:$0xff] %v10860_v55  ;;  %v10862_v56 = vpop.f32.mrb[27].mxu0 }
 0x123   :  { %15798 = vst [vmem:[#allocation5_spill] sm:$0xff] %v10862_v56 }
 0x124   :  { %8788 = vmatmul.mubr.msk.bf16.gmra.mrb[132].mxu0 %vm446_vm0, %v10056_v54 }
 0x125   :  { %978 = vmatprep.mubr.bf16.mxu0 %v15510_v3 }
 0x127   :  { %v10866_v57 = vpop.f32.mrb[28].mxu0 }
 0x128   :  { %15799 = vst [vmem:[#allocation6_spill] sm:$0xff] %v10866_v57  ;;  %v10868_v58 = vpop.f32.mrb[29].mxu0 }
 0x129   :  { %15800 = vst [vmem:[#allocation7_spill] sm:$0xff] %v10868_v58  ;;  %v10873_v60 = vpop.f32.mrb[30].mxu0 }
 0x12a   :  { %15801 = vst [vmem:[#allocation8_spill] sm:$0xff] %v10873_v60  ;;  %v10875_v61 = vpop.f32.mrb[31].mxu0 }
 0x12b   :  { %15802 = vst [vmem:[#allocation9_spill] sm:$0xff] %v10875_v61 }
 0x12c   :  { %8789 = vmatmul.mubr.msk.bf16.gmra.mrb[136].mxu0 %vm446_vm0, %v10057_v59 }
 0x12d   :  { %988 = vmatprep.mubr.bf16.mxu0 %v15510_v3 }
 0x12f   :  { %v10879_v62 = vpop.f32.mrb[32].mxu0 }
 0x130   :  { %15803 = vst [vmem:[#allocation10_spill] sm:$0xff] %v10879_v62  ;;  %v10881_v63 = vpop.f32.mrb[33].mxu0 }
 0x131   :  { %15804 = vst [vmem:[#allocation11_spill] sm:$0xff] %v10881_v63  ;;  %v10886_v1 = vpop.f32.mrb[34].mxu0 }
 0x132   :  { %15805 = vst [vmem:[#allocation12_spill] sm:$0xff] %v10886_v1  ;;  %v10888_v2 = vpop.f32.mrb[35].mxu0 }
 0x133   :  { %15806 = vst [vmem:[#allocation13_spill] sm:$0xff] %v10888_v2 }
 0x134   :  { %8790 = vmatmul.mubr.msk.bf16.gmra.mrb[140].mxu0 %vm446_vm0, %v10058_v0 }
 0x135   :  { %998 = vmatprep.mubr.bf16.mxu0 %v15510_v3 }
 0x137   :  { %v10892_v4 = vpop.f32.mrb[36].mxu0 }
 0x138   :  { %15807 = vst [vmem:[#allocation14_spill] sm:$0xff] %v10892_v4  ;;  %v10894_v5 = vpop.f32.mrb[37].mxu0 }
 0x139   :  { %15808 = vst [vmem:[#allocation15_spill] sm:$0xff] %v10894_v5  ;;  %v10899_v7 = vpop.f32.mrb[38].mxu0 }
 0x13a   :  { %15809 = vst [vmem:[#allocation16_spill] sm:$0xff] %v10899_v7  ;;  %v10901_v8 = vpop.f32.mrb[39].mxu0 }
 0x13b   :  { %15810 = vst [vmem:[#allocation17_spill] sm:$0xff] %v10901_v8 }
 0x13c   :  { %8791 = vmatmul.mubr.msk.bf16.gmra.mrb[144].mxu0 %vm446_vm0, %v10059_v6  ;;  %v10064_v6 = vld [vmem:[%s15490_s1 + $0x148] sm:$0xff]  }
 0x13d   :  { %1008 = vmatprep.mubr.bf16.mxu0 %v15510_v3 }
 0x13f   :  { %v10905_v9 = vpop.f32.mrb[40].mxu0 }
 0x140   :  { %15811 = vst [vmem:[#allocation18_spill] sm:$0xff] %v10905_v9  ;;  %v10907_v10 = vpop.f32.mrb[41].mxu0 }
 0x141   :  { %15812 = vst [vmem:[#allocation19_spill] sm:$0xff] %v10907_v10  ;;  %v744_v12 = vpop.f32.mrb[42].mxu0 }
 0x142   :  { %1209 = vrot.lane.b32.xlu0 %v744_v12, %s10429_s2  ;;  %v746_v13 = vpop.f32.mrb[43].mxu0 }
 0x144   :  { %8792 = vmatmul.mubr.msk.bf16.gmra.mrb[148].mxu0 %vm446_vm0, %v10060_v11 }
 0x145   :  { %1018 = vmatprep.mubr.bf16.mxu0 %v15510_v3 }
 0x146   :  { %1211 = vrot.lane.b32.xlu0 %v746_v13, %s10429_s2 }
 0x147   :  { %v750_v14 = vpop.f32.mrb[44].mxu0 }
 0x148   :  { %1213 = vrot.lane.b32.xlu1 %v750_v14, %s10429_s2  ;;  %v752_v15 = vpop.f32.mrb[45].mxu0 }
 0x149   :  { %v754_v17 = vpop.f32.mrb[46].mxu0 }
 0x14a   :  { %1217 = vrot.lane.b32.xlu0 %v754_v17, %s10429_s2  ;;  %v756_v18 = vpop.f32.mrb[47].mxu0 }
 0x14c   :  { %8793 = vmatmul.mubr.msk.bf16.gmra.mrb[152].mxu0 %vm446_vm0, %v10061_v16  ;;  %1215 = vrot.lane.b32.xlu1 %v752_v15, %s10429_s2  ;;  %v10065_v15 = vld [vmem:[%s15490_s1 + $0x150] sm:$0xff]  }
 0x14d   :  { %1028 = vmatprep.mubr.bf16.mxu0 %v15510_v3 }
 0x14f   :  { %v760_v19 = vpop.f32.mrb[48].mxu0 }
 0x150   :  { %1219 = vrot.lane.b32.xlu1 %v756_v18, %s10429_s2  ;;  %1221 = vrot.lane.b32.xlu0 %v760_v19, %s10429_s2  ;;  %v762_v20 = vpop.f32.mrb[49].mxu0 }
 0x151   :  { %v764_v24 = vpop.f32.mrb[50].mxu0 }
 0x152   :  { %v766_v29 = vpop.f32.mrb[51].mxu0 }
 0x154   :  { %8794 = vmatmul.mubr.msk.bf16.gmra.mrb[156].mxu0 %vm446_vm0, %v10062_v21  ;;  %1223 = vrot.lane.b32.xlu1 %v762_v20, %s10429_s2  ;;  %v10066_v20 = vld [vmem:[%s15490_s1 + $0x158] sm:$0xff]  }
 0x155   :  { %1225 = vrot.lane.b32.xlu0 %v764_v24, %s10429_s2  ;;  %1038 = vmatprep.mubr.bf16.mxu0 %v15510_v3 }
 0x157   :  { %v770_v34 = vpop.f32.mrb[52].mxu0 }
 0x158   :  { %1227 = vrot.lane.b32.xlu1 %v766_v29, %s10429_s2  ;;  %v772_v39 = vpop.f32.mrb[53].mxu0 }
 0x159   :  { %1229 = vrot.lane.b32.xlu0 %v770_v34, %s10429_s2  ;;  %v774_v49 = vpop.f32.mrb[54].mxu0 }
 0x15a   :  { %v776_v54 = vpop.f32.mrb[55].mxu0 }
 0x15c   :  { %8795 = vmatmul.mubr.msk.bf16.gmra.mrb[160].mxu0 %vm446_vm0, %v10063_v44  ;;  %1231 = vrot.lane.b32.xlu1 %v772_v39, %s10429_s2  ;;  %v10067_v39 = vld [vmem:[%s15490_s1 + $0x160] sm:$0xff]   ;;  %v10973_v44 = vpop.permute.xlu1 %2291 }
 0x15d   :  { %1233 = vrot.lane.b32.xlu0 %v774_v49, %s10429_s2  ;;  %1048 = vmatprep.mubr.bf16.mxu0 %v15510_v3  ;;  %15813 = vst [vmem:[#allocation20_spill] sm:$0xff] %v10973_v44 }
 0x15f   :  { %v780_v59 = vpop.f32.mrb[56].mxu0 }
 0x160   :  { %1235 = vrot.lane.b32.xlu1 %v776_v54, %s10429_s2  ;;  %v782_v0 = vpop.f32.mrb[57].mxu0  ;;  %v10976_v54 = vpop.permute.xlu0 %2286 }
 0x161   :  { %1237 = vrot.lane.b32.xlu0 %v780_v59, %s10429_s2  ;;  %v784_v11 = vpop.f32.mrb[58].mxu0  ;;  %15814 = vst [vmem:[#allocation21_spill] sm:$0xff] %v10976_v54 }
 0x162   :  { %v786_v12 = vpop.f32.mrb[59].mxu0 }
 0x164   :  { %8796 = vmatmul.mubr.msk.bf16.gmra.mrb[164].mxu0 %vm446_vm0, %v10064_v6  ;;  %1239 = vrot.lane.b32.xlu1 %v782_v0, %s10429_s2  ;;  %v10982_v0 = vpop.permute.xlu1 %2296 }
 0x165   :  { %1241 = vrot.lane.b32.xlu0 %v784_v11, %s10429_s2  ;;  %1058 = vmatprep.mubr.bf16.mxu0 %v15510_v3  ;;  %15815 = vst [vmem:[#allocation22_spill] sm:$0xff] %v10982_v0  ;;  %v10984_v11 = vpop.permute.xlu0 %2301 }
 0x166   :  { %15816 = vst [vmem:[#allocation23_spill] sm:$0xff] %v10984_v11 }
 0x167   :  { %v790_v13 = vpop.f32.mrb[60].mxu0 }
 0x168   :  { %1243 = vrot.lane.b32.xlu1 %v786_v12, %s10429_s2  ;;  %v792_v14 = vpop.f32.mrb[61].mxu0 }
 0x169   :  { %1245 = vrot.lane.b32.xlu0 %v790_v13, %s10429_s2  ;;  %v794_v16 = vpop.f32.mrb[62].mxu0  ;;  %v10068_v13 = vld [vmem:[%s15490_s1 + $0x168] sm:$0xff]  }
 0x16a   :  { %v796_v17 = vpop.f32.mrb[63].mxu0 }
 0x16c   :  { %8797 = vmatmul.mubr.msk.bf16.gmra.mrb[168].mxu0 %vm446_vm0, %v10065_v15  ;;  %1247 = vrot.lane.b32.xlu1 %v792_v14, %s10429_s2 }
 0x16d   :  { %1249 = vrot.lane.b32.xlu0 %v794_v16, %s10429_s2  ;;  %1068 = vmatprep.mubr.bf16.mxu0 %v15510_v3  ;;  %v10993_v16 = vpop.permute.xlu1 %2306 }
 0x16e   :  { %15817 = vst [vmem:[#allocation24_spill] sm:$0xff] %v10993_v16 }
 0x16f   :  { %v800_v18 = vpop.f32.mrb[64].mxu0 }
 0x170   :  { %1251 = vrot.lane.b32.xlu1 %v796_v17, %s10429_s2  ;;  %v802_v19 = vpop.f32.mrb[65].mxu0  ;;  %v10997_v17 = vpop.permute.xlu0 %2311 }
 0x171   :  { %1253 = vrot.lane.b32.xlu0 %v800_v18, %s10429_s2  ;;  %v804_v21 = vpop.f32.mrb[66].mxu0  ;;  %15818 = vst [vmem:[#allocation25_spill] sm:$0xff] %v10997_v17 }
 0x172   :  { %v806_v24 = vpop.f32.mrb[67].mxu0 }
 0x174   :  { %8798 = vmatmul.mubr.msk.bf16.gmra.mrb[172].mxu0 %vm446_vm0, %v10066_v20  ;;  %1255 = vrot.lane.b32.xlu1 %v802_v19, %s10429_s2  ;;  %v10069_v20 = vld [vmem:[%s15490_s1 + $0x170] sm:$0xff]  }
 0x175   :  { %1257 = vrot.lane.b32.xlu0 %v804_v21, %s10429_s2  ;;  %1078 = vmatprep.mubr.bf16.mxu0 %v15510_v3 }
 0x177   :  { %v810_v29 = vpop.f32.mrb[68].mxu0 }
 0x178   :  { %1259 = vrot.lane.b32.xlu1 %v806_v24, %s10429_s2  ;;  %v812_v34 = vpop.f32.mrb[69].mxu0 }
 0x179   :  { %1261 = vrot.lane.b32.xlu0 %v810_v29, %s10429_s2  ;;  %v814_v49 = vpop.f32.mrb[70].mxu0  ;;  %v11004_v29 = vpop.permute.xlu1 %2316 }
 0x17a   :  { %v816_v59 = vpop.f32.mrb[71].mxu0  ;;  %15819 = vst [vmem:[#allocation26_spill] sm:$0xff] %v11004_v29 }
 0x17c   :  { %8799 = vmatmul.mubr.msk.bf16.gmra.mrb[176].mxu0 %vm446_vm0, %v10067_v39  ;;  %1263 = vrot.lane.b32.xlu1 %v812_v34, %s10429_s2  ;;  %v11006_v34 = vpop.permute.xlu0 %2321 }
 0x17d   :  { %1265 = vrot.lane.b32.xlu0 %v814_v49, %s10429_s2  ;;  %1088 = vmatprep.mubr.bf16.mxu0 %v15510_v3  ;;  %15820 = vst [vmem:[#allocation27_spill] sm:$0xff] %v11006_v34 }
 0x17f   :  { %v820_v6 = vpop.f32.mrb[72].mxu0 }
 0x180   :  { %1267 = vrot.lane.b32.xlu1 %v816_v59, %s10429_s2  ;;  %v822_v12 = vpop.f32.mrb[73].mxu0  ;;  %v10070_v59 = vld [vmem:[%s15490_s1 + $0x178] sm:$0xff]  }
 0x181   :  { %1269 = vrot.lane.b32.xlu0 %v820_v6, %s10429_s2  ;;  %v824_v14 = vpop.f32.mrb[74].mxu0  ;;  %v11016_v6 = vpop.permute.xlu1 %2326 }
 0x182   :  { %v826_v15 = vpop.f32.mrb[75].mxu0  ;;  %15821 = vst [vmem:[#allocation28_spill] sm:$0xff] %v11016_v6 }
 0x184   :  { %8800 = vmatmul.mubr.msk.bf16.gmra.mrb[180].mxu0 %vm446_vm0, %v10068_v13  ;;  %1271 = vrot.lane.b32.xlu1 %v822_v12, %s10429_s2  ;;  %v11019_v13 = vpop.permute.xlu0 %2331 }
 0x185   :  { %1273 = vrot.lane.b32.xlu0 %v824_v14, %s10429_s2  ;;  %1098 = vmatprep.mubr.bf16.mxu0 %v15510_v3  ;;  %15822 = vst [vmem:[#allocation29_spill] sm:$0xff] %v11019_v13 }
 0x187   :  { %v830_v18 = vpop.f32.mrb[76].mxu0 }
 0x188   :  { %1275 = vrot.lane.b32.xlu1 %v826_v15, %s10429_s2  ;;  %v832_v19 = vpop.f32.mrb[77].mxu0  ;;  %v11025_v15 = vpop.permute.xlu1 %2336 }
 0x189   :  { %1277 = vrot.lane.b32.xlu0 %v830_v18, %s10429_s2  ;;  %v834_v21 = vpop.f32.mrb[78].mxu0  ;;  %15823 = vst [vmem:[#allocation30_spill] sm:$0xff] %v11025_v15 }
 0x18a   :  { %v836_v24 = vpop.f32.mrb[79].mxu0 }
 0x18c   :  { %8801 = vmatmul.mubr.msk.bf16.gmra.mrb[184].mxu0 %vm446_vm0, %v10069_v20  ;;  %1279 = vrot.lane.b32.xlu1 %v832_v19, %s10429_s2  ;;  %v11027_v19 = vpop.permute.xlu0 %2341 }
 0x18d   :  { %1281 = vrot.lane.b32.xlu0 %v834_v21, %s10429_s2  ;;  %1108 = vmatprep.mubr.bf16.mxu0 %v15510_v3  ;;  %15824 = vst [vmem:[#allocation31_spill] sm:$0xff] %v11027_v19  ;;  %v10071_v21 = vld [vmem:[%s15490_s1 + $0x180] sm:$0xff]  }
 0x18f   :  { %v840_v39 = vpop.f32.mrb[80].mxu0 }
 0x190   :  { %1283 = vrot.lane.b32.xlu1 %v836_v24, %s10429_s2  ;;  %v842_v49 = vpop.f32.mrb[81].mxu0 }
 0x191   :  { %1285 = vrot.lane.b32.xlu0 %v840_v39, %s10429_s2  ;;  %v844_v12 = vpop.f32.mrb[82].mxu0 }
 0x192   :  { %v846_v14 = vpop.f32.mrb[83].mxu0 }
 0x194   :  { %8802 = vmatmul.mubr.msk.bf16.gmra.mrb[188].mxu0 %vm446_vm0, %v10070_v59  ;;  %1287 = vrot.lane.b32.xlu1 %v842_v49, %s10429_s2  ;;  %v11036_v49 = vpop.permute.xlu1 %2346  ;;  %v11040_v59 = vpop.permute.xlu0 %2351 }
 0x195   :  { %1289 = vrot.lane.b32.xlu0 %v844_v12, %s10429_s2  ;;  %1118 = vmatprep.mubr.bf16.mxu0 %v15510_v3  ;;  %15825 = vst [vmem:[#allocation32_spill] sm:$0xff] %v11036_v49  ;;  %15826 = vst [vmem:[#allocation33_spill] sm:$0xff] %v11040_v59 }
 0x197   :  { %v850_v18 = vpop.f32.mrb[84].mxu0 }
 0x198   :  { %1291 = vrot.lane.b32.xlu1 %v846_v14, %s10429_s2  ;;  %v852_v20 = vpop.f32.mrb[85].mxu0  ;;  %v11047_v10 = vpop.permute.xlu1 %2356 }
 0x199   :  { %1483 = vrot.lane.b32.xlu0 %v850_v18, %s10430_s19  ;;  %v854_v24 = vpop.f32.mrb[86].mxu0  ;;  %v10072_v18 = vld [vmem:[%s15490_s1 + $0x188] sm:$0xff]   ;;  %15827 = vst [vmem:[#allocation34_spill] sm:$0xff] %v11047_v10  ;;  %v11049_v49 = vpop.permute.xlu0 %2361 }
 0x19a   :  { %v856_v39 = vpop.f32.mrb[87].mxu0  ;;  %15828 = vst [vmem:[#allocation35_spill] sm:$0xff] %v11049_v49 }
 0x19c   :  { %8803 = vmatmul.mubr.msk.bf16.gmra.mrb[192].mxu0 %vm446_vm0, %v10071_v21  ;;  %1485 = vrot.lane.b32.xlu1 %v852_v20, %s10430_s19  ;;  %v11059_v59 = vpop.permute.xlu1 %2366 }
 0x19d   :  { %1487 = vrot.lane.b32.xlu0 %v854_v24, %s10430_s19  ;;  %1128 = vmatprep.mubr.bf16.mxu0 %v15510_v3  ;;  %15829 = vst [vmem:[#allocation36_spill] sm:$0xff] %v11059_v59 }
 0x19f   :  { %v860_v12 = vpop.f32.mrb[88].mxu0 }
 0x1a0   :  { %1489 = vrot.lane.b32.xlu1 %v856_v39, %s10430_s19  ;;  %v862_v14 = vpop.f32.mrb[89].mxu0 }
 0x1a1   :  { %1491 = vrot.lane.b32.xlu0 %v860_v12, %s10430_s19  ;;  %v864_v21 = vpop.f32.mrb[90].mxu0  ;;  %v10073_v12 = vld [vmem:[%s15490_s1 + $0x190] sm:$0xff]  }
 0x1a2   :  { %v866_v20 = vpop.f32.mrb[91].mxu0 }
 0x1a4   :  { %8804 = vmatmul.mubr.msk.bf16.gmra.mrb[196].mxu0 %vm446_vm0, %v10072_v18  ;;  %1493 = vrot.lane.b32.xlu1 %v862_v14, %s10430_s19  ;;  %v11062_v18 = vpop.permute.xlu0 %2371 }
 0x1a5   :  { %1495 = vrot.lane.b32.xlu0 %v864_v21, %s10430_s19  ;;  %1138 = vmatprep.mubr.bf16.mxu0 %v15510_v3  ;;  %15830 = vst [vmem:[#allocation37_spill] sm:$0xff] %v11062_v18  ;;  %v11068_v21 = vpop.permute.xlu1 %2376  ;;  %v10074_v18 = vld [vmem:[%s15490_s1 + $0x198] sm:$0xff]  }
 0x1a6   :  { %15831 = vst [vmem:[#allocation38_spill] sm:$0xff] %v11068_v21 }
 0x1a7   :  { %v870_v24 = vpop.f32.mrb[92].mxu0 }
 0x1a8   :  { %1497 = vrot.lane.b32.xlu1 %v866_v20, %s10430_s19  ;;  %v872_v39 = vpop.f32.mrb[93].mxu0  ;;  %v11070_v10 = vpop.permute.xlu0 %2381 }
 0x1a9   :  { %1499 = vrot.lane.b32.xlu0 %v870_v24, %s10430_s19  ;;  %v874_v49 = vpop.f32.mrb[94].mxu0  ;;  %15832 = vst [vmem:[#allocation39_spill] sm:$0xff] %v11070_v10 }
 0x1aa   :  { %v876_v14 = vpop.f32.mrb[95].mxu0 }
 0x1ac   :  { %8805 = vmatmul.mubr.msk.bf16.gmra.mrb[200].mxu0 %vm446_vm0, %v10073_v12  ;;  %1501 = vrot.lane.b32.xlu1 %v872_v39, %s10430_s19 }
 0x1ad   :  { %1503 = vrot.lane.b32.xlu0 %v874_v49, %s10430_s19  ;;  %1148 = vmatprep.mubr.bf16.mxu0 %v15510_v3 }
 0x1af   :  { %v880_v20 = vpop.f32.mrb[96].mxu0 }
 0x1b0   :  { %1505 = vrot.lane.b32.xlu1 %v876_v14, %s10430_s19  ;;  %v882_v24 = vpop.f32.mrb[97].mxu0  ;;  %v11083_v14 = vpop.permute.xlu1 %2386 }
 0x1b1   :  { %1507 = vrot.lane.b32.xlu0 %v880_v20, %s10430_s19  ;;  %v884_v12 = vpop.f32.mrb[98].mxu0  ;;  %15833 = vst [vmem:[#allocation40_spill] sm:$0xff] %v11083_v14 }
 0x1b2   :  { %v886_v39 = vpop.f32.mrb[99].mxu0 }
 0x1b4   :  { %8806 = vmatmul.mubr.msk.bf16.gmra.mrb[204].mxu0 %vm446_vm0, %v10074_v18  ;;  %v11078_v49 = vpop.permute.xlu0 %1209  ;;  %1509 = vrot.lane.b32.xlu1 %v882_v24, %s10430_s19  ;;  %v10075_v18 = vld [vmem:[%s15490_s1 + $0x1a0] ss:$0 sps:$4 sm:$0xff]   ;;  %s10431_s1 = smov 125  }
 0x1b5   :  { %1511 = vrot.lane.b32.xlu0 %v884_v12, %s10430_s19  ;;  %1158 = vmatprep.mubr.bf16.mxu0 %v15510_v3 }
 0x1b7   :  { %v890_v10 = vpop.f32.mrb[100].mxu0 }
 0x1b8   :  { %v11085_v21 = vpop.permute.xlu0 %1211  ;;  %1513 = vrot.lane.b32.xlu1 %v886_v39, %s10430_s19  ;;  %v892_v20 = vpop.f32.mrb[101].mxu0 }
 0x1b9   :  { %1515 = vrot.lane.b32.xlu0 %v890_v10, %s10430_s19  ;;  %v894_v59 = vpop.f32.mrb[102].mxu0 }
 0x1ba   :  { %v11092_v24 = vpop.permute.xlu1 %1213  ;;  %v896_v12 = vpop.f32.mrb[103].mxu0 }
 0x1bc   :  { %8807 = vmatmul.mubr.msk.bf16.gmra.mrb[208].mxu0 %vm446_vm0, %v10075_v18  ;;  %1517 = vrot.lane.b32.xlu1 %v892_v20, %s10430_s19  ;;  %v11097_v3 = vpop.permute.xlu0 %1217 }
 0x1bd   :  { %1519 = vrot.lane.b32.xlu0 %v894_v59, %s10430_s19 }
 0x1be   :  { %v11099_v39 = vpop.permute.xlu1 %1215 }
 0x1bf   :  { %v900_v14 = vpop.f32.mrb[104].mxu0 }
 0x1c0   :  { %1521 = vrot.lane.b32.xlu1 %v896_v12, %s10430_s19  ;;  %v902_v19 = vpop.f32.mrb[105].mxu0 }
 0x1c1   :  { %1523 = vrot.lane.b32.xlu0 %v900_v14, %s10430_s19  ;;  %v904_v10 = vpop.f32.mrb[106].mxu0 }
 0x1c2   :  { %v11103_v15 = vpop.permute.xlu1 %1219  ;;  %v11105_v13 = vpop.permute.xlu0 %1221 }
 0x1c3   :  { %v906_v18 = vpop.f32.mrb[107].mxu0 }
 0x1c4   :  { %1525 = vrot.lane.b32.xlu1 %v902_v19, %s10430_s19 }
 0x1c5   :  { %1527 = vrot.lane.b32.xlu0 %v904_v10, %s10430_s19 }
 0x1c6   :  { %v11109_v59 = vpop.permute.xlu1 %1223 }
 0x1c7   :  { %v11111_v20 = vpop.permute.xlu0 %1225  ;;  %v910_v6 = vpop.f32.mrb[108].mxu0 }
 0x1c8   :  { %1529 = vrot.lane.b32.xlu1 %v906_v18, %s10430_s19  ;;  %v912_v12 = vpop.f32.mrb[109].mxu0 }
 0x1c9   :  { %1531 = vrot.lane.b32.xlu0 %v910_v6, %s10430_s19  ;;  %v914_v14 = vpop.f32.mrb[110].mxu0 }
 0x1ca   :  { %v11115_v34 = vpop.permute.xlu1 %1227  ;;  %v916_v29 = vpop.f32.mrb[111].mxu0 }
 0x1cb   :  { %v11117_v17 = vpop.permute.xlu0 %1229 }
 0x1cc   :  { %1533 = vrot.lane.b32.xlu1 %v912_v12, %s10430_s19 }
 0x1cd   :  { %1535 = vrot.lane.b32.xlu0 %v914_v14, %s10430_s19 }
 0x1ce   :  { %v11121_v19 = vpop.permute.xlu1 %1231 }
 0x1cf   :  { %v11123_v10 = vpop.permute.xlu0 %1233  ;;  %v920_v16 = vpop.f32.mrb[112].mxu0 }
 0x1d0   :  { %1537 = vrot.lane.b32.xlu1 %v916_v29, %s10430_s19  ;;  %v922_v18 = vpop.f32.mrb[113].mxu0 }
 0x1d1   :  { %1539 = vrot.lane.b32.xlu0 %v920_v16, %s10430_s19  ;;  %v924_v6 = vpop.f32.mrb[114].mxu0 }
 0x1d2   :  { %v11127_v11 = vpop.permute.xlu1 %1235  ;;  %v926_v0 = vpop.f32.mrb[115].mxu0 }
 0x1d3   :  { %v11129_v44 = vpop.permute.xlu0 %1237 }
 0x1d4   :  { %1541 = vrot.lane.b32.xlu1 %v922_v18, %s10430_s19 }
 0x1d5   :  { %1543 = vrot.lane.b32.xlu0 %v924_v6, %s10430_s19 }
 0x1d6   :  { %v11133_v12 = vpop.permute.xlu1 %1239 }
 0x1d7   :  { %v11135_v14 = vpop.permute.xlu0 %1241  ;;  %v930_v54 = vpop.f32.mrb[116].mxu0 }
 0x1d8   :  { %1545 = vrot.lane.b32.xlu1 %v926_v0, %s10430_s19  ;;  %v932_v29 = vpop.f32.mrb[117].mxu0 }
 0x1d9   :  { %1547 = vrot.lane.b32.xlu0 %v930_v54, %s10430_s19  ;;  %v934_v16 = vpop.f32.mrb[118].mxu0 }
 0x1da   :  { %v11139_v9 = vpop.permute.xlu1 %1243  ;;  %v936_v8 = vpop.f32.mrb[119].mxu0 }
 0x1db   :  { %v11141_v7 = vpop.permute.xlu0 %1245 }
 0x1dc   :  { %1549 = vrot.lane.b32.xlu1 %v932_v29, %s10430_s19 }
 0x1dd   :  { %1551 = vrot.lane.b32.xlu0 %v934_v16, %s10430_s19 }
 0x1de   :  { %v11145_v18 = vpop.permute.xlu1 %1247 }
 0x1df   :  { %v11147_v6 = vpop.permute.xlu0 %1249  ;;  %v940_v5 = vpop.f32.mrb[120].mxu0 }
 0x1e0   :  { %1553 = vrot.lane.b32.xlu1 %v936_v8, %s10430_s19  ;;  %v942_v0 = vpop.f32.mrb[121].mxu0 }
 0x1e1   :  { %1555 = vrot.lane.b32.xlu0 %v940_v5, %s10430_s19  ;;  %v944_v54 = vpop.f32.mrb[122].mxu0 }
 0x1e2   :  { %v11151_v4 = vpop.permute.xlu1 %1251  ;;  %v946_v2 = vpop.f32.mrb[123].mxu0 }
 0x1e3   :  { %v11153_v1 = vpop.permute.xlu0 %1253 }
 0x1e4   :  { %1557 = vrot.lane.b32.xlu1 %v942_v0, %s10430_s19 }
 0x1e5   :  { %1559 = vrot.lane.b32.xlu0 %v944_v54, %s10430_s19 }
 0x1e6   :  { %v11157_v29 = vpop.permute.xlu1 %1255 }
 0x1e7   :  { %v11159_v16 = vpop.permute.xlu0 %1257  ;;  %v950_v63 = vpop.f32.mrb[124].mxu0 }
 0x1e8   :  { %1561 = vrot.lane.b32.xlu1 %v946_v2, %s10430_s19  ;;  %v952_v8 = vpop.f32.mrb[125].mxu0 }
 0x1e9   :  { %1563 = vrot.lane.b32.xlu0 %v950_v63, %s10430_s19  ;;  %v954_v5 = vpop.f32.mrb[126].mxu0 }
 0x1ea   :  { %v11163_v62 = vpop.permute.xlu1 %1259  ;;  %v956_v61 = vpop.f32.mrb[127].mxu0 }
 0x1eb   :  { %v11165_v60 = vpop.permute.xlu0 %1261 }
 0x1ec   :  { %1565 = vrot.lane.b32.xlu1 %v952_v8, %s10430_s19 }
 0x1ed   :  { %1757 = vrot.lane.b32.xlu0 %v954_v5, %s10431_s1 }
 0x1ee   :  { %v11169_v0 = vpop.permute.xlu1 %1263 }
 0x1ef   :  { %v11171_v54 = vpop.permute.xlu0 %1265  ;;  %v960_v58 = vpop.f32.mrb[128].mxu0 }
 0x1f0   :  { %15834 = vst [vmem:[#allocation41_spill] sm:$0xff] %v11171_v54  ;;  %1759 = vrot.lane.b32.xlu1 %v956_v61, %s10431_s1  ;;  %v962_v2 = vpop.f32.mrb[129].mxu0 }
 0x1f1   :  { %1761 = vrot.lane.b32.xlu0 %v960_v58, %s10431_s1  ;;  %v964_v63 = vpop.f32.mrb[130].mxu0 }
 0x1f2   :  { %v11175_v57 = vpop.permute.xlu1 %1267  ;;  %v966_v56 = vpop.f32.mrb[131].mxu0 }
 0x1f3   :  { %15835 = vst [vmem:[#allocation42_spill] sm:$0xff] %v11175_v57  ;;  %v11177_v55 = vpop.permute.xlu0 %1269 }
 0x1f4   :  { %15836 = vst [vmem:[#allocation43_spill] sm:$0xff] %v11177_v55  ;;  %1763 = vrot.lane.b32.xlu1 %v962_v2, %s10431_s1 }
 0x1f5   :  { %1765 = vrot.lane.b32.xlu0 %v964_v63, %s10431_s1 }
 0x1f6   :  { %v11181_v8 = vpop.permute.xlu1 %1271 }
 0x1f7   :  { %15837 = vst [vmem:[#allocation44_spill] sm:$0xff] %v11181_v8  ;;  %v11183_v5 = vpop.permute.xlu0 %1273  ;;  %v970_v54 = vpop.f32.mrb[132].mxu0 }
 0x1f8   :  { %15838 = vst [vmem:[#allocation45_spill] sm:$0xff] %v11183_v5  ;;  %1767 = vrot.lane.b32.xlu1 %v966_v56, %s10431_s1  ;;  %v972_v61 = vpop.f32.mrb[133].mxu0 }
 0x1f9   :  { %1769 = vrot.lane.b32.xlu0 %v970_v54, %s10431_s1  ;;  %v974_v58 = vpop.f32.mrb[134].mxu0 }
 0x1fa   :  { %v11187_v53 = vpop.permute.xlu1 %1275  ;;  %v976_v57 = vpop.f32.mrb[135].mxu0 }
 0x1fb   :  { %15839 = vst [vmem:[#allocation46_spill] sm:$0xff] %v11187_v53  ;;  %v11189_v52 = vpop.permute.xlu0 %1277 }
 0x1fc   :  { %15840 = vst [vmem:[#allocation47_spill] sm:$0xff] %v11189_v52  ;;  %1771 = vrot.lane.b32.xlu1 %v972_v61, %s10431_s1 }
 0x1fd   :  { %1773 = vrot.lane.b32.xlu0 %v974_v58, %s10431_s1 }
 0x1fe   :  { %v11193_v2 = vpop.permute.xlu1 %1279 }
 0x1ff   :  { %15841 = vst [vmem:[#allocation48_spill] sm:$0xff] %v11193_v2  ;;  %v11195_v63 = vpop.permute.xlu0 %1281  ;;  %v980_v5 = vpop.f32.mrb[136].mxu0 }
 0x200   :  { %15842 = vst [vmem:[#allocation49_spill] sm:$0xff] %v11195_v63  ;;  %1775 = vrot.lane.b32.xlu1 %v976_v57, %s10431_s1  ;;  %v982_v56 = vpop.f32.mrb[137].mxu0 }
 0x201   :  { %1777 = vrot.lane.b32.xlu0 %v980_v5, %s10431_s1  ;;  %v984_v54 = vpop.f32.mrb[138].mxu0 }
 0x202   :  { %v11199_v55 = vpop.permute.xlu1 %1283  ;;  %v986_v53 = vpop.f32.mrb[139].mxu0 }
 0x203   :  { %15843 = vst [vmem:[#allocation50_spill] sm:$0xff] %v11199_v55  ;;  %v11201_v8 = vpop.permute.xlu0 %1285 }
 0x204   :  { %15844 = vst [vmem:[#allocation51_spill] sm:$0xff] %v11201_v8  ;;  %1779 = vrot.lane.b32.xlu1 %v982_v56, %s10431_s1 }
 0x205   :  { %1781 = vrot.lane.b32.xlu0 %v984_v54, %s10431_s1 }
 0x206   :  { %v11205_v61 = vpop.permute.xlu1 %1287 }
 0x207   :  { %15845 = vst [vmem:[#allocation52_spill] sm:$0xff] %v11205_v61  ;;  %v11207_v58 = vpop.permute.xlu0 %1289  ;;  %v990_v63 = vpop.f32.mrb[140].mxu0 }
 0x208   :  { %15846 = vst [vmem:[#allocation53_spill] sm:$0xff] %v11207_v58  ;;  %1783 = vrot.lane.b32.xlu1 %v986_v53, %s10431_s1  ;;  %v992_v57 = vpop.f32.mrb[141].mxu0 }
 0x209   :  { %1785 = vrot.lane.b32.xlu0 %v990_v63, %s10431_s1  ;;  %v994_v5 = vpop.f32.mrb[142].mxu0 }
 0x20a   :  { %v11211_v52 = vpop.permute.xlu1 %1291  ;;  %v996_v55 = vpop.f32.mrb[143].mxu0 }
 0x20b   :  { %15847 = vst [vmem:[#allocation54_spill] sm:$0xff] %v11211_v52  ;;  %v11213_v2 = vpop.permute.xlu0 %1483 }
 0x20c   :  { %15848 = vst [vmem:[#allocation55_spill] sm:$0xff] %v11213_v2  ;;  %1787 = vrot.lane.b32.xlu1 %v992_v57, %s10431_s1 }
 0x20d   :  { %1789 = vrot.lane.b32.xlu0 %v994_v5, %s10431_s1 }
 0x20e   :  { %v11217_v56 = vpop.permute.xlu1 %1485 }
 0x20f   :  { %15849 = vst [vmem:[#allocation56_spill] sm:$0xff] %v11217_v56  ;;  %v11219_v54 = vpop.permute.xlu0 %1487  ;;  %v1000_v58 = vpop.f32.mrb[144].mxu0 }
 0x210   :  { %15850 = vst [vmem:[#allocation57_spill] sm:$0xff] %v11219_v54  ;;  %1791 = vrot.lane.b32.xlu1 %v996_v55, %s10431_s1  ;;  %v1002_v53 = vpop.f32.mrb[145].mxu0 }
 0x211   :  { %1793 = vrot.lane.b32.xlu0 %v1000_v58, %s10431_s1  ;;  %v1004_v63 = vpop.f32.mrb[146].mxu0 }
 0x212   :  { %v11223_v8 = vpop.permute.xlu1 %1489  ;;  %v1006_v52 = vpop.f32.mrb[147].mxu0 }
 0x213   :  { %15851 = vst [vmem:[#allocation58_spill] sm:$0xff] %v11223_v8  ;;  %v11225_v61 = vpop.permute.xlu0 %1491 }
 0x214   :  { %15852 = vst [vmem:[#allocation59_spill] sm:$0xff] %v11225_v61  ;;  %1795 = vrot.lane.b32.xlu1 %v1002_v53, %s10431_s1 }
 0x215   :  { %1797 = vrot.lane.b32.xlu0 %v1004_v63, %s10431_s1 }
 0x216   :  { %v11229_v57 = vpop.permute.xlu1 %1493 }
 0x217   :  { %15853 = vst [vmem:[#allocation60_spill] sm:$0xff] %v11229_v57  ;;  %v11231_v5 = vpop.permute.xlu0 %1495  ;;  %v1010_v54 = vpop.f32.mrb[148].mxu0 }
 0x218   :  { %15854 = vst [vmem:[#allocation61_spill] sm:$0xff] %v11231_v5  ;;  %1799 = vrot.lane.b32.xlu1 %v1006_v52, %s10431_s1  ;;  %v1012_v55 = vpop.f32.mrb[149].mxu0 }
 0x219   :  { %1801 = vrot.lane.b32.xlu0 %v1010_v54, %s10431_s1  ;;  %v1014_v58 = vpop.f32.mrb[150].mxu0 }
 0x21a   :  { %v11235_v2 = vpop.permute.xlu1 %1497  ;;  %v1016_v8 = vpop.f32.mrb[151].mxu0 }
 0x21b   :  { %15855 = vst [vmem:[#allocation62_spill] sm:$0xff] %v11235_v2  ;;  %v11237_v56 = vpop.permute.xlu0 %1499 }
 0x21c   :  { %15856 = vst [vmem:[#allocation63_spill] sm:$0xff] %v11237_v56  ;;  %1803 = vrot.lane.b32.xlu1 %v1012_v55, %s10431_s1 }
 0x21d   :  { %1805 = vrot.lane.b32.xlu0 %v1014_v58, %s10431_s1 }
 0x21e   :  { %v11241_v53 = vpop.permute.xlu1 %1501 }
 0x21f   :  { %15857 = vst [vmem:[#allocation64_spill] sm:$0xff] %v11241_v53  ;;  %v11243_v63 = vpop.permute.xlu0 %1503  ;;  %v1020_v5 = vpop.f32.mrb[152].mxu0 }
 0x220   :  { %15858 = vst [vmem:[#allocation65_spill] sm:$0xff] %v11243_v63  ;;  %1807 = vrot.lane.b32.xlu1 %v1016_v8, %s10431_s1  ;;  %v1022_v52 = vpop.f32.mrb[153].mxu0 }
 0x221   :  { %1809 = vrot.lane.b32.xlu0 %v1020_v5, %s10431_s1  ;;  %v1024_v54 = vpop.f32.mrb[154].mxu0 }
 0x222   :  { %v11247_v61 = vpop.permute.xlu1 %1505  ;;  %v1026_v2 = vpop.f32.mrb[155].mxu0 }
 0x223   :  { %15859 = vst [vmem:[#allocation66_spill] sm:$0xff] %v11247_v61  ;;  %v11249_v57 = vpop.permute.xlu0 %1507 }
 0x224   :  { %15860 = vst [vmem:[#allocation67_spill] sm:$0xff] %v11249_v57  ;;  %1811 = vrot.lane.b32.xlu1 %v1022_v52, %s10431_s1 }
 0x225   :  { %1813 = vrot.lane.b32.xlu0 %v1024_v54, %s10431_s1 }
 0x226   :  { %v11253_v55 = vpop.permute.xlu1 %1509 }
 0x227   :  { %15861 = vst [vmem:[#allocation68_spill] sm:$0xff] %v11253_v55  ;;  %v11255_v58 = vpop.permute.xlu0 %1511  ;;  %v1030_v63 = vpop.f32.mrb[156].mxu0 }
 0x228   :  { %15862 = vst [vmem:[#allocation69_spill] sm:$0xff] %v11255_v58  ;;  %1815 = vrot.lane.b32.xlu1 %v1026_v2, %s10431_s1  ;;  %v1032_v8 = vpop.f32.mrb[157].mxu0 }
 0x229   :  { %1817 = vrot.lane.b32.xlu0 %v1030_v63, %s10431_s1  ;;  %v1034_v5 = vpop.f32.mrb[158].mxu0 }
 0x22a   :  { %v11259_v56 = vpop.permute.xlu1 %1513  ;;  %v1036_v61 = vpop.f32.mrb[159].mxu0 }
 0x22b   :  { %15863 = vst [vmem:[#allocation70_spill] sm:$0xff] %v11259_v56  ;;  %v11261_v53 = vpop.permute.xlu0 %1515 }
 0x22c   :  { %15864 = vst [vmem:[#allocation71_spill] sm:$0xff] %v11261_v53  ;;  %1819 = vrot.lane.b32.xlu1 %v1032_v8, %s10431_s1 }
 0x22d   :  { %1821 = vrot.lane.b32.xlu0 %v1034_v5, %s10431_s1 }
 0x22e   :  { %v11265_v52 = vpop.permute.xlu1 %1517 }
 0x22f   :  { %15865 = vst [vmem:[#allocation72_spill] sm:$0xff] %v11265_v52  ;;  %v11267_v54 = vpop.permute.xlu0 %1519  ;;  %v1040_v58 = vpop.f32.mrb[160].mxu0 }
 0x230   :  { %15866 = vst [vmem:[#allocation73_spill] sm:$0xff] %v11267_v54  ;;  %1823 = vrot.lane.b32.xlu1 %v1036_v61, %s10431_s1  ;;  %v1042_v2 = vpop.f32.mrb[161].mxu0 }
 0x231   :  { %1825 = vrot.lane.b32.xlu0 %v1040_v58, %s10431_s1  ;;  %v1044_v63 = vpop.f32.mrb[162].mxu0 }
 0x232   :  { %v11271_v57 = vpop.permute.xlu1 %1521  ;;  %v1046_v56 = vpop.f32.mrb[163].mxu0 }
 0x233   :  { %15867 = vst [vmem:[#allocation74_spill] sm:$0xff] %v11271_v57  ;;  %v11273_v55 = vpop.permute.xlu0 %1523 }
 0x234   :  { %15868 = vst [vmem:[#allocation75_spill] sm:$0xff] %v11273_v55  ;;  %1827 = vrot.lane.b32.xlu1 %v1042_v2, %s10431_s1 }
 0x235   :  { %1829 = vrot.lane.b32.xlu0 %v1044_v63, %s10431_s1 }
 0x236   :  { %v11277_v8 = vpop.permute.xlu1 %1525 }
 0x237   :  { %15869 = vst [vmem:[#allocation76_spill] sm:$0xff] %v11277_v8  ;;  %v11279_v5 = vpop.permute.xlu0 %1527  ;;  %v1050_v54 = vpop.f32.mrb[164].mxu0 }
 0x238   :  { %15870 = vst [vmem:[#allocation77_spill] sm:$0xff] %v11279_v5  ;;  %1831 = vrot.lane.b32.xlu1 %v1046_v56, %s10431_s1  ;;  %v1052_v61 = vpop.f32.mrb[165].mxu0 }
 0x239   :  { %1833 = vrot.lane.b32.xlu0 %v1050_v54, %s10431_s1  ;;  %v1054_v58 = vpop.f32.mrb[166].mxu0 }
 0x23a   :  { %v11283_v53 = vpop.permute.xlu1 %1529  ;;  %v1056_v57 = vpop.f32.mrb[167].mxu0 }
 0x23b   :  { %15871 = vst [vmem:[#allocation78_spill] sm:$0xff] %v11283_v53  ;;  %v11285_v52 = vpop.permute.xlu0 %1531 }
 0x23c   :  { %15872 = vst [vmem:[#allocation79_spill] sm:$0xff] %v11285_v52  ;;  %1835 = vrot.lane.b32.xlu1 %v1052_v61, %s10431_s1 }
 0x23d   :  { %1837 = vrot.lane.b32.xlu0 %v1054_v58, %s10431_s1 }
 0x23e   :  { %v11289_v2 = vpop.permute.xlu1 %1533 }
 0x23f   :  { %15873 = vst [vmem:[#allocation80_spill] sm:$0xff] %v11289_v2  ;;  %v11291_v63 = vpop.permute.xlu0 %1535  ;;  %v1060_v5 = vpop.f32.mrb[168].mxu0 }
 0x240   :  { %15874 = vst [vmem:[#allocation81_spill] sm:$0xff] %v11291_v63  ;;  %1839 = vrot.lane.b32.xlu1 %v1056_v57, %s10431_s1  ;;  %v1062_v56 = vpop.f32.mrb[169].mxu0 }
 0x241   :  { %2031 = vrot.lane.b32.xlu0 %v1060_v5, %s10432_s28  ;;  %v1064_v54 = vpop.f32.mrb[170].mxu0 }
 0x242   :  { %v11295_v53 = vpop.permute.xlu1 %1537  ;;  %v1066_v55 = vpop.f32.mrb[171].mxu0 }
 0x243   :  { %15875 = vst [vmem:[#allocation82_spill] sm:$0xff] %v11295_v53  ;;  %v11297_v52 = vpop.permute.xlu0 %1539 }
 0x244   :  { %15876 = vst [vmem:[#allocation83_spill] sm:$0xff] %v11297_v52  ;;  %2033 = vrot.lane.b32.xlu1 %v1062_v56, %s10432_s28 }
 0x245   :  { %2035 = vrot.lane.b32.xlu0 %v1064_v54, %s10432_s28 }
 0x246   :  { %v11301_v61 = vpop.permute.xlu1 %1541 }
 0x247   :  { %15877 = vst [vmem:[#allocation84_spill] sm:$0xff] %v11301_v61  ;;  %v11303_v58 = vpop.permute.xlu0 %1543  ;;  %v1070_v63 = vpop.f32.mrb[172].mxu0 }
 0x248   :  { %15878 = vst [vmem:[#allocation85_spill] sm:$0xff] %v11303_v58  ;;  %2037 = vrot.lane.b32.xlu1 %v1066_v55, %s10432_s28  ;;  %v1072_v57 = vpop.f32.mrb[173].mxu0 }
 0x249   :  { %2039 = vrot.lane.b32.xlu0 %v1070_v63, %s10432_s28  ;;  %v1074_v5 = vpop.f32.mrb[174].mxu0 }
 0x24a   :  { %v11307_v2 = vpop.permute.xlu1 %1545  ;;  %v1076_v53 = vpop.f32.mrb[175].mxu0 }
 0x24b   :  { %15879 = vst [vmem:[#allocation86_spill] sm:$0xff] %v11307_v2  ;;  %v11309_v8 = vpop.permute.xlu0 %1547 }
 0x24c   :  { %15880 = vst [vmem:[#allocation87_spill] sm:$0xff] %v11309_v8  ;;  %2041 = vrot.lane.b32.xlu1 %v1072_v57, %s10432_s28 }
 0x24d   :  { %2043 = vrot.lane.b32.xlu0 %v1074_v5, %s10432_s28 }
 0x24e   :  { %v11313_v56 = vpop.permute.xlu1 %1549 }
 0x24f   :  { %15881 = vst [vmem:[#allocation88_spill] sm:$0xff] %v11313_v56  ;;  %v11315_v54 = vpop.permute.xlu0 %1551  ;;  %v1080_v58 = vpop.f32.mrb[176].mxu0 }
 0x250   :  { %15882 = vst [vmem:[#allocation89_spill] sm:$0xff] %v11315_v54  ;;  %2045 = vrot.lane.b32.xlu1 %v1076_v53, %s10432_s28  ;;  %v1082_v55 = vpop.f32.mrb[177].mxu0 }
 0x251   :  { %2047 = vrot.lane.b32.xlu0 %v1080_v58, %s10432_s28  ;;  %v1084_v63 = vpop.f32.mrb[178].mxu0 }
 0x252   :  { %v11319_v52 = vpop.permute.xlu1 %1553  ;;  %v1086_v2 = vpop.f32.mrb[179].mxu0 }
 0x253   :  { %15883 = vst [vmem:[#allocation90_spill] sm:$0xff] %v11319_v52  ;;  %v11321_v61 = vpop.permute.xlu0 %1555 }
 0x254   :  { %15884 = vst [vmem:[#allocation91_spill] sm:$0xff] %v11321_v61  ;;  %2049 = vrot.lane.b32.xlu1 %v1082_v55, %s10432_s28 }
 0x255   :  { %2051 = vrot.lane.b32.xlu0 %v1084_v63, %s10432_s28 }
 0x256   :  { %v11325_v57 = vpop.permute.xlu1 %1557 }
 0x257   :  { %15885 = vst [vmem:[#allocation92_spill] sm:$0xff] %v11325_v57  ;;  %v11327_v5 = vpop.permute.xlu0 %1559  ;;  %v1090_v54 = vpop.f32.mrb[180].mxu0 }
 0x258   :  { %15886 = vst [vmem:[#allocation93_spill] sm:$0xff] %v11327_v5  ;;  %2053 = vrot.lane.b32.xlu1 %v1086_v2, %s10432_s28  ;;  %v1092_v53 = vpop.f32.mrb[181].mxu0 }
 0x259   :  { %2055 = vrot.lane.b32.xlu0 %v1090_v54, %s10432_s28  ;;  %v1094_v58 = vpop.f32.mrb[182].mxu0 }
 0x25a   :  { %v11331_v8 = vpop.permute.xlu1 %1561  ;;  %v1096_v52 = vpop.f32.mrb[183].mxu0 }
 0x25b   :  { %15887 = vst [vmem:[#allocation94_spill] sm:$0xff] %v11331_v8  ;;  %v11333_v56 = vpop.permute.xlu0 %1563 }
 0x25c   :  { %15888 = vst [vmem:[#allocation95_spill] sm:$0xff] %v11333_v56  ;;  %2057 = vrot.lane.b32.xlu1 %v1092_v53, %s10432_s28 }
 0x25d   :  { %2059 = vrot.lane.b32.xlu0 %v1094_v58, %s10432_s28 }
 0x25e   :  { %v11337_v55 = vpop.permute.xlu1 %1565 }
 0x25f   :  { %15889 = vst [vmem:[#allocation96_spill] sm:$0xff] %v11337_v55  ;;  %v11339_v63 = vpop.permute.xlu0 %1757  ;;  %v1100_v5 = vpop.f32.mrb[184].mxu0 }
 0x260   :  { %15890 = vst [vmem:[#allocation97_spill] sm:$0xff] %v11339_v63  ;;  %2061 = vrot.lane.b32.xlu1 %v1096_v52, %s10432_s28  ;;  %v1102_v2 = vpop.f32.mrb[185].mxu0 }
 0x261   :  { %2063 = vrot.lane.b32.xlu0 %v1100_v5, %s10432_s28  ;;  %v1104_v54 = vpop.f32.mrb[186].mxu0 }
 0x262   :  { %v11343_v61 = vpop.permute.xlu1 %1759  ;;  %v1106_v8 = vpop.f32.mrb[187].mxu0 }
 0x263   :  { %15891 = vst [vmem:[#allocation98_spill] sm:$0xff] %v11343_v61  ;;  %v11345_v57 = vpop.permute.xlu0 %1761 }
 0x264   :  { %15892 = vst [vmem:[#allocation99_spill] sm:$0xff] %v11345_v57  ;;  %2065 = vrot.lane.b32.xlu1 %v1102_v2, %s10432_s28 }
 0x265   :  { %2067 = vrot.lane.b32.xlu0 %v1104_v54, %s10432_s28 }
 0x266   :  { %v11349_v53 = vpop.permute.xlu1 %1763 }
 0x267   :  { %15893 = vst [vmem:[#allocation100_spill] sm:$0xff] %v11349_v53  ;;  %v11351_v58 = vpop.permute.xlu0 %1765  ;;  %v1110_v56 = vpop.f32.mrb[188].mxu0 }
 0x268   :  { %15894 = vst [vmem:[#allocation101_spill] sm:$0xff] %v11351_v58  ;;  %2069 = vrot.lane.b32.xlu1 %v1106_v8, %s10432_s28  ;;  %v1112_v52 = vpop.f32.mrb[189].mxu0 }
 0x269   :  { %2071 = vrot.lane.b32.xlu0 %v1110_v56, %s10432_s28  ;;  %v1114_v5 = vpop.f32.mrb[190].mxu0 }
 0x26a   :  { %v11355_v55 = vpop.permute.xlu1 %1767  ;;  %v1116_v63 = vpop.f32.mrb[191].mxu0 }
 0x26b   :  { %15895 = vst [vmem:[#allocation102_spill] sm:$0xff] %v11355_v55  ;;  %v11357_v61 = vpop.permute.xlu0 %1769 }
 0x26c   :  { %15896 = vst [vmem:[#allocation103_spill] sm:$0xff] %v11357_v61  ;;  %2073 = vrot.lane.b32.xlu1 %v1112_v52, %s10432_s28 }
 0x26d   :  { %2075 = vrot.lane.b32.xlu0 %v1114_v5, %s10432_s28 }
 0x26e   :  { %v11361_v2 = vpop.permute.xlu1 %1771 }
 0x26f   :  { %15897 = vst [vmem:[#allocation104_spill] sm:$0xff] %v11361_v2  ;;  %v11363_v54 = vpop.permute.xlu0 %1773  ;;  %v1120_v58 = vpop.f32.mrb[192].mxu0 }
 0x270   :  { %15898 = vst [vmem:[#allocation105_spill] sm:$0xff] %v11363_v54  ;;  %2077 = vrot.lane.b32.xlu1 %v1116_v63, %s10432_s28  ;;  %v1122_v8 = vpop.f32.mrb[193].mxu0 }
 0x271   :  { %2079 = vrot.lane.b32.xlu0 %v1120_v58, %s10432_s28  ;;  %v1124_v56 = vpop.f32.mrb[194].mxu0 }
 0x272   :  { %v11367_v57 = vpop.permute.xlu1 %1775  ;;  %v1126_v55 = vpop.f32.mrb[195].mxu0 }
 0x273   :  { %15899 = vst [vmem:[#allocation106_spill] sm:$0xff] %v11367_v57  ;;  %v11369_v53 = vpop.permute.xlu0 %1777 }
 0x274   :  { %15900 = vst [vmem:[#allocation107_spill] sm:$0xff] %v11369_v53  ;;  %2081 = vrot.lane.b32.xlu1 %v1122_v8, %s10432_s28 }
 0x275   :  { %2083 = vrot.lane.b32.xlu0 %v1124_v56, %s10432_s28 }
 0x276   :  { %v11373_v52 = vpop.permute.xlu1 %1779 }
 0x277   :  { %15901 = vst [vmem:[#allocation108_spill] sm:$0xff] %v11373_v52  ;;  %v11375_v5 = vpop.permute.xlu0 %1781  ;;  %v1130_v54 = vpop.f32.mrb[196].mxu0 }
 0x278   :  { %15902 = vst [vmem:[#allocation109_spill] sm:$0xff] %v11375_v5  ;;  %2085 = vrot.lane.b32.xlu1 %v1126_v55, %s10432_s28  ;;  %v1132_v63 = vpop.f32.mrb[197].mxu0 }
 0x279   :  { %2087 = vrot.lane.b32.xlu0 %v1130_v54, %s10432_s28  ;;  %v1134_v58 = vpop.f32.mrb[198].mxu0 }
 0x27a   :  { %v11379_v61 = vpop.permute.xlu1 %1783  ;;  %v1136_v57 = vpop.f32.mrb[199].mxu0 }
 0x27b   :  { %15903 = vst [vmem:[#allocation110_spill] sm:$0xff] %v11379_v61  ;;  %v11381_v2 = vpop.permute.xlu0 %1785 }
 0x27c   :  { %15904 = vst [vmem:[#allocation111_spill] sm:$0xff] %v11381_v2  ;;  %2089 = vrot.lane.b32.xlu1 %v1132_v63, %s10432_s28 }
 0x27d   :  { %2091 = vrot.lane.b32.xlu0 %v1134_v58, %s10432_s28 }
 0x27e   :  { %v11385_v8 = vpop.permute.xlu1 %1787 }
 0x27f   :  { %15905 = vst [vmem:[#allocation112_spill] sm:$0xff] %v11385_v8  ;;  %v11387_v56 = vpop.permute.xlu0 %1789  ;;  %v1140_v5 = vpop.f32.mrb[200].mxu0 }
 0x280   :  { %15906 = vst [vmem:[#allocation113_spill] sm:$0xff] %v11387_v56  ;;  %2093 = vrot.lane.b32.xlu1 %v1136_v57, %s10432_s28  ;;  %v1142_v55 = vpop.f32.mrb[201].mxu0 }
 0x281   :  { %2095 = vrot.lane.b32.xlu0 %v1140_v5, %s10432_s28  ;;  %v1144_v54 = vpop.f32.mrb[202].mxu0 }
 0x282   :  { %v11391_v53 = vpop.permute.xlu1 %1791  ;;  %v1146_v61 = vpop.f32.mrb[203].mxu0 }
 0x283   :  { %15907 = vst [vmem:[#allocation114_spill] sm:$0xff] %v11391_v53  ;;  %v11393_v52 = vpop.permute.xlu0 %1793 }
 0x284   :  { %15908 = vst [vmem:[#allocation115_spill] sm:$0xff] %v11393_v52  ;;  %2097 = vrot.lane.b32.xlu1 %v1142_v55, %s10432_s28 }
 0x285   :  { %2099 = vrot.lane.b32.xlu0 %v1144_v54, %s10432_s28 }
 0x286   :  { %v11397_v63 = vpop.permute.xlu1 %1795 }
 0x287   :  { %15909 = vst [vmem:[#allocation116_spill] sm:$0xff] %v11397_v63  ;;  %v11399_v58 = vpop.permute.xlu0 %1797  ;;  %v1150_v56 = vpop.f32.mrb[204].mxu0 }
 0x288   :  { %15910 = vst [vmem:[#allocation117_spill] sm:$0xff] %v11399_v58  ;;  %2101 = vrot.lane.b32.xlu1 %v1146_v61, %s10432_s28  ;;  %v1152_v57 = vpop.f32.mrb[205].mxu0 }
 0x289   :  { %2103 = vrot.lane.b32.xlu0 %v1150_v56, %s10432_s28  ;;  %v1154_v5 = vpop.f32.mrb[206].mxu0 }
 0x28a   :  { %v11403_v2 = vpop.permute.xlu1 %1799  ;;  %v1156_v53 = vpop.f32.mrb[207].mxu0 }
 0x28b   :  { %15911 = vst [vmem:[#allocation118_spill] sm:$0xff] %v11403_v2  ;;  %v11405_v8 = vpop.permute.xlu0 %1801 }
 0x28c   :  { %2105 = vrot.lane.b32.xlu1 %v1152_v57, %s10432_s28 }
 0x28d   :  { %2107 = vrot.lane.b32.xlu0 %v1154_v5, %s10432_s28 }
 0x28e   :  { %v11409_v55 = vpop.permute.xlu1 %1803 }
 0x28f   :  { %v11411_v54 = vpop.permute.xlu0 %1805  ;;  %v1160_v58 = vpop.f32.mrb[208].mxu0 }
 0x290   :  { %2109 = vrot.lane.b32.xlu1 %v1156_v53, %s10432_s28  ;;  %v1162_v61 = vpop.f32.mrb[209].mxu0  ;;  %v1294_v53 = vsel %vm1293_vm1, %v11078_v49, %v11085_v21 }
 0x291   :  { %v1164_v52 = vpop.f32.mrb[210].mxu0  ;;  %2111 = vrot.lane.b32.xlu0 %v1160_v58, %s10432_s28 }
 0x292   :  { %v11415_v56 = vpop.permute.xlu1 %1807  ;;  %v1165_v2 = vpop.f32.mrb[211].mxu0  ;;  %v1378_v52 = vsel %vm1293_vm1, %v11085_v21, %v11078_v49  ;;  %v1296_v21 = vsel %vm1293_vm1, %v11097_v3, %v11103_v15  ;;  %v1380_v49 = vsel %vm1293_vm1, %v11103_v15, %v11097_v3  ;;  %v1383_v15 = vsel %vm1293_vm1, %v11121_v19, %v11117_v17 }
 0x293   :  { %v11417_v63 = vpop.permute.xlu0 %1809  ;;  %v1295_v2 = vsel %vm1293_vm1, %v11092_v24, %v11099_v39 }
 0x294   :  { %15912 = vst [vmem:[#allocation119_spill] sm:$0xff] %v11417_v63  ;;  %2113 = vrot.lane.b32.xlu1 %v1162_v61, %s10432_s28  ;;  %v11436_v61 = vadd.f32 %v1294_v53, %v10775_v22  ;;  %v1297_v22 = vsel %vm1293_vm1, %v11105_v13, %v11109_v59  ;;  %v11456_v53 = vadd.f32 %v1295_v2, %v10782_v25 }
 0x295   :  { %v1299_v25 = vsel %vm1293_vm1, %v11117_v17, %v11121_v19 }
 0x296   :  { %v11420_v57 = vpop.permute.xlu1 %1811 }
 0x297   :  { %15913 = vst [vmem:[#allocation120_spill] sm:$0xff] %v11420_v57  ;;  %v11422_v5 = vpop.permute.xlu0 %1813  ;;  %v11444_v57 = vadd.f32 %v1378_v52, %v10777_v23  ;;  %v1381_v23 = vsel %vm1293_vm1, %v11109_v59, %v11105_v13  ;;  %v1300_v13 = vsel %vm1293_vm1, %v11123_v10, %v11127_v11  ;;  %v11482_v52 = vadd.f32 %v1296_v21, %v10788_v27 }
 0x298   :  { %15914 = vst [vmem:[#allocation121_spill] sm:$0xff] %v11422_v5  ;;  %v1379_v5 = vsel %vm1293_vm1, %v11099_v39, %v11092_v24  ;;  %v1298_v24 = vsel %vm1293_vm1, %v11111_v20, %v11115_v34  ;;  %v1382_v39 = vsel %vm1293_vm1, %v11115_v34, %v11111_v20  ;;  %v11488_v34 = vadd.f32 %v1297_v22, %v10795_v30  ;;  %v15921_v22 = vld [vmem:[#allocation3_spill] sm:$0xff] }
 0x299   :  { %v11468_v3 = vadd.f32 %v1379_v5, %v10784_v26  ;;  %v11485_v26 = vadd.f32 %v1380_v49, %v10790_v28  ;;  %v1384_v20 = vsel %vm1293_vm1, %v11127_v11, %v11123_v10  ;;  %v11496_v19 = vadd.f32 %v1381_v23, %v10797_v31 }
 0x29a   :  { %v11433_v58 = vpop.permute.xlu1 %1815  ;;  %v11499_v5 = vadd.f32 %v1298_v24, %v10801_v32  ;;  %v11502_v27 = vadd.f32 %v1382_v39, %v10803_v33  ;;  %v1301_v28 = vsel %vm1293_vm1, %v11129_v44, %v11133_v12  ;;  %v11508_v30 = vadd.f32 %v1299_v25, %v10808_v35  ;;  %v15922_v24 = vld [vmem:[#allocation42_spill] sm:$0xff]  ;;  %v15923_v39 = vld [vmem:[#allocation41_spill] sm:$0xff]  ;;  %v15924_v25 = vld [vmem:[#allocation44_spill] sm:$0xff] }
 0x29b   :  { %v11441_v63 = vpop.permute.xlu0 %1817  ;;  %v11511_v11 = vadd.f32 %v1383_v15, %v10810_v36  ;;  %v11514_v10 = vadd.f32 %v1300_v13, %v10814_v37  ;;  %v1385_v31 = vsel %vm1293_vm1, %v11133_v12, %v11129_v44  ;;  %v11520_v32 = vadd.f32 %v1384_v20, %v10816_v38  ;;  %v15925_v15 = vld [vmem:[#allocation43_spill] sm:$0xff]  ;;  %v15926_v20 = vld [vmem:[#allocation4_spill] sm:$0xff] }
 0x29c   :  { %v1302_v33 = vsel %vm1293_vm1, %v11135_v14, %v11139_v9  ;;  %v1386_v35 = vsel %vm1293_vm1, %v11139_v9, %v11135_v14  ;;  %v1303_v36 = vsel %vm1293_vm1, %v11141_v7, %v11145_v18  ;;  %v11534_v2 = vadd.f32 %v1301_v28, %v10821_v40  ;;  %v15927_v28 = vld [vmem:[#allocation46_spill] sm:$0xff] }
 0x29d   :  { %v1387_v38 = vsel %vm1293_vm1, %v11145_v18, %v11141_v7  ;;  %v1304_v44 = vsel %vm1293_vm1, %v11147_v6, %v11151_v4  ;;  %v1388_v9 = vsel %vm1293_vm1, %v11151_v4, %v11147_v6  ;;  %v11548_v14 = vadd.f32 %v1385_v31, %v10823_v41  ;;  %v15928_v31 = vld [vmem:[#allocation45_spill] sm:$0xff] }
 0x29e   :  { %v11479_v59 = vpop.permute.xlu1 %1819  ;;  %v1305_v40 = vsel %vm1293_vm1, %v11153_v1, %v11157_v29  ;;  %v1389_v7 = vsel %vm1293_vm1, %v11157_v29, %v11153_v1  ;;  %v1306_v18 = vsel %vm1293_vm1, %v11159_v16, %v11163_v62  ;;  %v11560_v4 = vadd.f32 %v1302_v33, %v10827_v42 }
 0x29f   :  { %v11493_v17 = vpop.permute.xlu0 %1821  ;;  %v11563_v6 = vadd.f32 %v1386_v35, %v10829_v43  ;;  %v11566_v41 = vadd.f32 %v1303_v36, %v10834_v45  ;;  %v1390_v21 = vsel %vm1293_vm1, %v11163_v62, %v11159_v16  ;;  %v11572_v49 = vadd.f32 %v1387_v38, %v10836_v46  ;;  %v15919_v46 = vld [vmem:[#allocation2_spill] sm:$0xff]  ;;  %v15929_v36 = vld [vmem:[#allocation5_spill] sm:$0xff] }
 0x2a0   :  { %15915 = vst [vmem:[#allocation122_spill] sm:$0xff] %v11493_v17  ;;  %v11575_v1 = vadd.f32 %v1304_v44, %v10840_v47  ;;  %v11578_v29 = vadd.f32 %v1388_v9, %v10842_v48  ;;  %v1307_v42 = vsel %vm1293_vm1, %v11165_v60, %v11169_v0  ;;  %v11586_v45 = vadd.f32 %v1305_v40, %v10847_v50  ;;  %v15930_v44 = vld [vmem:[#allocation48_spill] sm:$0xff]  ;;  %v15931_v9 = vld [vmem:[#allocation47_spill] sm:$0xff] }
 0x2a1   :  { %v11589_v62 = vadd.f32 %v1389_v7, %v10849_v51  ;;  %v11592_v16 = vadd.f32 %v1306_v18, %v15919_v46  ;;  %v1391_v47 = vsel %vm1293_vm1, %v11169_v0, %v11165_v60  ;;  %v11600_v23 = vadd.f32 %v1390_v21, %v15921_v22  ;;  %v15932_v18 = vld [vmem:[#allocation50_spill] sm:$0xff]  ;;  %v15933_v21 = vld [vmem:[#allocation49_spill] sm:$0xff] }
 0x2a2   :  { %v11531_v37 = vpop.permute.xlu1 %1823  ;;  %v1308_v50 = vsel %vm1293_vm1, %v15923_v39, %v15922_v24  ;;  %v1392_v51 = vsel %vm1293_vm1, %v15922_v24, %v15923_v39  ;;  %v1309_v13 = vsel %vm1293_vm1, %v15925_v15, %v15924_v25  ;;  %v11612_v60 = vadd.f32 %v1307_v42, %v15926_v20  ;;  %v15935_v22 = vld [vmem:[#allocation6_spill] sm:$0xff]  ;;  %v15936_v39 = vld [vmem:[#allocation7_spill] sm:$0xff] }
 0x2a3   :  { %15916 = vst [vmem:[#allocation123_spill] sm:$0xff] %v11531_v37  ;;  %v11545_v12 = vpop.permute.xlu0 %1825  ;;  %v1393_v0 = vsel %vm1293_vm1, %v15924_v25, %v15925_v15  ;;  %v1310_v33 = vsel %vm1293_vm1, %v15928_v31, %v15927_v28  ;;  %v1394_v35 = vsel %vm1293_vm1, %v15927_v28, %v15928_v31  ;;  %v11624_v38 = vadd.f32 %v1391_v47, %v15929_v36  ;;  %v15937_v25 = vld [vmem:[#allocation8_spill] sm:$0xff]  ;;  %v15939_v31 = vld [vmem:[#allocation9_spill] sm:$0xff] }
 0x2a4   :  { %15917 = vst [vmem:[#allocation124_spill] sm:$0xff] %v11545_v12  ;;  %v1311_v40 = vsel %vm1293_vm1, %v15931_v9, %v15930_v44  ;;  %v1395_v7 = vsel %vm1293_vm1, %v15930_v44, %v15931_v9  ;;  %v1312_v42 = vsel %vm1293_vm1, %v15933_v21, %v15932_v18  ;;  %v11638_v24 = vadd.f32 %v1308_v50, %v15935_v22  ;;  %v15940_v44 = vld [vmem:[#allocation10_spill] sm:$0xff]  ;;  %v15941_v50 = vld [vmem:[#allocation11_spill] sm:$0xff]  ;;  %v15953_v12 = vld [vmem:[#allocation56_spill] sm:$0xff] }
 0x2a5   :  { %v11641_v47 = vadd.f32 %v1392_v51, %v15936_v39  ;;  %v11644_v15 = vadd.f32 %v1309_v13, %v15937_v25  ;;  %v1396_v20 = vsel %vm1293_vm1, %v15932_v18, %v15933_v21  ;;  %v11652_v36 = vadd.f32 %v1393_v0, %v15939_v31  ;;  %v15942_v51 = vld [vmem:[#allocation52_spill] sm:$0xff]  ;;  %v15943_v39 = vld [vmem:[#allocation51_spill] sm:$0xff]  ;;  %v15947_v21 = vld [vmem:[#allocation14_spill] sm:$0xff] }
 0x2a6   :  { %v11583_v43 = vpop.permute.xlu1 %1827  ;;  %v11655_v9 = vadd.f32 %v1310_v33, %v15940_v44  ;;  %v11658_v22 = vadd.f32 %v1394_v35, %v15941_v50  ;;  %v1313_v13 = vsel %vm1293_vm1, %v15943_v39, %v15942_v51  ;;  %v15944_v25 = vld [vmem:[#allocation12_spill] sm:$0xff]  ;;  %v1397_v0 = vsel %vm1293_vm1, %v15942_v51, %v15943_v39  ;;  %v15949_v33 = vld [vmem:[#allocation15_spill] sm:$0xff]  ;;  %v15951_v31 = vld [vmem:[#allocation54_spill] sm:$0xff] }
 0x2a7   :  { %15918 = vst [vmem:[#allocation125_spill] sm:$0xff] %v11583_v43  ;;  %v11597_v48 = vpop.permute.xlu0 %1829  ;;  %v11676_v35 = vadd.f32 %v1396_v20, %v15949_v33  ;;  %v15952_v44 = vld [vmem:[#allocation53_spill] sm:$0xff]  ;;  %v15958_v51 = vld [vmem:[#allocation58_spill] sm:$0xff] }
 0x2a8   :  { %15920 = vst [vmem:[#allocation2_spill] sm:$0xff] %v11597_v48  ;;  %v11664_v48 = vadd.f32 %v1311_v40, %v15944_v25  ;;  %v1314_v50 = vsel %vm1293_vm1, %v15952_v44, %v15951_v31  ;;  %v15954_v40 = vld [vmem:[#allocation55_spill] sm:$0xff]  ;;  %v15959_v20 = vld [vmem:[#allocation57_spill] sm:$0xff] }
 0x2a9   :  { %15950 = vst [vmem:[#allocation43_spill] sm:$0xff] %v11676_v35  ;;  %v1568_v25 = vsel %vm1567_vm2, %v15954_v40, %v15953_v12  ;;  %v1569_v39 = vsel %vm1567_vm2, %v15959_v20, %v15958_v51  ;;  %v1653_v33 = vsel %vm1567_vm2, %v15958_v51, %v15959_v20  ;;  %v15960_v35 = vld [vmem:[#allocation60_spill] sm:$0xff]  ;;  %v15967_v51 = vld [vmem:[#allocation61_spill] sm:$0xff] }
 0x2aa   :  { %v11635_v46 = vpop.permute.xlu1 %1831 }
 0x2ab   :  { %15934 = vst [vmem:[#allocation3_spill] sm:$0xff] %v11635_v46  ;;  %v11649_v28 = vpop.permute.xlu0 %1833  ;;  %v15945_v46 = vld [vmem:[#allocation13_spill] sm:$0xff] }
 0x2ac   :  { %15938 = vst [vmem:[#allocation42_spill] sm:$0xff] %v11649_v28  ;;  %v11667_v18 = vadd.f32 %v1395_v7, %v15945_v46  ;;  %v11670_v28 = vadd.f32 %v1312_v42, %v15947_v21  ;;  %v1652_v7 = vsel %vm1567_vm2, %v15953_v12, %v15954_v40  ;;  %v15956_v46 = vld [vmem:[#allocation16_spill] sm:$0xff]  ;;  %v15963_v12 = vld [vmem:[#allocation17_spill] sm:$0xff] }
 0x2ad   :  { %v11690_v21 = vadd.f32 %v1313_v13, %v15956_v46  ;;  %v11704_v40 = vadd.f32 %v1397_v0, %v15963_v12  ;;  %v11709_v13 = vsel %vm1293_vm1, %v15951_v31, %v15952_v44  ;;  %v1674_v0 = vadd.f32 %v1652_v7, %v11444_v57  ;;  %v15974_v7 = vld [vmem:[#allocation97_spill] sm:$0xff] }
 0x2ae   :  { %15946 = vst [vmem:[#allocation41_spill] sm:$0xff] %v11667_v18  ;;  %15948 = vst [vmem:[#allocation44_spill] sm:$0xff] %v11670_v28  ;;  %v11687_v42 = vpop.permute.xlu1 %1835  ;;  %v15961_v28 = vld [vmem:[#allocation59_spill] sm:$0xff]  ;;  %v1675_v44 = vadd.f32 %v1569_v39, %v11456_v53  ;;  %v1676_v12 = vadd.f32 %v1653_v33, %v11468_v3 }
 0x2af   :  { %15955 = vst [vmem:[#allocation4_spill] sm:$0xff] %v11687_v42  ;;  %15957 = vst [vmem:[#allocation46_spill] sm:$0xff] %v11690_v21  ;;  %v1570_v43 = vsel %vm1567_vm2, %v15961_v28, %v15960_v35  ;;  %v11701_v18 = vpop.permute.xlu0 %1837  ;;  %v1654_v46 = vsel %vm1567_vm2, %v15960_v35, %v15961_v28  ;;  %v15966_v42 = vld [vmem:[#allocation62_spill] sm:$0xff]  ;;  %v15970_v35 = vld [vmem:[#allocation64_spill] sm:$0xff] }
 0x2b0   :  { %15962 = vst [vmem:[#allocation45_spill] sm:$0xff] %v11701_v18  ;;  %15964 = vst [vmem:[#allocation5_spill] sm:$0xff] %v11704_v40  ;;  %v1571_v20 = vsel %vm1567_vm2, %v15967_v51, %v15966_v42  ;;  %v15968_v21 = vld [vmem:[#allocation18_spill] sm:$0xff]  ;;  %v1673_v18 = vadd.f32 %v1568_v25, %v11436_v61  ;;  %v1655_v31 = vsel %vm1567_vm2, %v15966_v42, %v15967_v51  ;;  %v15978_v51 = vld [vmem:[#allocation67_spill] sm:$0xff] }
 0x2b1   :  { %15965 = vst [vmem:[#allocation48_spill] sm:$0xff] %v11709_v13  ;;  %v11718_v17 = vadd.f32 %v1314_v50, %v15968_v21  ;;  %v1677_v28 = vadd.f32 %v1570_v43, %v11482_v52  ;;  %v15971_v13 = vld [vmem:[#allocation63_spill] sm:$0xff]  ;;  %v1678_v61 = vadd.f32 %v1654_v46, %v11485_v26  ;;  %v11735_v57 = vadd.f32 %v1571_v20, %v11488_v34  ;;  %v15973_v25 = vld [vmem:[#allocation98_spill] sm:$0xff]  ;;  %v15976_v26 = vld [vmem:[#allocation65_spill] sm:$0xff] }
 0x2b2   :  { %v1572_v40 = vsel %vm1567_vm2, %v15971_v13, %v15970_v35  ;;  %v11731_v50 = vpop.permute.xlu1 %1839  ;;  %v1842_v42 = vsel %vm1841_vm3, %v15974_v7, %v15973_v25  ;;  %v1926_v53 = vsel %vm1841_vm3, %v15973_v25, %v15974_v7  ;;  %v1680_v52 = vadd.f32 %v1655_v31, %v11496_v19  ;;  %v15975_v21 = vld [vmem:[#allocation66_spill] sm:$0xff]  ;;  %v15977_v46 = vld [vmem:[#allocation68_spill] sm:$0xff]  ;;  %v15980_v25 = vld [vmem:[#allocation99_spill] sm:$0xff] }
 0x2b3   :  { %15969 = vst [vmem:[#allocation47_spill] sm:$0xff] %v11718_v17  ;;  %15972 = vst [vmem:[#allocation50_spill] sm:$0xff] %v11731_v50  ;;  %v2032_v3 = vpop.permute.xlu0 %2031  ;;  %v1656_v43 = vsel %vm1567_vm2, %v15970_v35, %v15971_v13  ;;  %v1573_v34 = vsel %vm1567_vm2, %v15976_v26, %v15975_v21  ;;  %v11751_v39 = vadd.f32 %v1572_v40, %v11499_v5  ;;  %v15979_v35 = vld [vmem:[#allocation100_spill] sm:$0xff]  ;;  %v15983_v17 = vld [vmem:[#allocation102_spill] sm:$0xff] }
 0x2b4   :  { %v1657_v33 = vsel %vm1567_vm2, %v15975_v21, %v15976_v26  ;;  %v1574_v19 = vsel %vm1567_vm2, %v15978_v51, %v15977_v46  ;;  %v1658_v13 = vsel %vm1567_vm2, %v15977_v46, %v15978_v51  ;;  %v1947_v20 = vadd.f32 %v1842_v42, %v1673_v18  ;;  %v15982_v46 = vld [vmem:[#allocation69_spill] sm:$0xff] }
 0x2b5   :  { %v1948_v31 = vadd.f32 %v1926_v53, %v1674_v0  ;;  %v1843_v7 = vsel %vm1841_vm3, %v15980_v25, %v15979_v35  ;;  %v1927_v5 = vsel %vm1841_vm3, %v15979_v35, %v15980_v25  ;;  %v11769_v21 = vadd.f32 %v1656_v43, %v11502_v27  ;;  %v15981_v53 = vld [vmem:[#allocation70_spill] sm:$0xff] }
 0x2b6   :  { %v2034_v40 = vpop.permute.xlu1 %2033  ;;  %v11772_v26 = vadd.f32 %v1573_v34, %v11508_v30  ;;  %v11777_v42 = vadd.f32 %v1657_v33, %v11511_v11  ;;  %v1575_v51 = vsel %vm1567_vm2, %v15982_v46, %v15981_v53  ;;  %v11783_v27 = vadd.f32 %v1574_v19, %v11514_v10  ;;  %v15985_v33 = vld [vmem:[#allocation21_spill] sm:$0xff] }
 0x2b7   :  { %v2116_v50 = vsel %vm2115_vm4, %v2032_v3, %v2034_v40  ;;  %v2200_v18 = vsel %vm2115_vm4, %v2034_v40, %v2032_v3  ;;  %v2036_v0 = vpop.permute.xlu0 %2035  ;;  %v11786_v30 = vadd.f32 %v1658_v13, %v11520_v32  ;;  %v1949_v43 = vadd.f32 %v1843_v7, %v1675_v44  ;;  %v15984_v3 = vld [vmem:[#allocation101_spill] sm:$0xff] }
 0x2b8   :  { %v2221_v35 = vadd.f32 %v2116_v50, %v1947_v20  ;;  %v2222_v25 = vadd.f32 %v2200_v18, %v1948_v31  ;;  %v1950_v34 = vadd.f32 %v1927_v5, %v1676_v12  ;;  %v1844_v40 = vsel %vm1841_vm3, %v15984_v3, %v15983_v17  ;;  %v15986_v5 = vld [vmem:[#allocation72_spill] sm:$0xff]  ;;  %v15987_v18 = vld [vmem:[#allocation71_spill] sm:$0xff] }
 0x2b9   :  { %v1928_v11 = vsel %vm1841_vm3, %v15983_v17, %v15984_v3  ;;  %v1659_v32 = vsel %vm1567_vm2, %v15981_v53, %v15982_v46  ;;  %v11804_v44 = vadd.f32 %v1575_v51, %v11534_v2  ;;  %v15988_v46 = vld [vmem:[#allocation104_spill] sm:$0xff]  ;;  %v15989_v2 = vld [vmem:[#allocation103_spill] sm:$0xff] }
 0x2ba   :  { %v11795_v37 = vadd.f32 %v15985_v33, %v2221_v35  ;;  %v11798_v50 = vadd.f32 %v15985_v33, %v2222_v25  ;;  %v2038_v10 = vpop.permute.xlu1 %2037  ;;  %v1576_v35 = vsel %vm1567_vm2, %v15987_v18, %v15986_v5  ;;  %v1951_v25 = vadd.f32 %v1844_v40, %v1677_v28  ;;  %v15990_v3 = vld [vmem:[#allocation20_spill] sm:$0xff] }
 0x2bb   :  { %v2117_v12 = vsel %vm2115_vm4, %v2036_v0, %v2038_v10  ;;  %v2201_v19 = vsel %vm2115_vm4, %v2038_v10, %v2036_v0  ;;  %v2040_v13 = vpop.permute.xlu0 %2039  ;;  %v1952_v53 = vadd.f32 %v1928_v11, %v1678_v61  ;;  %v1845_v51 = vsel %vm1841_vm3, %v15989_v2, %v15988_v46 }
 0x2bc   :  { %v15616_v17 = vmax.f32 %v11795_v37, 0.0  ;;  %v15621_v20 = vmax.f32 %v11798_v50, 0.0  ;;  %v2223_v31 = vadd.f32 %v2117_v12, %v1949_v43  ;;  %v2224_v7 = vadd.f32 %v2201_v19, %v1950_v34 }
 0x2bd   :  { %v1929_v0 = vsel %vm1841_vm3, %v15988_v46, %v15989_v2  ;;  %v11830_v61 = vadd.f32 %v1659_v32, %v11548_v14  ;;  %v1660_v40 = vsel %vm1567_vm2, %v15986_v5, %v15987_v18  ;;  %v11841_v14 = vadd.f32 %v1576_v35, %v11560_v4  ;;  %v15991_v5 = vld [vmem:[#allocation106_spill] sm:$0xff]  ;;  %v15992_v18 = vld [vmem:[#allocation105_spill] sm:$0xff] }
 0x2be   :  { %v11820_v33 = vadd.f32 %v15990_v3, %v2223_v31  ;;  %v11823_v43 = vadd.f32 %v15990_v3, %v2224_v7  ;;  %v2042_v34 = vpop.permute.xlu1 %2041  ;;  %v9818_v28 = vpack.i.bf16 %v15621_v20, %v15616_v17  ;;  %v1953_v32 = vadd.f32 %v1845_v51, %v11735_v57  ;;  %v15995_v35 = vld [vmem:[#allocation73_spill] sm:$0xff]  ;;  %v16003_v20 = vld [vmem:[#allocation24_spill] sm:$0xff] }
 0x2bf   :  { %v2118_v11 = vsel %vm2115_vm4, %v2040_v13, %v2042_v34  ;;  %v2202_v10 = vsel %vm2115_vm4, %v2042_v34, %v2040_v13  ;;  %v2044_v12 = vpop.permute.xlu0 %2043  ;;  %v1954_v2 = vadd.f32 %v1929_v0, %v1680_v52  ;;  %v1846_v3 = vsel %vm1841_vm3, %v15992_v18, %v15991_v5  ;;  %v15993_v34 = vld [vmem:[#allocation22_spill] sm:$0xff] }
 0x2c0   :  { %v15617_v19 = vmax.f32 %v11820_v33, 0.0  ;;  %v15620_v31 = vmax.f32 %v11823_v43, 0.0  ;;  %v2225_v7 = vadd.f32 %v2118_v11, %v1951_v25  ;;  %v2226_v46 = vadd.f32 %v2202_v10, %v1952_v53  ;;  %9819 = vrot.lane.b32.xlu0 %v9818_v28, %s10429_s2  ;;  %v15994_v52 = vld [vmem:[#allocation74_spill] sm:$0xff] }
 0x2c1   :  { %v1930_v13 = vsel %vm1841_vm3, %v15991_v5, %v15992_v18  ;;  %v11861_v57 = vadd.f32 %v1660_v40, %v11563_v6  ;;  %v1577_v51 = vsel %vm1567_vm2, %v15995_v35, %v15994_v52  ;;  %v1661_v6 = vsel %vm1567_vm2, %v15994_v52, %v15995_v35 }
 0x2c2   :  { %v11851_v17 = vadd.f32 %v15993_v34, %v2225_v7  ;;  %v11854_v25 = vadd.f32 %v15993_v34, %v2226_v46  ;;  %v2046_v53 = vpop.permute.xlu1 %2045  ;;  %v9823_v4 = vpack.i.bf16 %v15620_v31, %v15617_v19  ;;  %v1955_v40 = vadd.f32 %v1846_v3, %v11751_v39  ;;  %v15996_v34 = vld [vmem:[#allocation108_spill] sm:$0xff]  ;;  %v15997_v19 = vld [vmem:[#allocation107_spill] sm:$0xff]  ;;  %v16002_v31 = vld [vmem:[#allocation109_spill] sm:$0xff] }
 0x2c3   :  { %v2119_v0 = vsel %vm2115_vm4, %v2044_v12, %v2046_v53  ;;  %v2203_v28 = vsel %vm2115_vm4, %v2046_v53, %v2044_v12  ;;  %v2048_v11 = vpop.permute.xlu0 %2047  ;;  %v1956_v18 = vadd.f32 %v1930_v13, %v11769_v21  ;;  %v1847_v12 = vsel %vm1841_vm3, %v15997_v19, %v15996_v34  ;;  %v15999_v3 = vld [vmem:[#allocation76_spill] sm:$0xff]  ;;  %v16000_v13 = vld [vmem:[#allocation75_spill] sm:$0xff] }
 0x2c4   :  { %v15619_v10 = vmax.f32 %v11851_v17, 0.0  ;;  %v15618_v7 = vmax.f32 %v11854_v25, 0.0  ;;  %v2227_v46 = vadd.f32 %v2119_v0, %v1953_v32  ;;  %v2228_v5 = vadd.f32 %v2203_v28, %v1954_v2  ;;  %9824 = vrot.lane.b32.xlu1 %v9823_v4, %s10429_s2  ;;  %v15998_v32 = vld [vmem:[#allocation23_spill] sm:$0xff] }
 0x2c5   :  { %v1931_v53 = vsel %vm1841_vm3, %v15996_v34, %v15997_v19  ;;  %v11893_v21 = vadd.f32 %v1577_v51, %v11566_v41  ;;  %v1578_v52 = vsel %vm1567_vm2, %v16000_v13, %v15999_v3  ;;  %v11904_v41 = vadd.f32 %v1661_v6, %v11572_v49 }
 0x2c6   :  { %v11883_v2 = vadd.f32 %v15998_v32, %v2227_v46  ;;  %v11886_v4 = vadd.f32 %v15998_v32, %v2228_v5  ;;  %v2050_v0 = vpop.permute.xlu1 %2049  ;;  %v9828_v39 = vpack.i.bf16 %v15618_v7, %v15619_v10  ;;  %v1957_v51 = vadd.f32 %v1847_v12, %v11772_v26  ;;  %v16001_v10 = vld [vmem:[#allocation110_spill] sm:$0xff] }
 0x2c7   :  { %v2120_v19 = vsel %vm2115_vm4, %v2048_v11, %v2050_v0  ;;  %v2204_v35 = vsel %vm2115_vm4, %v2050_v0, %v2048_v11  ;;  %v2052_v28 = vpop.permute.xlu0 %2051  ;;  %v1958_v7 = vadd.f32 %v1931_v53, %v11777_v42  ;;  %v1848_v11 = vsel %vm1841_vm3, %v16002_v31, %v16001_v10 }
 0x2c8   :  { %v15628_v46 = vmax.f32 %v11883_v2, 0.0  ;;  %v15629_v5 = vmax.f32 %v11886_v4, 0.0  ;;  %v2229_v34 = vadd.f32 %v2120_v19, %v1955_v40  ;;  %v2230_v32 = vadd.f32 %v2204_v35, %v1956_v18  ;;  %9829 = vrot.lane.b32.xlu0 %v9828_v39, %s10429_s2  ;;  %v16004_v35 = vld [vmem:[#allocation78_spill] sm:$0xff] }
 0x2c9   :  { %v1932_v0 = vsel %vm1841_vm3, %v16001_v10, %v16002_v31  ;;  %v1662_v42 = vsel %vm1567_vm2, %v15999_v3, %v16000_v13  ;;  %v11928_v6 = vadd.f32 %v1578_v52, %v11575_v1  ;;  %v1959_v1 = vadd.f32 %v1848_v11, %v11783_v27  ;;  %v16006_v52 = vld [vmem:[#allocation112_spill] sm:$0xff] }
 0x2ca   :  { %v11915_v40 = vadd.f32 %v16003_v20, %v2229_v34  ;;  %v11918_v18 = vadd.f32 %v16003_v20, %v2230_v32  ;;  %v2054_v49 = vpop.permute.xlu1 %2053  ;;  %v9833_v26 = vpack.i.bf16 %v15629_v5, %v15628_v46  ;;  %v16005_v34 = vld [vmem:[#allocation77_spill] sm:$0xff]  ;;  %v1960_v13 = vadd.f32 %v1932_v0, %v11786_v30  ;;  %v16007_v32 = vld [vmem:[#allocation111_spill] sm:$0xff] }
 0x2cb   :  { %v2121_v31 = vsel %vm2115_vm4, %v2052_v28, %v2054_v49  ;;  %v2205_v10 = vsel %vm2115_vm4, %v2054_v49, %v2052_v28  ;;  %v2056_v12 = vpop.permute.xlu0 %2055  ;;  %v1579_v3 = vsel %vm1567_vm2, %v16005_v34, %v16004_v35  ;;  %v1849_v28 = vsel %vm1841_vm3, %v16007_v32, %v16006_v52  ;;  %v16020_v46 = vld [vmem:[#allocation117_spill] sm:$0xff] }
 0x2cc   :  { %v15623_v20 = vmax.f32 %v11915_v40, 0.0  ;;  %v15622_v53 = vmax.f32 %v11918_v18, 0.0  ;;  %v2231_v39 = vadd.f32 %v2121_v31, %v1957_v51  ;;  %v2232_v19 = vadd.f32 %v2205_v10, %v1958_v7  ;;  %9834 = vrot.lane.b32.xlu1 %v9833_v26, %s10429_s2  ;;  %v16008_v51 = vld [vmem:[#allocation25_spill] sm:$0xff] }
 0x2cd   :  { %v1933_v49 = vsel %vm1841_vm3, %v16006_v52, %v16007_v32  ;;  %v11957_v30 = vadd.f32 %v1662_v42, %v11578_v29  ;;  %v1663_v11 = vsel %vm1567_vm2, %v16004_v35, %v16005_v34  ;;  %v11968_v29 = vadd.f32 %v1579_v3, %v11586_v45  ;;  %v16009_v34 = vld [vmem:[#allocation114_spill] sm:$0xff]  ;;  %v16012_v3 = vld [vmem:[#allocation80_spill] sm:$0xff] }
 0x2ce   :  { %v11947_v7 = vadd.f32 %v16008_v51, %v2231_v39  ;;  %v11950_v26 = vadd.f32 %v16008_v51, %v2232_v19  ;;  %v2058_v31 = vpop.permute.xlu1 %2057  ;;  %v9838_v27 = vpack.i.bf16 %v15622_v53, %v15623_v20  ;;  %v1961_v42 = vadd.f32 %v1849_v28, %v11804_v44  ;;  %v16010_v53 = vld [vmem:[#allocation113_spill] sm:$0xff]  ;;  %v16011_v20 = vld [vmem:[#allocation26_spill] sm:$0xff]  ;;  %v16013_v28 = vld [vmem:[#allocation79_spill] sm:$0xff] }
 0x2cf   :  { %v2122_v0 = vsel %vm2115_vm4, %v2056_v12, %v2058_v31  ;;  %v2206_v10 = vsel %vm2115_vm4, %v2058_v31, %v2056_v12  ;;  %v2060_v39 = vpop.permute.xlu0 %2059  ;;  %v1962_v35 = vadd.f32 %v1933_v49, %v11830_v61  ;;  %v1850_v12 = vsel %vm1841_vm3, %v16010_v53, %v16009_v34 }
 0x2d0   :  { %v15624_v19 = vmax.f32 %v11947_v7, 0.0  ;;  %v15625_v52 = vmax.f32 %v11950_v26, 0.0  ;;  %v2233_v32 = vadd.f32 %v2122_v0, %v1959_v1  ;;  %v2234_v51 = vadd.f32 %v2206_v10, %v1960_v13  ;;  %9839 = vrot.lane.b32.xlu0 %v9838_v27, %s10429_s2 }
 0x2d1   :  { %v1934_v31 = vsel %vm1841_vm3, %v16009_v34, %v16010_v53  ;;  %v11989_v61 = vadd.f32 %v1663_v11, %v11589_v62  ;;  %v1580_v49 = vsel %vm1567_vm2, %v16013_v28, %v16012_v3  ;;  %v1664_v62 = vsel %vm1567_vm2, %v16012_v3, %v16013_v28 }
 0x2d2   :  { %v11979_v1 = vadd.f32 %v16011_v20, %v2233_v32  ;;  %v11982_v13 = vadd.f32 %v16011_v20, %v2234_v51  ;;  %v2062_v45 = vpop.permute.xlu1 %2061  ;;  %v9843_v44 = vpack.i.bf16 %v15625_v52, %v15624_v19  ;;  %v1963_v11 = vadd.f32 %v1850_v12, %v11841_v14  ;;  %v16014_v19 = vld [vmem:[#allocation116_spill] sm:$0xff]  ;;  %v16015_v52 = vld [vmem:[#allocation115_spill] sm:$0xff]  ;;  %v16017_v12 = vld [vmem:[#allocation82_spill] sm:$0xff] }
 0x2d3   :  { %v2123_v53 = vsel %vm2115_vm4, %v2060_v39, %v2062_v45  ;;  %v2207_v27 = vsel %vm2115_vm4, %v2062_v45, %v2060_v39  ;;  %v2064_v0 = vpop.permute.xlu0 %2063  ;;  %v1964_v34 = vadd.f32 %v1934_v31, %v11861_v57  ;;  %v1851_v39 = vsel %vm1841_vm3, %v16015_v52, %v16014_v19  ;;  %v16018_v31 = vld [vmem:[#allocation81_spill] sm:$0xff] }
 0x2d4   :  { %v15627_v20 = vmax.f32 %v11979_v1, 0.0  ;;  %v15626_v10 = vmax.f32 %v11982_v13, 0.0  ;;  %v2235_v32 = vadd.f32 %v2123_v53, %v1961_v42  ;;  %v2236_v51 = vadd.f32 %v2207_v27, %v1962_v35  ;;  %9844 = vrot.lane.b32.xlu1 %v9843_v44, %s10429_s2  ;;  %v16016_v42 = vld [vmem:[#allocation27_spill] sm:$0xff] }
 0x2d5   :  { %v1935_v45 = vsel %vm1841_vm3, %v16014_v19, %v16015_v52  ;;  %v12021_v57 = vadd.f32 %v1580_v49, %v11592_v16  ;;  %v1581_v3 = vsel %vm1567_vm2, %v16018_v31, %v16017_v12  ;;  %v1698_v16 = vadd.f32 %v1664_v62, %v11600_v23 }
 0x2d6   :  { %v12011_v35 = vadd.f32 %v16016_v42, %v2235_v32  ;;  %v12014_v44 = vadd.f32 %v16016_v42, %v2236_v51  ;;  %v2066_v53 = vpop.permute.xlu1 %2065  ;;  %v9848_v14 = vpack.i.bf16 %v15626_v10, %v15627_v20  ;;  %v1965_v49 = vadd.f32 %v1851_v39, %v11893_v21  ;;  %v16019_v20 = vld [vmem:[#allocation118_spill] sm:$0xff] }
 0x2d7   :  { %v2124_v19 = vsel %vm2115_vm4, %v2064_v0, %v2066_v53  ;;  %v2208_v52 = vsel %vm2115_vm4, %v2066_v53, %v2064_v0  ;;  %v2068_v28 = vpop.permute.xlu0 %2067  ;;  %v1966_v10 = vadd.f32 %v1935_v45, %v11904_v41  ;;  %v1852_v5 = vsel %vm1841_vm3, %v16020_v46, %v16019_v20  ;;  %v16021_v53 = vld [vmem:[#allocation28_spill] sm:$0xff] }
 0x2d8   :  { %v15648_v27 = vmax.f32 %v12011_v35, 0.0  ;;  %v2237_v51 = vadd.f32 %v2124_v19, %v1963_v11  ;;  %v2238_v42 = vadd.f32 %v2208_v52, %v1964_v34  ;;  %9849 = vrot.lane.b32.xlu0 %v9848_v14, %s10429_s2  ;;  %v1936_v0 = vsel %vm1841_vm3, %v16019_v20, %v16020_v46 }
 0x2d9   :  { %v16022_v23 = vmax.f32 %v12014_v44, 0.0  ;;  %v1665_v41 = vsel %vm1567_vm2, %v16017_v12, %v16018_v31  ;;  %v12054_v62 = vadd.f32 %v1581_v3, %v11612_v60  ;;  %v1967_v60 = vadd.f32 %v1852_v5, %v11928_v6 }
 0x2da   :  { %v12041_v32 = vadd.f32 %v16021_v53, %v2237_v51  ;;  %v12044_v11 = vadd.f32 %v16021_v53, %v2238_v42  ;;  %v2070_v34 = vpop.permute.xlu1 %2069  ;;  %v16023_v51 = vld [vmem:[#allocation84_spill] sm:$0xff]  ;;  %v16024_v42 = vld [vmem:[#allocation83_spill] sm:$0xff]  ;;  %v1968_v31 = vadd.f32 %v1936_v0, %v11957_v30  ;;  %v1853_v3 = vsel %vm1841_vm3, %v11405_v8, %v11409_v55 }
 0x2db   :  { %v9853_v21 = vpack.i.bf16 %v16022_v23, %v15648_v27  ;;  %v2125_v46 = vsel %vm2115_vm4, %v2068_v28, %v2070_v34  ;;  %v2209_v20 = vsel %vm2115_vm4, %v2070_v34, %v2068_v28  ;;  %v2072_v39 = vpop.permute.xlu0 %2071  ;;  %v1582_v12 = vsel %vm1567_vm2, %v16024_v42, %v16023_v51 }
 0x2dc   :  { %v15647_v45 = vmax.f32 %v12041_v32, 0.0  ;;  %v15646_v14 = vmax.f32 %v12044_v11, 0.0  ;;  %v2239_v19 = vadd.f32 %v2125_v46, %v1965_v49  ;;  %v2240_v52 = vadd.f32 %v2209_v20, %v1966_v10  ;;  %v16025_v49 = vld [vmem:[#allocation29_spill] sm:$0xff] }
 0x2dd   :  { %9854 = vrot.lane.b32.xlu1 %v9853_v21, %s10429_s2  ;;  %v1937_v28 = vsel %vm1841_vm3, %v11409_v55, %v11405_v8  ;;  %v1700_v6 = vadd.f32 %v1665_v41, %v11624_v38  ;;  %v1666_v30 = vsel %vm1567_vm2, %v16023_v51, %v16024_v42  ;;  %v1969_v38 = vadd.f32 %v1853_v3, %v11968_v29  ;;  %v16026_v51 = vld [vmem:[#allocation30_spill] sm:$0xff] }
 0x2de   :  { %v12073_v10 = vadd.f32 %v16025_v49, %v2239_v19  ;;  %v12076_v53 = vadd.f32 %v16025_v49, %v2240_v52  ;;  %v2074_v34 = vpop.permute.xlu1 %2073  ;;  %v9858_v5 = vpack.i.bf16 %v15646_v14, %v15647_v45  ;;  %v1701_v19 = vadd.f32 %v1582_v12, %v11638_v24  ;;  %v16028_v12 = vld [vmem:[#allocation85_spill] sm:$0xff] }
 0x2df   :  { %v2126_v8 = vsel %vm2115_vm4, %v2072_v39, %v2074_v34  ;;  %v2210_v55 = vsel %vm2115_vm4, %v2074_v34, %v2072_v39  ;;  %v2076_v0 = vpop.permute.xlu0 %2075  ;;  %v1970_v41 = vadd.f32 %v1937_v28, %v11989_v61  ;;  %v1854_v52 = vsel %vm1841_vm3, %v11411_v54, %v11415_v56  ;;  %v16027_v61 = vld [vmem:[#allocation86_spill] sm:$0xff]  ;;  %v16066_v45 = vld [vmem:[#allocation45_spill] sm:$0xff] }
 0x2e0   :  { %v15632_v23 = vmax.f32 %v12073_v10, 0.0  ;;  %v15641_v21 = vmax.f32 %v12076_v53, 0.0  ;;  %v2241_v46 = vadd.f32 %v2126_v8, %v1967_v60  ;;  %v2242_v20 = vadd.f32 %v2210_v55, %v1968_v31  ;;  %9859 = vrot.lane.b32.xlu0 %v9858_v5, %s10429_s2 }
 0x2e1   :  { %v1938_v39 = vsel %vm1841_vm3, %v11415_v56, %v11411_v54  ;;  %v1702_v29 = vadd.f32 %v1666_v30, %v11641_v47  ;;  %v1583_v3 = vsel %vm1567_vm2, %v16028_v12, %v16027_v61  ;;  %v1667_v47 = vsel %vm1567_vm2, %v16027_v61, %v16028_v12 }
 0x2e2   :  { %v12101_v42 = vadd.f32 %v16026_v51, %v2241_v46  ;;  %v12104_v60 = vadd.f32 %v16026_v51, %v2242_v20  ;;  %v2078_v31 = vpop.permute.xlu1 %2077  ;;  %v9863_v24 = vpack.i.bf16 %v15641_v21, %v15632_v23  ;;  %v1971_v30 = vadd.f32 %v1854_v52, %v12021_v57  ;;  %v16029_v46 = vld [vmem:[#allocation120_spill] sm:$0xff]  ;;  %v16030_v20 = vld [vmem:[#allocation119_spill] sm:$0xff] }
 0x2e3   :  { %v2127_v54 = vsel %vm2115_vm4, %v2076_v0, %v2078_v31  ;;  %v2211_v56 = vsel %vm2115_vm4, %v2078_v31, %v2076_v0  ;;  %v2080_v28 = vpop.permute.xlu0 %2079  ;;  %v1972_v55 = vadd.f32 %v1938_v39, %v1698_v16  ;;  %v1855_v0 = vsel %vm1841_vm3, %v16030_v20, %v16029_v46  ;;  %v16031_v31 = vld [vmem:[#allocation31_spill] sm:$0xff]  ;;  %v16032_v52 = vld [vmem:[#allocation88_spill] sm:$0xff] }
 0x2e4   :  { %v15631_v49 = vmax.f32 %v12101_v42, 0.0  ;;  %v15630_v34 = vmax.f32 %v12104_v60, 0.0  ;;  %v2243_v5 = vadd.f32 %v2127_v54, %v1969_v38  ;;  %v2244_v8 = vadd.f32 %v2211_v56, %v1970_v41  ;;  %9864 = vrot.lane.b32.xlu1 %v9863_v24, %s10429_s2  ;;  %v16033_v39 = vld [vmem:[#allocation87_spill] sm:$0xff] }
 0x2e5   :  { %v1939_v51 = vsel %vm1841_vm3, %v16029_v46, %v16030_v20  ;;  %v1703_v16 = vadd.f32 %v1583_v3, %v11644_v15  ;;  %v1584_v61 = vsel %vm1567_vm2, %v16033_v39, %v16032_v52  ;;  %v1973_v15 = vadd.f32 %v1855_v0, %v12054_v62 }
 0x2e6   :  { %v12130_v38 = vadd.f32 %v16031_v31, %v2243_v5  ;;  %v12133_v41 = vadd.f32 %v16031_v31, %v2244_v8  ;;  %v2082_v24 = vpop.permute.xlu1 %2081  ;;  %v9868_v57 = vpack.i.bf16 %v15630_v34, %v15631_v49  ;;  %v1704_v31 = vadd.f32 %v1667_v47, %v11652_v36  ;;  %v16034_v34 = vld [vmem:[#allocation121_spill] sm:$0xff] }
 0x2e7   :  { %v2128_v12 = vsel %vm2115_vm4, %v2080_v28, %v2082_v24  ;;  %v2212_v54 = vsel %vm2115_vm4, %v2082_v24, %v2080_v28  ;;  %v2084_v56 = vpop.permute.xlu0 %2083  ;;  %v1974_v3 = vadd.f32 %v1939_v51, %v1700_v6  ;;  %v1856_v49 = vsel %vm1841_vm3, %v16034_v34, %v11433_v58  ;;  %v16035_v24 = vld [vmem:[#allocation32_spill] sm:$0xff] }
 0x2e8   :  { %v15639_v5 = vmax.f32 %v12130_v38, 0.0  ;;  %v15640_v8 = vmax.f32 %v12133_v41, 0.0  ;;  %v2245_v46 = vadd.f32 %v2128_v12, %v1971_v30  ;;  %v2246_v20 = vadd.f32 %v2212_v54, %v1972_v55  ;;  %9869 = vrot.lane.b32.xlu0 %v9868_v57, %s10429_s2  ;;  %v16036_v54 = vld [vmem:[#allocation90_spill] sm:$0xff] }
 0x2e9   :  { %v1940_v28 = vsel %vm1841_vm3, %v11433_v58, %v16034_v34  ;;  %v1668_v62 = vsel %vm1567_vm2, %v16032_v52, %v16033_v39  ;;  %v1705_v6 = vadd.f32 %v1584_v61, %v11655_v9  ;;  %v1975_v52 = vadd.f32 %v1856_v49, %v1701_v19 }
 0x2ea   :  { %v12157_v23 = vadd.f32 %v16035_v24, %v2245_v46  ;;  %v12160_v30 = vadd.f32 %v16035_v24, %v2246_v20  ;;  %v2086_v55 = vpop.permute.xlu1 %2085  ;;  %v9873_v36 = vpack.i.bf16 %v15640_v8, %v15639_v5  ;;  %v16037_v46 = vld [vmem:[#allocation89_spill] sm:$0xff]  ;;  %v1976_v39 = vadd.f32 %v1940_v28, %v1702_v29  ;;  %v16053_v5 = vld [vmem:[#allocation2_spill] sm:$0xff] }
 0x2eb   :  { %v2129_v58 = vsel %vm2115_vm4, %v2084_v56, %v2086_v55  ;;  %v2213_v34 = vsel %vm2115_vm4, %v2086_v55, %v2084_v56  ;;  %v2088_v47 = vpop.permute.xlu0 %2087  ;;  %v1585_v20 = vsel %vm1567_vm2, %v16037_v46, %v16036_v54  ;;  %v1857_v9 = vsel %vm1841_vm3, %v11441_v63, %v11479_v59  ;;  %v16038_v56 = vld [vmem:[#allocation33_spill] sm:$0xff] }
 0x2ec   :  { %v15636_v0 = vmax.f32 %v12157_v23, 0.0  ;;  %v15635_v51 = vmax.f32 %v12160_v30, 0.0  ;;  %v2247_v57 = vadd.f32 %v2129_v58, %v1973_v15  ;;  %v2248_v12 = vadd.f32 %v2213_v34, %v1974_v3  ;;  %9874 = vrot.lane.b32.xlu1 %v9873_v36, %s10429_s2 }
 0x2ed   :  { %v1941_v61 = vsel %vm1841_vm3, %v11479_v59, %v11441_v63  ;;  %v1706_v29 = vadd.f32 %v1668_v62, %v11658_v22  ;;  %v1669_v49 = vsel %vm1567_vm2, %v16036_v54, %v16037_v46  ;;  %v1977_v22 = vadd.f32 %v1857_v9, %v1703_v16  ;;  %v16041_v46 = vld [vmem:[#allocation34_spill] sm:$0xff]  ;;  %v16042_v16 = vld [vmem:[#allocation41_spill] sm:$0xff]  ;;  %v16044_v9 = vld [vmem:[#allocation91_spill] sm:$0xff] }
 0x2ee   :  { %v12185_v24 = vadd.f32 %v16038_v56, %v2247_v57  ;;  %v12188_v15 = vadd.f32 %v16038_v56, %v2248_v12  ;;  %v2090_v3 = vpop.permute.xlu1 %2089  ;;  %v9878_v19 = vpack.i.bf16 %v15635_v51, %v15636_v0  ;;  %v1707_v57 = vadd.f32 %v1585_v20, %v11664_v48  ;;  %v16039_v12 = vld [vmem:[#allocation123_spill] sm:$0xff]  ;;  %v16040_v56 = vld [vmem:[#allocation122_spill] sm:$0xff]  ;;  %v16043_v20 = vld [vmem:[#allocation92_spill] sm:$0xff] }
 0x2ef   :  { %v2130_v63 = vsel %vm2115_vm4, %v2088_v47, %v2090_v3  ;;  %v2214_v59 = vsel %vm2115_vm4, %v2090_v3, %v2088_v47  ;;  %v2092_v28 = vpop.permute.xlu0 %2091  ;;  %v1978_v62 = vadd.f32 %v1941_v61, %v1704_v31  ;;  %v1858_v54 = vsel %vm1841_vm3, %v16040_v56, %v16039_v12 }
 0x2f0   :  { %v15633_v55 = vmax.f32 %v12185_v24, 0.0  ;;  %v15634_v36 = vmax.f32 %v12188_v15, 0.0  ;;  %v2249_v58 = vadd.f32 %v2130_v63, %v1975_v52  ;;  %v2250_v34 = vadd.f32 %v2214_v59, %v1976_v39  ;;  %9879 = vrot.lane.b32.xlu0 %v9878_v19, %s10429_s2 }
 0x2f1   :  { %v1942_v47 = vsel %vm1841_vm3, %v16039_v12, %v16040_v56  ;;  %v1708_v31 = vadd.f32 %v1669_v49, %v16042_v16  ;;  %v1586_v61 = vsel %vm1567_vm2, %v16044_v9, %v16043_v20  ;;  %v1670_v49 = vsel %vm1567_vm2, %v16043_v20, %v16044_v9 }
 0x2f2   :  { %v12211_v3 = vadd.f32 %v16041_v46, %v2249_v58  ;;  %v12214_v52 = vadd.f32 %v16041_v46, %v2250_v34  ;;  %v2094_v39 = vpop.permute.xlu1 %2093  ;;  %v9883_v48 = vpack.i.bf16 %v15634_v36, %v15633_v55  ;;  %v1979_v46 = vadd.f32 %v1858_v54, %v1705_v6  ;;  %v16045_v55 = vld [vmem:[#allocation125_spill] sm:$0xff]  ;;  %v16046_v36 = vld [vmem:[#allocation124_spill] sm:$0xff] }
 0x2f3   :  { %v2131_v19 = vsel %vm2115_vm4, %v2092_v28, %v2094_v39  ;;  %v2215_v63 = vsel %vm2115_vm4, %v2094_v39, %v2092_v28  ;;  %v2096_v59 = vpop.permute.xlu0 %2095  ;;  %v1980_v16 = vadd.f32 %v1942_v47, %v1706_v29  ;;  %v1859_v51 = vsel %vm1841_vm3, %v16046_v36, %v16045_v55  ;;  %v16047_v39 = vld [vmem:[#allocation35_spill] sm:$0xff]  ;;  %v16048_v29 = vld [vmem:[#allocation44_spill] sm:$0xff]  ;;  %v16049_v47 = vld [vmem:[#allocation94_spill] sm:$0xff] }
 0x2f4   :  { %v15638_v58 = vmax.f32 %v12211_v3, 0.0  ;;  %v15637_v34 = vmax.f32 %v12214_v52, 0.0  ;;  %v2251_v12 = vadd.f32 %v2131_v19, %v1977_v22  ;;  %v2252_v56 = vadd.f32 %v2215_v63, %v1978_v62  ;;  %9884 = vrot.lane.b32.xlu1 %v9883_v48, %s10429_s2  ;;  %v16050_v48 = vld [vmem:[#allocation93_spill] sm:$0xff] }
 0x2f5   :  { %v1943_v28 = vsel %vm1841_vm3, %v16045_v55, %v16046_v36  ;;  %v1709_v54 = vadd.f32 %v1586_v61, %v16048_v29  ;;  %v1587_v20 = vsel %vm1567_vm2, %v16050_v48, %v16049_v47  ;;  %v1981_v61 = vadd.f32 %v1859_v51, %v1707_v57 }
 0x2f6   :  { %v12239_v0 = vadd.f32 %v16047_v39, %v2251_v12  ;;  %v12242_v22 = vadd.f32 %v16047_v39, %v2252_v56  ;;  %v2098_v62 = vpop.permute.xlu1 %2097  ;;  %v9888_v6 = vpack.i.bf16 %v15637_v34, %v15638_v58  ;;  %v16051_v39 = vld [vmem:[#allocation43_spill] sm:$0xff]  ;;  %v1982_v29 = vadd.f32 %v1943_v28, %v1708_v31  ;;  %v16055_v31 = vld [vmem:[#allocation46_spill] sm:$0xff] }
 0x2f7   :  { %v2132_v55 = vsel %vm2115_vm4, %v2096_v59, %v2098_v62  ;;  %v2216_v36 = vsel %vm2115_vm4, %v2098_v62, %v2096_v59  ;;  %v2100_v9 = vpop.permute.xlu0 %2099  ;;  %v1710_v34 = vadd.f32 %v1670_v49, %v16051_v39  ;;  %v16052_v58 = vld [vmem:[#allocation3_spill] sm:$0xff]  ;;  %v16054_v62 = vld [vmem:[#allocation36_spill] sm:$0xff]  ;;  %v1671_v57 = vsel %vm1567_vm2, %v16049_v47, %v16050_v48 }
 0x2f8   :  { %v15642_v19 = vmax.f32 %v12239_v0, 0.0  ;;  %v15643_v63 = vmax.f32 %v12242_v22, 0.0  ;;  %v2253_v12 = vadd.f32 %v2132_v55, %v1979_v46  ;;  %v2254_v56 = vadd.f32 %v2216_v36, %v1980_v16  ;;  %9889 = vrot.lane.b32.xlu0 %v9888_v6, %s10429_s2  ;;  %v16057_v39 = vld [vmem:[#allocation95_spill] sm:$0xff] }
 0x2f9   :  { %v1860_v8 = vsel %vm1841_vm3, %v16053_v5, %v16052_v58  ;;  %v1944_v59 = vsel %vm1841_vm3, %v16052_v58, %v16053_v5  ;;  %v1711_v49 = vadd.f32 %v1587_v20, %v16055_v31  ;;  %v16058_v20 = vld [vmem:[#allocation4_spill] sm:$0xff]  ;;  %v16059_v31 = vld [vmem:[#allocation42_spill] sm:$0xff] }
 0x2fa   :  { %v12265_v21 = vadd.f32 %v16054_v62, %v2253_v12  ;;  %v12268_v46 = vadd.f32 %v16054_v62, %v2254_v56  ;;  %v2102_v16 = vpop.permute.xlu1 %2101  ;;  %v9893_v51 = vpack.i.bf16 %v15643_v63, %v15642_v19  ;;  %v16056_v56 = vld [vmem:[#allocation96_spill] sm:$0xff]  ;;  %v1983_v47 = vadd.f32 %v1860_v8, %v1709_v54 }
 0x2fb   :  { %v2133_v5 = vsel %vm2115_vm4, %v2100_v9, %v2102_v16  ;;  %v2217_v58 = vsel %vm2115_vm4, %v2102_v16, %v2100_v9  ;;  %v2104_v28 = vpop.permute.xlu0 %2103  ;;  %v1588_v62 = vsel %vm1567_vm2, %v16057_v39, %v16056_v56  ;;  %v1984_v48 = vadd.f32 %v1944_v59, %v1710_v34  ;;  %v16060_v16 = vld [vmem:[#allocation37_spill] sm:$0xff] }
 0x2fc   :  { %v15645_v6 = vmax.f32 %v12265_v21, 0.0  ;;  %v15644_v55 = vmax.f32 %v12268_v46, 0.0  ;;  %v2255_v36 = vadd.f32 %v2133_v5, %v1981_v61  ;;  %v2256_v12 = vadd.f32 %v2217_v58, %v1982_v29  ;;  %9894 = vrot.lane.b32.xlu1 %v9893_v51, %s10429_s2  ;;  %v16061_v34 = vld [vmem:[#allocation5_spill] sm:$0xff] }
 0x2fd   :  { %v1861_v19 = vsel %vm1841_vm3, %v16059_v31, %v16058_v20  ;;  %v1945_v9 = vsel %vm1841_vm3, %v16058_v20, %v16059_v31  ;;  %v1712_v54 = vadd.f32 %v1671_v57, %v16061_v34  ;;  %v1672_v59 = vsel %vm1567_vm2, %v16056_v56, %v16057_v39  ;;  %v16064_v34 = vld [vmem:[#allocation47_spill] sm:$0xff]  ;;  %v16065_v39 = vld [vmem:[#allocation50_spill] sm:$0xff] }
 0x2fe   :  { %v12293_v63 = vadd.f32 %v16060_v16, %v2255_v36  ;;  %v12296_v61 = vadd.f32 %v16060_v16, %v2256_v12  ;;  %v2106_v29 = vpop.permute.xlu1 %2105  ;;  %v9898_v8 = vpack.i.bf16 %v15644_v55, %v15645_v6  ;;  %v16062_v16 = vld [vmem:[#allocation19_spill] sm:$0xff]  ;;  %v16063_v55 = vld [vmem:[#allocation48_spill] sm:$0xff]  ;;  %v1713_v6 = vadd.f32 %v1588_v62, %v16064_v34 }
 0x2ff   :  { %v2134_v51 = vsel %vm2115_vm4, %v2104_v28, %v2106_v29  ;;  %v2218_v5 = vsel %vm2115_vm4, %v2106_v29, %v2104_v28  ;;  %v2108_v31 = vpop.permute.xlu0 %2107  ;;  %v1440_v57 = vadd.f32 %v16063_v55, %v16062_v16  ;;  %v1985_v14 = vadd.f32 %v1861_v19, %v1711_v49  ;;  %v16067_v29 = vld [vmem:[#allocation38_spill] sm:$0xff] }
 0x300   :  { %v15657_v58 = vmax.f32 %v12293_v63, 0.0  ;;  %v15658_v36 = vmax.f32 %v12296_v61, 0.0  ;;  %v2257_v12 = vadd.f32 %v2134_v51, %v1983_v47  ;;  %v2258_v20 = vadd.f32 %v2218_v5, %v1984_v48  ;;  %9899 = vrot.lane.b32.xlu0 %v9898_v8, %s10429_s2 }
 0x301   :  { %v1986_v56 = vadd.f32 %v1945_v9, %v1712_v54  ;;  %v1862_v28 = vsel %vm1841_vm3, %v16066_v45, %v16065_v39  ;;  %v1714_v8 = vadd.f32 %v1672_v59, %v1440_v57  ;;  %v1946_v19 = vsel %vm1841_vm3, %v16065_v39, %v16066_v45  ;;  %v16068_v59 = vld [vmem:[#allocation39_spill] sm:$0xff] }
 0x302   :  { %v12318_v27 = vadd.f32 %v16067_v29, %v2257_v12  ;;  %v12321_v47 = vadd.f32 %v16067_v29, %v2258_v20  ;;  %v2110_v48 = vpop.permute.xlu1 %2109  ;;  %v9903_v55 = vpack.i.bf16 %v15658_v36, %v15657_v58  ;;  %v1987_v20 = vadd.f32 %v1862_v28, %v1713_v6 }
 0x303   :  { %v2135_v49 = vsel %vm2115_vm4, %v2108_v31, %v2110_v48  ;;  %v2219_v62 = vsel %vm2115_vm4, %v2110_v48, %v2108_v31  ;;  %v2112_v12 = vpop.permute.xlu0 %2111  ;;  %v1988_v16 = vadd.f32 %v1946_v19, %v1714_v8  ;;  %v16069_v48 = vld [vmem:[#allocation40_spill] sm:$0xff] }
 0x304   :  { %v15656_v9 = vmax.f32 %v12318_v27, 0.0  ;;  %v15653_v54 = vmax.f32 %v12321_v47, 0.0  ;;  %v2259_v51 = vadd.f32 %v2135_v49, %v1985_v14  ;;  %v2260_v5 = vadd.f32 %v2219_v62, %v1986_v56  ;;  %9904 = vrot.lane.b32.xlu1 %v9903_v55, %s10429_s2 }
 0x306   :  { %v12336_v57 = vadd.f32 %v16068_v59, %v2259_v51  ;;  %v12339_v45 = vadd.f32 %v16068_v59, %v2260_v5  ;;  %v2114_v34 = vpop.permute.xlu1 %2113  ;;  %v9908_v31 = vpack.i.bf16 %v15653_v54, %v15656_v9  ;;  %v5264_v51 = vld [vmem:[%s15492_s4] sm:$0xff]  ;;  %v5267_v59 = vld [vmem:[%s15492_s4 + $0x18] sm:$0xff] }
 0x307   :  { %v2136_v14 = vsel %vm2115_vm4, %v2112_v12, %v2114_v34  ;;  %v2220_v56 = vsel %vm2115_vm4, %v2114_v34, %v2112_v12  ;;  %v5266_v12 = vld [vmem:[%s15492_s4 + $0x10] sm:$0xff]  ;;  %v10078_v34 = vld [vmem:[%s15493_s3 + $0x4] ss:$8 sps:$4 sm:$0xff]  }
 0x308   :  { %v15651_v39 = vmax.f32 %v12336_v57, 0.0  ;;  %v15652_v6 = vmax.f32 %v12339_v45, 0.0  ;;  %v2261_v28 = vadd.f32 %v2136_v14, %v1987_v20  ;;  %v2262_v29 = vadd.f32 %v2220_v56, %v1988_v16  ;;  %9909 = vrot.lane.b32.xlu0 %v9908_v31, %s10429_s2  ;;  %v5265_v20 = vld [vmem:[%s15492_s4 + $0x8] sm:$0xff]  ;;  %v5268_v16 = vld [vmem:[%s15492_s4 + $0x20] sm:$0xff]  ;;  %v5270_v31 = vld [vmem:[%s15492_s4 + $0x30] sm:$0xff]  ;;  %8909 = vmatprep.mubr.msk.bf16.mxu1 %vm3531_vm5, %v10078_v34 }
 0x309   :  { %v5269_v14 = vld [vmem:[%s15492_s4 + $0x28] sm:$0xff]  ;;  %v5272_v56 = vld [vmem:[%s15492_s4 + $0x40] sm:$0xff] }
 0x30a   :  { %v12351_v55 = vadd.f32 %v16069_v48, %v2261_v28  ;;  %v12354_v8 = vadd.f32 %v16069_v48, %v2262_v29  ;;  %v9913_v19 = vpack.i.bf16 %v15652_v6, %v15651_v39  ;;  %v5271_v28 = vld [vmem:[%s15492_s4 + $0x38] sm:$0xff]  ;;  %v5274_v29 = vld [vmem:[%s15492_s4 + $0x50] sm:$0xff]  ;;  %v5273_v48 = vld [vmem:[%s15492_s4 + $0x48] sm:$0xff] }
 0x30b   :  { %v5281_v34 = vld [vmem:[%s15492_s4 + $0x88] sm:$0xff] }
 0x30c   :  { %16070 = vst [vmem:[#allocation49_spill] sm:$0xff] %v12354_v8  ;;  %v15650_v49 = vmax.f32 %v12351_v55, 0.0  ;;  %v15649_v62 = vmax.f32 %v12354_v8, 0.0  ;;  %9914 = vrot.lane.b32.xlu1 %v9913_v19, %s10429_s2  ;;  %v5276_v19 = vld [vmem:[%s15492_s4 + $0x60] sm:$0xff] }
 0x30e   :  { %v9918_v5 = vpack.i.bf16 %v15649_v62, %v15650_v49  ;;  %v16075_v49 = vmax.f32 %v11823_v43, 0.0 }
 0x310   :  { %5286 = vperm.xlu1 %9817, %v5264_v51   ;;  %9919 = vrot.lane.b32.xlu0 %v9918_v5, %s10429_s2  ;;  %v5275_v51 = vld [vmem:[%s15492_s4 + $0x58] sm:$0xff]  ;;  %v5278_v5 = vld [vmem:[%s15492_s4 + $0x70] sm:$0xff] }
 0x314   :  { %5296 = vperm.xlu1 %9817, %v5266_v12   ;;  %5291 = vperm.xlu0 %9816, %v5265_v20   ;;  %v5277_v12 = vld [vmem:[%s15492_s4 + $0x68] sm:$0xff]  ;;  %v5280_v20 = vld [vmem:[%s15492_s4 + $0x80] sm:$0xff] }
 0x318   :  { %5306 = vperm.xlu1 %9817, %v5268_v16   ;;  %5301 = vperm.xlu0 %9816, %v5267_v59   ;;  %v5279_v16 = vld [vmem:[%s15492_s4 + $0x78] sm:$0xff]  ;;  %v5282_v59 = vld [vmem:[%s15492_s4 + $0x90] sm:$0xff] }
 0x31c   :  { %5316 = vperm.xlu1 %9817, %v5270_v31   ;;  %5311 = vperm.xlu0 %9816, %v5269_v14  }
 0x320   :  { %5326 = vperm.xlu1 %9817, %v5272_v56   ;;  %5321 = vperm.xlu0 %9816, %v5271_v28   ;;  %v5283_v28 = vld [vmem:[%s15492_s4 + $0x98] sm:$0xff] }
 0x324   :  { %5336 = vperm.xlu1 %9817, %v5274_v29   ;;  %5331 = vperm.xlu0 %9816, %v5273_v48  }
 0x328   :  { %5346 = vperm.xlu1 %9817, %v5276_v19   ;;  %5341 = vperm.xlu0 %9816, %v5275_v51  }
 0x32c   :  { %5356 = vperm.xlu1 %9817, %v5278_v5   ;;  %5351 = vperm.xlu0 %9816, %v5277_v12   ;;  %v16071_v12 = vmax.f32 %v11798_v50, 0.0 }
 0x330   :  { %5366 = vperm.xlu1 %9817, %v5280_v20   ;;  %5361 = vperm.xlu0 %9816, %v5279_v16   ;;  %v16073_v16 = vmax.f32 %v11795_v37, 0.0 }
 0x332   :  { %v9820_v31 = vpop.permute.xlu0 %9819 }
 0x333   :  { %v9822_v14 = vunpack.i.h.bf16 %v9820_v31  ;;  %v9821_v56 = vunpack.i.l.bf16 %v9820_v31 }
 0x334   :  { %5376 = vperm.xlu1 %9817, %v5282_v59   ;;  %5371 = vperm.xlu0 %9816, %v5281_v34  }
 0x335   :  { %v2683_v29 = vsel %vm1293_vm1, %v9822_v14, %v9821_v56  ;;  %v2599_v48 = vsel %vm1293_vm1, %v9821_v56, %v9822_v14  ;;  %v16076_v56 = vmax.f32 %v11820_v33, 0.0 }
 0x336   :  { %v9825_v19 = vpop.permute.xlu1 %9824  ;;  %v12436_v20 = vmax.f32 %v16071_v12, %v2683_v29  ;;  %v12440_v31 = vmax.f32 %v16073_v16, %v2599_v48 }
 0x337   :  { %v9827_v51 = vunpack.i.h.bf16 %v9825_v19  ;;  %v9826_v5 = vunpack.i.l.bf16 %v9825_v19 }
 0x338   :  { %5381 = vperm.xlu1 %9817, %v5283_v28   ;;  %16072 = vst [vmem:[#allocation6_spill] sm:$0xff] %v12436_v20  ;;  %16074 = vst [vmem:[#allocation7_spill] sm:$0xff] %v12440_v31  ;;  %v15655_v50 = vrot.slane %v12436_v20, 1  ;;  %v15654_v37 = vrot.slane %v12440_v31, 1 }
 0x339   :  { %v2684_v62 = vsel %vm1293_vm1, %v9827_v51, %v9826_v5  ;;  %v2600_v59 = vsel %vm1293_vm1, %v9826_v5, %v9827_v51  ;;  %v16077_v5 = vmax.f32 %v11851_v17, 0.0 }
 0x33a   :  { %v9830_v34 = vpop.permute.xlu0 %9829  ;;  %v2707_v14 = vmax.f32 %v16075_v49, %v2684_v62  ;;  %v2706_v19 = vmax.f32 %v16076_v56, %v2600_v59  ;;  %v16078_v49 = vmax.f32 %v11854_v25, 0.0 }
 0x33b   :  { %v9832_v28 = vunpack.i.h.bf16 %v9830_v34  ;;  %v9831_v39 = vunpack.i.l.bf16 %v9830_v34 }
 0x33c   :  { %v2793_v29 = vrot.slane %v2707_v14, 1  ;;  %v2790_v48 = vrot.slane %v2706_v19, 1 }
 0x33d   :  { %v2601_v12 = vsel %vm1293_vm1, %v9831_v39, %v9832_v28  ;;  %v2685_v51 = vsel %vm1293_vm1, %v9832_v28, %v9831_v39 }
 0x33e   :  { %v2708_v43 = vmax.f32 %v16077_v5, %v2601_v12  ;;  %v2709_v33 = vmax.f32 %v16078_v49, %v2685_v51  ;;  %v9835_v62 = vpop.permute.xlu1 %9834  ;;  %v2794_v16 = vsel %vm2788_vm6, %v15655_v50, %v2793_v29  ;;  %v2791_v59 = vsel %vm2788_vm6, %v15654_v37, %v2790_v48 }
 0x33f   :  { %v9837_v34 = vunpack.i.h.bf16 %v9835_v62  ;;  %v9836_v56 = vunpack.i.l.bf16 %v9835_v62  ;;  %v2918_v25 = vmax.f32 %v12436_v20, %v2794_v16  ;;  %v2917_v28 = vmax.f32 %v12440_v31, %v2791_v59 }
 0x340   :  { %v2797_v6 = vrot.slane %v2709_v33, 1  ;;  %v2795_v54 = vrot.slane %v2708_v43, 1  ;;  %v16079_v49 = vmax.f32 %v11886_v4, 0.0  ;;  %v16080_v62 = vmax.f32 %v11883_v2, 0.0 }
 0x341   :  { %v2602_v39 = vsel %vm1293_vm1, %v9836_v56, %v9837_v34  ;;  %v2686_v17 = vsel %vm1293_vm1, %v9837_v34, %v9836_v56  ;;  %v16082_v4 = vmax.f32 %v11918_v18, 0.0 }
 0x342   :  { %v9840_v12 = vpop.permute.xlu0 %9839  ;;  %v2798_v51 = vsel %vm2788_vm6, %v2793_v29, %v2797_v6  ;;  %v2796_v5 = vsel %vm2788_vm6, %v2790_v48, %v2795_v54  ;;  %v2711_v37 = vmax.f32 %v16079_v49, %v2686_v17  ;;  %v2710_v50 = vmax.f32 %v16080_v62, %v2602_v39 }
 0x343   :  { %v9842_v9 = vunpack.i.h.bf16 %v9840_v12  ;;  %v9841_v58 = vunpack.i.l.bf16 %v9840_v12  ;;  %v2920_v36 = vmax.f32 %v2707_v14, %v2798_v51  ;;  %v2919_v8 = vmax.f32 %v2706_v19, %v2796_v5 }
 0x344   :  { %v2801_v34 = vrot.slane %v2711_v37, 1  ;;  %v2799_v56 = vrot.slane %v2710_v50, 1  ;;  %v16081_v48 = vmax.f32 %v11915_v40, 0.0 }
 0x345   :  { %v2603_v16 = vsel %vm1293_vm1, %v9841_v58, %v9842_v9  ;;  %v2687_v59 = vsel %vm1293_vm1, %v9842_v9, %v9841_v58  ;;  %v2960_v31 = vpack.c.bf16 %v2920_v36, %v2918_v25  ;;  %v2959_v29 = vpack.c.bf16 %v2919_v8, %v2917_v28 }
 0x346   :  { %v2712_v20 = vmax.f32 %v16081_v48, %v2603_v16  ;;  %v2713_v17 = vmax.f32 %v16082_v4, %v2687_v59  ;;  %v9845_v2 = vpop.permute.xlu1 %9844  ;;  %v2802_v39 = vsel %vm2788_vm6, %v2797_v6, %v2801_v34  ;;  %v2800_v14 = vsel %vm2788_vm6, %v2795_v54, %v2799_v56 }
 0x347   :  { %v9847_v19 = vunpack.i.h.bf16 %v9845_v2  ;;  %v9846_v12 = vunpack.i.l.bf16 %v9845_v2  ;;  %3689 = vmatprep.subr.bf16.mxu1 %v2960_v31  ;;  %v2922_v40 = vmax.f32 %v2709_v33, %v2802_v39  ;;  %v2921_v9 = vmax.f32 %v2708_v43, %v2800_v14 }
 0x348   :  { %v2803_v51 = vrot.slane %v2712_v20, 1  ;;  %v2805_v5 = vrot.slane %v2713_v17, 1  ;;  %3690 = vmatpush1.bf16.msra.mxu1 %v2959_v29  ;;  %v16083_v6 = vmax.f32 %v11950_v26, 0.0  ;;  %v16084_v28 = vmax.f32 %v11947_v7, 0.0 }
 0x349   :  { %v2604_v58 = vsel %vm1293_vm1, %v9846_v12, %v9847_v19  ;;  %v2688_v36 = vsel %vm1293_vm1, %v9847_v19, %v9846_v12  ;;  %v16086_v26 = vmax.f32 %v11982_v13, 0.0 }
 0x34a   :  { %v9850_v8 = vpop.permute.xlu0 %9849  ;;  %v2806_v18 = vsel %vm2788_vm6, %v2801_v34, %v2805_v5  ;;  %v2804_v25 = vsel %vm2788_vm6, %v2799_v56, %v2803_v51  ;;  %v2715_v54 = vmax.f32 %v16083_v6, %v2688_v36  ;;  %v2714_v31 = vmax.f32 %v16084_v28, %v2604_v58 }
 0x34b   :  { %v9852_v49 = vunpack.i.h.bf16 %v9850_v8  ;;  %v9851_v62 = vunpack.i.l.bf16 %v9850_v8  ;;  %v2924_v16 = vmax.f32 %v2711_v37, %v2806_v18  ;;  %v2923_v59 = vmax.f32 %v2710_v50, %v2804_v25 }
 0x34c   :  { %v2809_v29 = vrot.slane %v2715_v54, 1  ;;  %v2807_v48 = vrot.slane %v2714_v31, 1  ;;  %v16085_v56 = vmax.f32 %v11979_v1, 0.0  ;;  %v16088_v25 = vmax.f32 %v12011_v35, 0.0 }
 0x34d   :  { %v2605_v33 = vsel %vm1293_vm1, %v9851_v62, %v9852_v49  ;;  %v2689_v43 = vsel %vm1293_vm1, %v9852_v49, %v9851_v62  ;;  %v2962_v4 = vpack.c.bf16 %v2924_v16, %v2922_v40  ;;  %v2961_v34 = vpack.c.bf16 %v2923_v59, %v2921_v9 }
 0x34e   :  { %v2716_v2 = vmax.f32 %v16085_v56, %v2605_v33  ;;  %v2717_v39 = vmax.f32 %v16086_v26, %v2689_v43  ;;  %v2810_v14 = vsel %vm2788_vm6, %v2805_v5, %v2809_v29  ;;  %v2808_v37 = vsel %vm2788_vm6, %v2803_v51, %v2807_v48 }
 0x34f   :  { %v9855_v7 = vpop.permute.xlu1 %9854  ;;  %3691 = vmatprep.subr.bf16.mxu1 %v2962_v4  ;;  %v2926_v1 = vmax.f32 %v2713_v17, %v2810_v14  ;;  %v2925_v9 = vmax.f32 %v2712_v20, %v2808_v37  ;;  %v16087_v5 = vmax.f32 %v12014_v44, 0.0  ;;  %v16090_v44 = vmax.f32 %v12044_v11, 0.0 }
 0x350   :  { %v9857_v50 = vunpack.i.h.bf16 %v9855_v7  ;;  %v9856_v19 = vunpack.i.l.bf16 %v9855_v7  ;;  %v2811_v12 = vrot.slane %v2716_v2, 1  ;;  %v2813_v58 = vrot.slane %v2717_v39, 1  ;;  %3692 = vmatpush1.bf16.msra.mxu1 %v2961_v34 }
 0x352   :  { %v2606_v36 = vsel %vm1293_vm1, %v9856_v19, %v9857_v50  ;;  %v2690_v40 = vsel %vm1293_vm1, %v9857_v50, %v9856_v19  ;;  %v9860_v8 = vpop.permute.xlu0 %9859  ;;  %v2814_v13 = vsel %vm2788_vm6, %v2809_v29, %v2813_v58  ;;  %v2812_v18 = vsel %vm2788_vm6, %v2807_v48, %v2811_v12 }
 0x353   :  { %v2719_v51 = vmax.f32 %v16087_v5, %v2690_v40  ;;  %v2718_v6 = vmax.f32 %v16088_v25, %v2606_v36  ;;  %v9862_v28 = vunpack.i.h.bf16 %v9860_v8  ;;  %v9861_v49 = vunpack.i.l.bf16 %v9860_v8 }
 0x354   :  { %v2928_v62 = vmax.f32 %v2715_v54, %v2814_v13  ;;  %v2927_v16 = vmax.f32 %v2714_v31, %v2812_v18  ;;  %v16089_v48 = vmax.f32 %v12041_v32, 0.0 }
 0x355   :  { %v2817_v59 = vrot.slane %v2719_v51, 1  ;;  %v2815_v33 = vrot.slane %v2718_v6, 1  ;;  %v2607_v17 = vsel %vm1293_vm1, %v9861_v49, %v9862_v28  ;;  %v2691_v20 = vsel %vm1293_vm1, %v9862_v28, %v9861_v49 }
 0x356   :  { %v2964_v43 = vpack.c.bf16 %v2928_v62, %v2926_v1  ;;  %v2963_v29 = vpack.c.bf16 %v2927_v16, %v2925_v9  ;;  %v2720_v4 = vmax.f32 %v16089_v48, %v2607_v17  ;;  %v2721_v34 = vmax.f32 %v16090_v44, %v2691_v20  ;;  %v9865_v35 = vpop.permute.xlu1 %9864 }
 0x357   :  { %v2818_v56 = vsel %vm2788_vm6, %v2813_v58, %v2817_v59  ;;  %v2816_v54 = vsel %vm2788_vm6, %v2811_v12, %v2815_v33  ;;  %v9867_v31 = vunpack.i.h.bf16 %v9865_v35  ;;  %v9866_v26 = vunpack.i.l.bf16 %v9865_v35 }
 0x358   :  { %3693 = vmatprep.subr.bf16.mxu1 %v2964_v43  ;;  %v2819_v7 = vrot.slane %v2720_v4, 1  ;;  %v2821_v14 = vrot.slane %v2721_v34, 1  ;;  %v2930_v32 = vmax.f32 %v2717_v39, %v2818_v56  ;;  %v2929_v19 = vmax.f32 %v2716_v2, %v2816_v54 }
 0x359   :  { %3694 = vmatpush1.bf16.msra.mxu1 %v2963_v29  ;;  %v2608_v37 = vsel %vm1293_vm1, %v9866_v26, %v9867_v31  ;;  %v2692_v50 = vsel %vm1293_vm1, %v9867_v31, %v9866_v26  ;;  %v16091_v58 = vmax.f32 %v12076_v53, 0.0  ;;  %v16092_v1 = vmax.f32 %v12073_v10, 0.0 }
 0x35a   :  { %v9870_v36 = vpop.permute.xlu0 %9869  ;;  %v2822_v11 = vsel %vm2788_vm6, %v2817_v59, %v2821_v14  ;;  %v2820_v40 = vsel %vm2788_vm6, %v2815_v33, %v2819_v7  ;;  %v16093_v16 = vmax.f32 %v12101_v42, 0.0  ;;  %v16094_v53 = vmax.f32 %v12104_v60, 0.0 }
 0x35b   :  { %v2723_v12 = vmax.f32 %v16091_v58, %v2692_v50  ;;  %v2722_v9 = vmax.f32 %v16092_v1, %v2608_v37  ;;  %v9872_v8 = vunpack.i.h.bf16 %v9870_v36  ;;  %v9871_v13 = vunpack.i.l.bf16 %v9870_v36 }
 0x35c   :  { %v2932_v18 = vmax.f32 %v2719_v51, %v2822_v11  ;;  %v2931_v5 = vmax.f32 %v2718_v6, %v2820_v40  ;;  %v16095_v31 = vmax.f32 %v12133_v41, 0.0  ;;  %v16097_v1 = vmax.f32 %v12157_v23, 0.0 }
 0x35d   :  { %v2825_v25 = vrot.slane %v2723_v12, 1  ;;  %v2823_v28 = vrot.slane %v2722_v9, 1  ;;  %v2609_v39 = vsel %vm1293_vm1, %v9871_v13, %v9872_v8  ;;  %v2693_v2 = vsel %vm1293_vm1, %v9872_v8, %v9871_v13 }
 0x35e   :  { %v2966_v49 = vpack.c.bf16 %v2932_v18, %v2930_v32  ;;  %v2965_v62 = vpack.c.bf16 %v2931_v5, %v2929_v19  ;;  %v2724_v59 = vmax.f32 %v16093_v16, %v2609_v39  ;;  %v2725_v33 = vmax.f32 %v16094_v53, %v2693_v2  ;;  %v9875_v10 = vpop.permute.xlu1 %9874 }
 0x35f   :  { %v2826_v17 = vsel %vm2788_vm6, %v2821_v14, %v2825_v25  ;;  %v2824_v51 = vsel %vm2788_vm6, %v2819_v7, %v2823_v28  ;;  %v9877_v6 = vunpack.i.h.bf16 %v9875_v10  ;;  %v9876_v20 = vunpack.i.l.bf16 %v9875_v10 }
 0x360   :  { %3695 = vmatprep.subr.bf16.mxu1 %v2966_v49  ;;  %v2827_v43 = vrot.slane %v2724_v59, 1  ;;  %v2829_v29 = vrot.slane %v2725_v33, 1  ;;  %v2934_v42 = vmax.f32 %v2721_v34, %v2826_v17  ;;  %v2933_v35 = vmax.f32 %v2720_v4, %v2824_v51 }
 0x361   :  { %3696 = vmatpush1.bf16.msra.mxu1 %v2965_v62  ;;  %v2610_v48 = vsel %vm1293_vm1, %v9876_v20, %v9877_v6  ;;  %v2694_v44 = vsel %vm1293_vm1, %v9877_v6, %v9876_v20  ;;  %v16096_v7 = vmax.f32 %v12130_v38, 0.0  ;;  %v16098_v41 = vmax.f32 %v12160_v30, 0.0 }
 0x362   :  { %v9880_v56 = vpop.permute.xlu0 %9879  ;;  %v2830_v60 = vsel %vm2788_vm6, %v2825_v25, %v2829_v29  ;;  %v2828_v54 = vsel %vm2788_vm6, %v2823_v28, %v2827_v43  ;;  %v2727_v26 = vmax.f32 %v16095_v31, %v2694_v44  ;;  %v16099_v53 = vmax.f32 %v12188_v15, 0.0 }
 0x363   :  { %v2726_v14 = vmax.f32 %v16096_v7, %v2610_v48  ;;  %v9882_v37 = vunpack.i.h.bf16 %v9880_v56  ;;  %v9881_v50 = vunpack.i.l.bf16 %v9880_v56  ;;  %v2936_v32 = vmax.f32 %v2723_v12, %v2830_v60 }
 0x364   :  { %v2935_v19 = vmax.f32 %v2722_v9, %v2828_v54  ;;  %v2833_v36 = vrot.slane %v2727_v26, 1  ;;  %v16100_v17 = vmax.f32 %v12185_v24, 0.0  ;;  %v16101_v56 = vmax.f32 %v12211_v3, 0.0 }
 0x365   :  { %v2831_v11 = vrot.slane %v2726_v14, 1  ;;  %v2611_v34 = vsel %vm1293_vm1, %v9881_v50, %v9882_v37  ;;  %v2695_v4 = vsel %vm1293_vm1, %v9882_v37, %v9881_v50  ;;  %v2968_v40 = vpack.c.bf16 %v2936_v32, %v2934_v42 }
 0x366   :  { %v2967_v58 = vpack.c.bf16 %v2935_v19, %v2933_v35  ;;  %v2728_v8 = vmax.f32 %v16097_v1, %v2611_v34  ;;  %v2729_v13 = vmax.f32 %v16098_v41, %v2695_v4  ;;  %v9885_v38 = vpop.permute.xlu1 %9884  ;;  %v2834_v18 = vsel %vm2788_vm6, %v2829_v29, %v2833_v36 }
 0x367   :  { %v2832_v12 = vsel %vm2788_vm6, %v2827_v43, %v2831_v11  ;;  %v9887_v9 = vunpack.i.h.bf16 %v9885_v38  ;;  %v9886_v5 = vunpack.i.l.bf16 %v9885_v38  ;;  %3697 = vmatprep.subr.bf16.mxu1 %v2968_v40  ;;  %v2938_v23 = vmax.f32 %v2725_v33, %v2834_v18 }
 0x368   :  { %v2835_v25 = vrot.slane %v2728_v8, 1  ;;  %v2837_v28 = vrot.slane %v2729_v13, 1  ;;  %3698 = vmatpush1.bf16.msra.mxu1 %v2967_v58  ;;  %v2937_v49 = vmax.f32 %v2724_v59, %v2832_v12  ;;  %v16102_v15 = vmax.f32 %v12214_v52, 0.0 }
 0x369   :  { %v2612_v39 = vsel %vm1293_vm1, %v9886_v5, %v9887_v9  ;;  %v2696_v2 = vsel %vm1293_vm1, %v9887_v9, %v9886_v5  ;;  %v16103_v4 = vmax.f32 %v12242_v22, 0.0  ;;  %v16104_v58 = vmax.f32 %v12239_v0, 0.0 }
 0x36a   :  { %v9890_v62 = vpop.permute.xlu0 %9889  ;;  %v2838_v30 = vsel %vm2788_vm6, %v2833_v36, %v2837_v28  ;;  %v2836_v16 = vsel %vm2788_vm6, %v2831_v11, %v2835_v25  ;;  %v2731_v10 = vmax.f32 %v16099_v53, %v2696_v2  ;;  %v2730_v51 = vmax.f32 %v16100_v17, %v2612_v39 }
 0x36b   :  { %v9892_v6 = vunpack.i.h.bf16 %v9890_v62  ;;  %v9891_v20 = vunpack.i.l.bf16 %v9890_v62  ;;  %v2940_v43 = vmax.f32 %v2727_v26, %v2838_v30  ;;  %v2939_v29 = vmax.f32 %v2726_v14, %v2836_v16 }
 0x36c   :  { %v2841_v48 = vrot.slane %v2731_v10, 1  ;;  %v2839_v44 = vrot.slane %v2730_v51, 1  ;;  %v16105_v39 = vmax.f32 %v12265_v21, 0.0  ;;  %v16106_v22 = vmax.f32 %v12268_v46, 0.0 }
 0x36d   :  { %v2613_v33 = vsel %vm1293_vm1, %v9891_v20, %v9892_v6  ;;  %v2697_v59 = vsel %vm1293_vm1, %v9892_v6, %v9891_v20  ;;  %v2970_v42 = vpack.c.bf16 %v2940_v43, %v2938_v23  ;;  %v2969_v35 = vpack.c.bf16 %v2939_v29, %v2937_v49 }
 0x36e   :  { %v2732_v60 = vmax.f32 %v16101_v56, %v2613_v33  ;;  %v2733_v54 = vmax.f32 %v16102_v15, %v2697_v59  ;;  %v9895_v24 = vpop.permute.xlu1 %9894  ;;  %v2842_v31 = vsel %vm2788_vm6, %v2837_v28, %v2841_v48  ;;  %v2840_v26 = vsel %vm2788_vm6, %v2835_v25, %v2839_v44 }
 0x36f   :  { %v9897_v7 = vunpack.i.h.bf16 %v9895_v24  ;;  %v9896_v14 = vunpack.i.l.bf16 %v9895_v24  ;;  %3699 = vmatprep.subr.bf16.mxu1 %v2970_v42  ;;  %v2942_v3 = vmax.f32 %v2729_v13, %v2842_v31  ;;  %v2941_v36 = vmax.f32 %v2728_v8, %v2840_v26 }
 0x370   :  { %v2843_v37 = vrot.slane %v2732_v60, 1  ;;  %v2845_v50 = vrot.slane %v2733_v54, 1  ;;  %3700 = vmatpush1.bf16.msra.mxu1 %v2969_v35  ;;  %v16107_v29 = vmax.f32 %v12296_v61, 0.0  ;;  %v16110_v61 = vmax.f32 %v12321_v47, 0.0 }
 0x371   :  { %v2614_v32 = vsel %vm1293_vm1, %v9896_v14, %v9897_v7  ;;  %v2698_v19 = vsel %vm1293_vm1, %v9897_v7, %v9896_v14  ;;  %v16109_v7 = vmax.f32 %v12318_v27, 0.0 }
 0x372   :  { %v9900_v11 = vpop.permute.xlu0 %9899  ;;  %v2846_v52 = vsel %vm2788_vm6, %v2841_v48, %v2845_v50  ;;  %v2844_v34 = vsel %vm2788_vm6, %v2839_v44, %v2843_v37  ;;  %v2735_v40 = vmax.f32 %v16103_v4, %v2698_v19  ;;  %v2734_v1 = vmax.f32 %v16104_v58, %v2614_v32 }
 0x373   :  { %v9902_v41 = vunpack.i.h.bf16 %v9900_v11  ;;  %v9901_v38 = vunpack.i.l.bf16 %v9900_v11  ;;  %v2944_v18 = vmax.f32 %v2731_v10, %v2846_v52  ;;  %v2943_v12 = vmax.f32 %v2730_v51, %v2844_v34 }
 0x374   :  { %v2849_v9 = vrot.slane %v2735_v40, 1  ;;  %v2847_v5 = vrot.slane %v2734_v1, 1  ;;  %v16108_v44 = vmax.f32 %v12293_v63, 0.0 }
 0x375   :  { %v2615_v13 = vsel %vm1293_vm1, %v9901_v38, %v9902_v41  ;;  %v2699_v8 = vsel %vm1293_vm1, %v9902_v41, %v9901_v38  ;;  %v2972_v25 = vpack.c.bf16 %v2944_v18, %v2942_v3  ;;  %v2971_v28 = vpack.c.bf16 %v2943_v12, %v2941_v36 }
 0x376   :  { %v2736_v2 = vmax.f32 %v16105_v39, %v2615_v13  ;;  %v2737_v23 = vmax.f32 %v16106_v22, %v2699_v8  ;;  %v9905_v0 = vpop.permute.xlu1 %9904  ;;  %v2850_v49 = vsel %vm2788_vm6, %v2845_v50, %v2849_v9  ;;  %v2848_v62 = vsel %vm2788_vm6, %v2843_v37, %v2847_v5 }
 0x377   :  { %v9907_v30 = vunpack.i.h.bf16 %v9905_v0  ;;  %v9906_v16 = vunpack.i.l.bf16 %v9905_v0  ;;  %3701 = vmatprep.subr.bf16.mxu1 %v2972_v25  ;;  %v2946_v21 = vmax.f32 %v2733_v54, %v2850_v49  ;;  %v2945_v6 = vmax.f32 %v2732_v60, %v2848_v62 }
 0x378   :  { %v2851_v53 = vrot.slane %v2736_v2, 1  ;;  %v2853_v10 = vrot.slane %v2737_v23, 1  ;;  %3702 = vmatpush1.bf16.msra.mxu1 %v2971_v28  ;;  %v16112_v38 = vmax.f32 %v12336_v57, 0.0 }
 0x379   :  { %v2616_v17 = vsel %vm1293_vm1, %v9906_v16, %v9907_v30  ;;  %v2700_v51 = vsel %vm1293_vm1, %v9907_v30, %v9906_v16 }
 0x37a   :  { %v9910_v20 = vpop.permute.xlu0 %9909  ;;  %v2854_v46 = vsel %vm2788_vm6, %v2849_v9, %v2853_v10  ;;  %v2852_v43 = vsel %vm2788_vm6, %v2847_v5, %v2851_v53  ;;  %v2739_v48 = vmax.f32 %v16107_v29, %v2700_v51  ;;  %v2738_v33 = vmax.f32 %v16108_v44, %v2616_v17 }
 0x37b   :  { %v9912_v59 = vunpack.i.h.bf16 %v9910_v20  ;;  %v9911_v42 = vunpack.i.l.bf16 %v9910_v20  ;;  %v2948_v35 = vmax.f32 %v2735_v40, %v2854_v46  ;;  %v2947_v56 = vmax.f32 %v2734_v1, %v2852_v43  ;;  %v16118_v46 = vld [vmem:[#allocation7_spill] sm:$0xff] }
 0x37c   :  { %v2857_v15 = vrot.slane %v2739_v48, 1  ;;  %v2855_v24 = vrot.slane %v2738_v33, 1  ;;  %v16111_v1 = vmax.f32 %v12339_v45, 0.0  ;;  %v16114_v45 = vld [vmem:[#allocation49_spill] sm:$0xff]  ;;  %v16119_v43 = vrot.slane %v16118_v46, 1 }
 0x37d   :  { %v2617_v54 = vsel %vm1293_vm1, %v9911_v42, %v9912_v59  ;;  %v2701_v60 = vsel %vm1293_vm1, %v9912_v59, %v9911_v42  ;;  %v2974_v31 = vpack.c.bf16 %v2948_v35, %v2946_v21  ;;  %v2973_v26 = vpack.c.bf16 %v2947_v56, %v2945_v6  ;;  %v16116_v6 = vld [vmem:[#allocation6_spill] sm:$0xff] }
 0x37e   :  { %v2740_v14 = vmax.f32 %v16109_v7, %v2617_v54  ;;  %v2741_v37 = vmax.f32 %v16110_v61, %v2701_v60  ;;  %v9915_v63 = vpop.permute.xlu1 %9914  ;;  %v2858_v50 = vsel %vm2788_vm6, %v2853_v10, %v2857_v15  ;;  %v2856_v32 = vsel %vm2788_vm6, %v2851_v53, %v2855_v24  ;;  %v10076_v54 = vld [vmem:[%s15493_s3] ss:$8 sps:$4 sm:$0xff]   ;;  %v10079_v60 = vld [vmem:[%s15493_s3 + $0x14] ss:$8 sps:$4 sm:$0xff]   ;;  %v10087_v61 = vld [vmem:[%s15493_s3 + $0x30] ss:$8 sps:$4 sm:$0xff]  }
 0x37f   :  { %v9917_v19 = vunpack.i.h.bf16 %v9915_v63  ;;  %v9916_v3 = vunpack.i.l.bf16 %v9915_v63  ;;  %3703 = vmatprep.subr.bf16.mxu1 %v2974_v31  ;;  %v2950_v27 = vmax.f32 %v2737_v23, %v2858_v50  ;;  %v2949_v4 = vmax.f32 %v2736_v2, %v2856_v32  ;;  %v10081_v31 = vld [vmem:[%s15493_s3 + $0x10] ss:$8 sps:$4 sm:$0xff]   ;;  %v10084_v7 = vld [vmem:[%s15493_s3 + $0x20] ss:$8 sps:$4 sm:$0xff]   ;;  %v10091_v50 = vld [vmem:[%s15493_s3 + $0x54] ss:$8 sps:$4 sm:$0xff]  }
 0x380   :  { %v2859_v36 = vrot.slane %v2740_v14, 1  ;;  %v2861_v11 = vrot.slane %v2741_v37, 1  ;;  %3704 = vmatpush1.bf16.msra.mxu1 %v2973_v26  ;;  %v16113_v23 = vmax.f32 %v12351_v55, 0.0  ;;  %v16115_v49 = vmax.f32 %v16114_v45, 0.0  ;;  %v10082_v26 = vld [vmem:[%s15493_s3 + $0x24] ss:$8 sps:$4 sm:$0xff]  }
 0x381   :  { %v2618_v52 = vsel %vm1293_vm1, %v9916_v3, %v9917_v19  ;;  %v2702_v34 = vsel %vm1293_vm1, %v9917_v19, %v9916_v3  ;;  %v16117_v55 = vrot.slane %v16116_v6, 1  ;;  %v10090_v63 = vld [vmem:[%s15493_s3 + $0x40] ss:$8 sps:$4 sm:$0xff]   ;;  %v10093_v32 = vld [vmem:[%s15493_s3 + $0x50] ss:$8 sps:$4 sm:$0xff]  }
 0x382   :  { %v9920_v40 = vpop.permute.xlu0 %9919  ;;  %v2862_v47 = vsel %vm2788_vm6, %v2857_v15, %v2861_v11  ;;  %v2860_v58 = vsel %vm2788_vm6, %v2855_v24, %v2859_v36  ;;  %v2743_v41 = vmax.f32 %v16111_v1, %v2702_v34  ;;  %v2742_v18 = vmax.f32 %v16112_v38, %v2618_v52  ;;  %v10094_v19 = vld [vmem:[%s15493_s3 + $0x64] ss:$8 sps:$4 sm:$0xff]   ;;  %v10096_v3 = vld [vmem:[%s15493_s3 + $0x60] ss:$8 sps:$4 sm:$0xff]   ;;  %v10111_v1 = vld [vmem:[%s15493_s3 + $0xb0] ss:$8 sps:$4 sm:$0xff]  }
 0x383   :  { %v9922_v12 = vunpack.i.h.bf16 %v9920_v40  ;;  %v9921_v9 = vunpack.i.l.bf16 %v9920_v40  ;;  %v2952_v5 = vmax.f32 %v2739_v48, %v2862_v47  ;;  %v2951_v13 = vmax.f32 %v2738_v33, %v2860_v58  ;;  %v10100_v52 = vld [vmem:[%s15493_s3 + $0x84] ss:$8 sps:$4 sm:$0xff]   ;;  %v10102_v34 = vld [vmem:[%s15493_s3 + $0x80] ss:$8 sps:$4 sm:$0xff]   ;;  %v10109_v58 = vld [vmem:[%s15493_s3 + $0xb4] ss:$8 sps:$4 sm:$0xff]  }
 0x384   :  { %v2865_v8 = vrot.slane %v2743_v41, 1  ;;  %v2863_v25 = vrot.slane %v2742_v18, 1  ;;  %v10106_v40 = vld [vmem:[%s15493_s3 + $0xa4] ss:$8 sps:$4 sm:$0xff]   ;;  %v10108_v47 = vld [vmem:[%s15493_s3 + $0xa0] ss:$8 sps:$4 sm:$0xff]  }
 0x385   :  { %v2619_v28 = vsel %vm1293_vm1, %v9921_v9, %v9922_v12  ;;  %v2703_v39 = vsel %vm1293_vm1, %v9922_v12, %v9921_v9  ;;  %v2976_v2 = vpack.c.bf16 %v2952_v5, %v2950_v27  ;;  %v2975_v22 = vpack.c.bf16 %v2951_v13, %v2949_v4  ;;  %v10103_v27 = vld [vmem:[%s15493_s3 + $0x94] ss:$8 sps:$4 sm:$0xff]   ;;  %v10105_v4 = vld [vmem:[%s15493_s3 + $0x90] ss:$8 sps:$4 sm:$0xff]   ;;  %v10114_v38 = vld [vmem:[%s15493_s3 + $0xc0] ss:$8 sps:$4 sm:$0xff]  }
 0x386   :  { %v2744_v0 = vmax.f32 %v16113_v23, %v2619_v28  ;;  %v2745_v62 = vmax.f32 %v16115_v49, %v2703_v39  ;;  %v2866_v57 = vsel %vm2788_vm6, %v2861_v11, %v2865_v8  ;;  %v2864_v30 = vsel %vm2788_vm6, %v2859_v36, %v2863_v25  ;;  %v10097_v36 = vld [vmem:[%s15493_s3 + $0x74] ss:$8 sps:$4 sm:$0xff]   ;;  %v10099_v11 = vld [vmem:[%s15493_s3 + $0x70] ss:$8 sps:$4 sm:$0xff]   ;;  %v10118_v9 = vld [vmem:[%s15493_s3 + $0xe4] ss:$8 sps:$4 sm:$0xff]  }
 0x387   :  { %3705 = vmatprep.subr.bf16.mxu1 %v2976_v2  ;;  %v2954_v10 = vmax.f32 %v2741_v37, %v2866_v57  ;;  %v2953_v17 = vmax.f32 %v2740_v14, %v2864_v30  ;;  %v10085_v14 = vld [vmem:[%s15493_s3 + $0x34] ss:$8 sps:$4 sm:$0xff]   ;;  %v10088_v37 = vld [vmem:[%s15493_s3 + $0x44] ss:$8 sps:$4 sm:$0xff]   ;;  %v10117_v12 = vld [vmem:[%s15493_s3 + $0xd0] ss:$8 sps:$4 sm:$0xff]  }
 0x388   :  { %v2867_v16 = vrot.slane %v2744_v0, 1  ;;  %v2869_v53 = vrot.slane %v2745_v62, 1  ;;  %3706 = vmatpush1.bf16.msra.mxu1 %v2975_v22  ;;  %v10120_v5 = vld [vmem:[%s15493_s3 + $0xe0] ss:$8 sps:$4 sm:$0xff]   ;;  %v10121_v13 = vld [vmem:[%s15493_s3 + $0xf4] ss:$8 sps:$4 sm:$0xff]  }
 0x389   :  { %v10126_v28 = vld [vmem:[%s15493_s3 + $0x100] ss:$8 sps:$4 sm:$0xff]   ;;  %v10127_v39 = vld [vmem:[%s15493_s3 + $0x114] ss:$8 sps:$4 sm:$0xff]   ;;  %v10129_v2 = vld [vmem:[%s15493_s3 + $0x110] ss:$8 sps:$4 sm:$0xff]  }
 0x38a   :  { %v2870_v51 = vsel %vm2788_vm6, %v2865_v8, %v2869_v53  ;;  %v2868_v21 = vsel %vm2788_vm6, %v2863_v25, %v2867_v16  ;;  %v2916_v20 = vsel %vm2788_vm6, %v2869_v53, %v16117_v55  ;;  %v2915_v29 = vsel %vm2788_vm6, %v2867_v16, %v16119_v43  ;;  %v10123_v8 = vld [vmem:[%s15493_s3 + $0xf0] ss:$8 sps:$4 sm:$0xff]   ;;  %v10124_v25 = vld [vmem:[%s15493_s3 + $0x104] ss:$8 sps:$4 sm:$0xff]   ;;  %v10132_v23 = vld [vmem:[%s15493_s3 + $0x120] ss:$8 sps:$4 sm:$0xff]  }
 0x38b   :  { %v2956_v48 = vmax.f32 %v2743_v41, %v2870_v51  ;;  %v2955_v44 = vmax.f32 %v2742_v18, %v2868_v21  ;;  %v2958_v33 = vmax.f32 %v2745_v62, %v2916_v20  ;;  %v2957_v59 = vmax.f32 %v2744_v0, %v2915_v29  ;;  %v10112_v41 = vld [vmem:[%s15493_s3 + $0xc4] ss:$8 sps:$4 sm:$0xff]   ;;  %v10115_v18 = vld [vmem:[%s15493_s3 + $0xd4] ss:$8 sps:$4 sm:$0xff]   ;;  %v10135_v45 = vld [vmem:[%s15493_s3 + $0x130] ss:$8 sps:$4 sm:$0xff]  }
 0x38c   :  { %v10130_v22 = vld [vmem:[%s15493_s3 + $0x124] ss:$8 sps:$4 sm:$0xff]   ;;  %v10133_v0 = vld [vmem:[%s15493_s3 + $0x134] ss:$8 sps:$4 sm:$0xff]   ;;  %v10138_v62 = vld [vmem:[%s15493_s3 + $0x140] ss:$8 sps:$4 sm:$0xff]  }
 0x38d   :  { %v2978_v42 = vpack.c.bf16 %v2956_v48, %v2954_v10  ;;  %v2977_v35 = vpack.c.bf16 %v2955_v44, %v2953_v17  ;;  %v2980_v56 = vpack.c.bf16 %v2958_v33, %v2958_v33  ;;  %v2979_v15 = vpack.c.bf16 %v2957_v59, %v2957_v59  ;;  %v10136_v49 = vld [vmem:[%s15493_s3 + $0x144] ss:$8 sps:$4 sm:$0xff]   ;;  %v10139_v57 = vld [vmem:[%s15493_s3 + $0x154] ss:$8 sps:$4 sm:$0xff]   ;;  %v10141_v30 = vld [vmem:[%s15493_s3 + $0x150] ss:$8 sps:$4 sm:$0xff]  }
 0x38e   :  { %v10142_v16 = vld [vmem:[%s15493_s3 + $0x164] ss:$8 sps:$4 sm:$0xff]   ;;  %v10144_v53 = vld [vmem:[%s15493_s3 + $0x160] ss:$8 sps:$4 sm:$0xff]   ;;  %v10145_v10 = vld [vmem:[%s15493_s3 + $0x174] ss:$8 sps:$4 sm:$0xff]  }
 0x38f   :  { %3707 = vmatprep.subr.bf16.mxu1 %v2978_v42  ;;  %v3684_v24 = vsel %vm3682_vm7, %v2979_v15, 0  ;;  %v10147_v17 = vld [vmem:[%s15493_s3 + $0x170] ss:$8 sps:$4 sm:$0xff]   ;;  %v10148_v51 = vld [vmem:[%s15493_s3 + $0x184] ss:$8 sps:$4 sm:$0xff]  }
 0x390   :  { %3708 = vmatpush1.bf16.msra.mxu1 %v2977_v35  ;;  %v10150_v21 = vld [vmem:[%s15493_s3 + $0x180] ss:$8 sps:$4 sm:$0xff]   ;;  %v10151_v6 = vld [vmem:[%s15493_s3 + $0x194] ss:$8 sps:$4 sm:$0xff]   ;;  %v10153_v55 = vld [vmem:[%s15493_s3 + $0x190] ss:$8 sps:$4 sm:$0xff]  }
 0x391   :  { %8908 = vmatprep.subr.msk.bf16.mxu1 %vm3682_vm7, %v2980_v56  ;;  %v10154_v20 = vld [vmem:[%s15493_s3 + $0x1a4] ss:$8 sps:$4 sm:$0xff]   ;;  %v10156_v46 = vld [vmem:[%s15493_s3 + $0x1a0] ss:$8 sps:$4 sm:$0xff]   ;;  %v10157_v43 = vld [vmem:[%s15493_s3 + $0x1b4] ss:$8 sps:$4 sm:$0xff]  }
 0x392   :  { %v10159_v44 = vld [vmem:[%s15493_s3 + $0x1b0] ss:$8 sps:$4 sm:$0xff]   ;;  %v10160_v59 = vld [vmem:[%s15493_s3 + $0x1c4] ss:$8 sps:$4 sm:$0xff]   ;;  %v10162_v15 = vld [vmem:[%s15493_s3 + $0x1c0] ss:$8 sps:$4 sm:$0xff]  }
 0x394   :  { %3710 = vmatpush1.bf16.msra.mxu1 %v3684_v24 }
 0x397   :  { %3722 = vmatmul.mubr.bf16.vlgmr.msra.gmra.mrb[0].mxu1 %v10076_v54  ;;  %v10163_v54 = vld [vmem:[%s15493_s3 + $0x1d4] ss:$8 sps:$4 sm:$0xff]  }
 0x398   :  { %8910 = vmatprep.mubr.msk.bf16.mxu1 %vm3531_vm5, %v10079_v60 }
 0x39f   :  { %3732 = vmatmul.mubr.bf16.gmra.mrb[4].mxu1 %v10081_v31 }
 0x3a0   :  { %8911 = vmatprep.mubr.msk.bf16.mxu1 %vm3531_vm5, %v10082_v26 }
 0x3a7   :  { %3742 = vmatmul.mubr.bf16.gmra.mrb[8].mxu1 %v10084_v7  ;;  %v10165_v7 = vld [vmem:[%s15493_s3 + $0x1d0] ss:$8 sps:$4 sm:$0xff]  }
 0x3a8   :  { %8912 = vmatprep.mubr.msk.bf16.mxu1 %vm3531_vm5, %v10085_v14 }
 0x3af   :  { %3752 = vmatmul.mubr.bf16.gmra.mrb[12].mxu1 %v10087_v61  ;;  %v10166_v61 = vld [vmem:[%s15493_s3 + $0x1e4] ss:$8 sps:$4 sm:$0xff]  }
 0x3b0   :  { %8913 = vmatprep.mubr.msk.bf16.mxu1 %vm3531_vm5, %v10088_v37 }
 0x3b7   :  { %3762 = vmatmul.mubr.bf16.gmra.mrb[16].mxu1 %v10090_v63 }
 0x3b8   :  { %8914 = vmatprep.mubr.msk.bf16.mxu1 %vm3531_vm5, %v10091_v50 }
 0x3bf   :  { %3772 = vmatmul.mubr.bf16.gmra.mrb[20].mxu1 %v10093_v32  ;;  %v10168_v32 = vld [vmem:[%s15493_s3 + $0x1e0] ss:$8 sps:$4 sm:$0xff]  }
 0x3c0   :  { %8915 = vmatprep.mubr.msk.bf16.mxu1 %vm3531_vm5, %v10094_v19 }
 0x3c7   :  { %3782 = vmatmul.mubr.bf16.gmra.mrb[24].mxu1 %v10096_v3  ;;  %v10169_v3 = vld [vmem:[%s15493_s3 + $0x1f4] ss:$8 sps:$4 sm:$0xff]  }
 0x3c8   :  { %8916 = vmatprep.mubr.msk.bf16.mxu1 %vm3531_vm5, %v10097_v36 }
 0x3cf   :  { %3792 = vmatmul.mubr.bf16.gmra.mrb[28].mxu1 %v10099_v11 }
 0x3d0   :  { %8917 = vmatprep.mubr.msk.bf16.mxu1 %vm3531_vm5, %v10100_v52 }
 0x3d7   :  { %3802 = vmatmul.mubr.bf16.gmra.mrb[32].mxu1 %v10102_v34  ;;  %v10171_v34 = vld [vmem:[%s15493_s3 + $0x1f0] ss:$8 sps:$4 sm:$0xff]  }
 0x3d8   :  { %8918 = vmatprep.mubr.msk.bf16.mxu1 %vm3531_vm5, %v10103_v27 }
 0x3df   :  { %3812 = vmatmul.mubr.bf16.gmra.mrb[36].mxu1 %v10105_v4  ;;  %v10172_v4 = vld [vmem:[%s15493_s3 + $0x204] ss:$8 sps:$4 sm:$0xff]  }
 0x3e0   :  { %8919 = vmatprep.mubr.msk.bf16.mxu1 %vm3531_vm5, %v10106_v40 }
 0x3e7   :  { %3822 = vmatmul.mubr.bf16.gmra.mrb[40].mxu1 %v10108_v47 }
 0x3e8   :  { %8920 = vmatprep.mubr.msk.bf16.mxu1 %vm3531_vm5, %v10109_v58 }
 0x3ef   :  { %3832 = vmatmul.mubr.bf16.gmra.mrb[44].mxu1 %v10111_v1  ;;  %v10174_v1 = vld [vmem:[%s15493_s3 + $0x200] ss:$8 sps:$4 sm:$0xff]  }
 0x3f0   :  { %8921 = vmatprep.mubr.msk.bf16.mxu1 %vm3531_vm5, %v10112_v41 }
 0x3f7   :  { %3842 = vmatmul.mubr.bf16.gmra.mrb[48].mxu1 %v10114_v38  ;;  %v10175_v38 = vld [vmem:[%s15493_s3 + $0x214] ss:$8 sps:$4 sm:$0xff]  }
 0x3f8   :  { %8922 = vmatprep.mubr.msk.bf16.mxu1 %vm3531_vm5, %v10115_v18 }
 0x3ff   :  { %3852 = vmatmul.mubr.bf16.gmra.mrb[52].mxu1 %v10117_v12 }
 0x400   :  { %8923 = vmatprep.mubr.msk.bf16.mxu1 %vm3531_vm5, %v10118_v9 }
 0x407   :  { %3862 = vmatmul.mubr.bf16.gmra.mrb[56].mxu1 %v10120_v5  ;;  %v10177_v5 = vld [vmem:[%s15493_s3 + $0x210] ss:$8 sps:$4 sm:$0xff]  }
 0x408   :  { %8924 = vmatprep.mubr.msk.bf16.mxu1 %vm3531_vm5, %v10121_v13 }
 0x40f   :  { %3872 = vmatmul.mubr.bf16.gmra.mrb[60].mxu1 %v10123_v8  ;;  %v10178_v8 = vld [vmem:[%s15493_s3 + $0x224] ss:$8 sps:$4 sm:$0xff]  }
 0x410   :  { %8925 = vmatprep.mubr.msk.bf16.mxu1 %vm3531_vm5, %v10124_v25 }
 0x417   :  { %3882 = vmatmul.mubr.bf16.gmra.mrb[64].mxu1 %v10126_v28 }
 0x418   :  { %8926 = vmatprep.mubr.msk.bf16.mxu1 %vm3531_vm5, %v10127_v39 }
 0x41f   :  { %3892 = vmatmul.mubr.bf16.gmra.mrb[68].mxu1 %v10129_v2  ;;  %v10180_v2 = vld [vmem:[%s15493_s3 + $0x220] ss:$8 sps:$4 sm:$0xff]  }
 0x420   :  { %8927 = vmatprep.mubr.msk.bf16.mxu1 %vm3531_vm5, %v10130_v22 }
 0x427   :  { %3902 = vmatmul.mubr.bf16.gmra.mrb[72].mxu1 %v10132_v23  ;;  %v10181_v23 = vld [vmem:[%s15493_s3 + $0x234] ss:$8 sps:$4 sm:$0xff]  }
 0x428   :  { %8928 = vmatprep.mubr.msk.bf16.mxu1 %vm3531_vm5, %v10133_v0 }
 0x42f   :  { %3912 = vmatmul.mubr.bf16.gmra.mrb[76].mxu1 %v10135_v45 }
 0x430   :  { %8929 = vmatprep.mubr.msk.bf16.mxu1 %vm3531_vm5, %v10136_v49 }
 0x437   :  { %3922 = vmatmul.mubr.bf16.gmra.mrb[80].mxu1 %v10138_v62  ;;  %v10183_v62 = vld [vmem:[%s15493_s3 + $0x230] ss:$8 sps:$4 sm:$0xff]  }
 0x438   :  { %8930 = vmatprep.mubr.msk.bf16.mxu1 %vm3531_vm5, %v10139_v57 }
 0x43f   :  { %3932 = vmatmul.mubr.bf16.gmra.mrb[84].mxu1 %v10141_v30  ;;  %v10184_v30 = vld [vmem:[%s15493_s3 + $0x244] ss:$8 sps:$4 sm:$0xff]  }
 0x440   :  { %8931 = vmatprep.mubr.msk.bf16.mxu1 %vm3531_vm5, %v10142_v16 }
 0x447   :  { %3942 = vmatmul.mubr.bf16.gmra.mrb[88].mxu1 %v10144_v53 }
 0x448   :  { %8932 = vmatprep.mubr.msk.bf16.mxu1 %vm3531_vm5, %v10145_v10 }
 0x44f   :  { %3952 = vmatmul.mubr.bf16.gmra.mrb[92].mxu1 %v10147_v17  ;;  %v10186_v17 = vld [vmem:[%s15493_s3 + $0x240] ss:$8 sps:$4 sm:$0xff]  }
 0x450   :  { %8933 = vmatprep.mubr.msk.bf16.mxu1 %vm3531_vm5, %v10148_v51 }
 0x457   :  { %3962 = vmatmul.mubr.bf16.gmra.mrb[96].mxu1 %v10150_v21  ;;  %v10187_v21 = vld [vmem:[%s15493_s3 + $0x254] ss:$8 sps:$4 sm:$0xff]  }
 0x458   :  { %8934 = vmatprep.mubr.msk.bf16.mxu1 %vm3531_vm5, %v10151_v6 }
 0x45f   :  { %3972 = vmatmul.mubr.bf16.gmra.mrb[100].mxu1 %v10153_v55 }
 0x460   :  { %8935 = vmatprep.mubr.msk.bf16.mxu1 %vm3531_vm5, %v10154_v20 }
 0x467   :  { %3982 = vmatmul.mubr.bf16.gmra.mrb[104].mxu1 %v10156_v46  ;;  %v10189_v46 = vld [vmem:[%s15493_s3 + $0x250] ss:$8 sps:$4 sm:$0xff]  }
 0x468   :  { %8936 = vmatprep.mubr.msk.bf16.mxu1 %vm3531_vm5, %v10157_v43 }
 0x46a   :  { %v12807_v29 = vpop.f32.mrb[0].mxu1 }
 0x46b   :  { %v12809_v48 = vpop.f32.mrb[1].mxu1 }
 0x46c   :  { %v12814_v33 = vpop.f32.mrb[2].mxu1 }
 0x46d   :  { %v12819_v42 = vpop.f32.mrb[3].mxu1 }
 0x46f   :  { %3992 = vmatmul.mubr.bf16.gmra.mrb[108].mxu1 %v10159_v44  ;;  %v10190_v44 = vld [vmem:[%s15493_s3 + $0x264] ss:$8 sps:$4 sm:$0xff]  }
 0x470   :  { %8937 = vmatprep.mubr.msk.bf16.mxu1 %vm3531_vm5, %v10160_v59 }
 0x472   :  { %v12822_v35 = vpop.f32.mrb[4].mxu1 }
 0x473   :  { %v12824_v56 = vpop.f32.mrb[5].mxu1 }
 0x474   :  { %v12829_v24 = vpop.f32.mrb[6].mxu1 }
 0x475   :  { %v12834_v60 = vpop.f32.mrb[7].mxu1 }
 0x477   :  { %4002 = vmatmul.mubr.bf16.gmra.mrb[112].mxu1 %v10162_v15 }
 0x478   :  { %8938 = vmatprep.mubr.msk.bf16.mxu1 %vm3531_vm5, %v10163_v54 }
 0x47a   :  { %v12837_v31 = vpop.f32.mrb[8].mxu1 }
 0x47b   :  { %v12839_v26 = vpop.f32.mrb[9].mxu1 }
 0x47c   :  { %v12844_v14 = vpop.f32.mrb[10].mxu1 }
 0x47d   :  { %v12849_v37 = vpop.f32.mrb[11].mxu1 }
 0x47f   :  { %4012 = vmatmul.mubr.bf16.gmra.mrb[116].mxu1 %v10165_v7  ;;  %v10192_v7 = vld [vmem:[%s15493_s3 + $0x260] ss:$8 sps:$4 sm:$0xff]  }
 0x480   :  { %8939 = vmatprep.mubr.msk.bf16.mxu1 %vm3531_vm5, %v10166_v61 }
 0x482   :  { %v12852_v63 = vpop.f32.mrb[12].mxu1 }
 0x483   :  { %v12854_v50 = vpop.f32.mrb[13].mxu1 }
 0x484   :  { %v12859_v19 = vpop.f32.mrb[14].mxu1 }
 0x485   :  { %v12864_v36 = vpop.f32.mrb[15].mxu1 }
 0x487   :  { %4022 = vmatmul.mubr.bf16.gmra.mrb[120].mxu1 %v10168_v32  ;;  %v10193_v32 = vld [vmem:[%s15493_s3 + $0x274] ss:$8 sps:$4 sm:$0xff]  }
 0x488   :  { %8940 = vmatprep.mubr.msk.bf16.mxu1 %vm3531_vm5, %v10169_v3 }
 0x48a   :  { %v12867_v11 = vpop.f32.mrb[16].mxu1 }
 0x48b   :  { %v12869_v52 = vpop.f32.mrb[17].mxu1 }
 0x48c   :  { %v12874_v27 = vpop.f32.mrb[18].mxu1 }
 0x48d   :  { %v12879_v40 = vpop.f32.mrb[19].mxu1 }
 0x48f   :  { %4032 = vmatmul.mubr.bf16.gmra.mrb[124].mxu1 %v10171_v34 }
 0x490   :  { %8941 = vmatprep.mubr.msk.bf16.mxu1 %vm3531_vm5, %v10172_v4 }
 0x492   :  { %v12882_v47 = vpop.f32.mrb[20].mxu1 }
 0x493   :  { %v12884_v58 = vpop.f32.mrb[21].mxu1 }
 0x494   :  { %v12889_v41 = vpop.f32.mrb[22].mxu1 }
 0x495   :  { %v12894_v18 = vpop.f32.mrb[23].mxu1 }
 0x496   :  { %16120 = vst [vmem:[#allocation8_spill] sm:$0xff] %v12894_v18 }
 0x497   :  { %4042 = vmatmul.mubr.bf16.gmra.mrb[128].mxu1 %v10174_v1  ;;  %v10195_v1 = vld [vmem:[%s15493_s3 + $0x270] ss:$8 sps:$4 sm:$0xff]  }
 0x498   :  { %8942 = vmatprep.mubr.msk.bf16.mxu1 %vm3531_vm5, %v10175_v38 }
 0x49a   :  { %v12897_v12 = vpop.f32.mrb[24].mxu1 }
 0x49b   :  { %16121 = vst [vmem:[#allocation9_spill] sm:$0xff] %v12897_v12  ;;  %v12899_v9 = vpop.f32.mrb[25].mxu1 }
 0x49c   :  { %16122 = vst [vmem:[#allocation10_spill] sm:$0xff] %v12899_v9  ;;  %v12904_v13 = vpop.f32.mrb[26].mxu1 }
 0x49d   :  { %16123 = vst [vmem:[#allocation11_spill] sm:$0xff] %v12904_v13  ;;  %v12909_v25 = vpop.f32.mrb[27].mxu1 }
 0x49e   :  { %16124 = vst [vmem:[#allocation52_spill] sm:$0xff] %v12909_v25 }
 0x49f   :  { %4052 = vmatmul.mubr.bf16.gmra.mrb[132].mxu1 %v10177_v5 }
 0x4a0   :  { %8943 = vmatprep.mubr.msk.bf16.mxu1 %vm3531_vm5, %v10178_v8  ;;  %v10196_v8 = vld [vmem:[%s15493_s3 + $0x284] ss:$8 sps:$4 sm:$0xff]  }
 0x4a2   :  { %v12912_v28 = vpop.f32.mrb[28].mxu1 }
 0x4a3   :  { %v12914_v39 = vpop.f32.mrb[29].mxu1 }
 0x4a4   :  { %v12919_v22 = vpop.f32.mrb[30].mxu1 }
 0x4a5   :  { %16125 = vst [vmem:[#allocation51_spill] sm:$0xff] %v12919_v22  ;;  %v12924_v0 = vpop.f32.mrb[31].mxu1 }
 0x4a6   :  { %16126 = vst [vmem:[#allocation12_spill] sm:$0xff] %v12924_v0 }
 0x4a7   :  { %4062 = vmatmul.mubr.bf16.gmra.mrb[136].mxu1 %v10180_v2 }
 0x4a8   :  { %8944 = vmatprep.mubr.msk.bf16.mxu1 %vm3531_vm5, %v10181_v23 }
 0x4aa   :  { %v12927_v45 = vpop.f32.mrb[32].mxu1 }
 0x4ab   :  { %16127 = vst [vmem:[#allocation13_spill] sm:$0xff] %v12927_v45  ;;  %v12929_v49 = vpop.f32.mrb[33].mxu1 }
 0x4ac   :  { %16128 = vst [vmem:[#allocation14_spill] sm:$0xff] %v12929_v49  ;;  %v12934_v57 = vpop.f32.mrb[34].mxu1 }
 0x4ad   :  { %16129 = vst [vmem:[#allocation15_spill] sm:$0xff] %v12934_v57  ;;  %v12939_v16 = vpop.f32.mrb[35].mxu1 }
 0x4ae   :  { %16130 = vst [vmem:[#allocation54_spill] sm:$0xff] %v12939_v16 }
 0x4af   :  { %4072 = vmatmul.mubr.bf16.gmra.mrb[140].mxu1 %v10183_v62  ;;  %v10198_v62 = vld [vmem:[%s15493_s3 + $0x280] ss:$8 sps:$4 sm:$0xff]  }
 0x4b0   :  { %8945 = vmatprep.mubr.msk.bf16.mxu1 %vm3531_vm5, %v10184_v30 }
 0x4b2   :  { %v12942_v53 = vpop.f32.mrb[36].mxu1 }
 0x4b3   :  { %16131 = vst [vmem:[#allocation53_spill] sm:$0xff] %v12942_v53  ;;  %v12944_v10 = vpop.f32.mrb[37].mxu1 }
 0x4b4   :  { %16132 = vst [vmem:[#allocation56_spill] sm:$0xff] %v12944_v10  ;;  %v12949_v51 = vpop.f32.mrb[38].mxu1 }
 0x4b5   :  { %16133 = vst [vmem:[#allocation55_spill] sm:$0xff] %v12949_v51  ;;  %v12954_v6 = vpop.f32.mrb[39].mxu1 }
 0x4b6   :  { %16134 = vst [vmem:[#allocation16_spill] sm:$0xff] %v12954_v6 }
 0x4b7   :  { %4082 = vmatmul.mubr.bf16.gmra.mrb[144].mxu1 %v10186_v17 }
 0x4b8   :  { %8946 = vmatprep.mubr.msk.bf16.mxu1 %vm3531_vm5, %v10187_v21  ;;  %v10199_v21 = vld [vmem:[%s15493_s3 + $0x294] ss:$8 sps:$4 sm:$0xff]  }
 0x4ba   :  { %v3823_v55 = vpop.f32.mrb[40].mxu1 }
 0x4bb   :  { %4262 = vrot.lane.b32.xlu1 %v3823_v55, %s10430_s19  ;;  %v3825_v20 = vpop.f32.mrb[41].mxu1 }
 0x4bc   :  { %4264 = vrot.lane.b32.xlu0 %v3825_v20, %s10430_s19  ;;  %v3827_v43 = vpop.f32.mrb[42].mxu1 }
 0x4bd   :  { %v3829_v59 = vpop.f32.mrb[43].mxu1 }
 0x4bf   :  { %4092 = vmatmul.mubr.bf16.gmra.mrb[148].mxu1 %v10189_v46  ;;  %4266 = vrot.lane.b32.xlu1 %v3827_v43, %s10430_s19  ;;  %v10201_v46 = vld [vmem:[%s15493_s3 + $0x290] ss:$8 sps:$4 sm:$0xff]  }
 0x4c0   :  { %4268 = vrot.lane.b32.xlu0 %v3829_v59, %s10430_s19  ;;  %8947 = vmatprep.mubr.msk.bf16.mxu1 %vm3531_vm5, %v10190_v44  ;;  %v10202_v59 = vld [vmem:[%s15493_s3 + $0x2a4] ss:$8 sps:$4 sm:$0xff]  }
 0x4c2   :  { %v3833_v15 = vpop.f32.mrb[44].mxu1 }
 0x4c3   :  { %4270 = vrot.lane.b32.xlu1 %v3833_v15, %s10430_s19  ;;  %v3835_v54 = vpop.f32.mrb[45].mxu1 }
 0x4c4   :  { %4272 = vrot.lane.b32.xlu0 %v3835_v54, %s10430_s19  ;;  %v3837_v61 = vpop.f32.mrb[46].mxu1 }
 0x4c5   :  { %v3839_v3 = vpop.f32.mrb[47].mxu1 }
 0x4c7   :  { %4102 = vmatmul.mubr.bf16.gmra.mrb[152].mxu1 %v10192_v7  ;;  %4276 = vrot.lane.b32.xlu1 %v3839_v3, %s10430_s19  ;;  %v10204_v7 = vld [vmem:[%s15493_s3 + $0x2a0] ss:$8 sps:$4 sm:$0xff]   ;;  %v10205_v3 = vld [vmem:[%s15493_s3 + $0x2b4] ss:$8 sps:$4 sm:$0xff]  }
 0x4c8   :  { %4274 = vrot.lane.b32.xlu0 %v3837_v61, %s10430_s19  ;;  %8948 = vmatprep.mubr.msk.bf16.mxu1 %vm3531_vm5, %v10193_v32 }
 0x4ca   :  { %v3843_v34 = vpop.f32.mrb[48].mxu1 }
 0x4cb   :  { %v3845_v4 = vpop.f32.mrb[49].mxu1 }
 0x4cc   :  { %4278 = vrot.lane.b32.xlu0 %v3843_v34, %s10430_s19  ;;  %4280 = vrot.lane.b32.xlu1 %v3845_v4, %s10430_s19  ;;  %v3847_v38 = vpop.f32.mrb[50].mxu1 }
 0x4cd   :  { %v3849_v5 = vpop.f32.mrb[51].mxu1 }
 0x4cf   :  { %4112 = vmatmul.mubr.bf16.gmra.mrb[156].mxu1 %v10195_v1  ;;  %v10207_v1 = vld [vmem:[%s15493_s3 + $0x2b0] ss:$8 sps:$4 sm:$0xff]  }
 0x4d0   :  { %4282 = vrot.lane.b32.xlu0 %v3847_v38, %s10430_s19  ;;  %4284 = vrot.lane.b32.xlu1 %v3849_v5, %s10430_s19  ;;  %v13028_v5 = vpop.permute.xlu1 %5286 }
 0x4d1   :  { %8949 = vmatprep.mubr.msk.bf16.mxu1 %vm3531_vm5, %v10196_v8  ;;  %16135 = vst [vmem:[#allocation58_spill] sm:$0xff] %v13028_v5 }
 0x4d2   :  { %v3853_v2 = vpop.f32.mrb[52].mxu1 }
 0x4d3   :  { %v3855_v23 = vpop.f32.mrb[53].mxu1 }
 0x4d4   :  { %4286 = vrot.lane.b32.xlu0 %v3853_v2, %s10430_s19  ;;  %4288 = vrot.lane.b32.xlu1 %v3855_v23, %s10430_s19  ;;  %v3857_v30 = vpop.f32.mrb[54].mxu1  ;;  %v10208_v2 = vld [vmem:[%s15493_s3 + $0x2c4] ss:$8 sps:$4 sm:$0xff]  }
 0x4d5   :  { %v3859_v17 = vpop.f32.mrb[55].mxu1 }
 0x4d7   :  { %4122 = vmatmul.mubr.bf16.gmra.mrb[160].mxu1 %v10198_v62  ;;  %v13036_v62 = vpop.permute.xlu1 %5296 }
 0x4d8   :  { %4290 = vrot.lane.b32.xlu0 %v3857_v30, %s10430_s19  ;;  %4292 = vrot.lane.b32.xlu1 %v3859_v17, %s10430_s19  ;;  %16136 = vst [vmem:[#allocation57_spill] sm:$0xff] %v13036_v62  ;;  %v10210_v17 = vld [vmem:[%s15493_s3 + $0x2c0] ss:$8 sps:$4 sm:$0xff]  }
 0x4d9   :  { %8950 = vmatprep.mubr.msk.bf16.mxu1 %vm3531_vm5, %v10199_v21 }
 0x4da   :  { %v3863_v55 = vpop.f32.mrb[56].mxu1 }
 0x4db   :  { %v3865_v20 = vpop.f32.mrb[57].mxu1 }
 0x4dc   :  { %4294 = vrot.lane.b32.xlu0 %v3863_v55, %s10430_s19  ;;  %4296 = vrot.lane.b32.xlu1 %v3865_v20, %s10430_s19  ;;  %v3867_v43 = vpop.f32.mrb[58].mxu1  ;;  %v10211_v20 = vld [vmem:[%s15493_s3 + $0x2d4] ss:$8 sps:$4 sm:$0xff]  }
 0x4dd   :  { %v3869_v44 = vpop.f32.mrb[59].mxu1 }
 0x4df   :  { %4132 = vmatmul.mubr.bf16.gmra.mrb[164].mxu1 %v10201_v46  ;;  %v13048_v46 = vpop.permute.xlu1 %5306 }
 0x4e0   :  { %4298 = vrot.lane.b32.xlu0 %v3867_v43, %s10430_s19  ;;  %4300 = vrot.lane.b32.xlu1 %v3869_v44, %s10430_s19  ;;  %16137 = vst [vmem:[#allocation60_spill] sm:$0xff] %v13048_v46  ;;  %v10213_v43 = vld [vmem:[%s15493_s3 + $0x2d0] ss:$8 sps:$4 sm:$0xff]   ;;  %v13054_v44 = vpop.permute.xlu0 %5291 }
 0x4e1   :  { %8951 = vmatprep.mubr.msk.bf16.mxu1 %vm3531_vm5, %v10202_v59  ;;  %16138 = vst [vmem:[#allocation59_spill] sm:$0xff] %v13054_v44 }
 0x4e2   :  { %v3873_v15 = vpop.f32.mrb[60].mxu1 }
 0x4e3   :  { %v3875_v54 = vpop.f32.mrb[61].mxu1 }
 0x4e4   :  { %4302 = vrot.lane.b32.xlu0 %v3873_v15, %s10430_s19  ;;  %4304 = vrot.lane.b32.xlu1 %v3875_v54, %s10430_s19  ;;  %v3877_v61 = vpop.f32.mrb[62].mxu1  ;;  %v10226_v15 = vld [vmem:[%s15494_s5 + $0xc0] sm:$0xff]  }
 0x4e5   :  { %v3879_v32 = vpop.f32.mrb[63].mxu1  ;;  %9437 = vmatprep.subr.bf16.mxu0 %v10226_v15  ;;  %v10220_v15 = vld [vmem:[%s15493_s3 + $0x304] ss:$8 sps:$4 sm:$0xff]  }
 0x4e7   :  { %4142 = vmatmul.mubr.bf16.gmra.mrb[168].mxu1 %v10204_v7  ;;  %v10214_v7 = vld [vmem:[%s15493_s3 + $0x2e4] ss:$8 sps:$4 sm:$0xff]  }
 0x4e8   :  { %4306 = vrot.lane.b32.xlu0 %v3877_v61, %s10430_s19  ;;  %4308 = vrot.lane.b32.xlu1 %v3879_v32, %s10430_s19  ;;  %v10227_v61 = vld [vmem:[%s15494_s5 + $0x80] sm:$0xff]  }
 0x4e9   :  { %8952 = vmatprep.mubr.msk.bf16.mxu1 %vm3531_vm5, %v10205_v3  ;;  %9438 = vmatpush3.bf16.msra.mxu0 %v10227_v61 }
 0x4ea   :  { %v3883_v34 = vpop.f32.mrb[64].mxu1 }
 0x4eb   :  { %v3885_v4 = vpop.f32.mrb[65].mxu1 }
 0x4ec   :  { %4310 = vrot.lane.b32.xlu0 %v3883_v34, %s10430_s19  ;;  %4312 = vrot.lane.b32.xlu1 %v3885_v4, %s10430_s19  ;;  %v3887_v38 = vpop.f32.mrb[66].mxu1  ;;  %v13067_v34 = vpop.permute.xlu1 %5316 }
 0x4ed   :  { %v3889_v8 = vpop.f32.mrb[67].mxu1  ;;  %16139 = vst [vmem:[#allocation17_spill] sm:$0xff] %v13067_v34  ;;  %v13069_v4 = vpop.permute.xlu0 %5301 }
 0x4ee   :  { %16140 = vst [vmem:[#allocation62_spill] sm:$0xff] %v13069_v4 }
 0x4ef   :  { %4152 = vmatmul.mubr.bf16.gmra.mrb[172].mxu1 %v10207_v1  ;;  %v10216_v1 = vld [vmem:[%s15493_s3 + $0x2e0] ss:$8 sps:$4 sm:$0xff]  }
 0x4f0   :  { %4314 = vrot.lane.b32.xlu0 %v3887_v38, %s10430_s19  ;;  %4316 = vrot.lane.b32.xlu1 %v3889_v8, %s10430_s19 }
 0x4f1   :  { %8953 = vmatprep.mubr.msk.bf16.mxu1 %vm3531_vm5, %v10208_v2  ;;  %v10217_v2 = vld [vmem:[%s15493_s3 + $0x2f4] ss:$8 sps:$4 sm:$0xff]  }
 0x4f2   :  { %v3893_v23 = vpop.f32.mrb[68].mxu1 }
 0x4f3   :  { %v3895_v30 = vpop.f32.mrb[69].mxu1 }
 0x4f4   :  { %4318 = vrot.lane.b32.xlu0 %v3893_v23, %s10430_s19  ;;  %4320 = vrot.lane.b32.xlu1 %v3895_v30, %s10430_s19  ;;  %v3897_v21 = vpop.f32.mrb[70].mxu1  ;;  %v13082_v30 = vpop.permute.xlu1 %5326 }
 0x4f5   :  { %v3899_v55 = vpop.f32.mrb[71].mxu1  ;;  %16141 = vst [vmem:[#allocation61_spill] sm:$0xff] %v13082_v30 }
 0x4f7   :  { %4162 = vmatmul.mubr.bf16.gmra.mrb[176].mxu1 %v10210_v17 }
 0x4f8   :  { %4322 = vrot.lane.b32.xlu0 %v3897_v21, %s10430_s19  ;;  %4324 = vrot.lane.b32.xlu1 %v3899_v55, %s10430_s19  ;;  %v13084_v21 = vpop.permute.xlu0 %5311  ;;  %v10219_v55 = vld [vmem:[%s15493_s3 + $0x2f0] ss:$8 sps:$4 sm:$0xff]  }
 0x4f9   :  { %8954 = vmatprep.mubr.msk.bf16.mxu1 %vm3531_vm5, %v10211_v20  ;;  %16142 = vst [vmem:[#allocation18_spill] sm:$0xff] %v13084_v21 }
 0x4fa   :  { %v3903_v59 = vpop.f32.mrb[72].mxu1 }
 0x4fb   :  { %v3905_v54 = vpop.f32.mrb[73].mxu1 }
 0x4fc   :  { %4326 = vrot.lane.b32.xlu0 %v3903_v59, %s10430_s19  ;;  %4328 = vrot.lane.b32.xlu1 %v3905_v54, %s10430_s19  ;;  %v3907_v32 = vpop.f32.mrb[74].mxu1  ;;  %v13097_v54 = vpop.permute.xlu0 %5321 }
 0x4fd   :  { %v3909_v3 = vpop.f32.mrb[75].mxu1  ;;  %16144 = vst [vmem:[#allocation63_spill] sm:$0xff] %v13097_v54 }
 0x4ff   :  { %4172 = vmatmul.mubr.bf16.gmra.mrb[180].mxu1 %v10213_v43  ;;  %v13092_v43 = vpop.permute.xlu1 %5336 }
 0x500   :  { %4330 = vrot.lane.b32.xlu0 %v3907_v32, %s10430_s19  ;;  %4332 = vrot.lane.b32.xlu1 %v3909_v3, %s10430_s19  ;;  %16143 = vst [vmem:[#allocation64_spill] sm:$0xff] %v13092_v43  ;;  %v10222_v3 = vld [vmem:[%s15493_s3 + $0x300] ss:$8 sps:$4 sm:$0xff]  }
 0x501   :  { %8955 = vmatprep.mubr.msk.bf16.mxu1 %vm3531_vm5, %v10214_v7 }
 0x502   :  { %v3913_v38 = vpop.f32.mrb[76].mxu1 }
 0x503   :  { %v3915_v8 = vpop.f32.mrb[77].mxu1  ;;  %v13103_v32 = vpop.permute.xlu1 %5346 }
 0x504   :  { %4334 = vrot.lane.b32.xlu0 %v3913_v38, %s10430_s19  ;;  %4336 = vrot.lane.b32.xlu1 %v3915_v8, %s10430_s19  ;;  %v3917_v23 = vpop.f32.mrb[78].mxu1  ;;  %16145 = vst [vmem:[#allocation98_spill] sm:$0xff] %v13103_v32 }
 0x505   :  { %v3919_v17 = vpop.f32.mrb[79].mxu1 }
 0x507   :  { %4182 = vmatmul.mubr.bf16.gmra.mrb[184].mxu1 %v10216_v1  ;;  %v13109_v1 = vpop.permute.xlu0 %5331 }
 0x508   :  { %4338 = vrot.lane.b32.xlu1 %v3917_v23, %s10430_s19  ;;  %4340 = vrot.lane.b32.xlu0 %v3919_v17, %s10430_s19  ;;  %16146 = vst [vmem:[#allocation97_spill] sm:$0xff] %v13109_v1 }
 0x509   :  { %8956 = vmatprep.mubr.msk.bf16.mxu1 %vm3531_vm5, %v10217_v2  ;;  %v10223_v2 = vld [vmem:[%s15493_s3 + $0x314] ss:$8 sps:$4 sm:$0xff]  }
 0x50a   :  { %v3923_v20 = vpop.f32.mrb[80].mxu1 }
 0x50b   :  { %v3925_v59 = vpop.f32.mrb[81].mxu1 }
 0x50c   :  { %4522 = vrot.lane.b32.xlu1 %v3923_v20, %s10432_s28  ;;  %4524 = vrot.lane.b32.xlu0 %v3925_v59, %s10432_s28  ;;  %v3927_v7 = vpop.f32.mrb[82].mxu1  ;;  %v13118_v20 = vpop.permute.xlu0 %5341  ;;  %v10225_v59 = vld [vmem:[%s15493_s3 + $0x310] ss:$8 sps:$4 sm:$0xff]  }
 0x50d   :  { %v3929_v61 = vpop.f32.mrb[83].mxu1  ;;  %16148 = vst [vmem:[#allocation65_spill] sm:$0xff] %v13118_v20 }
 0x50f   :  { %4192 = vmatmul.mubr.bf16.gmra.mrb[188].mxu1 %v10219_v55  ;;  %v13116_v55 = vpop.permute.xlu1 %5356 }
 0x510   :  { %4526 = vrot.lane.b32.xlu1 %v3927_v7, %s10432_s28  ;;  %4528 = vrot.lane.b32.xlu0 %v3929_v61, %s10432_s28  ;;  %16147 = vst [vmem:[#allocation66_spill] sm:$0xff] %v13116_v55 }
 0x511   :  { %8957 = vmatprep.mubr.msk.bf16.mxu1 %vm3531_vm5, %v10220_v15 }
 0x512   :  { %v3933_v38 = vpop.f32.mrb[84].mxu1 }
 0x513   :  { %v3935_v8 = vpop.f32.mrb[85].mxu1 }
 0x514   :  { %4530 = vrot.lane.b32.xlu1 %v3933_v38, %s10432_s28  ;;  %4532 = vrot.lane.b32.xlu0 %v3935_v8, %s10432_s28  ;;  %v3937_v23 = vpop.f32.mrb[86].mxu1  ;;  %v13130_v8 = vpop.permute.xlu0 %5351 }
 0x515   :  { %v3939_v17 = vpop.f32.mrb[87].mxu1  ;;  %16150 = vst [vmem:[#allocation67_spill] sm:$0xff] %v13130_v8 }
 0x517   :  { %4202 = vmatmul.mubr.bf16.gmra.mrb[192].mxu1 %v10222_v3  ;;  %v13128_v3 = vpop.permute.xlu1 %5366 }
 0x518   :  { %4534 = vrot.lane.b32.xlu0 %v3937_v23, %s10432_s28  ;;  %4536 = vrot.lane.b32.xlu1 %v3939_v17, %s10432_s28  ;;  %16149 = vst [vmem:[#allocation68_spill] sm:$0xff] %v13128_v3  ;;  %v13136_v55 = vpop.permute.xlu0 %5361 }
 0x519   :  { %8958 = vmatprep.mubr.msk.bf16.mxu1 %vm3531_vm5, %v10223_v2  ;;  %16152 = vst [vmem:[#allocation99_spill] sm:$0xff] %v13136_v55 }
 0x51a   :  { %v3943_v15 = vpop.f32.mrb[88].mxu1 }
 0x51b   :  { %v3945_v7 = vpop.f32.mrb[89].mxu1  ;;  %v13134_v23 = vpop.permute.xlu1 %5376 }
 0x51c   :  { %4538 = vrot.lane.b32.xlu0 %v3943_v15, %s10432_s28  ;;  %4540 = vrot.lane.b32.xlu1 %v3945_v7, %s10432_s28  ;;  %v3947_v61 = vpop.f32.mrb[90].mxu1  ;;  %16151 = vst [vmem:[#allocation100_spill] sm:$0xff] %v13134_v23 }
 0x51d   :  { %v3949_v38 = vpop.f32.mrb[91].mxu1 }
 0x51f   :  { %4212 = vmatmul.mubr.bf16.gmra.mrb[196].mxu1 %v10225_v59  ;;  %v13142_v59 = vpop.permute.xlu1 %5381 }
 0x520   :  { %4542 = vrot.lane.b32.xlu0 %v3947_v61, %s10432_s28  ;;  %4544 = vrot.lane.b32.xlu1 %v3949_v38, %s10432_s28  ;;  %16153 = vst [vmem:[#allocation70_spill] sm:$0xff] %v13142_v59  ;;  %v13144_v61 = vpop.permute.xlu0 %5371 }
 0x521   :  { %16154 = vst [vmem:[#allocation69_spill] sm:$0xff] %v13144_v61 }
 0x522   :  { %v3953_v2 = vpop.f32.mrb[92].mxu1 }
 0x523   :  { %v3955_v17 = vpop.f32.mrb[93].mxu1 }
 0x524   :  { %4546 = vrot.lane.b32.xlu0 %v3953_v2, %s10432_s28  ;;  %4548 = vrot.lane.b32.xlu1 %v3955_v17, %s10432_s28  ;;  %v3957_v15 = vpop.f32.mrb[94].mxu1 }
 0x525   :  { %v3959_v7 = vpop.f32.mrb[95].mxu1 }
 0x528   :  { %4550 = vrot.lane.b32.xlu0 %v3957_v15, %s10432_s28  ;;  %4552 = vrot.lane.b32.xlu1 %v3959_v7, %s10432_s28  ;;  %v10228_v15 = vld [vmem:[%s15494_s5 + $0xc8] sm:$0xff]  }
 0x529   :  { %v10229_v7 = vld [vmem:[%s15494_s5 + $0x88] sm:$0xff]   ;;  %9439 = vmatprep.subr.bf16.mxu0 %v10228_v15 }
 0x52a   :  { %v3963_v38 = vpop.f32.mrb[96].mxu1  ;;  %9440 = vmatpush3.bf16.msra.mxu0 %v10229_v7 }
 0x52b   :  { %v3965_v3 = vpop.f32.mrb[97].mxu1 }
 0x52c   :  { %4554 = vrot.lane.b32.xlu0 %v3963_v38, %s10432_s28  ;;  %4556 = vrot.lane.b32.xlu1 %v3965_v3, %s10432_s28  ;;  %v3967_v23 = vpop.f32.mrb[98].mxu1 }
 0x52d   :  { %v13148_v2 = vpop.permute.xlu1 %4262  ;;  %v3969_v17 = vpop.f32.mrb[99].mxu1 }
 0x52e   :  { %v13156_v59 = vpop.permute.xlu0 %4264 }
 0x530   :  { %4558 = vrot.lane.b32.xlu0 %v3967_v23, %s10432_s28  ;;  %4560 = vrot.lane.b32.xlu1 %v3969_v17, %s10432_s28 }
 0x531   :  { %v13160_v3 = vpop.permute.xlu1 %4266 }
 0x532   :  { %v13162_v38 = vpop.permute.xlu0 %4268  ;;  %v3973_v61 = vpop.f32.mrb[100].mxu1 }
 0x533   :  { %v3975_v55 = vpop.f32.mrb[101].mxu1 }
 0x534   :  { %4562 = vrot.lane.b32.xlu0 %v3973_v61, %s10432_s28  ;;  %4564 = vrot.lane.b32.xlu1 %v3975_v55, %s10432_s28  ;;  %v3977_v8 = vpop.f32.mrb[102].mxu1 }
 0x535   :  { %v13166_v32 = vpop.permute.xlu1 %4270  ;;  %v3979_v20 = vpop.f32.mrb[103].mxu1 }
 0x536   :  { %v13168_v15 = vpop.permute.xlu0 %4272 }
 0x538   :  { %4566 = vrot.lane.b32.xlu0 %v3977_v8, %s10432_s28  ;;  %4568 = vrot.lane.b32.xlu1 %v3979_v20, %s10432_s28 }
 0x539   :  { %v13172_v23 = vpop.permute.xlu1 %4276 }
 0x53a   :  { %v13174_v17 = vpop.permute.xlu0 %4274  ;;  %v3983_v7 = vpop.f32.mrb[104].mxu1 }
 0x53b   :  { %v3985_v25 = vpop.f32.mrb[105].mxu1 }
 0x53c   :  { %4570 = vrot.lane.b32.xlu0 %v3983_v7, %s10432_s28  ;;  %4572 = vrot.lane.b32.xlu1 %v3985_v25, %s10432_s28  ;;  %v3987_v55 = vpop.f32.mrb[106].mxu1 }
 0x53d   :  { %v3989_v61 = vpop.f32.mrb[107].mxu1 }
 0x53e   :  { %v13178_v43 = vpop.permute.xlu0 %4278  ;;  %v13180_v1 = vpop.permute.xlu1 %4280 }
 0x540   :  { %4574 = vrot.lane.b32.xlu0 %v3987_v55, %s10432_s28  ;;  %4576 = vrot.lane.b32.xlu1 %v3989_v61, %s10432_s28 }
 0x542   :  { %v13184_v20 = vpop.permute.xlu0 %4282  ;;  %v13186_v8 = vpop.permute.xlu1 %4284 }
 0x543   :  { %v3993_v30 = vpop.f32.mrb[108].mxu1 }
 0x544   :  { %v3995_v54 = vpop.f32.mrb[109].mxu1  ;;  %4578 = vrot.lane.b32.xlu0 %v3993_v30, %s10432_s28 }
 0x545   :  { %4580 = vrot.lane.b32.xlu1 %v3995_v54, %s10432_s28  ;;  %v3997_v25 = vpop.f32.mrb[110].mxu1 }
 0x546   :  { %v3999_v7 = vpop.f32.mrb[111].mxu1  ;;  %v13190_v34 = vpop.permute.xlu0 %4286 }
 0x547   :  { %v13192_v21 = vpop.permute.xlu1 %4288 }
 0x548   :  { %4582 = vrot.lane.b32.xlu0 %v3997_v25, %s10432_s28 }
 0x549   :  { %4584 = vrot.lane.b32.xlu1 %v3999_v7, %s10432_s28 }
 0x54a   :  { %v13196_v55 = vpop.permute.xlu0 %4290  ;;  %v4003_v61 = vpop.f32.mrb[112].mxu1 }
 0x54b   :  { %v13198_v46 = vpop.permute.xlu1 %4292  ;;  %v4005_v4 = vpop.f32.mrb[113].mxu1 }
 0x54c   :  { %4586 = vrot.lane.b32.xlu0 %v4003_v61, %s10432_s28  ;;  %v4007_v30 = vpop.f32.mrb[114].mxu1 }
 0x54d   :  { %4588 = vrot.lane.b32.xlu1 %v4005_v4, %s10432_s28  ;;  %v4009_v54 = vpop.f32.mrb[115].mxu1 }
 0x54e   :  { %v13202_v62 = vpop.permute.xlu0 %4294 }
 0x54f   :  { %v13204_v44 = vpop.permute.xlu1 %4296 }
 0x550   :  { %4590 = vrot.lane.b32.xlu0 %v4007_v30, %s10432_s28 }
 0x551   :  { %4592 = vrot.lane.b32.xlu1 %v4009_v54, %s10432_s28 }
 0x552   :  { %v13208_v25 = vpop.permute.xlu0 %4298  ;;  %v4013_v7 = vpop.f32.mrb[116].mxu1 }
 0x553   :  { %v13210_v5 = vpop.permute.xlu1 %4300  ;;  %v4015_v6 = vpop.f32.mrb[117].mxu1 }
 0x554   :  { %4594 = vrot.lane.b32.xlu0 %v4013_v7, %s10432_s28  ;;  %v4017_v61 = vpop.f32.mrb[118].mxu1 }
 0x555   :  { %4596 = vrot.lane.b32.xlu1 %v4015_v6, %s10432_s28  ;;  %v4019_v4 = vpop.f32.mrb[119].mxu1 }
 0x556   :  { %v13214_v51 = vpop.permute.xlu0 %4302 }
 0x557   :  { %v13216_v10 = vpop.permute.xlu1 %4304 }
 0x558   :  { %4600 = vrot.lane.b32.xlu0 %v4019_v4, %s10432_s28 }
 0x559   :  { %4598 = vrot.lane.b32.xlu1 %v4017_v61, %s10432_s28  ;;  %v10230_v61 = vld [vmem:[%s15494_s5 + $0xd0] sm:$0xff]  }
 0x55a   :  { %v13220_v30 = vpop.permute.xlu0 %4306  ;;  %v4023_v54 = vpop.f32.mrb[120].mxu1  ;;  %9441 = vmatprep.subr.bf16.mxu0 %v10230_v61 }
 0x55b   :  { %v13222_v53 = vpop.permute.xlu1 %4308  ;;  %v4025_v13 = vpop.f32.mrb[121].mxu1 }
 0x55c   :  { %4782 = vrot.lane.b32.xlu0 %v4023_v54, %s10433_s0  ;;  %v4027_v7 = vpop.f32.mrb[122].mxu1 }
 0x55d   :  { %4784 = vrot.lane.b32.xlu1 %v4025_v13, %s10433_s0  ;;  %v4029_v6 = vpop.f32.mrb[123].mxu1 }
 0x55e   :  { %v13226_v16 = vpop.permute.xlu0 %4310 }
 0x55f   :  { %16155 = vst [vmem:[#allocation102_spill] sm:$0xff] %v13226_v16  ;;  %v13228_v57 = vpop.permute.xlu1 %4312 }
 0x560   :  { %16156 = vst [vmem:[#allocation101_spill] sm:$0xff] %v13228_v57  ;;  %4786 = vrot.lane.b32.xlu0 %v4027_v7, %s10433_s0  ;;  %v10231_v7 = vld [vmem:[%s15494_s5 + $0x90] sm:$0xff]  }
 0x561   :  { %4788 = vrot.lane.b32.xlu1 %v4029_v6, %s10433_s0  ;;  %9442 = vmatpush3.bf16.msra.mxu0 %v10231_v7 }
 0x562   :  { %v13235_v4 = vpop.permute.xlu0 %4314  ;;  %v4033_v49 = vpop.f32.mrb[124].mxu1 }
 0x563   :  { %16157 = vst [vmem:[#allocation21_spill] sm:$0xff] %v13235_v4  ;;  %v13237_v54 = vpop.permute.xlu1 %4316  ;;  %v4035_v45 = vpop.f32.mrb[125].mxu1 }
 0x564   :  { %16158 = vst [vmem:[#allocation72_spill] sm:$0xff] %v13237_v54  ;;  %4790 = vrot.lane.b32.xlu0 %v4033_v49, %s10433_s0  ;;  %v4037_v13 = vpop.f32.mrb[126].mxu1 }
 0x565   :  { %4792 = vrot.lane.b32.xlu1 %v4035_v45, %s10433_s0  ;;  %v4039_v9 = vpop.f32.mrb[127].mxu1 }
 0x566   :  { %v13244_v6 = vpop.permute.xlu0 %4318 }
 0x567   :  { %v13246_v12 = vpop.permute.xlu1 %4320 }
 0x568   :  { %4794 = vrot.lane.b32.xlu0 %v4037_v13, %s10433_s0 }
 0x569   :  { %4796 = vrot.lane.b32.xlu1 %v4039_v9, %s10433_s0 }
 0x56a   :  { %v13250_v61 = vpop.permute.xlu0 %4322  ;;  %v4043_v49 = vpop.f32.mrb[128].mxu1 }
 0x56b   :  { %16159 = vst [vmem:[#allocation71_spill] sm:$0xff] %v13250_v61  ;;  %v13252_v4 = vpop.permute.xlu1 %4324  ;;  %v4045_v45 = vpop.f32.mrb[129].mxu1 }
 0x56c   :  { %16160 = vst [vmem:[#allocation104_spill] sm:$0xff] %v13252_v4  ;;  %4798 = vrot.lane.b32.xlu0 %v4043_v49, %s10433_s0  ;;  %v4047_v54 = vpop.f32.mrb[130].mxu1 }
 0x56d   :  { %4800 = vrot.lane.b32.xlu1 %v4045_v45, %s10433_s0  ;;  %v4049_v18 = vpop.f32.mrb[131].mxu1 }
 0x56e   :  { %v13256_v0 = vpop.permute.xlu0 %4326 }
 0x56f   :  { %16161 = vst [vmem:[#allocation103_spill] sm:$0xff] %v13256_v0  ;;  %v13258_v22 = vpop.permute.xlu1 %4328 }
 0x570   :  { %16162 = vst [vmem:[#allocation20_spill] sm:$0xff] %v13258_v22  ;;  %4802 = vrot.lane.b32.xlu0 %v4047_v54, %s10433_s0 }
 0x571   :  { %4804 = vrot.lane.b32.xlu1 %v4049_v18, %s10433_s0 }
 0x572   :  { %v13262_v9 = vpop.permute.xlu0 %4330  ;;  %v4053_v13 = vpop.f32.mrb[132].mxu1 }
 0x573   :  { %16163 = vst [vmem:[#allocation106_spill] sm:$0xff] %v13262_v9  ;;  %v13264_v7 = vpop.permute.xlu1 %4332  ;;  %v4055_v16 = vpop.f32.mrb[133].mxu1 }
 0x574   :  { %16164 = vst [vmem:[#allocation105_spill] sm:$0xff] %v13264_v7  ;;  %4806 = vrot.lane.b32.xlu0 %v4053_v13, %s10433_s0  ;;  %v4057_v49 = vpop.f32.mrb[134].mxu1 }
 0x575   :  { %4808 = vrot.lane.b32.xlu1 %v4055_v16, %s10433_s0  ;;  %v4059_v45 = vpop.f32.mrb[135].mxu1 }
 0x576   :  { %v13268_v57 = vpop.permute.xlu0 %4334 }
 0x577   :  { %16165 = vst [vmem:[#allocation22_spill] sm:$0xff] %v13268_v57  ;;  %v13270_v0 = vpop.permute.xlu1 %4336 }
 0x578   :  { %16166 = vst [vmem:[#allocation74_spill] sm:$0xff] %v13270_v0  ;;  %4810 = vrot.lane.b32.xlu0 %v4057_v49, %s10433_s0 }
 0x579   :  { %4812 = vrot.lane.b32.xlu1 %v4059_v45, %s10433_s0 }
 0x57a   :  { %v13274_v18 = vpop.permute.xlu0 %4340  ;;  %v4063_v54 = vpop.f32.mrb[136].mxu1 }
 0x57b   :  { %16167 = vst [vmem:[#allocation73_spill] sm:$0xff] %v13274_v18  ;;  %v13276_v9 = vpop.permute.xlu1 %4338  ;;  %v4065_v7 = vpop.f32.mrb[137].mxu1 }
 0x57c   :  { %16168 = vst [vmem:[#allocation108_spill] sm:$0xff] %v13276_v9  ;;  %4814 = vrot.lane.b32.xlu0 %v4063_v54, %s10433_s0  ;;  %v4067_v13 = vpop.f32.mrb[138].mxu1 }
 0x57d   :  { %4816 = vrot.lane.b32.xlu1 %v4065_v7, %s10433_s0  ;;  %v4069_v16 = vpop.f32.mrb[139].mxu1 }
 0x57e   :  { %v13280_v22 = vpop.permute.xlu0 %4524 }
 0x57f   :  { %16169 = vst [vmem:[#allocation107_spill] sm:$0xff] %v13280_v22  ;;  %v13282_v57 = vpop.permute.xlu1 %4522 }
 0x580   :  { %16170 = vst [vmem:[#allocation23_spill] sm:$0xff] %v13282_v57  ;;  %4818 = vrot.lane.b32.xlu0 %v4067_v13, %s10433_s0 }
 0x581   :  { %4820 = vrot.lane.b32.xlu1 %v4069_v16, %s10433_s0 }
 0x582   :  { %v13286_v49 = vpop.permute.xlu0 %4528  ;;  %v4073_v45 = vpop.f32.mrb[140].mxu1 }
 0x583   :  { %16171 = vst [vmem:[#allocation76_spill] sm:$0xff] %v13286_v49  ;;  %v13288_v18 = vpop.permute.xlu1 %4526  ;;  %v4075_v9 = vpop.f32.mrb[141].mxu1 }
 0x584   :  { %16172 = vst [vmem:[#allocation75_spill] sm:$0xff] %v13288_v18  ;;  %4822 = vrot.lane.b32.xlu0 %v4073_v45, %s10433_s0  ;;  %v4077_v54 = vpop.f32.mrb[142].mxu1 }
 0x585   :  { %4824 = vrot.lane.b32.xlu1 %v4075_v9, %s10433_s0  ;;  %v4079_v7 = vpop.f32.mrb[143].mxu1 }
 0x586   :  { %v13292_v0 = vpop.permute.xlu0 %4532 }
 0x587   :  { %16173 = vst [vmem:[#allocation110_spill] sm:$0xff] %v13292_v0  ;;  %v13294_v22 = vpop.permute.xlu1 %4530 }
 0x588   :  { %16174 = vst [vmem:[#allocation109_spill] sm:$0xff] %v13294_v22  ;;  %4826 = vrot.lane.b32.xlu0 %v4077_v54, %s10433_s0 }
 0x589   :  { %4828 = vrot.lane.b32.xlu1 %v4079_v7, %s10433_s0 }
 0x58a   :  { %v13298_v13 = vpop.permute.xlu0 %4534  ;;  %v4083_v16 = vpop.f32.mrb[144].mxu1 }
 0x58b   :  { %16175 = vst [vmem:[#allocation24_spill] sm:$0xff] %v13298_v13  ;;  %v13300_v49 = vpop.permute.xlu1 %4536  ;;  %v4085_v18 = vpop.f32.mrb[145].mxu1 }
 0x58c   :  { %16176 = vst [vmem:[#allocation78_spill] sm:$0xff] %v13300_v49  ;;  %4830 = vrot.lane.b32.xlu0 %v4083_v16, %s10433_s0  ;;  %v4087_v45 = vpop.f32.mrb[146].mxu1 }
 0x58d   :  { %4832 = vrot.lane.b32.xlu1 %v4085_v18, %s10433_s0  ;;  %v4089_v9 = vpop.f32.mrb[147].mxu1 }
 0x58e   :  { %v13304_v57 = vpop.permute.xlu0 %4538 }
 0x58f   :  { %16177 = vst [vmem:[#allocation77_spill] sm:$0xff] %v13304_v57  ;;  %v13306_v0 = vpop.permute.xlu1 %4540 }
 0x590   :  { %16178 = vst [vmem:[#allocation112_spill] sm:$0xff] %v13306_v0  ;;  %4834 = vrot.lane.b32.xlu0 %v4087_v45, %s10433_s0  ;;  %v10232_v45 = vld [vmem:[%s15494_s5 + $0xd8] sm:$0xff]  }
 0x591   :  { %4836 = vrot.lane.b32.xlu1 %v4089_v9, %s10433_s0  ;;  %v10233_v9 = vld [vmem:[%s15494_s5 + $0x98] sm:$0xff]   ;;  %9443 = vmatprep.subr.bf16.mxu0 %v10232_v45 }
 0x592   :  { %v13310_v54 = vpop.permute.xlu0 %4542  ;;  %v4093_v7 = vpop.f32.mrb[148].mxu1  ;;  %9444 = vmatpush3.bf16.msra.mxu0 %v10233_v9 }
 0x593   :  { %16179 = vst [vmem:[#allocation111_spill] sm:$0xff] %v13310_v54  ;;  %v13312_v13 = vpop.permute.xlu1 %4544  ;;  %v4095_v49 = vpop.f32.mrb[149].mxu1 }
 0x594   :  { %16180 = vst [vmem:[#allocation25_spill] sm:$0xff] %v13312_v13  ;;  %4838 = vrot.lane.b32.xlu0 %v4093_v7, %s10433_s0  ;;  %v4097_v16 = vpop.f32.mrb[150].mxu1 }
 0x595   :  { %4840 = vrot.lane.b32.xlu1 %v4095_v49, %s10433_s0  ;;  %v4099_v18 = vpop.f32.mrb[151].mxu1 }
 0x596   :  { %v13316_v22 = vpop.permute.xlu0 %4546 }
 0x597   :  { %16181 = vst [vmem:[#allocation114_spill] sm:$0xff] %v13316_v22  ;;  %v13318_v57 = vpop.permute.xlu1 %4548 }
 0x598   :  { %16182 = vst [vmem:[#allocation113_spill] sm:$0xff] %v13318_v57  ;;  %4842 = vrot.lane.b32.xlu0 %v4097_v16, %s10433_s0 }
 0x599   :  { %4844 = vrot.lane.b32.xlu1 %v4099_v18, %s10433_s0 }
 0x59a   :  { %v13328_v7 = vpop.permute.xlu0 %4550  ;;  %v4103_v49 = vpop.f32.mrb[152].mxu1 }
 0x59b   :  { %16183 = vst [vmem:[#allocation26_spill] sm:$0xff] %v13328_v7  ;;  %v13330_v54 = vpop.permute.xlu1 %4552  ;;  %v4105_v22 = vpop.f32.mrb[153].mxu1 }
 0x59c   :  { %16184 = vst [vmem:[#allocation80_spill] sm:$0xff] %v13330_v54  ;;  %4846 = vrot.lane.b32.xlu0 %v4103_v49, %s10433_s0  ;;  %v4107_v16 = vpop.f32.mrb[154].mxu1 }
 0x59d   :  { %4848 = vrot.lane.b32.xlu1 %v4105_v22, %s10433_s0  ;;  %v4109_v18 = vpop.f32.mrb[155].mxu1 }
 0x59e   :  { %v13334_v57 = vpop.permute.xlu0 %4554 }
 0x59f   :  { %16185 = vst [vmem:[#allocation79_spill] sm:$0xff] %v13334_v57  ;;  %v13336_v13 = vpop.permute.xlu1 %4556 }
 0x5a0   :  { %16186 = vst [vmem:[#allocation116_spill] sm:$0xff] %v13336_v13  ;;  %4850 = vrot.lane.b32.xlu0 %v4107_v16, %s10433_s0 }
 0x5a1   :  { %4852 = vrot.lane.b32.xlu1 %v4109_v18, %s10433_s0 }
 0x5a2   :  { %v13340_v7 = vpop.permute.xlu0 %4558  ;;  %v4113_v54 = vpop.f32.mrb[156].mxu1 }
 0x5a3   :  { %16187 = vst [vmem:[#allocation115_spill] sm:$0xff] %v13340_v7  ;;  %v13342_v0 = vpop.permute.xlu1 %4560  ;;  %v4115_v45 = vpop.f32.mrb[157].mxu1 }
 0x5a4   :  { %16188 = vst [vmem:[#allocation27_spill] sm:$0xff] %v13342_v0  ;;  %4854 = vrot.lane.b32.xlu0 %v4113_v54, %s10433_s0  ;;  %v4117_v9 = vpop.f32.mrb[158].mxu1 }
 0x5a5   :  { %4856 = vrot.lane.b32.xlu1 %v4115_v45, %s10433_s0  ;;  %v4119_v22 = vpop.f32.mrb[159].mxu1 }
 0x5a6   :  { %v13346_v49 = vpop.permute.xlu0 %4562 }
 0x5a7   :  { %16189 = vst [vmem:[#allocation82_spill] sm:$0xff] %v13346_v49  ;;  %v13348_v57 = vpop.permute.xlu1 %4564 }
 0x5a8   :  { %16190 = vst [vmem:[#allocation81_spill] sm:$0xff] %v13348_v57  ;;  %4858 = vrot.lane.b32.xlu0 %v4117_v9, %s10433_s0 }
 0x5a9   :  { %4860 = vrot.lane.b32.xlu1 %v4119_v22, %s10433_s0 }
 0x5aa   :  { %v13352_v16 = vpop.permute.xlu0 %4566  ;;  %v4123_v18 = vpop.f32.mrb[160].mxu1 }
 0x5ab   :  { %16191 = vst [vmem:[#allocation118_spill] sm:$0xff] %v13352_v16  ;;  %v13354_v7 = vpop.permute.xlu1 %4568  ;;  %v4125_v0 = vpop.f32.mrb[161].mxu1 }
 0x5ac   :  { %16192 = vst [vmem:[#allocation117_spill] sm:$0xff] %v13354_v7  ;;  %5043 = vrot.lane.b32.xlu0 %v4123_v18, %s10434_s26  ;;  %v4127_v54 = vpop.f32.mrb[162].mxu1 }
 0x5ad   :  { %5045 = vrot.lane.b32.xlu1 %v4125_v0, %s10434_s26  ;;  %v4129_v45 = vpop.f32.mrb[163].mxu1 }
 0x5ae   :  { %v13358_v49 = vpop.permute.xlu0 %4570 }
 0x5af   :  { %16193 = vst [vmem:[#allocation28_spill] sm:$0xff] %v13358_v49  ;;  %v13360_v57 = vpop.permute.xlu1 %4572 }
 0x5b0   :  { %16194 = vst [vmem:[#allocation84_spill] sm:$0xff] %v13360_v57  ;;  %5047 = vrot.lane.b32.xlu0 %v4127_v54, %s10434_s26 }
 0x5b1   :  { %5049 = vrot.lane.b32.xlu1 %v4129_v45, %s10434_s26 }
 0x5b2   :  { %v13364_v9 = vpop.permute.xlu0 %4574  ;;  %v4133_v22 = vpop.f32.mrb[164].mxu1 }
 0x5b3   :  { %16195 = vst [vmem:[#allocation83_spill] sm:$0xff] %v13364_v9  ;;  %v13366_v16 = vpop.permute.xlu1 %4576  ;;  %v4135_v7 = vpop.f32.mrb[165].mxu1 }
 0x5b4   :  { %16196 = vst [vmem:[#allocation29_spill] sm:$0xff] %v13366_v16  ;;  %5051 = vrot.lane.b32.xlu0 %v4133_v22, %s10434_s26  ;;  %v4137_v18 = vpop.f32.mrb[166].mxu1 }
 0x5b5   :  { %5053 = vrot.lane.b32.xlu1 %v4135_v7, %s10434_s26  ;;  %v4139_v0 = vpop.f32.mrb[167].mxu1 }
 0x5b6   :  { %v13370_v13 = vpop.permute.xlu0 %4578 }
 0x5b7   :  { %v13372_v49 = vpop.permute.xlu1 %4580 }
 0x5b8   :  { %5055 = vrot.lane.b32.xlu0 %v4137_v18, %s10434_s26 }
 0x5b9   :  { %5057 = vrot.lane.b32.xlu1 %v4139_v0, %s10434_s26 }
 0x5ba   :  { %v13376_v54 = vpop.permute.xlu0 %4582  ;;  %v4143_v45 = vpop.f32.mrb[168].mxu1 }
 0x5bb   :  { %16197 = vst [vmem:[#allocation30_spill] sm:$0xff] %v13376_v54  ;;  %v13378_v9 = vpop.permute.xlu1 %4584  ;;  %v4145_v16 = vpop.f32.mrb[169].mxu1 }
 0x5bc   :  { %16198 = vst [vmem:[#allocation86_spill] sm:$0xff] %v13378_v9  ;;  %5059 = vrot.lane.b32.xlu0 %v4143_v45, %s10434_s26  ;;  %v4147_v22 = vpop.f32.mrb[170].mxu1 }
 0x5bd   :  { %5061 = vrot.lane.b32.xlu1 %v4145_v16, %s10434_s26  ;;  %v4149_v7 = vpop.f32.mrb[171].mxu1 }
 0x5be   :  { %v13382_v57 = vpop.permute.xlu0 %4586 }
 0x5bf   :  { %16199 = vst [vmem:[#allocation85_spill] sm:$0xff] %v13382_v57  ;;  %v13384_v61 = vpop.permute.xlu1 %4588 }
 0x5c0   :  { %16200 = vst [vmem:[#allocation120_spill] sm:$0xff] %v13384_v61  ;;  %5063 = vrot.lane.b32.xlu0 %v4147_v22, %s10434_s26 }
 0x5c1   :  { %5065 = vrot.lane.b32.xlu1 %v4149_v7, %s10434_s26 }
 0x5c2   :  { %v13388_v18 = vpop.permute.xlu0 %4590  ;;  %v4153_v0 = vpop.f32.mrb[172].mxu1 }
 0x5c3   :  { %16201 = vst [vmem:[#allocation119_spill] sm:$0xff] %v13388_v18  ;;  %v13390_v54 = vpop.permute.xlu1 %4592  ;;  %v4155_v9 = vpop.f32.mrb[173].mxu1 }
 0x5c4   :  { %16202 = vst [vmem:[#allocation31_spill] sm:$0xff] %v13390_v54  ;;  %5067 = vrot.lane.b32.xlu0 %v4153_v0, %s10434_s26  ;;  %v4157_v45 = vpop.f32.mrb[174].mxu1 }
 0x5c5   :  { %5069 = vrot.lane.b32.xlu1 %v4155_v9, %s10434_s26  ;;  %v4159_v16 = vpop.f32.mrb[175].mxu1 }
 0x5c6   :  { %v13394_v4 = vpop.permute.xlu0 %4594 }
 0x5c7   :  { %16203 = vst [vmem:[#allocation88_spill] sm:$0xff] %v13394_v4  ;;  %v13396_v57 = vpop.permute.xlu1 %4596 }
 0x5c8   :  { %16204 = vst [vmem:[#allocation87_spill] sm:$0xff] %v13396_v57  ;;  %5071 = vrot.lane.b32.xlu0 %v4157_v45, %s10434_s26 }
 0x5c9   :  { %5073 = vrot.lane.b32.xlu1 %v4159_v16, %s10434_s26 }
 0x5ca   :  { %v13400_v22 = vpop.permute.xlu0 %4600  ;;  %v4163_v7 = vpop.f32.mrb[176].mxu1 }
 0x5cb   :  { %16205 = vst [vmem:[#allocation121_spill] sm:$0xff] %v13400_v22  ;;  %v13402_v18 = vpop.permute.xlu1 %4598  ;;  %v4165_v54 = vpop.f32.mrb[177].mxu1 }
 0x5cc   :  { %16206 = vst [vmem:[#allocation32_spill] sm:$0xff] %v13402_v18  ;;  %5075 = vrot.lane.b32.xlu0 %v4163_v7, %s10434_s26  ;;  %v4167_v0 = vpop.f32.mrb[178].mxu1  ;;  %v10234_v7 = vld [vmem:[%s15494_s5 + $0xe0] sm:$0xff]  }
 0x5cd   :  { %5077 = vrot.lane.b32.xlu1 %v4165_v54, %s10434_s26  ;;  %v4169_v9 = vpop.f32.mrb[179].mxu1  ;;  %v10235_v54 = vld [vmem:[%s15494_s5 + $0xa0] sm:$0xff]   ;;  %9445 = vmatprep.subr.bf16.mxu0 %v10234_v7 }
 0x5ce   :  { %v13406_v61 = vpop.permute.xlu0 %4782  ;;  %9446 = vmatpush3.bf16.msra.mxu0 %v10235_v54 }
 0x5cf   :  { %16207 = vst [vmem:[#allocation90_spill] sm:$0xff] %v13406_v61  ;;  %v13408_v4 = vpop.permute.xlu1 %4784 }
 0x5d0   :  { %16208 = vst [vmem:[#allocation89_spill] sm:$0xff] %v13408_v4  ;;  %5079 = vrot.lane.b32.xlu0 %v4167_v0, %s10434_s26 }
 0x5d1   :  { %5081 = vrot.lane.b32.xlu1 %v4169_v9, %s10434_s26 }
 0x5d2   :  { %v13412_v45 = vpop.permute.xlu0 %4786  ;;  %v4173_v16 = vpop.f32.mrb[180].mxu1 }
 0x5d3   :  { %16209 = vst [vmem:[#allocation33_spill] sm:$0xff] %v13412_v45  ;;  %v13414_v22 = vpop.permute.xlu1 %4788  ;;  %v4175_v18 = vpop.f32.mrb[181].mxu1 }
 0x5d4   :  { %16210 = vst [vmem:[#allocation123_spill] sm:$0xff] %v13414_v22  ;;  %5083 = vrot.lane.b32.xlu0 %v4173_v16, %s10434_s26  ;;  %v4177_v61 = vpop.f32.mrb[182].mxu1 }
 0x5d5   :  { %5085 = vrot.lane.b32.xlu1 %v4175_v18, %s10434_s26  ;;  %v4179_v0 = vpop.f32.mrb[183].mxu1 }
 0x5d6   :  { %v13424_v9 = vpop.permute.xlu0 %4790 }
 0x5d7   :  { %16211 = vst [vmem:[#allocation122_spill] sm:$0xff] %v13424_v9  ;;  %v13426_v45 = vpop.permute.xlu1 %4792 }
 0x5d8   :  { %16212 = vst [vmem:[#allocation34_spill] sm:$0xff] %v13426_v45  ;;  %5087 = vrot.lane.b32.xlu0 %v4177_v61, %s10434_s26 }
 0x5d9   :  { %5089 = vrot.lane.b32.xlu1 %v4179_v0, %s10434_s26 }
 0x5da   :  { %v13430_v22 = vpop.permute.xlu0 %4794  ;;  %v4183_v4 = vpop.f32.mrb[184].mxu1 }
 0x5db   :  { %16213 = vst [vmem:[#allocation41_spill] sm:$0xff] %v13430_v22  ;;  %v13432_v57 = vpop.permute.xlu1 %4796  ;;  %v4185_v16 = vpop.f32.mrb[185].mxu1 }
 0x5dc   :  { %16214 = vst [vmem:[#allocation92_spill] sm:$0xff] %v13432_v57  ;;  %5091 = vrot.lane.b32.xlu0 %v4183_v4, %s10434_s26  ;;  %v4187_v18 = vpop.f32.mrb[186].mxu1 }
 0x5dd   :  { %5093 = vrot.lane.b32.xlu1 %v4185_v16, %s10434_s26  ;;  %v4189_v7 = vpop.f32.mrb[187].mxu1 }
 0x5de   :  { %v13436_v9 = vpop.permute.xlu0 %4798 }
 0x5df   :  { %16215 = vst [vmem:[#allocation91_spill] sm:$0xff] %v13436_v9  ;;  %v13438_v54 = vpop.permute.xlu1 %4800 }
 0x5e0   :  { %5095 = vrot.lane.b32.xlu0 %v4187_v18, %s10434_s26 }
 0x5e1   :  { %5097 = vrot.lane.b32.xlu1 %v4189_v7, %s10434_s26 }
 0x5e2   :  { %v13442_v61 = vpop.permute.xlu0 %4802  ;;  %v4193_v0 = vpop.f32.mrb[188].mxu1 }
 0x5e3   :  { %16216 = vst [vmem:[#allocation125_spill] sm:$0xff] %v13442_v61  ;;  %v13444_v22 = vpop.permute.xlu1 %4804  ;;  %v4195_v57 = vpop.f32.mrb[189].mxu1 }
 0x5e4   :  { %16217 = vst [vmem:[#allocation124_spill] sm:$0xff] %v13444_v22  ;;  %5099 = vrot.lane.b32.xlu0 %v4193_v0, %s10434_s26  ;;  %v4197_v4 = vpop.f32.mrb[190].mxu1  ;;  %v10236_v0 = vld [vmem:[%s15494_s5 + $0x40] sm:$0xff]  }
 0x5e5   :  { %5101 = vrot.lane.b32.xlu1 %v4195_v57, %s10434_s26  ;;  %v4199_v16 = vpop.f32.mrb[191].mxu1  ;;  %9361 = vmatprep.subr.bf16.mxu1 %v10236_v0 }
 0x5e6   :  { %v13448_v45 = vpop.permute.xlu0 %4806 }
 0x5e7   :  { %16218 = vst [vmem:[#allocation35_spill] sm:$0xff] %v13448_v45  ;;  %v13450_v9 = vpop.permute.xlu1 %4808 }
 0x5e8   :  { %16219 = vst [vmem:[#allocation44_spill] sm:$0xff] %v13450_v9  ;;  %5103 = vrot.lane.b32.xlu0 %v4197_v4, %s10434_s26 }
 0x5e9   :  { %5105 = vrot.lane.b32.xlu1 %v4199_v16, %s10434_s26 }
 0x5ea   :  { %v13454_v18 = vpop.permute.xlu0 %4810  ;;  %v4203_v7 = vpop.f32.mrb[192].mxu1 }
 0x5eb   :  { %16220 = vst [vmem:[#allocation94_spill] sm:$0xff] %v13454_v18  ;;  %v13456_v61 = vpop.permute.xlu1 %4812  ;;  %v4205_v22 = vpop.f32.mrb[193].mxu1  ;;  %v10237_v18 = vld [vmem:[%s15494_s5] sm:$0xff]  }
 0x5ec   :  { %16221 = vst [vmem:[#allocation93_spill] sm:$0xff] %v13456_v61  ;;  %5107 = vrot.lane.b32.xlu0 %v4203_v7, %s10434_s26  ;;  %v4207_v57 = vpop.f32.mrb[194].mxu1  ;;  %9362 = vmatpush3.bf16.msra.mxu1 %v10237_v18  ;;  %v4422_v18 = vsel %vm1567_vm2, %v13156_v59, %v13148_v2 }
 0x5ed   :  { %5109 = vrot.lane.b32.xlu1 %v4205_v22, %s10434_s26  ;;  %v4209_v45 = vpop.f32.mrb[195].mxu1 }
 0x5ee   :  { %v13463_v4 = vpop.permute.xlu0 %4814 }
 0x5ef   :  { %16222 = vst [vmem:[#allocation43_spill] sm:$0xff] %v13463_v4  ;;  %v13465_v16 = vpop.permute.xlu1 %4816 }
 0x5f0   :  { %16223 = vst [vmem:[#allocation3_spill] sm:$0xff] %v13465_v16  ;;  %5111 = vrot.lane.b32.xlu0 %v4207_v57, %s10434_s26 }
 0x5f1   :  { %5113 = vrot.lane.b32.xlu1 %v4209_v45, %s10434_s26  ;;  %v4342_v45 = vsel %vm1567_vm2, %v13148_v2, %v13156_v59  ;;  %v4344_v59 = vsel %vm1567_vm2, %v13166_v32, %v13168_v15  ;;  %v4424_v2 = vsel %vm1567_vm2, %v13168_v15, %v13166_v32  ;;  %v4346_v32 = vsel %vm1567_vm2, %v13178_v43, %v13180_v1 }
 0x5f2   :  { %v13472_v61 = vpop.permute.xlu0 %4818  ;;  %v4213_v7 = vpop.f32.mrb[196].mxu1  ;;  %v4427_v15 = vsel %vm1567_vm2, %v13186_v8, %v13184_v20 }
 0x5f3   :  { %16224 = vst [vmem:[#allocation2_spill] sm:$0xff] %v13472_v61  ;;  %v13474_v9 = vpop.permute.xlu1 %4820  ;;  %v4215_v22 = vpop.f32.mrb[197].mxu1  ;;  %v13502_v61 = vadd.f32 %v4422_v18, %v12809_v48  ;;  %v4425_v48 = vsel %vm1567_vm2, %v13172_v23, %v13174_v17 }
 0x5f4   :  { %16225 = vst [vmem:[#allocation36_spill] sm:$0xff] %v13474_v9  ;;  %5115 = vrot.lane.b32.xlu0 %v4213_v7, %s10434_s26  ;;  %v13477_v0 = vpop.f32.mrb[198].mxu1  ;;  %v4343_v7 = vsel %vm1567_vm2, %v13160_v3, %v13162_v38  ;;  %v13554_v18 = vadd.f32 %v4425_v48, %v12834_v60  ;;  %v13574_v60 = vadd.f32 %v4427_v15, %v12849_v37 }
 0x5f5   :  { %5117 = vrot.lane.b32.xlu1 %v4215_v22, %s10434_s26  ;;  %v13480_v4 = vpop.f32.mrb[199].mxu1  ;;  %v4423_v22 = vsel %vm1567_vm2, %v13162_v38, %v13160_v3  ;;  %v13513_v9 = vadd.f32 %v4343_v7, %v12814_v33  ;;  %v4426_v33 = vsel %vm1567_vm2, %v13180_v1, %v13178_v43  ;;  %v4428_v43 = vsel %vm1567_vm2, %v13192_v21, %v13190_v34 }
 0x5f6   :  { %v13482_v16 = vpop.permute.xlu0 %4822  ;;  %v13516_v3 = vadd.f32 %v4423_v22, %v12819_v42  ;;  %v4347_v42 = vsel %vm1567_vm2, %v13184_v20, %v13186_v8  ;;  %v13565_v8 = vadd.f32 %v4346_v32, %v12837_v31  ;;  %v4350_v31 = vsel %vm1567_vm2, %v13202_v62, %v13204_v44 }
 0x5f7   :  { %16226 = vst [vmem:[#allocation46_spill] sm:$0xff] %v13482_v16  ;;  %v13490_v57 = vpop.permute.xlu1 %4824  ;;  %v13499_v16 = vadd.f32 %v4342_v45, %v12807_v29  ;;  %v4345_v29 = vsel %vm1567_vm2, %v13174_v17, %v13172_v23  ;;  %v13539_v23 = vadd.f32 %v4344_v59, %v12822_v35  ;;  %v13542_v17 = vadd.f32 %v4424_v2, %v12824_v56 }
 0x5f8   :  { %16227 = vst [vmem:[#allocation96_spill] sm:$0xff] %v13490_v57  ;;  %v4348_v45 = vsel %vm1567_vm2, %v13190_v34, %v13192_v21  ;;  %v13551_v1 = vadd.f32 %v4345_v29, %v12829_v24  ;;  %v4349_v35 = vsel %vm1567_vm2, %v13196_v55, %v13198_v46  ;;  %v4429_v56 = vsel %vm1567_vm2, %v13198_v46, %v13196_v55  ;;  %v10238_v55 = vld [vmem:[%s15494_s5 + $0xe8] sm:$0xff]  }
 0x5f9   :  { %v13568_v34 = vadd.f32 %v4426_v33, %v12839_v26  ;;  %v13571_v24 = vadd.f32 %v4347_v42, %v12844_v14  ;;  %v13579_v7 = vadd.f32 %v4348_v45, %v12852_v63  ;;  %v13582_v46 = vadd.f32 %v4428_v43, %v12854_v50  ;;  %9447 = vmatprep.subr.bf16.mxu0 %v10238_v55  ;;  %v16229_v33 = vld [vmem:[#allocation104_spill] sm:$0xff]  ;;  %v16231_v42 = vld [vmem:[#allocation101_spill] sm:$0xff]  ;;  %v16233_v45 = vld [vmem:[#allocation86_spill] sm:$0xff] }
 0x5fa   :  { %v13510_v57 = vpop.permute.xlu0 %4826  ;;  %v4430_v26 = vsel %vm1567_vm2, %v13204_v44, %v13202_v62  ;;  %v13591_v14 = vadd.f32 %v4349_v35, %v12859_v19  ;;  %v13594_v37 = vadd.f32 %v4429_v56, %v12864_v36  ;;  %v4351_v63 = vsel %vm1567_vm2, %v13208_v25, %v13210_v5  ;;  %v10239_v19 = vld [vmem:[%s15494_s5 + $0xa8] sm:$0xff]   ;;  %v16234_v43 = vld [vmem:[#allocation30_spill] sm:$0xff]  ;;  %v16236_v55 = vld [vmem:[#allocation12_spill] sm:$0xff] }
 0x5fb   :  { %v13524_v38 = vpop.permute.xlu1 %4828  ;;  %v4431_v50 = vsel %vm1567_vm2, %v13210_v5, %v13208_v25  ;;  %v4352_v36 = vsel %vm1567_vm2, %v13214_v51, %v13216_v10  ;;  %v4432_v62 = vsel %vm1567_vm2, %v13216_v10, %v13214_v51  ;;  %v4356_v5 = vsel %vm1567_vm2, %v13244_v6, %v13246_v12  ;;  %9448 = vmatpush3.bf16.msra.mxu0 %v10239_v19 }
 0x5fc   :  { %v4436_v44 = vsel %vm1567_vm2, %v13246_v12, %v13244_v6  ;;  %v13623_v22 = vadd.f32 %v4350_v31, %v12867_v11  ;;  %v13626_v59 = vadd.f32 %v4430_v26, %v12869_v52  ;;  %v4353_v10 = vsel %vm1567_vm2, %v13220_v30, %v13222_v53 }
 0x5fd   :  { %v13634_v2 = vadd.f32 %v4351_v63, %v12874_v27  ;;  %v13637_v12 = vadd.f32 %v4431_v50, %v12879_v40  ;;  %v4616_v11 = vsel %vm2115_vm4, %v13370_v13, %v13372_v49  ;;  %v4696_v52 = vsel %vm2115_vm4, %v13372_v49, %v13370_v13  ;;  %v16230_v13 = vld [vmem:[#allocation71_spill] sm:$0xff] }
 0x5fe   :  { %v13562_v20 = vpop.permute.xlu0 %4830  ;;  %v13646_v6 = vadd.f32 %v4352_v36, %v12882_v47  ;;  %v13649_v29 = vadd.f32 %v4432_v62, %v12884_v58  ;;  %v4470_v27 = vadd.f32 %v4356_v5, %v12912_v28  ;;  %v4471_v40 = vadd.f32 %v4436_v44, %v12914_v39  ;;  %v16232_v28 = vld [vmem:[#allocation102_spill] sm:$0xff]  ;;  %v16235_v63 = vld [vmem:[#allocation51_spill] sm:$0xff]  ;;  %v16239_v5 = vld [vmem:[#allocation8_spill] sm:$0xff] }
 0x5ff   :  { %v13576_v21 = vpop.permute.xlu1 %4832  ;;  %v4433_v48 = vsel %vm1567_vm2, %v13222_v53, %v13220_v30  ;;  %v13657_v32 = vadd.f32 %v4353_v10, %v12889_v41  ;;  %v4357_v49 = vsel %vm1567_vm2, %v16230_v13, %v16229_v33  ;;  %v4437_v47 = vsel %vm1567_vm2, %v16229_v33, %v16230_v13  ;;  %v16240_v10 = vld [vmem:[#allocation9_spill] sm:$0xff] }
 0x600   :  { %v4354_v39 = vsel %vm1567_vm2, %v16232_v28, %v16231_v42  ;;  %v4434_v53 = vsel %vm1567_vm2, %v16231_v42, %v16232_v28  ;;  %v4730_v30 = vadd.f32 %v4616_v11, %v4470_v27  ;;  %v4731_v41 = vadd.f32 %v4696_v52, %v4471_v40  ;;  %v16241_v52 = vld [vmem:[#allocation20_spill] sm:$0xff]  ;;  %v16242_v27 = vld [vmem:[#allocation103_spill] sm:$0xff]  ;;  %v16245_v42 = vld [vmem:[#allocation21_spill] sm:$0xff] }
 0x601   :  { %v4617_v35 = vsel %vm2115_vm4, %v16234_v43, %v16233_v45  ;;  %v4697_v56 = vsel %vm2115_vm4, %v16233_v45, %v16234_v43  ;;  %v4472_v50 = vadd.f32 %v4357_v49, %v16235_v63  ;;  %v4473_v19 = vadd.f32 %v4437_v47, %v16236_v55  ;;  %v16243_v49 = vld [vmem:[#allocation10_spill] sm:$0xff] }
 0x602   :  { %v13620_v25 = vpop.permute.xlu0 %4834  ;;  %v13686_v44 = vadd.f32 %v4433_v48, %v16239_v5  ;;  %v13689_v11 = vadd.f32 %v4354_v39, %v16240_v10  ;;  %v4358_v40 = vsel %vm1567_vm2, %v16242_v27, %v16241_v52  ;;  %v4438_v33 = vsel %vm1567_vm2, %v16241_v52, %v16242_v27  ;;  %v16249_v55 = vld [vmem:[#allocation14_spill] sm:$0xff] }
 0x603   :  { %16228 = vst [vmem:[#allocation95_spill] sm:$0xff] %v13620_v25  ;;  %v13631_v51 = vpop.permute.xlu1 %4836  ;;  %v13698_v47 = vadd.f32 %v4434_v53, %v16243_v49  ;;  %v4732_v28 = vadd.f32 %v4617_v35, %v4472_v50  ;;  %v4475_v5 = vadd.f32 %v4438_v33, %v16249_v55  ;;  %v16252_v50 = vld [vmem:[#allocation105_spill] sm:$0xff] }
 0x606   :  { %v4839_v58 = vpop.permute.xlu0 %4838 }
 0x607   :  { %v4841_v15 = vpop.permute.xlu1 %4840 }
 0x608   :  { %v4877_v31 = vsel %vm4862_vm8, %v4839_v58, %v4841_v15  ;;  %v4957_v26 = vsel %vm4862_vm8, %v4841_v15, %v4839_v58  ;;  %v16244_v58 = vld [vmem:[#allocation72_spill] sm:$0xff]  ;;  %v16247_v15 = vld [vmem:[#allocation85_spill] sm:$0xff] }
 0x609   :  { %v13681_v36 = vadd.f32 %v4877_v31, %v4730_v30  ;;  %v13683_v62 = vadd.f32 %v4957_v26, %v4731_v41  ;;  %v4355_v48 = vsel %vm1567_vm2, %v16245_v42, %v16244_v58  ;;  %v4733_v30 = vadd.f32 %v4697_v56, %v4473_v19  ;;  %v16246_v41 = vld [vmem:[#allocation120_spill] sm:$0xff]  ;;  %v16248_v26 = vld [vmem:[#allocation13_spill] sm:$0xff]  ;;  %v16253_v19 = vld [vmem:[#allocation106_spill] sm:$0xff] }
 0x60a   :  { %v4843_v13 = vpop.permute.xlu0 %4842  ;;  %v4618_v45 = vsel %vm2115_vm4, %v16247_v15, %v16246_v41  ;;  %v4698_v43 = vsel %vm2115_vm4, %v16246_v41, %v16247_v15  ;;  %v4474_v63 = vadd.f32 %v4358_v40, %v16248_v26  ;;  %v13720_v56 = vsel %vm1567_vm2, %v16244_v58, %v16245_v42  ;;  %v16254_v40 = vld [vmem:[#allocation74_spill] sm:$0xff]  ;;  %v16257_v58 = vld [vmem:[#allocation108_spill] sm:$0xff] }
 0x60b   :  { %16237 = vst [vmem:[#allocation4_spill] sm:$0xff] %v13681_v36  ;;  %16238 = vst [vmem:[#allocation42_spill] sm:$0xff] %v13683_v62  ;;  %v4845_v39 = vpop.permute.xlu1 %4844  ;;  %v4359_v52 = vsel %vm1567_vm2, %v16253_v19, %v16252_v50  ;;  %v4439_v27 = vsel %vm1567_vm2, %v16252_v50, %v16253_v19  ;;  %v4735_v41 = vadd.f32 %v4698_v43, %v4475_v5  ;;  %v10240_v43 = vld [vmem:[%s15494_s5 + $0x48] sm:$0xff]   ;;  %v16264_v36 = vld [vmem:[#allocation56_spill] sm:$0xff] }
 0x60c   :  { %v4878_v31 = vsel %vm4862_vm8, %v4843_v13, %v4845_v39  ;;  %v4958_v53 = vsel %vm4862_vm8, %v4845_v39, %v4843_v13  ;;  %v16255_v13 = vld [vmem:[#allocation22_spill] sm:$0xff]  ;;  %v4734_v39 = vadd.f32 %v4618_v45, %v4474_v63  ;;  %v16262_v63 = vld [vmem:[#allocation11_spill] sm:$0xff]  ;;  %9363 = vmatprep.subr.bf16.mxu1 %v10240_v43  ;;  %v10242_v43 = vld [vmem:[%s15494_s5 + $0x50] sm:$0xff]  }
 0x60d   :  { %v13713_v10 = vadd.f32 %v4878_v31, %v4732_v28  ;;  %v13715_v35 = vadd.f32 %v4958_v53, %v4733_v30  ;;  %v4360_v33 = vsel %vm1567_vm2, %v16255_v13, %v16254_v40  ;;  %v4440_v28 = vsel %vm1567_vm2, %v16254_v40, %v16255_v13  ;;  %v16256_v30 = vld [vmem:[#allocation73_spill] sm:$0xff]  ;;  %v16258_v31 = vld [vmem:[#allocation31_spill] sm:$0xff] }
 0x60e   :  { %v4847_v49 = vpop.permute.xlu0 %4846  ;;  %v4361_v42 = vsel %vm1567_vm2, %v16257_v58, %v16256_v30  ;;  %v16259_v53 = vld [vmem:[#allocation119_spill] sm:$0xff]  ;;  %v13755_v5 = vadd.f32 %v4355_v48, %v16262_v63  ;;  %v4479_v25 = vadd.f32 %v4440_v28, %v16264_v36  ;;  %v16269_v63 = vld [vmem:[#allocation88_spill] sm:$0xff] }
 0x60f   :  { %16250 = vst [vmem:[#allocation37_spill] sm:$0xff] %v13713_v10  ;;  %16251 = vst [vmem:[#allocation5_spill] sm:$0xff] %v13715_v35  ;;  %v4849_v15 = vpop.permute.xlu1 %4848  ;;  %v4619_v26 = vsel %vm2115_vm4, %v16259_v53, %v16258_v31  ;;  %v4699_v55 = vsel %vm2115_vm4, %v16258_v31, %v16259_v53  ;;  %v16260_v40 = vld [vmem:[#allocation15_spill] sm:$0xff]  ;;  %v16261_v35 = vld [vmem:[#allocation54_spill] sm:$0xff] }
 0x610   :  { %v4879_v50 = vsel %vm4862_vm8, %v4847_v49, %v4849_v15  ;;  %v4959_v19 = vsel %vm4862_vm8, %v4849_v15, %v4847_v49  ;;  %v4476_v13 = vadd.f32 %v4359_v52, %v16260_v40  ;;  %v4477_v10 = vadd.f32 %v4439_v27, %v16261_v35  ;;  %v16263_v31 = vld [vmem:[#allocation53_spill] sm:$0xff]  ;;  %v16265_v27 = vld [vmem:[#allocation55_spill] sm:$0xff] }
 0x611   :  { %v13747_v62 = vadd.f32 %v4879_v50, %v4734_v39  ;;  %v13749_v45 = vadd.f32 %v4959_v19, %v4735_v41  ;;  %v4478_v53 = vadd.f32 %v4360_v33, %v16263_v31  ;;  %v4441_v52 = vsel %vm1567_vm2, %v16256_v30, %v16257_v58  ;;  %v16266_v39 = vld [vmem:[#allocation107_spill] sm:$0xff] }
 0x612   :  { %v4851_v35 = vpop.permute.xlu0 %4850  ;;  %v4480_v49 = vadd.f32 %v4361_v42, %v16265_v27  ;;  %v16267_v41 = vld [vmem:[#allocation23_spill] sm:$0xff]  ;;  %v4736_v50 = vadd.f32 %v4619_v26, %v4476_v13  ;;  %v4737_v19 = vadd.f32 %v4699_v55, %v4477_v10  ;;  %v16270_v42 = vld [vmem:[#allocation16_spill] sm:$0xff] }
 0x613   :  { %v4602_v15 = vsel %vm2115_vm4, %v16267_v41, %v16266_v39  ;;  %v4853_v40 = vpop.permute.xlu1 %4852  ;;  %v16268_v48 = vld [vmem:[#allocation87_spill] sm:$0xff]  ;;  %v4481_v10 = vadd.f32 %v4441_v52, %v16270_v42  ;;  %v4682_v26 = vsel %vm2115_vm4, %v16266_v39, %v16267_v41  ;;  %v16276_v39 = vld [vmem:[#allocation109_spill] sm:$0xff] }
 0x614   :  { %v4620_v33 = vsel %vm2115_vm4, %v16269_v63, %v16268_v48  ;;  %v4700_v36 = vsel %vm2115_vm4, %v16268_v48, %v16269_v63  ;;  %v4880_v28 = vsel %vm4862_vm8, %v4851_v35, %v4853_v40  ;;  %v4960_v30 = vsel %vm4862_vm8, %v4853_v40, %v4851_v35  ;;  %v10241_v58 = vld [vmem:[%s15494_s5 + $0x8] sm:$0xff]   ;;  %v16273_v35 = vld [vmem:[#allocation76_spill] sm:$0xff]  ;;  %v16275_v48 = vld [vmem:[#allocation110_spill] sm:$0xff] }
 0x615   :  { %v13781_v55 = vadd.f32 %v4880_v28, %v4736_v50  ;;  %v13783_v13 = vadd.f32 %v4960_v30, %v4737_v19  ;;  %v4702_v31 = vadd.f32 %v4602_v15, %v13499_v16  ;;  %v16274_v27 = vld [vmem:[#allocation75_spill] sm:$0xff]  ;;  %v4604_v41 = vsel %vm2115_vm4, %v16276_v39, %v16275_v48  ;;  %9364 = vmatpush3.bf16.msra.mxu1 %v10241_v58  ;;  %v16277_v63 = vld [vmem:[#allocation78_spill] sm:$0xff]  ;;  %v16278_v16 = vld [vmem:[#allocation24_spill] sm:$0xff] }
 0x616   :  { %v4603_v40 = vsel %vm2115_vm4, %v16274_v27, %v16273_v35  ;;  %v4683_v52 = vsel %vm2115_vm4, %v16273_v35, %v16274_v27  ;;  %v4855_v50 = vpop.permute.xlu0 %4854  ;;  %v4684_v19 = vsel %vm2115_vm4, %v16275_v48, %v16276_v39  ;;  %v4605_v15 = vsel %vm2115_vm4, %v16278_v16, %v16277_v63  ;;  %9365 = vmatprep.subr.bf16.mxu1 %v10242_v43  ;;  %v16280_v35 = vld [vmem:[#allocation32_spill] sm:$0xff] }
 0x617   :  { %16271 = vst [vmem:[#allocation19_spill] sm:$0xff] %v13781_v55  ;;  %16272 = vst [vmem:[#allocation48_spill] sm:$0xff] %v13783_v13  ;;  %v4738_v28 = vadd.f32 %v4620_v33, %v4478_v53  ;;  %v4739_v30 = vadd.f32 %v4700_v36, %v4479_v25  ;;  %v4857_v42 = vpop.permute.xlu1 %4856  ;;  %v16279_v13 = vld [vmem:[#allocation121_spill] sm:$0xff]  ;;  %v10243_v39 = vld [vmem:[%s15494_s5 + $0x10] sm:$0xff]   ;;  %v4703_v25 = vadd.f32 %v4682_v26, %v13502_v61 }
 0x618   :  { %v4621_v27 = vsel %vm2115_vm4, %v16280_v35, %v16279_v13  ;;  %v4701_v58 = vsel %vm2115_vm4, %v16279_v13, %v16280_v35  ;;  %v4881_v55 = vsel %vm4862_vm8, %v4855_v50, %v4857_v42  ;;  %v4961_v48 = vsel %vm4862_vm8, %v4857_v42, %v4855_v50  ;;  %v16281_v61 = vld [vmem:[#allocation112_spill] sm:$0xff]  ;;  %v16282_v26 = vld [vmem:[#allocation77_spill] sm:$0xff] }
 0x619   :  { %v4704_v53 = vadd.f32 %v4603_v40, %v13513_v9  ;;  %v13817_v33 = vadd.f32 %v4881_v55, %v4738_v28  ;;  %v13819_v36 = vadd.f32 %v4961_v48, %v4739_v30  ;;  %v4705_v43 = vadd.f32 %v4683_v52, %v13516_v3  ;;  %9366 = vmatpush3.bf16.msra.mxu1 %v10243_v39  ;;  %v16283_v52 = vld [vmem:[#allocation89_spill] sm:$0xff] }
 0x61a   :  { %v13823_v13 = vadd.f32 %v4604_v41, %v13539_v23  ;;  %v13826_v35 = vadd.f32 %v4684_v19, %v13542_v17  ;;  %v4685_v50 = vsel %vm2115_vm4, %v16277_v63, %v16278_v16  ;;  %v4859_v42 = vpop.permute.xlu0 %4858  ;;  %v13832_v9 = vadd.f32 %v4605_v15, %v13551_v1  ;;  %v10244_v17 = vld [vmem:[%s15494_s5 + $0x58] sm:$0xff]   ;;  %v16284_v41 = vld [vmem:[#allocation90_spill] sm:$0xff] }
 0x61b   :  { %v4606_v55 = vsel %vm2115_vm4, %v16282_v26, %v16281_v61  ;;  %v4740_v3 = vadd.f32 %v4621_v27, %v4480_v49  ;;  %v4741_v40 = vadd.f32 %v4701_v58, %v4481_v10  ;;  %v4861_v23 = vpop.permute.xlu1 %4860  ;;  %v4863_v19 = vsel %vm4862_vm8, %v16284_v41, %v16283_v52  ;;  %v10245_v49 = vld [vmem:[%s15494_s5 + $0x18] sm:$0xff]   ;;  %9367 = vmatprep.subr.bf16.mxu1 %v10244_v17  ;;  %v16286_v58 = vld [vmem:[#allocation111_spill] sm:$0xff] }
 0x61c   :  { %v4943_v1 = vsel %vm4862_vm8, %v16283_v52, %v16284_v41  ;;  %v4882_v63 = vsel %vm4862_vm8, %v4859_v42, %v4861_v23  ;;  %v4962_v16 = vsel %vm4862_vm8, %v4861_v23, %v4859_v42  ;;  %v4686_v10 = vsel %vm2115_vm4, %v16281_v61, %v16282_v26  ;;  %v16285_v27 = vld [vmem:[#allocation25_spill] sm:$0xff]  ;;  %v16288_v23 = vld [vmem:[#allocation114_spill] sm:$0xff]  ;;  %v16289_v17 = vld [vmem:[#allocation123_spill] sm:$0xff] }
 0x61d   :  { %v13854_v15 = vadd.f32 %v4882_v63, %v4740_v3  ;;  %v13856_v28 = vadd.f32 %v4962_v16, %v4741_v40  ;;  %v13859_v30 = vadd.f32 %v4685_v50, %v13554_v18  ;;  %v4607_v48 = vsel %vm2115_vm4, %v16286_v58, %v16285_v27  ;;  %v16287_v42 = vld [vmem:[#allocation113_spill] sm:$0xff]  ;;  %9368 = vmatpush3.bf16.msra.mxu1 %v10245_v49  ;;  %v10246_v63 = vld [vmem:[%s15494_s5 + $0x60] sm:$0xff]  }
 0x61e   :  { %v4687_v39 = vsel %vm2115_vm4, %v16285_v27, %v16286_v58  ;;  %v4608_v61 = vsel %vm2115_vm4, %v16288_v23, %v16287_v42  ;;  %v5044_v26 = vpop.permute.xlu0 %5043  ;;  %v4963_v3 = vadd.f32 %v4863_v19, %v4702_v31  ;;  %v4964_v40 = vadd.f32 %v4943_v1, %v4703_v25  ;;  %v16290_v52 = vld [vmem:[#allocation33_spill] sm:$0xff]  ;;  %v10247_v19 = vld [vmem:[%s15494_s5 + $0x20] sm:$0xff]   ;;  %9369 = vmatprep.subr.bf16.mxu1 %v10246_v63 }
 0x61f   :  { %v4864_v18 = vsel %vm4862_vm8, %v16290_v52, %v16289_v17  ;;  %v4944_v50 = vsel %vm4862_vm8, %v16289_v17, %v16290_v52  ;;  %v5046_v41 = vpop.permute.xlu1 %5045  ;;  %v13880_v16 = vadd.f32 %v4606_v55, %v13565_v8  ;;  %v13883_v49 = vadd.f32 %v4686_v10, %v13568_v34  ;;  %v16291_v52 = vld [vmem:[#allocation34_spill] sm:$0xff] }
 0x620   :  { %v5124_v31 = vsel %vm5123_vm9, %v5044_v26, %v5046_v41  ;;  %v5204_v25 = vsel %vm5123_vm9, %v5046_v41, %v5044_v26  ;;  %v13891_v1 = vadd.f32 %v4607_v48, %v13571_v24  ;;  %v4688_v27 = vsel %vm2115_vm4, %v16287_v42, %v16288_v23  ;;  %v16292_v24 = vld [vmem:[#allocation122_spill] sm:$0xff]  ;;  %v10249_v41 = vld [vmem:[%s15494_s5 + $0x28] sm:$0xff]  }
 0x621   :  { %v5224_v8 = vadd.f32 %v5124_v31, %v4963_v3  ;;  %v5225_v55 = vadd.f32 %v5204_v25, %v4964_v40  ;;  %v13897_v34 = vadd.f32 %v4687_v39, %v13574_v60  ;;  %v13900_v10 = vadd.f32 %v4608_v61, %v13579_v7  ;;  %9370 = vmatpush3.bf16.msra.mxu1 %v10247_v19  ;;  %v16293_v23 = vld [vmem:[#allocation58_spill] sm:$0xff]  ;;  %v16294_v39 = vld [vmem:[#allocation80_spill] sm:$0xff] }
 0x622   :  { %v4965_v58 = vadd.f32 %v4864_v18, %v4704_v53  ;;  %v4966_v26 = vadd.f32 %v4944_v50, %v4705_v43  ;;  %v5048_v17 = vpop.permute.xlu0 %5047  ;;  %v4865_v48 = vsel %vm4862_vm8, %v16292_v24, %v16291_v52  ;;  %v4945_v42 = vsel %vm4862_vm8, %v16291_v52, %v16292_v24  ;;  %v10248_v53 = vld [vmem:[%s15494_s5 + $0x68] sm:$0xff]   ;;  %v16295_v61 = vld [vmem:[#allocation26_spill] sm:$0xff] }
 0x623   :  { %v13909_v3 = vadd.f32 %v16293_v23, %v5224_v8  ;;  %v13912_v60 = vadd.f32 %v16293_v23, %v5225_v55  ;;  %v5050_v7 = vpop.permute.xlu1 %5049  ;;  %v13918_v43 = vadd.f32 %v4688_v27, %v13582_v46  ;;  %v4609_v40 = vsel %vm2115_vm4, %v16295_v61, %v16294_v39  ;;  %9371 = vmatprep.subr.bf16.mxu1 %v10248_v53  ;;  %v16296_v55 = vld [vmem:[#allocation92_spill] sm:$0xff]  ;;  %v16298_v23 = vld [vmem:[#allocation59_spill] sm:$0xff] }
 0x624   :  { %v5125_v18 = vsel %vm5123_vm9, %v5048_v17, %v5050_v7  ;;  %v5205_v50 = vsel %vm5123_vm9, %v5050_v7, %v5048_v17  ;;  %v4689_v46 = vsel %vm2115_vm4, %v16294_v39, %v16295_v61  ;;  %v4967_v27 = vadd.f32 %v4865_v48, %v13823_v13  ;;  %v16297_v17 = vld [vmem:[#allocation41_spill] sm:$0xff]  ;;  %v10250_v48 = vld [vmem:[%s15494_s5 + $0x70] sm:$0xff]   ;;  %v16299_v39 = vld [vmem:[#allocation91_spill] sm:$0xff] }
 0x625   :  { %v5424_v63 = vmax.f32 %v13909_v3, 0.0  ;;  %v15756_v31 = vmax.f32 %v13912_v60, 0.0  ;;  %v5226_v25 = vadd.f32 %v5125_v18, %v4965_v58  ;;  %v5227_v19 = vadd.f32 %v5205_v50, %v4966_v26  ;;  %9372 = vmatpush3.bf16.msra.mxu1 %v10249_v41  ;;  %v10252_v41 = vld [vmem:[%s15494_s5 + $0x30] sm:$0xff]  }
 0x626   :  { %v4968_v8 = vadd.f32 %v4945_v42, %v13826_v35  ;;  %v4866_v52 = vsel %vm4862_vm8, %v16297_v17, %v16296_v55  ;;  %v5052_v24 = vpop.permute.xlu0 %5051  ;;  %v4946_v58 = vsel %vm4862_vm8, %v16296_v55, %v16297_v17  ;;  %v10251_v42 = vld [vmem:[%s15494_s5 + $0xf0] sm:$0xff]   ;;  %v13958_v53 = vadd.f32 %v4609_v40, %v13591_v14  ;;  %9373 = vmatprep.subr.bf16.mxu1 %v10250_v48 }
 0x627   :  { %v9923_v26 = vpack.i.bf16 %v15756_v31, %v5424_v63  ;;  %v13946_v7 = vadd.f32 %v16298_v23, %v5226_v25  ;;  %v13949_v13 = vadd.f32 %v16298_v23, %v5227_v19  ;;  %v5054_v35 = vpop.permute.xlu1 %5053  ;;  %v4867_v61 = vsel %vm4862_vm8, %v16299_v39, %v13438_v54  ;;  %v10253_v25 = vld [vmem:[%s15494_s5 + $0xb0] sm:$0xff]   ;;  %9449 = vmatprep.subr.bf16.mxu0 %v10251_v42  ;;  %v10254_v42 = vld [vmem:[%s15494_s5 + $0x78] sm:$0xff]  }
 0x628   :  { %v5126_v18 = vsel %vm5123_vm9, %v5052_v24, %v5054_v35  ;;  %v5206_v50 = vsel %vm5123_vm9, %v5054_v35, %v5052_v24  ;;  %v13975_v17 = vadd.f32 %v4689_v46, %v13594_v37  ;;  %v4969_v24 = vadd.f32 %v4866_v52, %v13832_v9  ;;  %9450 = vmatpush3.bf16.msra.mxu0 %v10253_v25  ;;  %v16302_v46 = vld [vmem:[#allocation79_spill] sm:$0xff] }
 0x629   :  { %v5426_v19 = vmax.f32 %v13946_v7, 0.0  ;;  %v5427_v14 = vmax.f32 %v13949_v13, 0.0  ;;  %v5228_v40 = vadd.f32 %v5126_v18, %v4967_v27  ;;  %v5229_v55 = vadd.f32 %v5206_v50, %v4968_v8  ;;  %9924 = vrot.lane.b32.xlu0 %v9923_v26, %s10430_s19  ;;  %9374 = vmatpush3.bf16.msra.mxu1 %v10252_v41  ;;  %v16300_v8 = vld [vmem:[#allocation57_spill] sm:$0xff]  ;;  %v8628_v7 = vld [vmem:[%s15497_s11] sm:$0xff] }
 0x62a   :  { %v4970_v23 = vadd.f32 %v4946_v58, %v13859_v30  ;;  %v5056_v35 = vpop.permute.xlu0 %5055  ;;  %v4947_v31 = vsel %vm4862_vm8, %v13438_v54, %v16299_v39  ;;  %v16301_v30 = vld [vmem:[#allocation116_spill] sm:$0xff]  ;;  %v4971_v58 = vadd.f32 %v4867_v61, %v13880_v16  ;;  %v10255_v39 = vld [vmem:[%s15494_s5 + $0xf8] sm:$0xff]   ;;  %9375 = vmatprep.subr.bf16.mxu1 %v10254_v42 }
 0x62b   :  { %v9928_v27 = vpack.i.bf16 %v5427_v14, %v5426_v19  ;;  %v13987_v26 = vadd.f32 %v16300_v8, %v5228_v40  ;;  %v13990_v37 = vadd.f32 %v16300_v8, %v5229_v55  ;;  %v5058_v9 = vpop.permute.xlu1 %5057  ;;  %v4610_v52 = vsel %vm2115_vm4, %v16302_v46, %v16301_v30  ;;  %v10256_v16 = vld [vmem:[%s15494_s5 + $0x38] sm:$0xff]   ;;  %v16303_v55 = vld [vmem:[#allocation124_spill] sm:$0xff]  ;;  %9451 = vmatprep.subr.bf16.mxu0 %v10255_v39 }
 0x62c   :  { %v5127_v54 = vsel %vm5123_vm9, %v5056_v35, %v5058_v9  ;;  %v5207_v48 = vsel %vm5123_vm9, %v5058_v9, %v5056_v35  ;;  %v10257_v61 = vld [vmem:[%s15494_s5 + $0xb8] sm:$0xff]   ;;  %v4972_v40 = vadd.f32 %v4947_v31, %v13883_v49  ;;  %v16305_v9 = vld [vmem:[#allocation62_spill] sm:$0xff] }
 0x62d   :  { %v15758_v18 = vmax.f32 %v13987_v26, 0.0  ;;  %v15757_v50 = vmax.f32 %v13990_v37, 0.0  ;;  %v5230_v41 = vadd.f32 %v5127_v54, %v4969_v24  ;;  %v5231_v25 = vadd.f32 %v5207_v48, %v4970_v23  ;;  %9929 = vrot.lane.b32.xlu1 %v9928_v27, %s10430_s19  ;;  %v16304_v35 = vld [vmem:[#allocation125_spill] sm:$0xff]  ;;  %9376 = vmatpush3.bf16.msra.mxu1 %v10256_v16  ;;  %v16307_v16 = vld [vmem:[#allocation44_spill] sm:$0xff] }
 0x62e   :  { %v4868_v8 = vsel %vm4862_vm8, %v16304_v35, %v16303_v55  ;;  %v4948_v24 = vsel %vm4862_vm8, %v16303_v55, %v16304_v35  ;;  %v5060_v23 = vpop.permute.xlu0 %5059  ;;  %9452 = vmatpush3.bf16.msra.mxu0 %v10257_v61  ;;  %v4690_v48 = vsel %vm2115_vm4, %v16301_v30, %v16302_v46  ;;  %v16306_v55 = vmov 0   ;;  %v16308_v61 = vld [vmem:[#allocation35_spill] sm:$0xff] }
 0x62f   :  { %v9933_v27 = vpack.i.bf16 %v15757_v50, %v15758_v18  ;;  %v14025_v54 = vadd.f32 %v16305_v9, %v5230_v41  ;;  %v14028_v49 = vadd.f32 %v16305_v9, %v5231_v25  ;;  %v5062_v31 = vpop.permute.xlu1 %5061  ;;  %6574 = vmatprep.subr.bf16.mxu1 %v16306_v55  ;;  %6763 = vmatprep.subr.bf16.mxu0 %v16306_v55 }
 0x630   :  { %v5128_v42 = vsel %vm5123_vm9, %v5060_v23, %v5062_v31  ;;  %v5208_v39 = vsel %vm5123_vm9, %v5062_v31, %v5060_v23  ;;  %v14038_v41 = vadd.f32 %v4610_v52, %v13623_v22  ;;  %v4973_v30 = vadd.f32 %v4868_v8, %v13891_v1  ;;  %v16310_v8 = vld [vmem:[#allocation27_spill] sm:$0xff] }
 0x631   :  { %v5232_v25 = vadd.f32 %v5128_v42, %v4971_v58  ;;  %v5233_v35 = vadd.f32 %v5208_v39, %v4972_v40  ;;  %9934 = vrot.lane.b32.xlu0 %v9933_v27, %s10430_s19  ;;  %5121 = vrot.lane.b32.xlu1 %v13480_v4, %s10434_s26  ;;  %v4974_v46 = vadd.f32 %v4948_v24, %v13897_v34  ;;  %v15766_v58 = vmax.f32 %v14025_v54, 0.0  ;;  %v16309_v27 = vld [vmem:[#allocation60_spill] sm:$0xff]  ;;  %v16311_v24 = vld [vmem:[#allocation115_spill] sm:$0xff] }
 0x632   :  { %v4869_v23 = vsel %vm4862_vm8, %v16308_v61, %v16307_v16  ;;  %v4949_v22 = vsel %vm4862_vm8, %v16307_v16, %v16308_v61  ;;  %v5064_v52 = vpop.permute.xlu0 %5063  ;;  %v15761_v40 = vmax.f32 %v14028_v49, 0.0  ;;  %v4719_v34 = vadd.f32 %v4690_v48, %v13626_v59  ;;  %v16312_v48 = vld [vmem:[#allocation93_spill] sm:$0xff] }
 0x633   :  { %v14054_v9 = vadd.f32 %v16309_v27, %v5232_v25  ;;  %v14057_v4 = vadd.f32 %v16309_v27, %v5233_v35  ;;  %v5066_v1 = vpop.permute.xlu1 %5065  ;;  %v4611_v31 = vsel %vm2115_vm4, %v16311_v24, %v16310_v8  ;;  %v4975_v35 = vadd.f32 %v4869_v23, %v13900_v10  ;;  %v16313_v27 = vld [vmem:[#allocation94_spill] sm:$0xff] }
 0x634   :  { %v5129_v42 = vsel %vm5123_vm9, %v5064_v52, %v5066_v1  ;;  %v5209_v39 = vsel %vm5123_vm9, %v5066_v1, %v5064_v52  ;;  %v4976_v59 = vadd.f32 %v4949_v22, %v13918_v43  ;;  %v4870_v18 = vsel %vm4862_vm8, %v16313_v27, %v16312_v48  ;;  %v16314_v10 = vld [vmem:[#allocation18_spill] sm:$0xff] }
 0x635   :  { %v15760_v16 = vmax.f32 %v14054_v9, 0.0  ;;  %v15759_v61 = vmax.f32 %v14057_v4, 0.0  ;;  %v5234_v25 = vadd.f32 %v5129_v42, %v4973_v30  ;;  %v5235_v50 = vadd.f32 %v5209_v39, %v4974_v46  ;;  %5119 = vrot.lane.b32.xlu0 %v13477_v0, %s10434_s26 }
 0x636   :  { %v4950_v52 = vsel %vm4862_vm8, %v16312_v48, %v16313_v27  ;;  %v5068_v1 = vpop.permute.xlu0 %5067  ;;  %v9938_v30 = vpack.i.bf16 %v15761_v40, %v15766_v58  ;;  %v4691_v22 = vsel %vm2115_vm4, %v16310_v8, %v16311_v24  ;;  %v4720_v42 = vadd.f32 %v4611_v31, %v13634_v2  ;;  %v16317_v31 = vld [vmem:[#allocation3_spill] sm:$0xff] }
 0x637   :  { %v9943_v0 = vpack.i.bf16 %v15759_v61, %v15760_v16  ;;  %v14086_v43 = vadd.f32 %v16314_v10, %v5234_v25  ;;  %v14089_v46 = vadd.f32 %v16314_v10, %v5235_v50  ;;  %v5070_v23 = vpop.permute.xlu1 %5069  ;;  %v16315_v50 = vld [vmem:[#allocation81_spill] sm:$0xff]  ;;  %v16316_v10 = vld [vmem:[#allocation82_spill] sm:$0xff]  ;;  %v4977_v2 = vadd.f32 %v4870_v18, %v13958_v53 }
 0x638   :  { %v5130_v39 = vsel %vm5123_vm9, %v5068_v1, %v5070_v23  ;;  %v5210_v48 = vsel %vm5123_vm9, %v5070_v23, %v5068_v1  ;;  %v4612_v8 = vsel %vm2115_vm4, %v16316_v10, %v16315_v50  ;;  %v4978_v24 = vadd.f32 %v4950_v52, %v13975_v17  ;;  %v16318_v1 = vld [vmem:[#allocation43_spill] sm:$0xff] }
 0x639   :  { %v15763_v27 = vmax.f32 %v14086_v43, 0.0  ;;  %v15762_v61 = vmax.f32 %v14089_v46, 0.0  ;;  %v5236_v25 = vadd.f32 %v5130_v39, %v4975_v35  ;;  %v5237_v16 = vadd.f32 %v5210_v48, %v4976_v59  ;;  %9939 = vrot.lane.b32.xlu0 %v9938_v30, %s10430_s19  ;;  %9944 = vrot.lane.b32.xlu1 %v9943_v0, %s10430_s19  ;;  %v16319_v30 = vld [vmem:[#allocation17_spill] sm:$0xff] }
 0x63a   :  { %v4871_v23 = vsel %vm4862_vm8, %v16318_v1, %v16317_v31  ;;  %v5072_v40 = vpop.permute.xlu0 %5071  ;;  %v4951_v35 = vsel %vm4862_vm8, %v16317_v31, %v16318_v1  ;;  %v4721_v18 = vadd.f32 %v4691_v22, %v13637_v12  ;;  %v4692_v52 = vsel %vm2115_vm4, %v16315_v50, %v16316_v10 }
 0x63b   :  { %v9948_v59 = vpack.i.bf16 %v15762_v61, %v15763_v27  ;;  %v14117_v0 = vadd.f32 %v16319_v30, %v5236_v25  ;;  %v14120_v53 = vadd.f32 %v16319_v30, %v5237_v16  ;;  %v5074_v17 = vpop.permute.xlu1 %5073  ;;  %v4722_v16 = vadd.f32 %v4612_v8, %v13646_v6  ;;  %v16320_v30 = vld [vmem:[#allocation36_spill] sm:$0xff]  ;;  %v16321_v27 = vld [vmem:[#allocation2_spill] sm:$0xff]  ;;  %v16323_v8 = vld [vmem:[#allocation117_spill] sm:$0xff] }
 0x63c   :  { %v5131_v39 = vsel %vm5123_vm9, %v5072_v40, %v5074_v17  ;;  %v5211_v48 = vsel %vm5123_vm9, %v5074_v17, %v5072_v40  ;;  %v4979_v12 = vadd.f32 %v4871_v23, %v14038_v41  ;;  %v4980_v22 = vadd.f32 %v4951_v35, %v4719_v34  ;;  %v16324_v23 = vld [vmem:[#allocation118_spill] sm:$0xff] }
 0x63d   :  { %v15765_v31 = vmax.f32 %v14117_v0, 0.0  ;;  %v15764_v1 = vmax.f32 %v14120_v53, 0.0  ;;  %v5238_v25 = vadd.f32 %v5131_v39, %v4977_v2  ;;  %v5239_v61 = vadd.f32 %v5211_v48, %v4978_v24  ;;  %9949 = vrot.lane.b32.xlu0 %v9948_v59, %s10430_s19  ;;  %v16322_v24 = vld [vmem:[#allocation63_spill] sm:$0xff] }
 0x63e   :  { %v4872_v50 = vsel %vm4862_vm8, %v16321_v27, %v16320_v30  ;;  %v5076_v10 = vpop.permute.xlu0 %5075  ;;  %v4952_v40 = vsel %vm4862_vm8, %v16320_v30, %v16321_v27  ;;  %v4723_v34 = vadd.f32 %v4692_v52, %v13649_v29  ;;  %v4613_v35 = vsel %vm2115_vm4, %v16324_v23, %v16323_v8 }
 0x63f   :  { %v9953_v2 = vpack.i.bf16 %v15764_v1, %v15765_v31  ;;  %v14144_v59 = vadd.f32 %v16322_v24, %v5238_v25  ;;  %v14147_v6 = vadd.f32 %v16322_v24, %v5239_v61  ;;  %v5078_v41 = vpop.permute.xlu1 %5077  ;;  %v4693_v29 = vsel %vm2115_vm4, %v16323_v8, %v16324_v23  ;;  %v16325_v24 = vld [vmem:[#allocation96_spill] sm:$0xff]  ;;  %v16326_v1 = vld [vmem:[#allocation46_spill] sm:$0xff] }
 0x640   :  { %v5132_v27 = vsel %vm5123_vm9, %v5076_v10, %v5078_v41  ;;  %v5212_v17 = vsel %vm5123_vm9, %v5078_v41, %v5076_v10  ;;  %v4981_v61 = vadd.f32 %v4872_v50, %v4720_v42  ;;  %v4982_v52 = vadd.f32 %v4952_v40, %v4721_v18  ;;  %v16328_v40 = vld [vmem:[#allocation84_spill] sm:$0xff] }
 0x641   :  { %v15792_v39 = vmax.f32 %v14144_v59, 0.0  ;;  %v15767_v48 = vmax.f32 %v14147_v6, 0.0  ;;  %v5240_v25 = vadd.f32 %v5132_v27, %v4979_v12  ;;  %v5241_v30 = vadd.f32 %v5212_v17, %v4980_v22  ;;  %9954 = vrot.lane.b32.xlu1 %v9953_v2, %s10430_s19  ;;  %v16327_v22 = vld [vmem:[#allocation61_spill] sm:$0xff]  ;;  %v16329_v41 = vld [vmem:[#allocation28_spill] sm:$0xff] }
 0x642   :  { %v4873_v31 = vsel %vm4862_vm8, %v16326_v1, %v16325_v24  ;;  %v5080_v58 = vpop.permute.xlu0 %5079  ;;  %v4953_v10 = vsel %vm4862_vm8, %v16325_v24, %v16326_v1  ;;  %v4724_v50 = vadd.f32 %v4613_v35, %v13657_v32  ;;  %v4614_v8 = vsel %vm2115_vm4, %v16329_v41, %v16328_v40 }
 0x643   :  { %v9958_v12 = vpack.i.bf16 %v15767_v48, %v15792_v39  ;;  %v14172_v2 = vadd.f32 %v16327_v22, %v5240_v25  ;;  %v14175_v42 = vadd.f32 %v16327_v22, %v5241_v30  ;;  %v5082_v18 = vpop.permute.xlu1 %5081  ;;  %v4725_v30 = vadd.f32 %v4693_v29, %v13686_v44 }
 0x644   :  { %v5133_v1 = vsel %vm5123_vm9, %v5080_v58, %v5082_v18  ;;  %v5213_v23 = vsel %vm5123_vm9, %v5082_v18, %v5080_v58  ;;  %v4983_v22 = vadd.f32 %v4873_v31, %v4722_v16  ;;  %v4984_v32 = vadd.f32 %v4953_v10, %v4723_v34 }
 0x645   :  { %v15791_v27 = vmax.f32 %v14172_v2, 0.0  ;;  %v15790_v17 = vmax.f32 %v14175_v42, 0.0  ;;  %v5242_v25 = vadd.f32 %v5133_v1, %v4981_v61  ;;  %v5243_v24 = vadd.f32 %v5213_v23, %v4982_v52  ;;  %9959 = vrot.lane.b32.xlu0 %v9958_v12, %s10430_s19  ;;  %v16330_v52 = vld [vmem:[#allocation97_spill] sm:$0xff] }
 0x646   :  { %v4874_v35 = vsel %vm4862_vm8, %v13510_v57, %v13524_v38  ;;  %v5084_v48 = vpop.permute.xlu0 %5083  ;;  %v4954_v58 = vsel %vm4862_vm8, %v13524_v38, %v13510_v57  ;;  %v4694_v16 = vsel %vm2115_vm4, %v16328_v40, %v16329_v41  ;;  %v4726_v34 = vadd.f32 %v4614_v8, %v13689_v11  ;;  %v16331_v23 = vld [vmem:[#allocation29_spill] sm:$0xff] }
 0x647   :  { %v9963_v61 = vpack.i.bf16 %v15790_v17, %v15791_v27  ;;  %v14198_v12 = vadd.f32 %v16330_v52, %v5242_v25  ;;  %v14201_v44 = vadd.f32 %v16330_v52, %v5243_v24  ;;  %v5086_v31 = vpop.permute.xlu1 %5085  ;;  %v16332_v25 = vld [vmem:[#allocation83_spill] sm:$0xff]  ;;  %v4985_v52 = vadd.f32 %v4874_v35, %v4724_v50 }
 0x648   :  { %v5134_v57 = vsel %vm5123_vm9, %v5084_v48, %v5086_v31  ;;  %v5214_v38 = vsel %vm5123_vm9, %v5086_v31, %v5084_v48  ;;  %v4615_v24 = vsel %vm2115_vm4, %v16332_v25, %v16331_v23  ;;  %v4986_v40 = vadd.f32 %v4954_v58, %v4725_v30 }
 0x649   :  { %v15789_v29 = vmax.f32 %v14198_v12, 0.0  ;;  %v15788_v10 = vmax.f32 %v14201_v44, 0.0  ;;  %v5244_v18 = vadd.f32 %v5134_v57, %v4983_v22  ;;  %v5245_v1 = vadd.f32 %v5214_v38, %v4984_v32  ;;  %9964 = vrot.lane.b32.xlu1 %v9963_v61, %s10430_s19  ;;  %v16333_v22 = vld [vmem:[#allocation64_spill] sm:$0xff] }
 0x64a   :  { %v4875_v11 = vsel %vm4862_vm8, %v13562_v20, %v13576_v21  ;;  %v5088_v41 = vpop.permute.xlu0 %5087  ;;  %v4955_v48 = vsel %vm4862_vm8, %v13576_v21, %v13562_v20  ;;  %v4727_v35 = vadd.f32 %v4694_v16, %v13698_v47  ;;  %v4695_v58 = vsel %vm2115_vm4, %v16331_v23, %v16332_v25  ;;  %v16335_v25 = vld [vmem:[#allocation95_spill] sm:$0xff] }
 0x64b   :  { %v9968_v8 = vpack.i.bf16 %v15788_v10, %v15789_v29  ;;  %v14226_v32 = vadd.f32 %v16333_v22, %v5244_v18  ;;  %v14229_v50 = vadd.f32 %v16333_v22, %v5245_v1  ;;  %v5090_v30 = vpop.permute.xlu1 %5089  ;;  %v16334_v18 = vld [vmem:[#allocation52_spill] sm:$0xff]  ;;  %v4728_v47 = vadd.f32 %v4615_v24, %v13755_v5 }
 0x64c   :  { %v5135_v20 = vsel %vm5123_vm9, %v5088_v41, %v5090_v30  ;;  %v5215_v21 = vsel %vm5123_vm9, %v5090_v30, %v5088_v41  ;;  %v4469_v1 = vadd.f32 %v13720_v56, %v16334_v18  ;;  %v4987_v16 = vadd.f32 %v4875_v11, %v4726_v34 }
 0x64d   :  { %v15786_v61 = vmax.f32 %v14226_v32, 0.0  ;;  %v15776_v31 = vmax.f32 %v14229_v50, 0.0  ;;  %v5246_v57 = vadd.f32 %v5135_v20, %v4985_v52  ;;  %v5247_v38 = vadd.f32 %v5215_v21, %v4986_v40  ;;  %9969 = vrot.lane.b32.xlu0 %v9968_v8, %s10430_s19  ;;  %v16336_v40 = vld [vmem:[#allocation65_spill] sm:$0xff] }
 0x64e   :  { %v4988_v22 = vadd.f32 %v4955_v48, %v4727_v35  ;;  %v5092_v23 = vpop.permute.xlu0 %5091  ;;  %v4876_v41 = vsel %vm4862_vm8, %v16335_v25, %v13631_v51  ;;  %v4729_v5 = vadd.f32 %v4695_v58, %v4469_v1  ;;  %v4956_v34 = vsel %vm4862_vm8, %v13631_v51, %v16335_v25  ;;  %v16337_v58 = vld [vmem:[#allocation98_spill] sm:$0xff] }
 0x64f   :  { %v9973_v52 = vpack.i.bf16 %v15776_v31, %v15786_v61  ;;  %v14251_v30 = vadd.f32 %v16336_v40, %v5246_v57  ;;  %v14254_v8 = vadd.f32 %v16336_v40, %v5247_v38  ;;  %v5094_v56 = vpop.permute.xlu1 %5093  ;;  %v4989_v57 = vadd.f32 %v4876_v41, %v4728_v47 }
 0x650   :  { %v5136_v24 = vsel %vm5123_vm9, %v5092_v23, %v5094_v56  ;;  %v5216_v11 = vsel %vm5123_vm9, %v5094_v56, %v5092_v23  ;;  %v4990_v18 = vadd.f32 %v4956_v34, %v4729_v5  ;;  %v16338_v34 = vld [vmem:[#allocation67_spill] sm:$0xff]  ;;  %v16355_v27 = vmax.f32 %v14028_v49, 0.0 }
 0x651   :  { %v15775_v48 = vmax.f32 %v14251_v30, 0.0  ;;  %v15770_v35 = vmax.f32 %v14254_v8, 0.0  ;;  %v5248_v20 = vadd.f32 %v5136_v24, %v4987_v16  ;;  %v5249_v21 = vadd.f32 %v5216_v11, %v4988_v22  ;;  %9974 = vrot.lane.b32.xlu1 %v9973_v52, %s10430_s19 }
 0x652   :  { %v5096_v38 = vpop.permute.xlu0 %5095 }
 0x653   :  { %v9978_v51 = vpack.i.bf16 %v15770_v35, %v15775_v48  ;;  %v14269_v1 = vadd.f32 %v16337_v58, %v5248_v20  ;;  %v14272_v23 = vadd.f32 %v16337_v58, %v5249_v21  ;;  %v5098_v25 = vpop.permute.xlu1 %5097  ;;  %v16347_v48 = vld [vmem:[#allocation48_spill] sm:$0xff] }
 0x654   :  { %v5137_v16 = vsel %vm5123_vm9, %v5096_v38, %v5098_v25  ;;  %v5217_v22 = vsel %vm5123_vm9, %v5098_v25, %v5096_v38  ;;  %v16340_v25 = vld [vmem:[#allocation42_spill] sm:$0xff] }
 0x655   :  { %v15769_v47 = vmax.f32 %v14269_v1, 0.0  ;;  %v15768_v41 = vmax.f32 %v14272_v23, 0.0  ;;  %v5250_v52 = vadd.f32 %v5137_v16, %v4989_v57  ;;  %v5251_v40 = vadd.f32 %v5217_v22, %v4990_v18  ;;  %9979 = vrot.lane.b32.xlu0 %v9978_v51, %s10430_s19  ;;  %v16339_v51 = vld [vmem:[#allocation4_spill] sm:$0xff] }
 0x656   :  { %v5100_v56 = vpop.permute.xlu0 %5099 }
 0x657   :  { %v9983_v5 = vpack.i.bf16 %v15768_v41, %v15769_v47  ;;  %v14284_v24 = vadd.f32 %v16338_v34, %v5250_v52  ;;  %v14287_v11 = vadd.f32 %v16338_v34, %v5251_v40  ;;  %v5102_v20 = vpop.permute.xlu1 %5101  ;;  %v16341_v40 = vld [vmem:[#allocation66_spill] sm:$0xff]  ;;  %v16343_v47 = vld [vmem:[#allocation5_spill] sm:$0xff] }
 0x658   :  { %v5138_v21 = vsel %vm5123_vm9, %v5100_v56, %v5102_v20  ;;  %v5218_v57 = vsel %vm5123_vm9, %v5102_v20, %v5100_v56 }
 0x659   :  { %v15772_v38 = vmax.f32 %v14284_v24, 0.0  ;;  %v15771_v18 = vmax.f32 %v14287_v11, 0.0  ;;  %v5252_v58 = vadd.f32 %v5138_v21, %v16339_v51  ;;  %v5253_v16 = vadd.f32 %v5218_v57, %v16340_v25  ;;  %9984 = vrot.lane.b32.xlu1 %v9983_v5, %s10430_s19  ;;  %v16342_v51 = vld [vmem:[#allocation37_spill] sm:$0xff] }
 0x65a   :  { %v5104_v22 = vpop.permute.xlu0 %5103 }
 0x65b   :  { %v9988_v52 = vpack.i.bf16 %v15771_v18, %v15772_v38  ;;  %v14301_v34 = vadd.f32 %v16341_v40, %v5252_v58  ;;  %v14304_v56 = vadd.f32 %v16341_v40, %v5253_v16  ;;  %v5106_v20 = vpop.permute.xlu1 %5105  ;;  %v16344_v40 = vld [vmem:[#allocation99_spill] sm:$0xff] }
 0x65c   :  { %v5139_v41 = vsel %vm5123_vm9, %v5104_v22, %v5106_v20  ;;  %v5219_v21 = vsel %vm5123_vm9, %v5106_v20, %v5104_v22 }
 0x65d   :  { %v15774_v57 = vmax.f32 %v14301_v34, 0.0  ;;  %v15773_v5 = vmax.f32 %v14304_v56, 0.0  ;;  %v5254_v25 = vadd.f32 %v5139_v41, %v16342_v51  ;;  %v5255_v35 = vadd.f32 %v5219_v21, %v16343_v47  ;;  %9989 = vrot.lane.b32.xlu0 %v9988_v52, %s10430_s19 }
 0x65e   :  { %v5108_v58 = vpop.permute.xlu0 %5107 }
 0x65f   :  { %v9993_v16 = vpack.i.bf16 %v15773_v5, %v15774_v57  ;;  %v14318_v18 = vadd.f32 %v16344_v40, %v5254_v25  ;;  %v14321_v22 = vadd.f32 %v16344_v40, %v5255_v35  ;;  %v5110_v20 = vpop.permute.xlu1 %5109  ;;  %v16345_v40 = vld [vmem:[#allocation68_spill] sm:$0xff] }
 0x660   :  { %v5140_v38 = vsel %vm5123_vm9, %v5108_v58, %v5110_v20  ;;  %v5220_v41 = vsel %vm5123_vm9, %v5110_v20, %v5108_v58 }
 0x661   :  { %v15778_v47 = vmax.f32 %v14318_v18, 0.0  ;;  %v15777_v52 = vmax.f32 %v14321_v22, 0.0  ;;  %v5256_v21 = vadd.f32 %v5140_v38, %v13747_v62  ;;  %v5257_v51 = vadd.f32 %v5220_v41, %v13749_v45  ;;  %9994 = vrot.lane.b32.xlu1 %v9993_v16, %s10430_s19  ;;  %v16346_v16 = vld [vmem:[#allocation19_spill] sm:$0xff] }
 0x662   :  { %v5112_v25 = vpop.permute.xlu0 %5111 }
 0x663   :  { %v9998_v35 = vpack.i.bf16 %v15777_v52, %v15778_v47  ;;  %v14335_v5 = vadd.f32 %v16345_v40, %v5256_v21  ;;  %v14338_v58 = vadd.f32 %v16345_v40, %v5257_v51  ;;  %v5114_v20 = vpop.permute.xlu1 %5113  ;;  %v16348_v40 = vld [vmem:[#allocation69_spill] sm:$0xff] }
 0x664   :  { %v5141_v57 = vsel %vm5123_vm9, %v5112_v25, %v5114_v20  ;;  %v5221_v62 = vsel %vm5123_vm9, %v5114_v20, %v5112_v25 }
 0x665   :  { %v15784_v45 = vmax.f32 %v14335_v5, 0.0  ;;  %v15779_v38 = vmax.f32 %v14338_v58, 0.0  ;;  %v5258_v41 = vadd.f32 %v5141_v57, %v16346_v16  ;;  %v5259_v31 = vadd.f32 %v5221_v62, %v16347_v48  ;;  %9999 = vrot.lane.b32.xlu0 %v9998_v35, %s10430_s19 }
 0x666   :  { %v5116_v21 = vpop.permute.xlu0 %5115 }
 0x667   :  { %v10003_v51 = vpack.i.bf16 %v15779_v38, %v15784_v45  ;;  %v14352_v52 = vadd.f32 %v16348_v40, %v5258_v41  ;;  %v14355_v25 = vadd.f32 %v16348_v40, %v5259_v31  ;;  %v5118_v20 = vpop.permute.xlu1 %5117  ;;  %v16349_v41 = vld [vmem:[#allocation100_spill] sm:$0xff] }
 0x668   :  { %v5142_v47 = vsel %vm5123_vm9, %v5116_v21, %v5118_v20  ;;  %v5222_v57 = vsel %vm5123_vm9, %v5118_v20, %v5116_v21 }
 0x669   :  { %v15783_v48 = vmax.f32 %v14352_v52, 0.0  ;;  %v15782_v35 = vmax.f32 %v14355_v25, 0.0  ;;  %v5260_v62 = vadd.f32 %v5142_v47, %v13817_v33  ;;  %v5261_v16 = vadd.f32 %v5222_v57, %v13819_v36  ;;  %10004 = vrot.lane.b32.xlu1 %v10003_v51, %s10430_s19  ;;  %v8275_v36 = vld [vmem:[%s15495_s7] sm:$0xff]  ;;  %v8277_v47 = vld [vmem:[%s15495_s7 + $0x10] sm:$0xff] }
 0x66a   :  { %v8279_v51 = vld [vmem:[%s15495_s7 + $0x20] sm:$0xff]  ;;  %v8281_v57 = vld [vmem:[%s15495_s7 + $0x30] sm:$0xff] }
 0x66b   :  { %v10008_v31 = vpack.i.bf16 %v15782_v35, %v15783_v48  ;;  %v14369_v40 = vadd.f32 %v16349_v41, %v5260_v62  ;;  %v14372_v21 = vadd.f32 %v16349_v41, %v5261_v16  ;;  %v8283_v62 = vld [vmem:[%s15495_s7 + $0x40] sm:$0xff]  ;;  %v8285_v16 = vld [vmem:[%s15495_s7 + $0x50] sm:$0xff]  ;;  %v16350_v35 = vmax.f32 %v13912_v60, 0.0 }
 0x66c   :  { %v8289_v41 = vld [vmem:[%s15495_s7 + $0x70] sm:$0xff] }
 0x66d   :  { %v15781_v20 = vmax.f32 %v14369_v40, 0.0  ;;  %v15780_v38 = vmax.f32 %v14372_v21, 0.0  ;;  %10009 = vrot.lane.b32.xlu0 %v10008_v31, %s10430_s19  ;;  %v8287_v31 = vld [vmem:[%s15495_s7 + $0x60] sm:$0xff] }
 0x66f   :  { %v10013_v33 = vpack.i.bf16 %v15780_v38, %v15781_v20 }
 0x671   :  { %10014 = vrot.lane.b32.xlu1 %v10013_v33, %s10430_s19  ;;  %v8415_v33 = vld [vmem:[%s15496_s9 + $0x8] sm:$0xff] }
 0x675   :  { %8292 = vperm.xlu1 %9817, %v8275_v36   ;;  %v8417_v36 = vld [vmem:[%s15496_s9 + $0x18] sm:$0xff] }
 0x679   :  { %8302 = vperm.xlu1 %9817, %v8277_v47   ;;  %v8419_v47 = vld [vmem:[%s15496_s9 + $0x28] sm:$0xff] }
 0x67d   :  { %8312 = vperm.xlu1 %9817, %v8279_v51  }
 0x681   :  { %8322 = vperm.xlu1 %9817, %v8281_v57  }
 0x685   :  { %8332 = vperm.xlu1 %9817, %v8283_v62  }
 0x689   :  { %8342 = vperm.xlu1 %9817, %v8285_v16  }
 0x68d   :  { %8352 = vperm.xlu1 %9817, %v8287_v31  }
 0x691   :  { %8362 = vperm.xlu1 %9817, %v8289_v41   ;;  %v8421_v41 = vld [vmem:[%s15496_s9 + $0x38] sm:$0xff] }
 0x695   :  { %8432 = vperm.xlu1 %9817, %v8415_v33  }
 0x699   :  { %8442 = vperm.xlu1 %9817, %v8417_v36  }
 0x69b   :  { %v9925_v51 = vpop.permute.xlu0 %9924 }
 0x69c   :  { %v9927_v57 = vunpack.i.h.bf16 %v9925_v51  ;;  %v9926_v62 = vunpack.i.l.bf16 %v9925_v51 }
 0x69d   :  { %8452 = vperm.xlu1 %9817, %v8419_v47  }
 0x69e   :  { %v5584_v16 = vsel %vm1567_vm2, %v9926_v62, %v9927_v57  ;;  %v5664_v31 = vsel %vm1567_vm2, %v9927_v57, %v9926_v62  ;;  %v8423_v57 = vld [vmem:[%s15496_s9 + $0x48] sm:$0xff] }
 0x69f   :  { %v9930_v33 = vpop.permute.xlu1 %9929  ;;  %v14422_v36 = vmax.f32 %v5424_v63, %v5584_v16  ;;  %v14426_v48 = vmax.f32 %v16350_v35, %v5664_v31 }
 0x6a0   :  { %v9932_v38 = vunpack.i.h.bf16 %v9930_v33  ;;  %v9931_v20 = vunpack.i.l.bf16 %v9930_v33 }
 0x6a1   :  { %8462 = vperm.xlu1 %9817, %v8421_v41   ;;  %v15785_v35 = vrot.slane %v14422_v36, 1  ;;  %v15787_v31 = vrot.slane %v14426_v48, 1 }
 0x6a2   :  { %v5585_v47 = vsel %vm1567_vm2, %v9931_v20, %v9932_v38  ;;  %v5665_v51 = vsel %vm1567_vm2, %v9932_v38, %v9931_v20 }
 0x6a3   :  { %v5686_v62 = vmax.f32 %v5426_v19, %v5585_v47  ;;  %v5687_v3 = vmax.f32 %v5427_v14, %v5665_v51  ;;  %v9935_v63 = vpop.permute.xlu0 %9934  ;;  %v16351_v14 = vmax.f32 %v13987_v26, 0.0  ;;  %v16352_v51 = vmax.f32 %v13990_v37, 0.0 }
 0x6a4   :  { %v9937_v16 = vunpack.i.h.bf16 %v9935_v63  ;;  %v9936_v60 = vunpack.i.l.bf16 %v9935_v63  ;;  %v5122_v63 = vpop.permute.xlu1 %5121 }
 0x6a5   :  { %v5765_v41 = vrot.slane %v5686_v62, 1  ;;  %v5768_v33 = vrot.slane %v5687_v3, 1  ;;  %8472 = vperm.xlu1 %9817, %v8423_v57  }
 0x6a6   :  { %v5586_v38 = vsel %vm1567_vm2, %v9936_v60, %v9937_v16  ;;  %v5666_v20 = vsel %vm1567_vm2, %v9937_v16, %v9936_v60 }
 0x6a7   :  { %v5766_v13 = vsel %vm2788_vm6, %v15785_v35, %v5765_v41  ;;  %v5769_v19 = vsel %vm2788_vm6, %v15787_v31, %v5768_v33  ;;  %v14452_v47 = vmax.f32 %v16351_v14, %v5586_v38  ;;  %v14456_v57 = vmax.f32 %v16352_v51, %v5666_v20  ;;  %v5120_v16 = vpop.permute.xlu0 %5119  ;;  %v16353_v51 = vld [vmem:[#allocation70_spill] sm:$0xff] }
 0x6a8   :  { %v5143_v60 = vsel %vm5123_vm9, %v5120_v16, %v5122_v63  ;;  %v5223_v45 = vsel %vm5123_vm9, %v5122_v63, %v5120_v16  ;;  %v5887_v38 = vmax.f32 %v14426_v48, %v5769_v19  ;;  %v5886_v37 = vmax.f32 %v14422_v36, %v5766_v13 }
 0x6a9   :  { %v5770_v35 = vrot.slane %v14452_v47, 1  ;;  %v5772_v61 = vrot.slane %v14456_v57, 1  ;;  %v5262_v31 = vadd.f32 %v5143_v60, %v13854_v15  ;;  %v5263_v26 = vadd.f32 %v5223_v45, %v13856_v28  ;;  %8632 = vperm.xlu1 %9817, %v8628_v7  }
 0x6ab   :  { %v5771_v20 = vsel %vm2788_vm6, %v5765_v41, %v5770_v35  ;;  %v5773_v14 = vsel %vm2788_vm6, %v5768_v33, %v5772_v61  ;;  %v14469_v10 = vadd.f32 %v16353_v51, %v5262_v31  ;;  %v14472_v63 = vadd.f32 %v16353_v51, %v5263_v26  ;;  %v9940_v16 = vpop.permute.xlu0 %9939  ;;  %v9945_v29 = vpop.permute.xlu1 %9944 }
 0x6ac   :  { %v9942_v15 = vunpack.i.h.bf16 %v9940_v16  ;;  %v9941_v60 = vunpack.i.l.bf16 %v9940_v16  ;;  %v9947_v28 = vunpack.i.h.bf16 %v9945_v29  ;;  %v9946_v45 = vunpack.i.l.bf16 %v9945_v29 }
 0x6ad   :  { %v15794_v7 = vmax.f32 %v14469_v10, 0.0  ;;  %v15793_v13 = vmax.f32 %v14472_v63, 0.0  ;;  %v5889_v19 = vmax.f32 %v5687_v3, %v5773_v14  ;;  %v5888_v41 = vmax.f32 %v5686_v62, %v5771_v20 }
 0x6ae   :  { %v5587_v33 = vsel %vm1567_vm2, %v9941_v60, %v9942_v15  ;;  %v5667_v31 = vsel %vm1567_vm2, %v9942_v15, %v9941_v60  ;;  %v5588_v17 = vsel %vm1567_vm2, %v9946_v45, %v9947_v28  ;;  %v5668_v26 = vsel %vm1567_vm2, %v9947_v28, %v9946_v45 }
 0x6af   :  { %v10018_v51 = vpack.i.bf16 %v15793_v13, %v15794_v7  ;;  %v16354_v29 = vmax.f32 %v14025_v54, 0.0  ;;  %v5691_v3 = vmax.f32 %v16355_v27, %v5667_v31  ;;  %v16356_v62 = vmax.f32 %v14054_v9, 0.0  ;;  %v9950_v14 = vpop.permute.xlu0 %9949  ;;  %v8276_v27 = vld [vmem:[%s15495_s7 + $0x8] sm:$0xff] }
 0x6b0   :  { %v16357_v15 = vmax.f32 %v14057_v4, 0.0  ;;  %v9952_v28 = vunpack.i.h.bf16 %v9950_v14  ;;  %v9951_v45 = vunpack.i.l.bf16 %v9950_v14  ;;  %v14496_v39 = vpack.c.bf16 %v5889_v19, %v5887_v38 }
 0x6b1   :  { %v5690_v16 = vmax.f32 %v16354_v29, %v5587_v33  ;;  %v14490_v20 = vmax.f32 %v16356_v62, %v5588_v17  ;;  %v5776_v7 = vrot.slane %v5691_v3, 1  ;;  %v14499_v33 = vpack.c.bf16 %v5888_v41, %v5886_v37  ;;  %10019 = vrot.lane.b32.xlu0 %v10018_v51, %s10430_s19 }
 0x6b2   :  { %v14494_v60 = vmax.f32 %v16357_v15, %v5668_v26  ;;  %v5589_v9 = vsel %vm1567_vm2, %v9951_v45, %v9952_v28  ;;  %v5669_v4 = vsel %vm1567_vm2, %v9952_v28, %v9951_v45  ;;  %6106 = vmatprep.mubr.bf16.mxu1 %v14496_v39  ;;  %6373 = vmatprep.mubr.bf16.mxu0 %v14496_v39  ;;  %v16358_v19 = vmax.f32 %v14086_v43, 0.0 }
 0x6b3   :  { %v5774_v13 = vrot.slane %v5690_v16, 1  ;;  %v5778_v54 = vrot.slane %v14490_v20, 1  ;;  %v5777_v38 = vsel %vm2788_vm6, %v5772_v61, %v5776_v7  ;;  %6107 = vmatmul.mubr.bf16.vlgmr.msra.gmra.mrb[200].mxu1 %v14499_v33  ;;  %v9955_v31 = vpop.permute.xlu1 %9954  ;;  %v16359_v51 = vmax.f32 %v14089_v46, 0.0  ;;  %6374 = vmatmul.mubr.bf16.vlgmr.msra.gmra.mrb[212].mxu0 %v14499_v33 }
 0x6b4   :  { %v5780_v49 = vrot.slane %v14494_v60, 1  ;;  %v5694_v41 = vmax.f32 %v16358_v19, %v5589_v9  ;;  %v9957_v62 = vunpack.i.h.bf16 %v9955_v31  ;;  %v9956_v14 = vunpack.i.l.bf16 %v9955_v31 }
 0x6b5   :  { %v5775_v17 = vsel %vm2788_vm6, %v5770_v35, %v5774_v13  ;;  %v5779_v37 = vsel %vm2788_vm6, %v5774_v13, %v5778_v54  ;;  %v5695_v29 = vmax.f32 %v16359_v51, %v5669_v4  ;;  %8297 = vperm.xlu0 %9816, %v8276_v27   ;;  %v5891_v61 = vmax.f32 %v14456_v57, %v5777_v38 }
 0x6b6   :  { %v5781_v26 = vsel %vm2788_vm6, %v5776_v7, %v5780_v49  ;;  %v5782_v35 = vrot.slane %v5694_v41, 1  ;;  %v5890_v43 = vmax.f32 %v14452_v47, %v5775_v17  ;;  %v5590_v28 = vsel %vm1567_vm2, %v9956_v14, %v9957_v62  ;;  %v8278_v47 = vld [vmem:[%s15495_s7 + $0x18] sm:$0xff] }
 0x6b7   :  { %v5893_v13 = vmax.f32 %v5691_v3, %v5781_v26  ;;  %v5784_v15 = vrot.slane %v5695_v29, 1  ;;  %v5670_v45 = vsel %vm1567_vm2, %v9957_v62, %v9956_v14  ;;  %v5892_v7 = vmax.f32 %v5690_v16, %v5779_v37  ;;  %v9960_v27 = vpop.permute.xlu0 %9959 }
 0x6b8   :  { %v16360_v46 = vmax.f32 %v14117_v0, 0.0  ;;  %v16361_v4 = vmax.f32 %v14120_v53, 0.0  ;;  %v9962_v3 = vunpack.i.h.bf16 %v9960_v27  ;;  %v9961_v17 = vunpack.i.l.bf16 %v9960_v27 }
 0x6b9   :  { %v14532_v31 = vpack.c.bf16 %v5893_v13, %v5891_v61  ;;  %v5785_v57 = vsel %vm2788_vm6, %v5780_v49, %v5784_v15  ;;  %v14538_v16 = vpack.c.bf16 %v5892_v7, %v5890_v43  ;;  %v5783_v53 = vsel %vm2788_vm6, %v5778_v54, %v5782_v35  ;;  %8307 = vperm.xlu0 %9816, %v8278_v47  }
 0x6ba   :  { %v14526_v9 = vmax.f32 %v16360_v46, %v5590_v28  ;;  %v14530_v19 = vmax.f32 %v16361_v4, %v5670_v45  ;;  %v5591_v37 = vsel %vm1567_vm2, %v9961_v17, %v9962_v3  ;;  %v5671_v26 = vsel %vm1567_vm2, %v9962_v3, %v9961_v17  ;;  %v8280_v28 = vld [vmem:[%s15495_s7 + $0x28] sm:$0xff] }
 0x6bb   :  { %6114 = vmatprep.mubr.bf16.mxu1 %v14532_v31  ;;  %6381 = vmatprep.mubr.bf16.mxu0 %v14532_v31  ;;  %v5895_v49 = vmax.f32 %v14494_v60, %v5785_v57  ;;  %v16362_v14 = vmax.f32 %v14144_v59, 0.0  ;;  %v16363_v13 = vmax.f32 %v14147_v6, 0.0  ;;  %v9965_v54 = vpop.permute.xlu1 %9964  ;;  %v5894_v59 = vmax.f32 %v14490_v20, %v5783_v53  ;;  %v8282_v20 = vld [vmem:[%s15495_s7 + $0x38] sm:$0xff] }
 0x6bc   :  { %v5786_v0 = vrot.slane %v14526_v9, 1  ;;  %v5788_v38 = vrot.slane %v14530_v19, 1  ;;  %6115 = vmatmul.mubr.bf16.gmra.mrb[204].mxu1 %v14538_v16  ;;  %6382 = vmatmul.mubr.bf16.gmra.mrb[216].mxu0 %v14538_v16  ;;  %v9967_v60 = vunpack.i.h.bf16 %v9965_v54  ;;  %v9966_v45 = vunpack.i.l.bf16 %v9965_v54 }
 0x6bd   :  { %v5698_v61 = vmax.f32 %v16362_v14, %v5591_v37  ;;  %v5699_v43 = vmax.f32 %v16363_v13, %v5671_v26  ;;  %8317 = vperm.xlu0 %9816, %v8280_v28   ;;  %v16364_v57 = vmax.f32 %v14172_v2, 0.0  ;;  %v16366_v54 = vmax.f32 %v14198_v12, 0.0 }
 0x6be   :  { %v5787_v51 = vsel %vm2788_vm6, %v5782_v35, %v5786_v0  ;;  %v5789_v62 = vsel %vm2788_vm6, %v5784_v15, %v5788_v38  ;;  %v5592_v6 = vsel %vm1567_vm2, %v9966_v45, %v9967_v60  ;;  %v5672_v4 = vsel %vm1567_vm2, %v9967_v60, %v9966_v45 }
 0x6bf   :  { %v5897_v35 = vmax.f32 %v5695_v29, %v5789_v62  ;;  %v5896_v7 = vmax.f32 %v5694_v41, %v5787_v51  ;;  %v5792_v15 = vrot.slane %v5699_v43, 1  ;;  %v5790_v46 = vrot.slane %v5698_v61, 1  ;;  %v9970_v17 = vpop.permute.xlu0 %9969 }
 0x6c0   :  { %v14567_v3 = vmax.f32 %v16364_v57, %v5592_v6  ;;  %v16365_v29 = vmax.f32 %v14175_v42, 0.0  ;;  %v9972_v37 = vunpack.i.h.bf16 %v9970_v17  ;;  %v9971_v26 = vunpack.i.l.bf16 %v9970_v17 }
 0x6c1   :  { %v14562_v27 = vpack.c.bf16 %v5897_v35, %v5895_v49  ;;  %v5793_v47 = vsel %vm2788_vm6, %v5788_v38, %v5792_v15  ;;  %v14576_v53 = vpack.c.bf16 %v5896_v7, %v5894_v59  ;;  %v5791_v42 = vsel %vm2788_vm6, %v5786_v0, %v5790_v46  ;;  %8327 = vperm.xlu0 %9816, %v8282_v20   ;;  %v8284_v35 = vld [vmem:[%s15495_s7 + $0x48] sm:$0xff] }
 0x6c2   :  { %v14571_v41 = vmax.f32 %v16365_v29, %v5672_v4  ;;  %v5794_v2 = vrot.slane %v14567_v3, 1  ;;  %v5593_v49 = vsel %vm1567_vm2, %v9971_v26, %v9972_v37  ;;  %v5673_v51 = vsel %vm1567_vm2, %v9972_v37, %v9971_v26 }
 0x6c3   :  { %6122 = vmatprep.mubr.bf16.mxu1 %v14562_v27  ;;  %6389 = vmatprep.mubr.bf16.mxu0 %v14562_v27  ;;  %v5899_v62 = vmax.f32 %v14530_v19, %v5793_v47  ;;  %v5702_v28 = vmax.f32 %v16366_v54, %v5593_v49  ;;  %v16367_v60 = vmax.f32 %v14201_v44, 0.0  ;;  %v9975_v0 = vpop.permute.xlu1 %9974  ;;  %v5898_v12 = vmax.f32 %v14526_v9, %v5791_v42  ;;  %v8286_v9 = vld [vmem:[%s15495_s7 + $0x58] sm:$0xff] }
 0x6c4   :  { %v5796_v38 = vrot.slane %v14571_v41, 1  ;;  %v5795_v14 = vsel %vm2788_vm6, %v5790_v46, %v5794_v2  ;;  %6123 = vmatmul.mubr.bf16.gmra.mrb[208].mxu1 %v14576_v53  ;;  %6390 = vmatmul.mubr.bf16.gmra.mrb[220].mxu0 %v14576_v53  ;;  %v9977_v19 = vunpack.i.h.bf16 %v9975_v0  ;;  %v9976_v7 = vunpack.i.l.bf16 %v9975_v0 }
 0x6c5   :  { %v5703_v45 = vmax.f32 %v16367_v60, %v5673_v51  ;;  %v5900_v46 = vmax.f32 %v5698_v61, %v5795_v14  ;;  %v5798_v6 = vrot.slane %v5702_v28, 1  ;;  %8337 = vperm.xlu0 %9816, %v8284_v35   ;;  %v16368_v29 = vmax.f32 %v14226_v32, 0.0 }
 0x6c6   :  { %v5797_v13 = vsel %vm2788_vm6, %v5792_v15, %v5796_v38  ;;  %v5594_v44 = vsel %vm1567_vm2, %v9976_v7, %v9977_v19  ;;  %v5674_v4 = vsel %vm1567_vm2, %v9977_v19, %v9976_v7  ;;  %v16370_v54 = vmax.f32 %v14251_v30, 0.0  ;;  %v8288_v19 = vld [vmem:[%s15495_s7 + $0x68] sm:$0xff] }
 0x6c7   :  { %v5901_v59 = vmax.f32 %v5699_v43, %v5797_v13  ;;  %v5800_v15 = vrot.slane %v5703_v45, 1  ;;  %v14605_v17 = vmax.f32 %v16368_v29, %v5594_v44  ;;  %v16369_v43 = vmax.f32 %v14229_v50, 0.0  ;;  %v9980_v20 = vpop.permute.xlu0 %9979 }
 0x6c8   :  { %v14614_v37 = vpack.c.bf16 %v5900_v46, %v5898_v12  ;;  %v9982_v26 = vunpack.i.h.bf16 %v9980_v20  ;;  %v9981_v42 = vunpack.i.l.bf16 %v9980_v20  ;;  %v5799_v50 = vsel %vm2788_vm6, %v5794_v2, %v5798_v6 }
 0x6c9   :  { %v14600_v47 = vpack.c.bf16 %v5901_v59, %v5899_v62  ;;  %v5801_v57 = vsel %vm2788_vm6, %v5796_v38, %v5800_v15  ;;  %v14609_v61 = vmax.f32 %v16369_v43, %v5674_v4  ;;  %v5802_v32 = vrot.slane %v14605_v17, 1  ;;  %8347 = vperm.xlu0 %9816, %v8286_v9  }
 0x6ca   :  { %v5595_v49 = vsel %vm1567_vm2, %v9981_v42, %v9982_v26  ;;  %v5675_v51 = vsel %vm1567_vm2, %v9982_v26, %v9981_v42  ;;  %v5903_v62 = vmax.f32 %v14571_v41, %v5801_v57  ;;  %v16371_v0 = vmax.f32 %v14254_v8, 0.0 }
 0x6cb   :  { %6130 = vmatprep.mubr.bf16.mxu1 %v14600_v47  ;;  %6397 = vmatprep.mubr.bf16.mxu0 %v14600_v47  ;;  %v5804_v38 = vrot.slane %v14609_v61, 1  ;;  %v5803_v14 = vsel %vm2788_vm6, %v5798_v6, %v5802_v32  ;;  %v5706_v60 = vmax.f32 %v16370_v54, %v5595_v49  ;;  %v9985_v2 = vpop.permute.xlu1 %9984  ;;  %v5902_v30 = vmax.f32 %v14567_v3, %v5799_v50  ;;  %v8414_v3 = vld [vmem:[%s15496_s9] sm:$0xff] }
 0x6cc   :  { %v5707_v35 = vmax.f32 %v16371_v0, %v5675_v51  ;;  %6131 = vmatmul.mubr.bf16.gmra.mrb[212].mxu1 %v14614_v37  ;;  %6398 = vmatmul.mubr.bf16.gmra.mrb[224].mxu0 %v14614_v37  ;;  %v9987_v41 = vunpack.i.h.bf16 %v9985_v2  ;;  %v9986_v7 = vunpack.i.l.bf16 %v9985_v2  ;;  %v5904_v46 = vmax.f32 %v5702_v28, %v5803_v14  ;;  %v8416_v2 = vld [vmem:[%s15496_s9 + $0x10] sm:$0xff] }
 0x6cd   :  { %v5805_v13 = vsel %vm2788_vm6, %v5800_v15, %v5804_v38  ;;  %v5806_v12 = vrot.slane %v5706_v60, 1  ;;  %8357 = vperm.xlu0 %9816, %v8288_v19   ;;  %v16372_v57 = vmax.f32 %v14269_v1, 0.0  ;;  %v16374_v14 = vmax.f32 %v14284_v24, 0.0 }
 0x6ce   :  { %v5905_v59 = vmax.f32 %v5703_v45, %v5805_v13  ;;  %v5808_v15 = vrot.slane %v5707_v35, 1  ;;  %v5596_v8 = vsel %vm1567_vm2, %v9986_v7, %v9987_v41  ;;  %v5676_v6 = vsel %vm1567_vm2, %v9987_v41, %v9986_v7 }
 0x6cf   :  { %v14643_v29 = vmax.f32 %v16372_v57, %v5596_v8  ;;  %v16373_v45 = vmax.f32 %v14272_v23, 0.0  ;;  %v9990_v43 = vpop.permute.xlu0 %9989  ;;  %v14652_v20 = vpack.c.bf16 %v5904_v46, %v5902_v30  ;;  %v5807_v23 = vsel %vm2788_vm6, %v5802_v32, %v5806_v12 }
 0x6d0   :  { %v14638_v44 = vpack.c.bf16 %v5905_v59, %v5903_v62  ;;  %v5809_v4 = vsel %vm2788_vm6, %v5804_v38, %v5808_v15  ;;  %v9992_v9 = vunpack.i.h.bf16 %v9990_v43  ;;  %v9991_v26 = vunpack.i.l.bf16 %v9990_v43 }
 0x6d1   :  { %v14647_v28 = vmax.f32 %v16373_v45, %v5676_v6  ;;  %v5810_v1 = vrot.slane %v14643_v29, 1  ;;  %8427 = vperm.xlu0 %9816, %v8414_v3   ;;  %v5907_v49 = vmax.f32 %v14609_v61, %v5809_v4  ;;  %v16375_v54 = vmax.f32 %v14287_v11, 0.0 }
 0x6d2   :  { %6138 = vmatprep.mubr.bf16.mxu1 %v14638_v44  ;;  %6405 = vmatprep.mubr.bf16.mxu0 %v14638_v44  ;;  %v5597_v38 = vsel %vm1567_vm2, %v9991_v26, %v9992_v9  ;;  %v5677_v50 = vsel %vm1567_vm2, %v9992_v9, %v9991_v26  ;;  %v5906_v24 = vmax.f32 %v14605_v17, %v5807_v23  ;;  %v16376_v8 = vmax.f32 %v14301_v34, 0.0  ;;  %v8418_v17 = vld [vmem:[%s15496_s9 + $0x20] sm:$0xff] }
 0x6d3   :  { %v5812_v42 = vrot.slane %v14647_v28, 1  ;;  %v5811_v51 = vsel %vm2788_vm6, %v5806_v12, %v5810_v1  ;;  %v5710_v13 = vmax.f32 %v16374_v14, %v5597_v38  ;;  %v5711_v0 = vmax.f32 %v16375_v54, %v5677_v50  ;;  %v9995_v32 = vpop.permute.xlu1 %9994  ;;  %v8420_v14 = vld [vmem:[%s15496_s9 + $0x30] sm:$0xff] }
 0x6d4   :  { %6139 = vmatmul.mubr.bf16.gmra.mrb[216].mxu1 %v14652_v20  ;;  %6406 = vmatmul.mubr.bf16.gmra.mrb[228].mxu0 %v14652_v20  ;;  %v9997_v61 = vunpack.i.h.bf16 %v9995_v32  ;;  %v9996_v19 = vunpack.i.l.bf16 %v9995_v32  ;;  %v5908_v7 = vmax.f32 %v5706_v60, %v5811_v51  ;;  %v16378_v50 = vmax.f32 %v14318_v18, 0.0 }
 0x6d5   :  { %v5813_v62 = vsel %vm2788_vm6, %v5808_v15, %v5812_v42  ;;  %v5816_v59 = vrot.slane %v5711_v0, 1  ;;  %v5814_v46 = vrot.slane %v5710_v13, 1  ;;  %8437 = vperm.xlu0 %9816, %v8416_v2   ;;  %v16379_v51 = vmax.f32 %v14321_v22, 0.0 }
 0x6d6   :  { %v5909_v41 = vmax.f32 %v5707_v35, %v5813_v62  ;;  %v5598_v11 = vsel %vm1567_vm2, %v9996_v19, %v9997_v61  ;;  %v5678_v15 = vsel %vm1567_vm2, %v9997_v61, %v9996_v19  ;;  %v16377_v35 = vmax.f32 %v14304_v56, 0.0 }
 0x6d7   :  { %v5817_v12 = vsel %vm2788_vm6, %v5812_v42, %v5816_v59  ;;  %v14681_v6 = vmax.f32 %v16376_v8, %v5598_v11  ;;  %v10000_v4 = vpop.permute.xlu0 %9999  ;;  %v14690_v57 = vpack.c.bf16 %v5908_v7, %v5906_v24  ;;  %v5815_v56 = vsel %vm2788_vm6, %v5810_v1, %v5814_v46 }
 0x6d8   :  { %v14676_v30 = vpack.c.bf16 %v5909_v41, %v5907_v49  ;;  %v14685_v60 = vmax.f32 %v16377_v35, %v5678_v15  ;;  %v10002_v45 = vunpack.i.h.bf16 %v10000_v4  ;;  %v10001_v43 = vunpack.i.l.bf16 %v10000_v4 }
 0x6d9   :  { %v5818_v34 = vrot.slane %v14681_v6, 1  ;;  %8447 = vperm.xlu0 %9816, %v8418_v17   ;;  %v5911_v42 = vmax.f32 %v14647_v28, %v5817_v12  ;;  %v5910_v18 = vmax.f32 %v14643_v29, %v5815_v56  ;;  %v16380_v24 = vmax.f32 %v14335_v5, 0.0  ;;  %v8422_v29 = vld [vmem:[%s15496_s9 + $0x40] sm:$0xff] }
 0x6da   :  { %6146 = vmatprep.mubr.bf16.mxu1 %v14676_v30  ;;  %6413 = vmatprep.mubr.bf16.mxu0 %v14676_v30  ;;  %v5820_v3 = vrot.slane %v14685_v60, 1  ;;  %v5599_v9 = vsel %vm1567_vm2, %v10001_v43, %v10002_v45  ;;  %v5679_v26 = vsel %vm1567_vm2, %v10002_v45, %v10001_v43  ;;  %v16381_v11 = vmax.f32 %v14338_v58, 0.0 }
 0x6db   :  { %v5819_v23 = vsel %vm2788_vm6, %v5814_v46, %v5818_v34  ;;  %v5714_v49 = vmax.f32 %v16378_v50, %v5599_v9  ;;  %v5715_v62 = vmax.f32 %v16379_v51, %v5679_v26  ;;  %v10005_v1 = vpop.permute.xlu1 %10004  ;;  %v16382_v56 = vmax.f32 %v14352_v52, 0.0 }
 0x6dc   :  { %v5821_v38 = vsel %vm2788_vm6, %v5816_v59, %v5820_v3  ;;  %6147 = vmatmul.mubr.bf16.gmra.mrb[220].mxu1 %v14690_v57  ;;  %6414 = vmatmul.mubr.bf16.gmra.mrb[232].mxu0 %v14690_v57  ;;  %v10007_v28 = vunpack.i.h.bf16 %v10005_v1  ;;  %v10006_v54 = vunpack.i.l.bf16 %v10005_v1  ;;  %v5912_v2 = vmax.f32 %v5710_v13, %v5819_v23  ;;  %v8424_v23 = vld [vmem:[%s15496_s9 + $0x50] sm:$0xf] }
 0x6dd   :  { %v5913_v32 = vmax.f32 %v5711_v0, %v5821_v38  ;;  %v5824_v61 = vrot.slane %v5715_v62, 1  ;;  %v5822_v19 = vrot.slane %v5714_v49, 1  ;;  %8457 = vperm.xlu0 %9816, %v8420_v14   ;;  %v16383_v26 = vmax.f32 %v14355_v25, 0.0 }
 0x6de   :  { %v5600_v22 = vsel %vm1567_vm2, %v10006_v54, %v10007_v28  ;;  %v5680_v41 = vsel %vm1567_vm2, %v10007_v28, %v10006_v54  ;;  %v14724_v15 = vpack.c.bf16 %v5912_v2, %v5910_v18 }
 0x6df   :  { %v14714_v7 = vpack.c.bf16 %v5913_v32, %v5911_v42  ;;  %v5825_v59 = vsel %vm2788_vm6, %v5820_v3, %v5824_v61  ;;  %v5716_v46 = vmax.f32 %v16380_v24, %v5600_v22  ;;  %v5717_v0 = vmax.f32 %v16381_v11, %v5680_v41  ;;  %v10010_v13 = vpop.permute.xlu0 %10009 }
 0x6e0   :  { %v10012_v12 = vunpack.i.h.bf16 %v10010_v13  ;;  %v10011_v8 = vunpack.i.l.bf16 %v10010_v13  ;;  %v5823_v5 = vsel %vm2788_vm6, %v5818_v34, %v5822_v19  ;;  %v5915_v45 = vmax.f32 %v14685_v60, %v5825_v59 }
 0x6e1   :  { %6154 = vmatprep.mubr.bf16.mxu1 %v14714_v7  ;;  %6421 = vmatprep.mubr.bf16.mxu0 %v14714_v7  ;;  %v5826_v35 = vrot.slane %v5716_v46, 1  ;;  %v5828_v4 = vrot.slane %v5717_v0, 1  ;;  %v5914_v52 = vmax.f32 %v14681_v6, %v5823_v5  ;;  %v16384_v32 = vmax.f32 %v14369_v40, 0.0 }
 0x6e2   :  { %v5601_v58 = vsel %vm1567_vm2, %v10011_v8, %v10012_v12  ;;  %v5681_v17 = vsel %vm1567_vm2, %v10012_v12, %v10011_v8  ;;  %8467 = vperm.xlu0 %9816, %v8422_v29  }
 0x6e3   :  { %v5827_v43 = vsel %vm2788_vm6, %v5822_v19, %v5826_v35  ;;  %v5829_v3 = vsel %vm2788_vm6, %v5824_v61, %v5828_v4  ;;  %v5718_v9 = vmax.f32 %v16382_v56, %v5601_v58  ;;  %v5719_v42 = vmax.f32 %v16383_v26, %v5681_v17  ;;  %v10015_v34 = vpop.permute.xlu1 %10014 }
 0x6e4   :  { %6155 = vmatmul.mubr.bf16.gmra.mrb[224].mxu1 %v14724_v15  ;;  %6422 = vmatmul.mubr.bf16.gmra.mrb[236].mxu0 %v14724_v15  ;;  %v10017_v60 = vunpack.i.h.bf16 %v10015_v34  ;;  %v10016_v38 = vunpack.i.l.bf16 %v10015_v34  ;;  %v5917_v50 = vmax.f32 %v5715_v62, %v5829_v3  ;;  %v5916_v51 = vmax.f32 %v5714_v49, %v5827_v43  ;;  %v8629_v49 = vld [vmem:[%s15497_s11 + $0x8] sm:$0x3] }
 0x6e5   :  { %v5832_v1 = vrot.slane %v5719_v42, 1  ;;  %v5830_v14 = vrot.slane %v5718_v9, 1  ;;  %v16385_v61 = vmax.f32 %v14372_v21, 0.0  ;;  %v16387_v17 = vmax.f32 %v14472_v63, 0.0 }
 0x6e6   :  { %v5602_v25 = vsel %vm1567_vm2, %v10016_v38, %v10017_v60  ;;  %v5682_v28 = vsel %vm1567_vm2, %v10017_v60, %v10016_v38  ;;  %8477 = vperm.xlu0 %9816, %v8424_v23   ;;  %v14746_v54 = vpack.c.bf16 %v5917_v50, %v5915_v45  ;;  %v14755_v62 = vpack.c.bf16 %v5916_v51, %v5914_v52 }
 0x6e7   :  { %v5720_v2 = vmax.f32 %v16384_v32, %v5602_v25  ;;  %v5721_v18 = vmax.f32 %v16385_v61, %v5682_v28  ;;  %v5833_v6 = vsel %vm2788_vm6, %v5828_v4, %v5832_v1  ;;  %v5831_v40 = vsel %vm2788_vm6, %v5826_v35, %v5830_v14 }
 0x6e8   :  { %6162 = vmatprep.mubr.bf16.mxu1 %v14746_v54  ;;  %6429 = vmatprep.mubr.bf16.mxu0 %v14746_v54  ;;  %v5919_v59 = vmax.f32 %v5717_v0, %v5833_v6  ;;  %v5918_v13 = vmax.f32 %v5716_v46, %v5831_v40  ;;  %v16386_v46 = vmax.f32 %v14469_v10, 0.0  ;;  %v16388_v26 = vrot.slane %v14422_v36, 1  ;;  %v10260_v40 = vld [vmem:[%s15498_s6 + $0x7c] ss:$8 sps:$4 sm:$0xff]  }
 0x6e9   :  { %v5834_v19 = vrot.slane %v5720_v2, 1  ;;  %v5836_v22 = vrot.slane %v5721_v18, 1  ;;  %v16389_v34 = vrot.slane %v14426_v48, 1 }
 0x6ea   :  { %8637 = vperm.xlu0 %9816, %v8629_v49  }
 0x6eb   :  { %v5835_v21 = vsel %vm2788_vm6, %v5830_v14, %v5834_v19  ;;  %v5837_v41 = vsel %vm2788_vm6, %v5832_v1, %v5836_v22 }
 0x6ec   :  { %6163 = vmatmul.mubr.bf16.gmra.mrb[228].mxu1 %v14755_v62  ;;  %6430 = vmatmul.mubr.bf16.gmra.mrb[240].mxu0 %v14755_v62  ;;  %v5921_v24 = vmax.f32 %v5719_v42, %v5837_v41  ;;  %v5920_v11 = vmax.f32 %v5718_v9, %v5835_v21 }
 0x6ee   :  { %v14765_v29 = vpack.c.bf16 %v5921_v24, %v5919_v59  ;;  %v14767_v12 = vpack.c.bf16 %v5920_v11, %v5918_v13  ;;  %v10263_v59 = vld [vmem:[%s15498_s6 + $0x4] ss:$8 sps:$4 sm:$0xff]  }
 0x6f0   :  { %6170 = vmatprep.mubr.bf16.mxu1 %v14765_v29  ;;  %6437 = vmatprep.mubr.bf16.mxu0 %v14765_v29 }
 0x6f4   :  { %6171 = vmatmul.mubr.bf16.gmra.mrb[232].mxu1 %v14767_v12  ;;  %6438 = vmatmul.mubr.bf16.gmra.mrb[244].mxu0 %v14767_v12 }
 0x723   :  { %v10020_v8 = vpop.permute.xlu0 %10019 }
 0x724   :  { %v10022_v35 = vunpack.i.h.bf16 %v10020_v8  ;;  %v10021_v4 = vunpack.i.l.bf16 %v10020_v8 }
 0x726   :  { %v5603_v0 = vsel %vm1567_vm2, %v10021_v4, %v10022_v35  ;;  %v5683_v5 = vsel %vm1567_vm2, %v10022_v35, %v10021_v4 }
 0x727   :  { %v5722_v58 = vmax.f32 %v16386_v46, %v5603_v0  ;;  %v5723_v45 = vmax.f32 %v16387_v17, %v5683_v5 }
 0x729   :  { %v5838_v43 = vrot.slane %v5722_v58, 1  ;;  %v5840_v3 = vrot.slane %v5723_v45, 1 }
 0x72b   :  { %v5839_v56 = vsel %vm2788_vm6, %v5834_v19, %v5838_v43  ;;  %v5841_v9 = vsel %vm2788_vm6, %v5836_v22, %v5840_v3  ;;  %v5884_v42 = vsel %vm2788_vm6, %v5838_v43, %v16388_v26  ;;  %v5885_v23 = vsel %vm2788_vm6, %v5840_v3, %v16389_v34 }
 0x72c   :  { %v5922_v60 = vmax.f32 %v5720_v2, %v5839_v56  ;;  %v5923_v10 = vmax.f32 %v5721_v18, %v5841_v9  ;;  %v5924_v38 = vmax.f32 %v5722_v58, %v5884_v42  ;;  %v5925_v50 = vmax.f32 %v5723_v45, %v5885_v23 }
 0x72e   :  { %v14787_v63 = vpack.c.bf16 %v5924_v38, %v5922_v60  ;;  %v14789_v51 = vpack.c.bf16 %v5925_v50, %v5923_v10 }
 0x730   :  { %6178 = vmatprep.mubr.bf16.mxu1 %v14789_v51  ;;  %6445 = vmatprep.mubr.bf16.mxu0 %v14789_v51 }
 0x731   :  { %6179 = vmatmul.mubr.bf16.gmra.mrb[236].mxu1 %v14787_v63  ;;  %6446 = vmatmul.mubr.bf16.gmra.mrb[248].mxu0 %v14787_v63 }
 0x732   :  { %9054 = vmatprep.mubr.msk.bf16.mxu1 %vm6549_vm10, %v10260_v40  ;;  %9078 = vmatprep.mubr.msk.bf16.mxu0 %vm6549_vm10, %v10263_v59 }
 0x786   :  { %v9377_v36 = vpop.f32.mrb[200].mxu1  ;;  %v9453_v48 = vpop.f32.mrb[212].mxu0 }
 0x787   :  { %v9378_v1 = vpop.f32.mrb[201].mxu1  ;;  %v9454_v14 = vpop.f32.mrb[213].mxu0 }
 0x788   :  { %v9379_v52 = vadd.f32 %v9378_v1, %v9377_v36  ;;  %v9380_v25 = vpop.f32.mrb[202].mxu1  ;;  %v9455_v28 = vadd.f32 %v9454_v14, %v9453_v48  ;;  %v9456_v32 = vpop.f32.mrb[214].mxu0 }
 0x789   :  { %v9381_v2 = vpop.f32.mrb[203].mxu1  ;;  %v9457_v18 = vpop.f32.mrb[215].mxu0 }
 0x78a   :  { %v9382_v61 = vadd.f32 %v9381_v2, %v9380_v25  ;;  %v9458_v49 = vadd.f32 %v9457_v18, %v9456_v32 }
 0x78c   :  { %v6202_v6 = vpack.c.bf16 %v9382_v61, %v9379_v52  ;;  %v6470_v19 = vpack.c.bf16 %v9458_v49, %v9455_v28 }
 0x78e   :  { %6764 = vmatpush1.bf16.msra.mxu0 %v6202_v6  ;;  %6575 = vmatpush1.bf16.msra.mxu1 %v6470_v19 }
 0x78f   :  { %v9383_v22 = vpop.f32.mrb[204].mxu1  ;;  %v9459_v21 = vpop.f32.mrb[216].mxu0  ;;  %6765 = vmatprep.subr.bf16.mxu0 %v16306_v55  ;;  %6576 = vmatprep.subr.bf16.mxu1 %v16306_v55 }
 0x790   :  { %v9384_v41 = vpop.f32.mrb[205].mxu1  ;;  %v9460_v11 = vpop.f32.mrb[217].mxu0 }
 0x791   :  { %v9385_v24 = vadd.f32 %v9384_v41, %v9383_v22  ;;  %v9386_v13 = vpop.f32.mrb[206].mxu1  ;;  %v9461_v8 = vadd.f32 %v9460_v11, %v9459_v21  ;;  %v9462_v35 = vpop.f32.mrb[218].mxu0 }
 0x792   :  { %v9387_v4 = vpop.f32.mrb[207].mxu1  ;;  %v9463_v5 = vpop.f32.mrb[219].mxu0 }
 0x793   :  { %v9388_v0 = vadd.f32 %v9387_v4, %v9386_v13  ;;  %v9464_v46 = vadd.f32 %v9463_v5, %v9462_v35 }
 0x795   :  { %v6203_v58 = vpack.c.bf16 %v9388_v0, %v9385_v24  ;;  %v6471_v17 = vpack.c.bf16 %v9464_v46, %v9461_v8 }
 0x797   :  { %v9389_v45 = vpop.f32.mrb[208].mxu1  ;;  %6766 = vmatpush1.bf16.msra.mxu0 %v6203_v58  ;;  %v9465_v43 = vpop.f32.mrb[220].mxu0  ;;  %6577 = vmatpush1.bf16.msra.mxu1 %v6471_v17 }
 0x798   :  { %v9390_v3 = vpop.f32.mrb[209].mxu1  ;;  %6767 = vmatprep.subr.bf16.mxu0 %v16306_v55  ;;  %v9466_v9 = vpop.f32.mrb[221].mxu0  ;;  %6578 = vmatprep.subr.bf16.mxu1 %v16306_v55 }
 0x799   :  { %v9391_v56 = vadd.f32 %v9390_v3, %v9389_v45  ;;  %v9392_v26 = vpop.f32.mrb[210].mxu1  ;;  %v9467_v42 = vadd.f32 %v9466_v9, %v9465_v43  ;;  %v9468_v34 = vpop.f32.mrb[222].mxu0 }
 0x79a   :  { %v9393_v23 = vpop.f32.mrb[211].mxu1  ;;  %v9469_v10 = vpop.f32.mrb[223].mxu0 }
 0x79b   :  { %v9394_v60 = vadd.f32 %v9393_v23, %v9392_v26  ;;  %v9470_v38 = vadd.f32 %v9469_v10, %v9468_v34 }
 0x79d   :  { %v6204_v50 = vpack.c.bf16 %v9394_v60, %v9391_v56  ;;  %v6472_v36 = vpack.c.bf16 %v9470_v38, %v9467_v42 }
 0x79f   :  { %v9395_v48 = vpop.f32.mrb[212].mxu1  ;;  %6768 = vmatpush1.bf16.msra.mxu0 %v6204_v50  ;;  %v9471_v1 = vpop.f32.mrb[224].mxu0  ;;  %6579 = vmatpush1.bf16.msra.mxu1 %v6472_v36 }
 0x7a0   :  { %v9396_v52 = vpop.f32.mrb[213].mxu1  ;;  %6769 = vmatprep.subr.bf16.mxu0 %v16306_v55  ;;  %v9472_v25 = vpop.f32.mrb[225].mxu0  ;;  %6580 = vmatprep.subr.bf16.mxu1 %v16306_v55 }
 0x7a1   :  { %v9397_v14 = vadd.f32 %v9396_v52, %v9395_v48  ;;  %v9398_v28 = vpop.f32.mrb[214].mxu1  ;;  %v9473_v32 = vadd.f32 %v9472_v25, %v9471_v1  ;;  %v9474_v2 = vpop.f32.mrb[226].mxu0 }
 0x7a2   :  { %v9399_v61 = vpop.f32.mrb[215].mxu1  ;;  %v9475_v49 = vpop.f32.mrb[227].mxu0 }
 0x7a3   :  { %v9400_v18 = vadd.f32 %v9399_v61, %v9398_v28  ;;  %v9476_v6 = vadd.f32 %v9475_v49, %v9474_v2 }
 0x7a5   :  { %v6205_v19 = vpack.c.bf16 %v9400_v18, %v9397_v14  ;;  %v6473_v22 = vpack.c.bf16 %v9476_v6, %v9473_v32 }
 0x7a7   :  { %v9401_v40 = vpop.f32.mrb[216].mxu1  ;;  %6770 = vmatpush1.bf16.msra.mxu0 %v6205_v19  ;;  %v9477_v21 = vpop.f32.mrb[228].mxu0  ;;  %6581 = vmatpush1.bf16.msra.mxu1 %v6473_v22 }
 0x7a8   :  { %v9402_v41 = vpop.f32.mrb[217].mxu1  ;;  %6771 = vmatprep.subr.bf16.mxu0 %v16306_v55  ;;  %v9478_v24 = vpop.f32.mrb[229].mxu0  ;;  %6582 = vmatprep.subr.bf16.mxu1 %v16306_v55 }
 0x7a9   :  { %v9403_v59 = vadd.f32 %v9402_v41, %v9401_v40  ;;  %v9404_v11 = vpop.f32.mrb[218].mxu1  ;;  %v9479_v13 = vadd.f32 %v9478_v24, %v9477_v21  ;;  %v9480_v8 = vpop.f32.mrb[230].mxu0 }
 0x7aa   :  { %v9405_v35 = vpop.f32.mrb[219].mxu1  ;;  %v9481_v0 = vpop.f32.mrb[231].mxu0 }
 0x7ab   :  { %v9406_v4 = vadd.f32 %v9405_v35, %v9404_v11  ;;  %v9482_v5 = vadd.f32 %v9481_v0, %v9480_v8 }
 0x7ad   :  { %v6206_v46 = vpack.c.bf16 %v9406_v4, %v9403_v59  ;;  %v6474_v58 = vpack.c.bf16 %v9482_v5, %v9479_v13 }
 0x7af   :  { %v9407_v17 = vpop.f32.mrb[220].mxu1  ;;  %6772 = vmatpush1.bf16.msra.mxu0 %v6206_v46  ;;  %v9483_v45 = vpop.f32.mrb[232].mxu0  ;;  %6583 = vmatpush1.bf16.msra.mxu1 %v6474_v58 }
 0x7b0   :  { %v9408_v43 = vpop.f32.mrb[221].mxu1  ;;  %6773 = vmatprep.subr.bf16.mxu0 %v16306_v55  ;;  %v9484_v56 = vpop.f32.mrb[233].mxu0  ;;  %6584 = vmatprep.subr.bf16.mxu1 %v16306_v55 }
 0x7b1   :  { %v9409_v3 = vadd.f32 %v9408_v43, %v9407_v17  ;;  %v9410_v9 = vpop.f32.mrb[222].mxu1  ;;  %v9485_v26 = vadd.f32 %v9484_v56, %v9483_v45  ;;  %v9486_v42 = vpop.f32.mrb[234].mxu0 }
 0x7b2   :  { %v9411_v34 = vpop.f32.mrb[223].mxu1  ;;  %v9487_v60 = vpop.f32.mrb[235].mxu0 }
 0x7b3   :  { %v9412_v23 = vadd.f32 %v9411_v34, %v9410_v9  ;;  %v9488_v10 = vadd.f32 %v9487_v60, %v9486_v42 }
 0x7b5   :  { %v6207_v38 = vpack.c.bf16 %v9412_v23, %v9409_v3  ;;  %v6475_v50 = vpack.c.bf16 %v9488_v10, %v9485_v26 }
 0x7b7   :  { %v9413_v36 = vpop.f32.mrb[224].mxu1  ;;  %6774 = vmatpush1.bf16.msra.mxu0 %v6207_v38  ;;  %v9489_v48 = vpop.f32.mrb[236].mxu0  ;;  %6585 = vmatpush1.bf16.msra.mxu1 %v6475_v50 }
 0x7b8   :  { %v9414_v1 = vpop.f32.mrb[225].mxu1  ;;  %6775 = vmatprep.subr.bf16.mxu0 %v16306_v55  ;;  %v9490_v14 = vpop.f32.mrb[237].mxu0  ;;  %6586 = vmatprep.subr.bf16.mxu1 %v16306_v55 }
 0x7b9   :  { %v9415_v52 = vadd.f32 %v9414_v1, %v9413_v36  ;;  %v9416_v25 = vpop.f32.mrb[226].mxu1  ;;  %v9491_v28 = vadd.f32 %v9490_v14, %v9489_v48  ;;  %v9492_v32 = vpop.f32.mrb[238].mxu0 }
 0x7ba   :  { %v9417_v2 = vpop.f32.mrb[227].mxu1  ;;  %v9493_v18 = vpop.f32.mrb[239].mxu0 }
 0x7bb   :  { %v9418_v61 = vadd.f32 %v9417_v2, %v9416_v25  ;;  %v9494_v49 = vadd.f32 %v9493_v18, %v9492_v32 }
 0x7bd   :  { %v6208_v6 = vpack.c.bf16 %v9418_v61, %v9415_v52  ;;  %v6476_v19 = vpack.c.bf16 %v9494_v49, %v9491_v28  ;;  %v10288_v49 = vld [vmem:[%s15494_s5 + $0x140] sm:$0xff]  }
 0x7bf   :  { %v9419_v22 = vpop.f32.mrb[228].mxu1  ;;  %6776 = vmatpush1.bf16.msra.mxu0 %v6208_v6  ;;  %v9495_v40 = vpop.f32.mrb[240].mxu0  ;;  %6587 = vmatpush1.bf16.msra.mxu1 %v6476_v19 }
 0x7c0   :  { %v9420_v21 = vpop.f32.mrb[229].mxu1  ;;  %6777 = vmatprep.subr.bf16.mxu0 %v16306_v55  ;;  %v9496_v59 = vpop.f32.mrb[241].mxu0  ;;  %6588 = vmatprep.subr.bf16.mxu1 %v16306_v55 }
 0x7c1   :  { %v9421_v41 = vadd.f32 %v9420_v21, %v9419_v22  ;;  %v9422_v24 = vpop.f32.mrb[230].mxu1  ;;  %v9497_v11 = vadd.f32 %v9496_v59, %v9495_v40  ;;  %v9498_v13 = vpop.f32.mrb[242].mxu0  ;;  %v10258_v22 = vld [vmem:[%s15498_s6 + $0x78] ss:$8 sps:$4 sm:$0xff]   ;;  %v10264_v21 = vld [vmem:[%s15498_s6 + $0x8c] ss:$8 sps:$4 sm:$0xff]  }
 0x7c2   :  { %v9423_v8 = vpop.f32.mrb[231].mxu1  ;;  %v9499_v4 = vpop.f32.mrb[243].mxu0  ;;  %v10261_v40 = vld [vmem:[%s15498_s6] ss:$8 sps:$4 sm:$0xff]  }
 0x7c3   :  { %v9424_v35 = vadd.f32 %v9423_v8, %v9422_v24  ;;  %v9500_v0 = vadd.f32 %v9499_v4, %v9498_v13  ;;  %v10289_v59 = vld [vmem:[%s15494_s5 + $0x100] sm:$0xff]   ;;  %v10290_v24 = vld [vmem:[%s15494_s5 + $0x148] sm:$0xff]   ;;  %v10298_v13 = vld [vmem:[%s15494_s5 + $0x150] sm:$0xff]  }
 0x7c4   :  { %v10266_v8 = vld [vmem:[%s15498_s6 + $0x10] ss:$8 sps:$4 sm:$0xff]   ;;  %v10270_v4 = vld [vmem:[%s15498_s6 + $0x9c] ss:$8 sps:$4 sm:$0xff]  }
 0x7c5   :  { %v6209_v5 = vpack.c.bf16 %v9424_v35, %v9421_v41  ;;  %v6477_v46 = vpack.c.bf16 %v9500_v0, %v9497_v11  ;;  %v10268_v41 = vld [vmem:[%s15498_s6 + $0x14] ss:$8 sps:$4 sm:$0xff]   ;;  %v10291_v11 = vld [vmem:[%s15494_s5 + $0x108] sm:$0xff]  }
 0x7c6   :  { %v10269_v35 = vld [vmem:[%s15498_s6 + $0x88] ss:$8 sps:$4 sm:$0xff]   ;;  %v10274_v0 = vld [vmem:[%s15498_s6 + $0x24] ss:$8 sps:$4 sm:$0xff]  }
 0x7c7   :  { %v9425_v58 = vpop.f32.mrb[232].mxu1  ;;  %6778 = vmatpush1.bf16.msra.mxu0 %v6209_v5  ;;  %v9501_v17 = vpop.f32.mrb[244].mxu0  ;;  %6589 = vmatpush1.bf16.msra.mxu1 %v6477_v46  ;;  %v10299_v5 = vld [vmem:[%s15494_s5 + $0x110] sm:$0xff]   ;;  %v10300_v46 = vld [vmem:[%s15494_s5 + $0x158] sm:$0xff]  }
 0x7c8   :  { %v9426_v45 = vpop.f32.mrb[233].mxu1  ;;  %6779 = vmatprep.subr.bf16.mxu0 %v16306_v55  ;;  %v9502_v3 = vpop.f32.mrb[245].mxu0  ;;  %6590 = vmatprep.subr.bf16.mxu1 %v16306_v55 }
 0x7c9   :  { %v9427_v43 = vadd.f32 %v9426_v45, %v9425_v58  ;;  %v9428_v56 = vpop.f32.mrb[234].mxu1  ;;  %v9503_v9 = vadd.f32 %v9502_v3, %v9501_v17  ;;  %v9504_v26 = vpop.f32.mrb[246].mxu0  ;;  %v10301_v58 = vld [vmem:[%s15494_s5 + $0x118] sm:$0xff]   ;;  %v10308_v17 = vld [vmem:[%s15494_s5 + $0x160] sm:$0xff]   ;;  %v10276_v3 = vld [vmem:[%s15498_s6 + $0xac] ss:$8 sps:$4 sm:$0xff]  }
 0x7ca   :  { %v9429_v42 = vpop.f32.mrb[235].mxu1  ;;  %v9505_v23 = vpop.f32.mrb[247].mxu0  ;;  %v10272_v45 = vld [vmem:[%s15498_s6 + $0x20] ss:$8 sps:$4 sm:$0xff]  }
 0x7cb   :  { %v9430_v34 = vadd.f32 %v9429_v42, %v9428_v56  ;;  %v9506_v60 = vadd.f32 %v9505_v23, %v9504_v26  ;;  %v10280_v56 = vld [vmem:[%s15498_s6 + $0x34] ss:$8 sps:$4 sm:$0xff]   ;;  %v10310_v26 = vld [vmem:[%s15494_s5 + $0x168] sm:$0xff]   ;;  %v10278_v23 = vld [vmem:[%s15498_s6 + $0x30] ss:$8 sps:$4 sm:$0xff]  }
 0x7cc   :  { %v10311_v42 = vld [vmem:[%s15494_s5 + $0x128] sm:$0xff]  }
 0x7cd   :  { %v6210_v10 = vpack.c.bf16 %v9430_v34, %v9427_v43  ;;  %v6478_v38 = vpack.c.bf16 %v9506_v60, %v9503_v9  ;;  %v10275_v43 = vld [vmem:[%s15498_s6 + $0x98] ss:$8 sps:$4 sm:$0xff]   ;;  %v10316_v34 = vld [vmem:[%s15494_s5 + $0x170] sm:$0xff]  }
 0x7ce   :  { %v10309_v9 = vld [vmem:[%s15494_s5 + $0x120] sm:$0xff]   ;;  %v10281_v60 = vld [vmem:[%s15498_s6 + $0xa8] ss:$8 sps:$4 sm:$0xff]  }
 0x7cf   :  { %6780 = vmatpush1.bf16.msra.mxu0 %v6210_v10  ;;  %6591 = vmatpush1.bf16.msra.mxu1 %v6478_v38  ;;  %v10284_v10 = vld [vmem:[%s15498_s6 + $0xbc] ss:$8 sps:$4 sm:$0xff]  }
 0x7d0   :  { %6781 = vmatprep.subr.bf16.mxu0 %v16306_v55  ;;  %6592 = vmatprep.subr.bf16.mxu1 %v16306_v55  ;;  %v10287_v38 = vld [vmem:[%s15498_s6 + $0x44] ss:$8 sps:$4 sm:$0xff]  }
 0x804   :  { %v9431_v50 = vpop.f32.mrb[236].mxu1  ;;  %v9507_v36 = vpop.f32.mrb[248].mxu0 }
 0x805   :  { %v9432_v48 = vpop.f32.mrb[237].mxu1  ;;  %v9508_v1 = vpop.f32.mrb[249].mxu0 }
 0x806   :  { %v9433_v52 = vadd.f32 %v9432_v48, %v9431_v50  ;;  %v9509_v14 = vadd.f32 %v9508_v1, %v9507_v36  ;;  %v9434_v25 = vpop.f32.mrb[238].mxu1  ;;  %v9510_v28 = vpop.f32.mrb[250].mxu0  ;;  %v10317_v50 = vld [vmem:[%s15494_s5 + $0x130] sm:$0xff]   ;;  %v10318_v36 = vld [vmem:[%s15494_s5 + $0x178] sm:$0xff]  }
 0x807   :  { %v9435_v32 = vpop.f32.mrb[239].mxu1  ;;  %v9511_v2 = vpop.f32.mrb[251].mxu0  ;;  %v10319_v48 = vld [vmem:[%s15494_s5 + $0x138] sm:$0xff]  }
 0x808   :  { %v9436_v61 = vadd.f32 %v9435_v32, %v9434_v25  ;;  %v9512_v18 = vadd.f32 %v9511_v2, %v9510_v28  ;;  %v10282_v1 = vld [vmem:[%s15498_s6 + $0xb8] ss:$8 sps:$4 sm:$0xff]   ;;  %v10297_v25 = vld [vmem:[%s15498_s6 + $0x54] ss:$8 sps:$4 sm:$0xff]   ;;  %v10292_v28 = vld [vmem:[%s15498_s6 + $0xc8] ss:$8 sps:$4 sm:$0xff]  }
 0x809   :  { %v10295_v32 = vld [vmem:[%s15498_s6 + $0x50] ss:$8 sps:$4 sm:$0xff]   ;;  %v10304_v2 = vld [vmem:[%s15498_s6 + $0xdc] ss:$8 sps:$4 sm:$0xff]  }
 0x80a   :  { %v6211_v6 = vpack.c.bf16 %v9436_v61, %v9433_v52  ;;  %v6479_v19 = vpack.c.bf16 %v9512_v18, %v9509_v14  ;;  %v10285_v52 = vld [vmem:[%s15498_s6 + $0x40] ss:$8 sps:$4 sm:$0xff]   ;;  %v10294_v14 = vld [vmem:[%s15498_s6 + $0xcc] ss:$8 sps:$4 sm:$0xff]  }
 0x80b   :  { %v10307_v61 = vld [vmem:[%s15498_s6 + $0x64] ss:$8 sps:$4 sm:$0xff]  }
 0x80c   :  { %6593 = vmatpush1.bf16.msra.mxu1 %v6479_v19  ;;  %6782 = vmatpush1.bf16.msra.mxu0 %v6211_v6  ;;  %v9037_v18 = vld [vmem:[%s15498_s6 + $0xe8] sm:$0xff]  ;;  %v10302_v6 = vld [vmem:[%s15498_s6 + $0xd8] ss:$8 sps:$4 sm:$0xff]  }
 0x80d   :  { %9513 = vmatprep.subr.bf16.mxu1 %v10288_v49  ;;  %7220 = vmatprep.subr.bf16.mxu0 %v16306_v55  ;;  %v6201_v49 = vld [vmem:[%s15498_s6 + $0x70] sm:$0xff]  ;;  %v10305_v19 = vld [vmem:[%s15498_s6 + $0x60] ss:$8 sps:$4 sm:$0xff]  }
 0x80f   :  { %6607 = vmatmul.mubr.bf16.vlgmr.msra.gmra.mrb[240].mxu1 %v10258_v22  ;;  %6796 = vmatmul.mubr.bf16.vlgmr.msra.gmra.mrb[252].mxu0 %v10261_v40  ;;  %v9053_v22 = vcombine.high %v9037_v18, %v9037_v18  ;;  %v9077_v40 = vcombine.high %v6201_v49, %v6201_v49 }
 0x810   :  { %9055 = vmatprep.mubr.msk.bf16.mxu1 %vm6549_vm10, %v10264_v21  ;;  %9079 = vmatprep.mubr.msk.bf16.mxu0 %vm6549_vm10, %v10268_v41  ;;  %v9052_v21 = vcombine.low %v9037_v18, %v9037_v18  ;;  %v9076_v41 = vcombine.low %v6201_v49, %v6201_v49 }
 0x811   :  { %9514 = vmatpush3.bf16.msra.mxu1 %v10289_v59 }
 0x812   :  { %9515 = vmatprep.subr.bf16.mxu1 %v10290_v24 }
 0x815   :  { %9516 = vmatpush3.bf16.msra.mxu1 %v10291_v11 }
 0x816   :  { %9517 = vmatprep.subr.bf16.mxu1 %v10298_v13 }
 0x817   :  { %6615 = vmatmul.mubr.bf16.gmra.mrb[244].mxu1 %v10269_v35  ;;  %6804 = vmatmul.mubr.bf16.gmra.mrb[0].mxu0 %v10266_v8 }
 0x818   :  { %9056 = vmatprep.mubr.msk.bf16.mxu1 %vm6549_vm10, %v10270_v4  ;;  %9080 = vmatprep.mubr.msk.bf16.mxu0 %vm6549_vm10, %v10274_v0 }
 0x819   :  { %9518 = vmatpush3.bf16.msra.mxu1 %v10299_v5 }
 0x81a   :  { %9519 = vmatprep.subr.bf16.mxu1 %v10300_v46 }
 0x81d   :  { %9520 = vmatpush3.bf16.msra.mxu1 %v10301_v58 }
 0x81e   :  { %9521 = vmatprep.subr.bf16.mxu1 %v10308_v17 }
 0x81f   :  { %6623 = vmatmul.mubr.bf16.gmra.mrb[248].mxu1 %v10275_v43  ;;  %6812 = vmatmul.mubr.bf16.gmra.mrb[4].mxu0 %v10272_v45 }
 0x820   :  { %9057 = vmatprep.mubr.msk.bf16.mxu1 %vm6549_vm10, %v10276_v3  ;;  %9081 = vmatprep.mubr.msk.bf16.mxu0 %vm6549_vm10, %v10280_v56 }
 0x821   :  { %9522 = vmatpush3.bf16.msra.mxu1 %v10309_v9 }
 0x822   :  { %9523 = vmatprep.subr.bf16.mxu1 %v10310_v26 }
 0x825   :  { %9524 = vmatpush3.bf16.msra.mxu1 %v10311_v42 }
 0x826   :  { %9525 = vmatprep.subr.bf16.mxu1 %v10316_v34 }
 0x827   :  { %6631 = vmatmul.mubr.bf16.gmra.mrb[252].mxu1 %v10281_v60  ;;  %6820 = vmatmul.mubr.bf16.gmra.mrb[8].mxu0 %v10278_v23 }
 0x828   :  { %9058 = vmatprep.mubr.msk.bf16.mxu1 %vm6549_vm10, %v10284_v10  ;;  %9082 = vmatprep.mubr.msk.bf16.mxu0 %vm6549_vm10, %v10287_v38  ;;  %v10322_v10 = vld [vmem:[%s15498_s6 + $0xf4] ss:$8 sps:$4 sm:$0xff]  }
 0x829   :  { %9526 = vmatpush3.bf16.msra.mxu1 %v10317_v50 }
 0x82a   :  { %9527 = vmatprep.subr.bf16.mxu1 %v10318_v36 }
 0x82d   :  { %9528 = vmatpush3.bf16.msra.mxu1 %v10319_v48 }
 0x82e   :  { %7692 = vmatprep.subr.bf16.mxu1 %v16306_v55 }
 0x82f   :  { %6639 = vmatmul.mubr.bf16.gmra.mrb[0].mxu1 %v10282_v1  ;;  %6828 = vmatmul.mubr.bf16.gmra.mrb[12].mxu0 %v10285_v52 }
 0x830   :  { %9059 = vmatprep.mubr.msk.bf16.mxu1 %vm6549_vm10, %v10294_v14  ;;  %9083 = vmatprep.mubr.msk.bf16.mxu0 %vm6549_vm10, %v10297_v25 }
 0x837   :  { %6647 = vmatmul.mubr.bf16.gmra.mrb[4].mxu1 %v10292_v28  ;;  %6836 = vmatmul.mubr.bf16.gmra.mrb[16].mxu0 %v10295_v32 }
 0x838   :  { %9060 = vmatprep.mubr.msk.bf16.mxu1 %vm6549_vm10, %v10304_v2  ;;  %9084 = vmatprep.mubr.msk.bf16.mxu0 %vm6549_vm10, %v10307_v61 }
 0x83f   :  { %6655 = vmatmul.mubr.bf16.gmra.mrb[8].mxu1 %v10302_v6  ;;  %6844 = vmatmul.mubr.bf16.gmra.mrb[20].mxu0 %v10305_v19 }
 0x840   :  { %9061 = vmatprep.mubr.msk.bf16.mxu1 %vm6549_vm10, %v9053_v22  ;;  %9085 = vmatprep.mubr.msk.bf16.mxu0 %vm6549_vm10, %v9077_v40 }
 0x847   :  { %6663 = vmatmul.mubr.bf16.gmra.mrb[12].mxu1 %v9052_v21  ;;  %6852 = vmatmul.mubr.bf16.gmra.mrb[24].mxu0 %v9076_v41 }
 0x848   :  { %7020 = vmatprep.mubr.bf16.mxu1 %v14496_v39  ;;  %9165 = vmatprep.mubr.msk.bf16.mxu0 %vm6549_vm10, %v10322_v10 }
 0x84f   :  { %7021 = vmatmul.mubr.bf16.vlgmr.msra.gmra.mrb[16].mxu1 %v14499_v33 }
 0x850   :  { %7028 = vmatprep.mubr.bf16.mxu1 %v14532_v31 }
 0x857   :  { %7029 = vmatmul.mubr.bf16.gmra.mrb[20].mxu1 %v14538_v16 }
 0x858   :  { %7036 = vmatprep.mubr.bf16.mxu1 %v14562_v27 }
 0x85f   :  { %7037 = vmatmul.mubr.bf16.gmra.mrb[24].mxu1 %v14576_v53 }
 0x860   :  { %7044 = vmatprep.mubr.bf16.mxu1 %v14600_v47 }
 0x867   :  { %7045 = vmatmul.mubr.bf16.gmra.mrb[28].mxu1 %v14614_v37 }
 0x868   :  { %7052 = vmatprep.mubr.bf16.mxu1 %v14638_v44 }
 0x86f   :  { %7053 = vmatmul.mubr.bf16.gmra.mrb[32].mxu1 %v14652_v20 }
 0x870   :  { %7060 = vmatprep.mubr.bf16.mxu1 %v14676_v30 }
 0x877   :  { %7061 = vmatmul.mubr.bf16.gmra.mrb[36].mxu1 %v14690_v57 }
 0x878   :  { %7068 = vmatprep.mubr.bf16.mxu1 %v14714_v7 }
 0x87f   :  { %7069 = vmatmul.mubr.bf16.gmra.mrb[40].mxu1 %v14724_v15 }
 0x880   :  { %7076 = vmatprep.mubr.bf16.mxu1 %v14746_v54 }
 0x887   :  { %7077 = vmatmul.mubr.bf16.gmra.mrb[44].mxu1 %v14755_v62 }
 0x888   :  { %7084 = vmatprep.mubr.bf16.mxu1 %v14765_v29 }
 0x88f   :  { %7085 = vmatmul.mubr.bf16.gmra.mrb[48].mxu1 %v14767_v12 }
 0x890   :  { %7092 = vmatprep.mubr.bf16.mxu1 %v14789_v51 }
 0x897   :  { %7093 = vmatmul.mubr.bf16.gmra.mrb[52].mxu1 %v14787_v63 }
 0x8e2   :  { %v6608_v59 = vpop.f32.mrb[240].mxu1  ;;  %v6797_v24 = vpop.f32.mrb[252].mxu0 }
 0x8e3   :  { %v14989_v11 = vadd.f32 %v6797_v24, %v6608_v59  ;;  %v6610_v13 = vpop.f32.mrb[241].mxu1  ;;  %v6799_v8 = vpop.f32.mrb[253].mxu0 }
 0x8e4   :  { %v6611_v35 = vpop.f32.mrb[242].mxu1  ;;  %v6800_v4 = vpop.f32.mrb[254].mxu0 }
 0x8e5   :  { %v14991_v0 = vadd.f32 %v6800_v4, %v6611_v35  ;;  %v6613_v5 = vpop.f32.mrb[243].mxu1  ;;  %v6802_v46 = vpop.f32.mrb[255].mxu0 }
 0x8ea   :  { %v6616_v58 = vpop.f32.mrb[244].mxu1  ;;  %v6805_v17 = vpop.f32.mrb[0].mxu0 }
 0x8eb   :  { %v14993_v45 = vadd.f32 %v6805_v17, %v6616_v58  ;;  %v6618_v43 = vpop.f32.mrb[245].mxu1  ;;  %v6807_v3 = vpop.f32.mrb[1].mxu0 }
 0x8ec   :  { %v6619_v56 = vpop.f32.mrb[246].mxu1  ;;  %v6808_v9 = vpop.f32.mrb[2].mxu0 }
 0x8ed   :  { %v14995_v26 = vadd.f32 %v6808_v9, %v6619_v56  ;;  %v6621_v42 = vpop.f32.mrb[247].mxu1  ;;  %v6810_v34 = vpop.f32.mrb[3].mxu0 }
 0x8f2   :  { %v6624_v23 = vpop.f32.mrb[248].mxu1  ;;  %v6813_v60 = vpop.f32.mrb[4].mxu0 }
 0x8f3   :  { %v15000_v38 = vadd.f32 %v6813_v60, %v6624_v23  ;;  %v6626_v50 = vpop.f32.mrb[249].mxu1  ;;  %v6815_v36 = vpop.f32.mrb[5].mxu0 }
 0x8f4   :  { %v6627_v48 = vpop.f32.mrb[250].mxu1  ;;  %v6816_v1 = vpop.f32.mrb[6].mxu0 }
 0x8f5   :  { %v15003_v52 = vadd.f32 %v6816_v1, %v6627_v48  ;;  %v6629_v14 = vpop.f32.mrb[251].mxu1  ;;  %v6818_v25 = vpop.f32.mrb[7].mxu0 }
 0x8fa   :  { %v6632_v28 = vpop.f32.mrb[252].mxu1  ;;  %v6821_v32 = vpop.f32.mrb[8].mxu0 }
 0x8fb   :  { %v15005_v2 = vadd.f32 %v6821_v32, %v6632_v28  ;;  %v6634_v61 = vpop.f32.mrb[253].mxu1  ;;  %v6823_v18 = vpop.f32.mrb[9].mxu0 }
 0x8fc   :  { %v6635_v49 = vpop.f32.mrb[254].mxu1  ;;  %v6824_v6 = vpop.f32.mrb[10].mxu0 }
 0x8fd   :  { %v15007_v19 = vadd.f32 %v6824_v6, %v6635_v49  ;;  %v6637_v22 = vpop.f32.mrb[255].mxu1  ;;  %v6826_v40 = vpop.f32.mrb[11].mxu0 }
 0x902   :  { %v6640_v21 = vpop.f32.mrb[0].mxu1  ;;  %v6829_v41 = vpop.f32.mrb[12].mxu0 }
 0x903   :  { %v15009_v59 = vadd.f32 %v6829_v41, %v6640_v21  ;;  %v6642_v24 = vpop.f32.mrb[1].mxu1  ;;  %v6831_v13 = vpop.f32.mrb[13].mxu0 }
 0x904   :  { %v6643_v8 = vpop.f32.mrb[2].mxu1  ;;  %v6832_v35 = vpop.f32.mrb[14].mxu0 }
 0x905   :  { %v15011_v4 = vadd.f32 %v6832_v35, %v6643_v8  ;;  %v6645_v5 = vpop.f32.mrb[3].mxu1  ;;  %v6834_v46 = vpop.f32.mrb[15].mxu0 }
 0x90a   :  { %v6648_v58 = vpop.f32.mrb[4].mxu1  ;;  %v6837_v17 = vpop.f32.mrb[16].mxu0 }
 0x90b   :  { %v15013_v43 = vadd.f32 %v6837_v17, %v6648_v58  ;;  %v6650_v3 = vpop.f32.mrb[5].mxu1  ;;  %v6839_v56 = vpop.f32.mrb[17].mxu0 }
 0x90c   :  { %v6651_v9 = vpop.f32.mrb[6].mxu1  ;;  %v6840_v42 = vpop.f32.mrb[18].mxu0 }
 0x90d   :  { %v15015_v34 = vadd.f32 %v6840_v42, %v6651_v9  ;;  %v6653_v23 = vpop.f32.mrb[7].mxu1  ;;  %v6842_v60 = vpop.f32.mrb[19].mxu0 }
 0x912   :  { %v6656_v10 = vpop.f32.mrb[8].mxu1  ;;  %v6845_v50 = vpop.f32.mrb[20].mxu0 }
 0x913   :  { %v15017_v36 = vadd.f32 %v6845_v50, %v6656_v10  ;;  %v6658_v48 = vpop.f32.mrb[9].mxu1  ;;  %v6847_v1 = vpop.f32.mrb[21].mxu0 }
 0x914   :  { %v6659_v14 = vpop.f32.mrb[10].mxu1  ;;  %v6848_v25 = vpop.f32.mrb[22].mxu0 }
 0x915   :  { %v15019_v28 = vadd.f32 %v6848_v25, %v6659_v14  ;;  %v6661_v32 = vpop.f32.mrb[11].mxu1  ;;  %v6850_v61 = vpop.f32.mrb[23].mxu0 }
 0x91a   :  { %v6664_v18 = vpop.f32.mrb[12].mxu1  ;;  %v6853_v49 = vpop.f32.mrb[24].mxu0 }
 0x91b   :  { %v15021_v6 = vadd.f32 %v6853_v49, %v6664_v18  ;;  %v6666_v22 = vpop.f32.mrb[13].mxu1  ;;  %v6855_v40 = vpop.f32.mrb[25].mxu0 }
 0x91c   :  { %v6667_v21 = vpop.f32.mrb[14].mxu1  ;;  %v6856_v41 = vpop.f32.mrb[26].mxu0 }
 0x91d   :  { %v6668_v24 = vpop.f32.mrb[15].mxu1  ;;  %v6857_v13 = vpop.f32.mrb[27].mxu0 }
 0x922   :  { %v9529_v8 = vpop.f32.mrb[16].mxu1 }
 0x923   :  { %v9530_v35 = vpop.f32.mrb[17].mxu1 }
 0x924   :  { %v9531_v5 = vadd.f32 %v9530_v35, %v9529_v8  ;;  %v9532_v46 = vpop.f32.mrb[18].mxu1 }
 0x925   :  { %v9533_v58 = vpop.f32.mrb[19].mxu1 }
 0x926   :  { %v9534_v17 = vadd.f32 %v9533_v58, %v9532_v46 }
 0x928   :  { %v7117_v3 = vpack.c.bf16 %v9534_v17, %v9531_v5 }
 0x92a   :  { %v9535_v56 = vpop.f32.mrb[20].mxu1  ;;  %7221 = vmatpush1.bf16.msra.mxu0 %v7117_v3 }
 0x92b   :  { %v9536_v9 = vpop.f32.mrb[21].mxu1  ;;  %7222 = vmatprep.subr.bf16.mxu0 %v16306_v55 }
 0x92c   :  { %v9537_v42 = vadd.f32 %v9536_v9, %v9535_v56  ;;  %v9538_v23 = vpop.f32.mrb[22].mxu1 }
 0x92d   :  { %v9539_v60 = vpop.f32.mrb[23].mxu1 }
 0x92e   :  { %v9540_v10 = vadd.f32 %v9539_v60, %v9538_v23 }
 0x930   :  { %v7118_v50 = vpack.c.bf16 %v9540_v10, %v9537_v42 }
 0x932   :  { %v9541_v48 = vpop.f32.mrb[24].mxu1  ;;  %7223 = vmatpush1.bf16.msra.mxu0 %v7118_v50 }
 0x933   :  { %v9542_v1 = vpop.f32.mrb[25].mxu1  ;;  %7224 = vmatprep.subr.bf16.mxu0 %v16306_v55 }
 0x934   :  { %v9543_v14 = vadd.f32 %v9542_v1, %v9541_v48  ;;  %v9544_v25 = vpop.f32.mrb[26].mxu1 }
 0x935   :  { %v9545_v32 = vpop.f32.mrb[27].mxu1 }
 0x936   :  { %v9546_v61 = vadd.f32 %v9545_v32, %v9544_v25 }
 0x938   :  { %v7119_v18 = vpack.c.bf16 %v9546_v61, %v9543_v14 }
 0x93a   :  { %v9547_v49 = vpop.f32.mrb[28].mxu1  ;;  %7225 = vmatpush1.bf16.msra.mxu0 %v7119_v18 }
 0x93b   :  { %v9548_v22 = vpop.f32.mrb[29].mxu1  ;;  %7226 = vmatprep.subr.bf16.mxu0 %v16306_v55 }
 0x93c   :  { %v9549_v40 = vadd.f32 %v9548_v22, %v9547_v49  ;;  %v9550_v21 = vpop.f32.mrb[30].mxu1 }
 0x93d   :  { %v9551_v41 = vpop.f32.mrb[31].mxu1 }
 0x93e   :  { %v9552_v24 = vadd.f32 %v9551_v41, %v9550_v21 }
 0x940   :  { %v7120_v13 = vpack.c.bf16 %v9552_v24, %v9549_v40 }
 0x942   :  { %v9553_v8 = vpop.f32.mrb[32].mxu1  ;;  %7227 = vmatpush1.bf16.msra.mxu0 %v7120_v13 }
 0x943   :  { %v9554_v35 = vpop.f32.mrb[33].mxu1  ;;  %7228 = vmatprep.subr.bf16.mxu0 %v16306_v55 }
 0x944   :  { %v9555_v5 = vadd.f32 %v9554_v35, %v9553_v8  ;;  %v9556_v46 = vpop.f32.mrb[34].mxu1 }
 0x945   :  { %v9557_v58 = vpop.f32.mrb[35].mxu1 }
 0x946   :  { %v9558_v17 = vadd.f32 %v9557_v58, %v9556_v46 }
 0x948   :  { %v7121_v3 = vpack.c.bf16 %v9558_v17, %v9555_v5 }
 0x94a   :  { %v9559_v56 = vpop.f32.mrb[36].mxu1  ;;  %7229 = vmatpush1.bf16.msra.mxu0 %v7121_v3 }
 0x94b   :  { %v9560_v9 = vpop.f32.mrb[37].mxu1  ;;  %7230 = vmatprep.subr.bf16.mxu0 %v16306_v55 }
 0x94c   :  { %v9561_v42 = vadd.f32 %v9560_v9, %v9559_v56  ;;  %v9562_v23 = vpop.f32.mrb[38].mxu1 }
 0x94d   :  { %v9563_v60 = vpop.f32.mrb[39].mxu1 }
 0x94e   :  { %v9564_v10 = vadd.f32 %v9563_v60, %v9562_v23 }
 0x950   :  { %v7122_v50 = vpack.c.bf16 %v9564_v10, %v9561_v42 }
 0x952   :  { %v9565_v48 = vpop.f32.mrb[40].mxu1  ;;  %7231 = vmatpush1.bf16.msra.mxu0 %v7122_v50  ;;  %v10335_v50 = vld [vmem:[%s15494_s5 + $0x1c0] sm:$0xff]  }
 0x953   :  { %v9566_v1 = vpop.f32.mrb[41].mxu1  ;;  %7232 = vmatprep.subr.bf16.mxu0 %v16306_v55 }
 0x954   :  { %v9567_v14 = vadd.f32 %v9566_v1, %v9565_v48  ;;  %v9568_v25 = vpop.f32.mrb[42].mxu1  ;;  %v10320_v1 = vld [vmem:[%s15498_s6 + $0xf0] ss:$8 sps:$4 sm:$0xff]  }
 0x955   :  { %v9569_v32 = vpop.f32.mrb[43].mxu1 }
 0x956   :  { %v9570_v61 = vadd.f32 %v9569_v32, %v9568_v25  ;;  %v10336_v25 = vld [vmem:[%s15494_s5 + $0x180] sm:$0xff]   ;;  %v10337_v32 = vld [vmem:[%s15494_s5 + $0x1c8] sm:$0xff]  }
 0x958   :  { %v7123_v18 = vpack.c.bf16 %v9570_v61, %v9567_v14  ;;  %v10325_v14 = vld [vmem:[%s15498_s6 + $0x104] ss:$8 sps:$4 sm:$0xff]  }
 0x959   :  { %v10338_v61 = vld [vmem:[%s15494_s5 + $0x188] sm:$0xff]  }
 0x95a   :  { %v9571_v49 = vpop.f32.mrb[44].mxu1  ;;  %7233 = vmatpush1.bf16.msra.mxu0 %v7123_v18  ;;  %v10342_v18 = vld [vmem:[%s15494_s5 + $0x1d0] sm:$0xff]  }
 0x95b   :  { %v9572_v22 = vpop.f32.mrb[45].mxu1  ;;  %7234 = vmatprep.subr.bf16.mxu0 %v16306_v55 }
 0x95c   :  { %v9573_v40 = vadd.f32 %v9572_v22, %v9571_v49  ;;  %v9574_v21 = vpop.f32.mrb[46].mxu1  ;;  %v10323_v49 = vld [vmem:[%s15498_s6 + $0x100] ss:$8 sps:$4 sm:$0xff]   ;;  %v10328_v22 = vld [vmem:[%s15498_s6 + $0x114] ss:$8 sps:$4 sm:$0xff]  }
 0x95d   :  { %v9575_v41 = vpop.f32.mrb[47].mxu1 }
 0x95e   :  { %v9576_v24 = vadd.f32 %v9575_v41, %v9574_v21  ;;  %v10344_v21 = vld [vmem:[%s15494_s5 + $0x1d8] sm:$0xff]  }
 0x95f   :  { %v10345_v41 = vld [vmem:[%s15494_s5 + $0x198] sm:$0xff]  }
 0x960   :  { %v7124_v13 = vpack.c.bf16 %v9576_v24, %v9573_v40  ;;  %v10343_v40 = vld [vmem:[%s15494_s5 + $0x190] sm:$0xff]   ;;  %v10349_v24 = vld [vmem:[%s15494_s5 + $0x1e0] sm:$0xff]  }
 0x962   :  { %v9577_v8 = vpop.f32.mrb[48].mxu1  ;;  %7235 = vmatpush1.bf16.msra.mxu0 %v7124_v13  ;;  %v10326_v13 = vld [vmem:[%s15498_s6 + $0x110] ss:$8 sps:$4 sm:$0xff]  }
 0x963   :  { %v9578_v35 = vpop.f32.mrb[49].mxu1  ;;  %7236 = vmatprep.subr.bf16.mxu0 %v16306_v55 }
 0x964   :  { %v9579_v5 = vadd.f32 %v9578_v35, %v9577_v8  ;;  %v9580_v46 = vpop.f32.mrb[50].mxu1  ;;  %v10331_v8 = vld [vmem:[%s15498_s6 + $0x124] ss:$8 sps:$4 sm:$0xff]  }
 0x965   :  { %v9581_v58 = vpop.f32.mrb[51].mxu1  ;;  %v10350_v35 = vld [vmem:[%s15494_s5 + $0x1a0] sm:$0xff]  }
 0x966   :  { %v9582_v17 = vadd.f32 %v9581_v58, %v9580_v46  ;;  %v10352_v46 = vld [vmem:[%s15494_s5 + $0x1a8] sm:$0xff]   ;;  %v10355_v58 = vld [vmem:[%s15494_s5 + $0x1f0] sm:$0xff]  }
 0x968   :  { %v7125_v3 = vpack.c.bf16 %v9582_v17, %v9579_v5  ;;  %v10351_v5 = vld [vmem:[%s15494_s5 + $0x1e8] sm:$0xff]  }
 0x969   :  { %v10329_v17 = vld [vmem:[%s15498_s6 + $0x120] ss:$8 sps:$4 sm:$0xff]  }
 0x96a   :  { %v9583_v56 = vpop.f32.mrb[52].mxu1  ;;  %7237 = vmatpush1.bf16.msra.mxu0 %v7125_v3  ;;  %v10334_v3 = vld [vmem:[%s15498_s6 + $0x134] ss:$8 sps:$4 sm:$0xff]  }
 0x96b   :  { %v9584_v9 = vpop.f32.mrb[53].mxu1  ;;  %7238 = vmatprep.subr.bf16.mxu0 %v16306_v55 }
 0x96c   :  { %v9585_v42 = vadd.f32 %v9584_v9, %v9583_v56  ;;  %v9586_v23 = vpop.f32.mrb[54].mxu1  ;;  %v10356_v56 = vld [vmem:[%s15494_s5 + $0x1b0] sm:$0xff]   ;;  %v10357_v9 = vld [vmem:[%s15494_s5 + $0x1f8] sm:$0xff]  }
 0x96d   :  { %v9587_v60 = vpop.f32.mrb[55].mxu1 }
 0x96e   :  { %v9588_v10 = vadd.f32 %v9587_v60, %v9586_v23  ;;  %v10332_v23 = vld [vmem:[%s15498_s6 + $0x130] ss:$8 sps:$4 sm:$0xff]   ;;  %v10341_v60 = vld [vmem:[%s15498_s6 + $0x144] ss:$8 sps:$4 sm:$0xff]  }
 0x970   :  { %v7126_v48 = vpack.c.bf16 %v9588_v10, %v9585_v42  ;;  %v10358_v42 = vld [vmem:[%s15494_s5 + $0x1b8] sm:$0xff]   ;;  %v10339_v10 = vld [vmem:[%s15498_s6 + $0x140] ss:$8 sps:$4 sm:$0xff]  }
 0x972   :  { %7239 = vmatpush1.bf16.msra.mxu0 %v7126_v48  ;;  %v9148_v48 = vld [vmem:[%s15498_s6 + $0x160] sm:$0xff] }
 0x973   :  { %9589 = vmatprep.subr.bf16.mxu0 %v10335_v50  ;;  %v10348_v50 = vld [vmem:[%s15498_s6 + $0x154] ss:$8 sps:$4 sm:$0xff]  }
 0x975   :  { %7253 = vmatmul.mubr.bf16.vlgmr.msra.gmra.mrb[28].mxu0 %v10320_v1  ;;  %v10346_v1 = vld [vmem:[%s15498_s6 + $0x150] ss:$8 sps:$4 sm:$0xff]  }
 0x976   :  { %9166 = vmatprep.mubr.msk.bf16.mxu0 %vm6549_vm10, %v10325_v14  ;;  %9590 = vmatpush3.bf16.msra.mxu0 %v10336_v25  ;;  %v9164_v14 = vcombine.high %v9148_v48, %v9148_v48  ;;  %v9163_v25 = vcombine.low %v9148_v48, %v9148_v48 }
 0x977   :  { %9591 = vmatprep.subr.bf16.mxu0 %v10337_v32 }
 0x97a   :  { %9592 = vmatpush3.bf16.msra.mxu0 %v10338_v61 }
 0x97b   :  { %9593 = vmatprep.subr.bf16.mxu0 %v10342_v18 }
 0x97d   :  { %7261 = vmatmul.mubr.bf16.gmra.mrb[32].mxu0 %v10323_v49 }
 0x97e   :  { %9167 = vmatprep.mubr.msk.bf16.mxu0 %vm6549_vm10, %v10328_v22  ;;  %9594 = vmatpush3.bf16.msra.mxu0 %v10343_v40 }
 0x97f   :  { %9595 = vmatprep.subr.bf16.mxu0 %v10344_v21 }
 0x982   :  { %9596 = vmatpush3.bf16.msra.mxu0 %v10345_v41 }
 0x983   :  { %9597 = vmatprep.subr.bf16.mxu0 %v10349_v24 }
 0x985   :  { %7269 = vmatmul.mubr.bf16.gmra.mrb[36].mxu0 %v10326_v13 }
 0x986   :  { %9168 = vmatprep.mubr.msk.bf16.mxu0 %vm6549_vm10, %v10331_v8  ;;  %9598 = vmatpush3.bf16.msra.mxu0 %v10350_v35 }
 0x987   :  { %9599 = vmatprep.subr.bf16.mxu0 %v10351_v5 }
 0x98a   :  { %9600 = vmatpush3.bf16.msra.mxu0 %v10352_v46 }
 0x98b   :  { %9601 = vmatprep.subr.bf16.mxu0 %v10355_v58 }
 0x98d   :  { %7277 = vmatmul.mubr.bf16.gmra.mrb[40].mxu0 %v10329_v17 }
 0x98e   :  { %9169 = vmatprep.mubr.msk.bf16.mxu0 %vm6549_vm10, %v10334_v3  ;;  %9602 = vmatpush3.bf16.msra.mxu0 %v10356_v56 }
 0x98f   :  { %9603 = vmatprep.subr.bf16.mxu0 %v10357_v9 }
 0x992   :  { %9604 = vmatpush3.bf16.msra.mxu0 %v10358_v42 }
 0x993   :  { %8164 = vmatprep.subr.bf16.mxu0 %v16306_v55 }
 0x995   :  { %7285 = vmatmul.mubr.bf16.gmra.mrb[44].mxu0 %v10332_v23 }
 0x996   :  { %9170 = vmatprep.mubr.msk.bf16.mxu0 %vm6549_vm10, %v10341_v60 }
 0x99d   :  { %7293 = vmatmul.mubr.bf16.gmra.mrb[48].mxu0 %v10339_v10 }
 0x99e   :  { %9171 = vmatprep.mubr.msk.bf16.mxu0 %vm6549_vm10, %v10348_v50 }
 0x9a5   :  { %7301 = vmatmul.mubr.bf16.gmra.mrb[52].mxu0 %v10346_v1 }
 0x9a6   :  { %9172 = vmatprep.mubr.msk.bf16.mxu0 %vm6549_vm10, %v9164_v14 }
 0x9ad   :  { %7309 = vmatmul.mubr.bf16.gmra.mrb[56].mxu0 %v9163_v25 }
 0x9ae   :  { %7492 = vmatprep.mubr.bf16.mxu0 %v14496_v39 }
 0x9b5   :  { %7493 = vmatmul.mubr.bf16.vlgmr.msra.gmra.mrb[60].mxu0 %v14499_v33 }
 0x9b6   :  { %7500 = vmatprep.mubr.bf16.mxu0 %v14532_v31 }
 0x9bd   :  { %7501 = vmatmul.mubr.bf16.gmra.mrb[64].mxu0 %v14538_v16 }
 0x9be   :  { %7508 = vmatprep.mubr.bf16.mxu0 %v14562_v27 }
 0x9c5   :  { %7509 = vmatmul.mubr.bf16.gmra.mrb[68].mxu0 %v14576_v53 }
 0x9c6   :  { %7516 = vmatprep.mubr.bf16.mxu0 %v14600_v47 }
 0x9cd   :  { %7517 = vmatmul.mubr.bf16.gmra.mrb[72].mxu0 %v14614_v37 }
 0x9ce   :  { %7524 = vmatprep.mubr.bf16.mxu0 %v14638_v44 }
 0x9d5   :  { %7525 = vmatmul.mubr.bf16.gmra.mrb[76].mxu0 %v14652_v20 }
 0x9d6   :  { %7532 = vmatprep.mubr.bf16.mxu0 %v14676_v30 }
 0x9dd   :  { %7533 = vmatmul.mubr.bf16.gmra.mrb[80].mxu0 %v14690_v57 }
 0x9de   :  { %7540 = vmatprep.mubr.bf16.mxu0 %v14714_v7 }
 0x9e5   :  { %7541 = vmatmul.mubr.bf16.gmra.mrb[84].mxu0 %v14724_v15 }
 0x9e6   :  { %7548 = vmatprep.mubr.bf16.mxu0 %v14746_v54 }
 0x9ed   :  { %7549 = vmatmul.mubr.bf16.gmra.mrb[88].mxu0 %v14755_v62 }
 0x9ee   :  { %7556 = vmatprep.mubr.bf16.mxu0 %v14765_v29 }
 0x9f5   :  { %7557 = vmatmul.mubr.bf16.gmra.mrb[92].mxu0 %v14767_v12 }
 0x9f6   :  { %7564 = vmatprep.mubr.bf16.mxu0 %v14789_v51 }
 0x9fd   :  { %7565 = vmatmul.mubr.bf16.gmra.mrb[96].mxu0 %v14787_v63 }
 0xa48   :  { %v7254_v32 = vpop.f32.mrb[28].mxu0 }
 0xa49   :  { %v15151_v61 = vadd.f32 %v7254_v32, %v14989_v11  ;;  %v7256_v18 = vpop.f32.mrb[29].mxu0  ;;  %v10361_v11 = vld [vmem:[%s15498_s6 + $0x16c] ss:$8 sps:$4 sm:$0xff]  }
 0xa4a   :  { %v7257_v49 = vpop.f32.mrb[30].mxu0  ;;  %9252 = vmatprep.mubr.msk.bf16.mxu1 %vm6549_vm10, %v10361_v11 }
 0xa4b   :  { %v15154_v22 = vadd.f32 %v7257_v49, %v14991_v0  ;;  %v7259_v40 = vpop.f32.mrb[31].mxu0 }
 0xa50   :  { %v7262_v21 = vpop.f32.mrb[32].mxu0 }
 0xa51   :  { %v15157_v41 = vadd.f32 %v7262_v21, %v14993_v45  ;;  %v7264_v24 = vpop.f32.mrb[33].mxu0 }
 0xa52   :  { %v7265_v13 = vpop.f32.mrb[34].mxu0 }
 0xa53   :  { %v15160_v8 = vadd.f32 %v7265_v13, %v14995_v26  ;;  %v7267_v35 = vpop.f32.mrb[35].mxu0 }
 0xa58   :  { %v7270_v5 = vpop.f32.mrb[36].mxu0 }
 0xa59   :  { %v15166_v46 = vadd.f32 %v7270_v5, %v15000_v38  ;;  %v7272_v0 = vpop.f32.mrb[37].mxu0 }
 0xa5a   :  { %v7273_v58 = vpop.f32.mrb[38].mxu0 }
 0xa5b   :  { %v15170_v45 = vadd.f32 %v7273_v58, %v15003_v52  ;;  %v7275_v17 = vpop.f32.mrb[39].mxu0 }
 0xa60   :  { %v7278_v3 = vpop.f32.mrb[40].mxu0 }
 0xa61   :  { %v15173_v26 = vadd.f32 %v7278_v3, %v15005_v2  ;;  %v7280_v56 = vpop.f32.mrb[41].mxu0 }
 0xa62   :  { %v7281_v9 = vpop.f32.mrb[42].mxu0 }
 0xa63   :  { %v15176_v42 = vadd.f32 %v7281_v9, %v15007_v19  ;;  %v7283_v23 = vpop.f32.mrb[43].mxu0 }
 0xa68   :  { %v7286_v38 = vpop.f32.mrb[44].mxu0 }
 0xa69   :  { %v15179_v60 = vadd.f32 %v7286_v38, %v15009_v59  ;;  %v7288_v10 = vpop.f32.mrb[45].mxu0 }
 0xa6a   :  { %v7289_v50 = vpop.f32.mrb[46].mxu0 }
 0xa6b   :  { %v15182_v52 = vadd.f32 %v7289_v50, %v15011_v4  ;;  %v7291_v48 = vpop.f32.mrb[47].mxu0 }
 0xa70   :  { %v7294_v1 = vpop.f32.mrb[48].mxu0 }
 0xa71   :  { %v15185_v2 = vadd.f32 %v7294_v1, %v15013_v43  ;;  %v7296_v14 = vpop.f32.mrb[49].mxu0 }
 0xa72   :  { %v7297_v25 = vpop.f32.mrb[50].mxu0 }
 0xa73   :  { %v15188_v19 = vadd.f32 %v7297_v25, %v15015_v34  ;;  %v7299_v32 = vpop.f32.mrb[51].mxu0 }
 0xa78   :  { %v7302_v18 = vpop.f32.mrb[52].mxu0 }
 0xa79   :  { %v15191_v59 = vadd.f32 %v7302_v18, %v15017_v36  ;;  %v7304_v49 = vpop.f32.mrb[53].mxu0 }
 0xa7a   :  { %v7305_v40 = vpop.f32.mrb[54].mxu0 }
 0xa7b   :  { %v15194_v4 = vadd.f32 %v7305_v40, %v15019_v28  ;;  %v7307_v21 = vpop.f32.mrb[55].mxu0 }
 0xa80   :  { %v7310_v24 = vpop.f32.mrb[56].mxu0 }
 0xa81   :  { %v15197_v43 = vadd.f32 %v7310_v24, %v15021_v6  ;;  %v7312_v13 = vpop.f32.mrb[57].mxu0 }
 0xa82   :  { %v7313_v35 = vpop.f32.mrb[58].mxu0 }
 0xa83   :  { %v7314_v5 = vpop.f32.mrb[59].mxu0 }
 0xa88   :  { %v9605_v34 = vpop.f32.mrb[60].mxu0 }
 0xa89   :  { %v9606_v11 = vpop.f32.mrb[61].mxu0 }
 0xa8a   :  { %v9607_v0 = vadd.f32 %v9606_v11, %v9605_v34  ;;  %v9608_v58 = vpop.f32.mrb[62].mxu0 }
 0xa8b   :  { %v9609_v17 = vpop.f32.mrb[63].mxu0 }
 0xa8c   :  { %v9610_v36 = vadd.f32 %v9609_v17, %v9608_v58 }
 0xa8e   :  { %v7589_v3 = vpack.c.bf16 %v9610_v36, %v9607_v0 }
 0xa90   :  { %v9611_v56 = vpop.f32.mrb[64].mxu0  ;;  %7693 = vmatpush1.bf16.msra.mxu1 %v7589_v3 }
 0xa91   :  { %v9612_v9 = vpop.f32.mrb[65].mxu0  ;;  %7694 = vmatprep.subr.bf16.mxu1 %v16306_v55 }
 0xa92   :  { %v9613_v28 = vadd.f32 %v9612_v9, %v9611_v56  ;;  %v9614_v23 = vpop.f32.mrb[66].mxu0 }
 0xa93   :  { %v9615_v38 = vpop.f32.mrb[67].mxu0 }
 0xa94   :  { %v9616_v6 = vadd.f32 %v9615_v38, %v9614_v23 }
 0xa96   :  { %v7590_v10 = vpack.c.bf16 %v9616_v6, %v9613_v28 }
 0xa98   :  { %v9617_v50 = vpop.f32.mrb[68].mxu0  ;;  %7695 = vmatpush1.bf16.msra.mxu1 %v7590_v10 }
 0xa99   :  { %v9618_v48 = vpop.f32.mrb[69].mxu0  ;;  %7696 = vmatprep.subr.bf16.mxu1 %v16306_v55 }
 0xa9a   :  { %v9619_v1 = vadd.f32 %v9618_v48, %v9617_v50  ;;  %v9620_v14 = vpop.f32.mrb[70].mxu0 }
 0xa9b   :  { %v9621_v25 = vpop.f32.mrb[71].mxu0 }
 0xa9c   :  { %v9622_v32 = vadd.f32 %v9621_v25, %v9620_v14 }
 0xa9e   :  { %v7591_v18 = vpack.c.bf16 %v9622_v32, %v9619_v1 }
 0xaa0   :  { %v9623_v49 = vpop.f32.mrb[72].mxu0  ;;  %7697 = vmatpush1.bf16.msra.mxu1 %v7591_v18 }
 0xaa1   :  { %v9624_v40 = vpop.f32.mrb[73].mxu0  ;;  %7698 = vmatprep.subr.bf16.mxu1 %v16306_v55 }
 0xaa2   :  { %v9625_v21 = vadd.f32 %v9624_v40, %v9623_v49  ;;  %v9626_v24 = vpop.f32.mrb[74].mxu0 }
 0xaa3   :  { %v9627_v13 = vpop.f32.mrb[75].mxu0 }
 0xaa4   :  { %v9628_v35 = vadd.f32 %v9627_v13, %v9626_v24 }
 0xaa6   :  { %v7592_v5 = vpack.c.bf16 %v9628_v35, %v9625_v21 }
 0xaa8   :  { %v9629_v34 = vpop.f32.mrb[76].mxu0  ;;  %7699 = vmatpush1.bf16.msra.mxu1 %v7592_v5 }
 0xaa9   :  { %v9630_v11 = vpop.f32.mrb[77].mxu0  ;;  %7700 = vmatprep.subr.bf16.mxu1 %v16306_v55 }
 0xaaa   :  { %v9631_v0 = vadd.f32 %v9630_v11, %v9629_v34  ;;  %v9632_v58 = vpop.f32.mrb[78].mxu0 }
 0xaab   :  { %v9633_v17 = vpop.f32.mrb[79].mxu0 }
 0xaac   :  { %v9634_v36 = vadd.f32 %v9633_v17, %v9632_v58 }
 0xaae   :  { %v7593_v3 = vpack.c.bf16 %v9634_v36, %v9631_v0 }
 0xab0   :  { %v9635_v56 = vpop.f32.mrb[80].mxu0  ;;  %7701 = vmatpush1.bf16.msra.mxu1 %v7593_v3 }
 0xab1   :  { %v9636_v9 = vpop.f32.mrb[81].mxu0  ;;  %7702 = vmatprep.subr.bf16.mxu1 %v16306_v55 }
 0xab2   :  { %v9637_v28 = vadd.f32 %v9636_v9, %v9635_v56  ;;  %v9638_v23 = vpop.f32.mrb[82].mxu0 }
 0xab3   :  { %v9639_v38 = vpop.f32.mrb[83].mxu0 }
 0xab4   :  { %v9640_v6 = vadd.f32 %v9639_v38, %v9638_v23 }
 0xab6   :  { %v7594_v10 = vpack.c.bf16 %v9640_v6, %v9637_v28 }
 0xab8   :  { %v9641_v50 = vpop.f32.mrb[84].mxu0  ;;  %7703 = vmatpush1.bf16.msra.mxu1 %v7594_v10  ;;  %v10374_v10 = vld [vmem:[%s15494_s5 + $0x240] sm:$0xff]  }
 0xab9   :  { %v9642_v48 = vpop.f32.mrb[85].mxu0  ;;  %7704 = vmatprep.subr.bf16.mxu1 %v16306_v55 }
 0xaba   :  { %v9643_v1 = vadd.f32 %v9642_v48, %v9641_v50  ;;  %v9644_v14 = vpop.f32.mrb[86].mxu0  ;;  %v10359_v48 = vld [vmem:[%s15498_s6 + $0x168] ss:$8 sps:$4 sm:$0xff]  }
 0xabb   :  { %v9645_v25 = vpop.f32.mrb[87].mxu0 }
 0xabc   :  { %v9646_v32 = vadd.f32 %v9645_v25, %v9644_v14  ;;  %v10375_v14 = vld [vmem:[%s15494_s5 + $0x200] sm:$0xff]   ;;  %v10376_v25 = vld [vmem:[%s15494_s5 + $0x248] sm:$0xff]  }
 0xabe   :  { %v7595_v18 = vpack.c.bf16 %v9646_v32, %v9643_v1  ;;  %v10364_v1 = vld [vmem:[%s15498_s6 + $0x17c] ss:$8 sps:$4 sm:$0xff]   ;;  %v10377_v32 = vld [vmem:[%s15494_s5 + $0x208] sm:$0xff]  }
 0xac0   :  { %v9647_v49 = vpop.f32.mrb[88].mxu0  ;;  %7705 = vmatpush1.bf16.msra.mxu1 %v7595_v18  ;;  %v10381_v18 = vld [vmem:[%s15494_s5 + $0x250] sm:$0xff]  }
 0xac1   :  { %v9648_v40 = vpop.f32.mrb[89].mxu0  ;;  %7706 = vmatprep.subr.bf16.mxu1 %v16306_v55 }
 0xac2   :  { %v9649_v21 = vadd.f32 %v9648_v40, %v9647_v49  ;;  %v9650_v24 = vpop.f32.mrb[90].mxu0  ;;  %v10362_v49 = vld [vmem:[%s15498_s6 + $0x178] ss:$8 sps:$4 sm:$0xff]   ;;  %v10367_v40 = vld [vmem:[%s15498_s6 + $0x18c] ss:$8 sps:$4 sm:$0xff]  }
 0xac3   :  { %v9651_v13 = vpop.f32.mrb[91].mxu0 }
 0xac4   :  { %v9652_v35 = vadd.f32 %v9651_v13, %v9650_v24  ;;  %v10383_v24 = vld [vmem:[%s15494_s5 + $0x258] sm:$0xff]  }
 0xac5   :  { %v10384_v13 = vld [vmem:[%s15494_s5 + $0x218] sm:$0xff]  }
 0xac6   :  { %v7596_v5 = vpack.c.bf16 %v9652_v35, %v9649_v21  ;;  %v10382_v21 = vld [vmem:[%s15494_s5 + $0x210] sm:$0xff]   ;;  %v10388_v35 = vld [vmem:[%s15494_s5 + $0x260] sm:$0xff]  }
 0xac8   :  { %v9653_v34 = vpop.f32.mrb[92].mxu0  ;;  %7707 = vmatpush1.bf16.msra.mxu1 %v7596_v5  ;;  %v10365_v5 = vld [vmem:[%s15498_s6 + $0x188] ss:$8 sps:$4 sm:$0xff]  }
 0xac9   :  { %v9654_v11 = vpop.f32.mrb[93].mxu0  ;;  %7708 = vmatprep.subr.bf16.mxu1 %v16306_v55 }
 0xaca   :  { %v9655_v0 = vadd.f32 %v9654_v11, %v9653_v34  ;;  %v9656_v58 = vpop.f32.mrb[94].mxu0  ;;  %v10370_v34 = vld [vmem:[%s15498_s6 + $0x19c] ss:$8 sps:$4 sm:$0xff]  }
 0xacb   :  { %v9657_v17 = vpop.f32.mrb[95].mxu0  ;;  %v10389_v11 = vld [vmem:[%s15494_s5 + $0x220] sm:$0xff]  }
 0xacc   :  { %v9658_v36 = vadd.f32 %v9657_v17, %v9656_v58  ;;  %v10391_v58 = vld [vmem:[%s15494_s5 + $0x228] sm:$0xff]   ;;  %v10394_v17 = vld [vmem:[%s15494_s5 + $0x270] sm:$0xff]  }
 0xace   :  { %v7597_v3 = vpack.c.bf16 %v9658_v36, %v9655_v0  ;;  %v10390_v0 = vld [vmem:[%s15494_s5 + $0x268] sm:$0xff]   ;;  %v10368_v36 = vld [vmem:[%s15498_s6 + $0x198] ss:$8 sps:$4 sm:$0xff]  }
 0xad0   :  { %v9659_v56 = vpop.f32.mrb[96].mxu0  ;;  %7709 = vmatpush1.bf16.msra.mxu1 %v7597_v3  ;;  %v10373_v3 = vld [vmem:[%s15498_s6 + $0x1ac] ss:$8 sps:$4 sm:$0xff]  }
 0xad1   :  { %v9660_v9 = vpop.f32.mrb[97].mxu0  ;;  %7710 = vmatprep.subr.bf16.mxu1 %v16306_v55 }
 0xad2   :  { %v9661_v28 = vadd.f32 %v9660_v9, %v9659_v56  ;;  %v9662_v23 = vpop.f32.mrb[98].mxu0  ;;  %v10395_v56 = vld [vmem:[%s15494_s5 + $0x230] sm:$0xff]   ;;  %v10396_v9 = vld [vmem:[%s15494_s5 + $0x278] sm:$0xff]  }
 0xad3   :  { %v9663_v38 = vpop.f32.mrb[99].mxu0 }
 0xad4   :  { %v9664_v6 = vadd.f32 %v9663_v38, %v9662_v23  ;;  %v10371_v23 = vld [vmem:[%s15498_s6 + $0x1a8] ss:$8 sps:$4 sm:$0xff]   ;;  %v10380_v38 = vld [vmem:[%s15498_s6 + $0x1bc] ss:$8 sps:$4 sm:$0xff]  }
 0xad6   :  { %v7598_v50 = vpack.c.bf16 %v9664_v6, %v9661_v28  ;;  %v10397_v28 = vld [vmem:[%s15494_s5 + $0x238] sm:$0xff]  }
 0xad7   :  { %v10378_v6 = vld [vmem:[%s15498_s6 + $0x1b8] ss:$8 sps:$4 sm:$0xff]  }
 0xad8   :  { %7711 = vmatpush1.bf16.msra.mxu1 %v7598_v50  ;;  %v9235_v50 = vld [vmem:[%s15498_s6 + $0x1d8] sm:$0xff] }
 0xad9   :  { %9665 = vmatprep.subr.bf16.mxu1 %v10374_v10  ;;  %v10387_v10 = vld [vmem:[%s15498_s6 + $0x1cc] ss:$8 sps:$4 sm:$0xff]  }
 0xadb   :  { %7725 = vmatmul.mubr.bf16.vlgmr.msra.gmra.mrb[56].mxu1 %v10359_v48  ;;  %v10385_v48 = vld [vmem:[%s15498_s6 + $0x1c8] ss:$8 sps:$4 sm:$0xff]  }
 0xadc   :  { %9253 = vmatprep.mubr.msk.bf16.mxu1 %vm6549_vm10, %v10364_v1  ;;  %9666 = vmatpush3.bf16.msra.mxu1 %v10375_v14  ;;  %v9251_v1 = vcombine.high %v9235_v50, %v9235_v50  ;;  %v9250_v14 = vcombine.low %v9235_v50, %v9235_v50 }
 0xadd   :  { %9667 = vmatprep.subr.bf16.mxu1 %v10376_v25 }
 0xae0   :  { %9668 = vmatpush3.bf16.msra.mxu1 %v10377_v32 }
 0xae1   :  { %9669 = vmatprep.subr.bf16.mxu1 %v10381_v18 }
 0xae3   :  { %7733 = vmatmul.mubr.bf16.gmra.mrb[60].mxu1 %v10362_v49 }
 0xae4   :  { %9254 = vmatprep.mubr.msk.bf16.mxu1 %vm6549_vm10, %v10367_v40  ;;  %9670 = vmatpush3.bf16.msra.mxu1 %v10382_v21 }
 0xae5   :  { %9671 = vmatprep.subr.bf16.mxu1 %v10383_v24 }
 0xae8   :  { %9672 = vmatpush3.bf16.msra.mxu1 %v10384_v13 }
 0xae9   :  { %9673 = vmatprep.subr.bf16.mxu1 %v10388_v35 }
 0xaeb   :  { %7741 = vmatmul.mubr.bf16.gmra.mrb[64].mxu1 %v10365_v5 }
 0xaec   :  { %9255 = vmatprep.mubr.msk.bf16.mxu1 %vm6549_vm10, %v10370_v34  ;;  %9674 = vmatpush3.bf16.msra.mxu1 %v10389_v11 }
 0xaed   :  { %9675 = vmatprep.subr.bf16.mxu1 %v10390_v0 }
 0xaf0   :  { %9676 = vmatpush3.bf16.msra.mxu1 %v10391_v58 }
 0xaf1   :  { %9677 = vmatprep.subr.bf16.mxu1 %v10394_v17 }
 0xaf3   :  { %7749 = vmatmul.mubr.bf16.gmra.mrb[68].mxu1 %v10368_v36 }
 0xaf4   :  { %9256 = vmatprep.mubr.msk.bf16.mxu1 %vm6549_vm10, %v10373_v3  ;;  %9678 = vmatpush3.bf16.msra.mxu1 %v10395_v56 }
 0xaf5   :  { %9679 = vmatprep.subr.bf16.mxu1 %v10396_v9 }
 0xaf8   :  { %9680 = vmatpush3.bf16.msra.mxu1 %v10397_v28 }
 0xafb   :  { %7757 = vmatmul.mubr.bf16.gmra.mrb[72].mxu1 %v10371_v23 }
 0xafc   :  { %9257 = vmatprep.mubr.msk.bf16.mxu1 %vm6549_vm10, %v10380_v38 }
 0xb03   :  { %7765 = vmatmul.mubr.bf16.gmra.mrb[76].mxu1 %v10378_v6 }
 0xb04   :  { %9258 = vmatprep.mubr.msk.bf16.mxu1 %vm6549_vm10, %v10387_v10 }
 0xb0b   :  { %7773 = vmatmul.mubr.bf16.gmra.mrb[80].mxu1 %v10385_v48 }
 0xb0c   :  { %9259 = vmatprep.mubr.msk.bf16.mxu1 %vm6549_vm10, %v9251_v1 }
 0xb13   :  { %7781 = vmatmul.mubr.bf16.gmra.mrb[84].mxu1 %v9250_v14 }
 0xb14   :  { %7964 = vmatprep.mubr.bf16.mxu1 %v14496_v39 }
 0xb1b   :  { %7965 = vmatmul.mubr.bf16.vlgmr.msra.gmra.mrb[88].mxu1 %v14499_v33 }
 0xb1c   :  { %7972 = vmatprep.mubr.bf16.mxu1 %v14532_v31 }
 0xb23   :  { %7973 = vmatmul.mubr.bf16.gmra.mrb[92].mxu1 %v14538_v16 }
 0xb24   :  { %7980 = vmatprep.mubr.bf16.mxu1 %v14562_v27 }
 0xb2b   :  { %7981 = vmatmul.mubr.bf16.gmra.mrb[96].mxu1 %v14576_v53 }
 0xb2c   :  { %7988 = vmatprep.mubr.bf16.mxu1 %v14600_v47 }
 0xb33   :  { %7989 = vmatmul.mubr.bf16.gmra.mrb[100].mxu1 %v14614_v37 }
 0xb34   :  { %7996 = vmatprep.mubr.bf16.mxu1 %v14638_v44 }
 0xb3b   :  { %7997 = vmatmul.mubr.bf16.gmra.mrb[104].mxu1 %v14652_v20 }
 0xb3c   :  { %8004 = vmatprep.mubr.bf16.mxu1 %v14676_v30 }
 0xb43   :  { %8005 = vmatmul.mubr.bf16.gmra.mrb[108].mxu1 %v14690_v57 }
 0xb44   :  { %8012 = vmatprep.mubr.bf16.mxu1 %v14714_v7 }
 0xb4b   :  { %8013 = vmatmul.mubr.bf16.gmra.mrb[112].mxu1 %v14724_v15  ;;  %v10400_v15 = vld [vmem:[%s15498_s6 + $0x1e4] ss:$8 sps:$4 sm:$0xff]  }
 0xb4c   :  { %8020 = vmatprep.mubr.bf16.mxu1 %v14746_v54  ;;  %9339 = vmatprep.mubr.msk.bf16.mxu0 %vm6549_vm10, %v10400_v15 }
 0xb53   :  { %8021 = vmatmul.mubr.bf16.gmra.mrb[116].mxu1 %v14755_v62 }
 0xb54   :  { %8028 = vmatprep.mubr.bf16.mxu1 %v14765_v29 }
 0xb5b   :  { %8029 = vmatmul.mubr.bf16.gmra.mrb[120].mxu1 %v14767_v12 }
 0xb5c   :  { %8036 = vmatprep.mubr.bf16.mxu1 %v14789_v51 }
 0xb63   :  { %8037 = vmatmul.mubr.bf16.gmra.mrb[124].mxu1 %v14787_v63 }
 0xbae   :  { %v7726_v39 = vpop.f32.mrb[56].mxu1 }
 0xbaf   :  { %v15326_v33 = vadd.f32 %v7726_v39, %v15151_v61  ;;  %v7728_v31 = vpop.f32.mrb[57].mxu1 }
 0xbb0   :  { %v7729_v16 = vpop.f32.mrb[58].mxu1 }
 0xbb1   :  { %v15329_v27 = vadd.f32 %v7729_v16, %v15154_v22  ;;  %v7731_v53 = vpop.f32.mrb[59].mxu1 }
 0xbb6   :  { %v7734_v47 = vpop.f32.mrb[60].mxu1 }
 0xbb7   :  { %v15332_v37 = vadd.f32 %v7734_v47, %v15157_v41  ;;  %v7736_v44 = vpop.f32.mrb[61].mxu1 }
 0xbb8   :  { %v7737_v20 = vpop.f32.mrb[62].mxu1 }
 0xbb9   :  { %v15335_v30 = vadd.f32 %v7737_v20, %v15160_v8  ;;  %v7739_v57 = vpop.f32.mrb[63].mxu1 }
 0xbbe   :  { %v7742_v7 = vpop.f32.mrb[64].mxu1 }
 0xbbf   :  { %v15341_v54 = vadd.f32 %v7742_v7, %v15166_v46  ;;  %v7744_v62 = vpop.f32.mrb[65].mxu1 }
 0xbc0   :  { %v7745_v29 = vpop.f32.mrb[66].mxu1 }
 0xbc1   :  { %v15345_v12 = vadd.f32 %v7745_v29, %v15170_v45  ;;  %v7747_v63 = vpop.f32.mrb[67].mxu1 }
 0xbc6   :  { %v7750_v51 = vpop.f32.mrb[68].mxu1 }
 0xbc7   :  { %v15348_v61 = vadd.f32 %v7750_v51, %v15173_v26  ;;  %v7752_v22 = vpop.f32.mrb[69].mxu1 }
 0xbc8   :  { %v7753_v41 = vpop.f32.mrb[70].mxu1 }
 0xbc9   :  { %v15351_v8 = vadd.f32 %v7753_v41, %v15176_v42  ;;  %v7755_v25 = vpop.f32.mrb[71].mxu1 }
 0xbce   :  { %v7758_v46 = vpop.f32.mrb[72].mxu1 }
 0xbcf   :  { %v15354_v32 = vadd.f32 %v7758_v46, %v15179_v60  ;;  %v7760_v18 = vpop.f32.mrb[73].mxu1 }
 0xbd0   :  { %v7761_v49 = vpop.f32.mrb[74].mxu1 }
 0xbd1   :  { %v15357_v45 = vadd.f32 %v7761_v49, %v15182_v52  ;;  %v7763_v40 = vpop.f32.mrb[75].mxu1 }
 0xbd6   :  { %v7766_v21 = vpop.f32.mrb[76].mxu1 }
 0xbd7   :  { %v15360_v26 = vadd.f32 %v7766_v21, %v15185_v2  ;;  %v7768_v24 = vpop.f32.mrb[77].mxu1 }
 0xbd8   :  { %v7769_v13 = vpop.f32.mrb[78].mxu1 }
 0xbd9   :  { %v15363_v42 = vadd.f32 %v7769_v13, %v15188_v19  ;;  %v7771_v35 = vpop.f32.mrb[79].mxu1 }
 0xbde   :  { %v7774_v5 = vpop.f32.mrb[80].mxu1 }
 0xbdf   :  { %v15366_v60 = vadd.f32 %v7774_v5, %v15191_v59  ;;  %v7776_v34 = vpop.f32.mrb[81].mxu1 }
 0xbe0   :  { %v7777_v11 = vpop.f32.mrb[82].mxu1 }
 0xbe1   :  { %v15369_v52 = vadd.f32 %v7777_v11, %v15194_v4  ;;  %v7779_v0 = vpop.f32.mrb[83].mxu1 }
 0xbe6   :  { %v7782_v58 = vpop.f32.mrb[84].mxu1 }
 0xbe7   :  { %v15372_v2 = vadd.f32 %v7782_v58, %v15197_v43  ;;  %v7784_v17 = vpop.f32.mrb[85].mxu1 }
 0xbe8   :  { %v7785_v36 = vpop.f32.mrb[86].mxu1 }
 0xbe9   :  { %v7786_v3 = vpop.f32.mrb[87].mxu1 }
 0xbee   :  { %v9681_v19 = vpop.f32.mrb[88].mxu1 }
 0xbef   :  { %v9682_v56 = vpop.f32.mrb[89].mxu1 }
 0xbf0   :  { %v9683_v9 = vadd.f32 %v9682_v56, %v9681_v19  ;;  %v9684_v28 = vpop.f32.mrb[90].mxu1 }
 0xbf1   :  { %v9685_v23 = vpop.f32.mrb[91].mxu1 }
 0xbf2   :  { %v9686_v59 = vadd.f32 %v9685_v23, %v9684_v28 }
 0xbf4   :  { %v8061_v38 = vpack.c.bf16 %v9686_v59, %v9683_v9 }
 0xbf6   :  { %v9687_v6 = vpop.f32.mrb[92].mxu1  ;;  %8165 = vmatpush1.bf16.msra.mxu0 %v8061_v38 }
 0xbf7   :  { %v9688_v10 = vpop.f32.mrb[93].mxu1  ;;  %8166 = vmatprep.subr.bf16.mxu0 %v16306_v55 }
 0xbf8   :  { %v9689_v4 = vadd.f32 %v9688_v10, %v9687_v6  ;;  %v9690_v50 = vpop.f32.mrb[94].mxu1 }
 0xbf9   :  { %v9691_v48 = vpop.f32.mrb[95].mxu1 }
 0xbfa   :  { %v9692_v43 = vadd.f32 %v9691_v48, %v9690_v50 }
 0xbfc   :  { %v8062_v1 = vpack.c.bf16 %v9692_v43, %v9689_v4 }
 0xbfe   :  { %v9693_v14 = vpop.f32.mrb[96].mxu1  ;;  %8167 = vmatpush1.bf16.msra.mxu0 %v8062_v1 }
 0xbff   :  { %v9694_v39 = vpop.f32.mrb[97].mxu1  ;;  %8168 = vmatprep.subr.bf16.mxu0 %v16306_v55 }
 0xc00   :  { %v9695_v31 = vadd.f32 %v9694_v39, %v9693_v14  ;;  %v9696_v16 = vpop.f32.mrb[98].mxu1 }
 0xc01   :  { %v9697_v53 = vpop.f32.mrb[99].mxu1 }
 0xc02   :  { %v9698_v47 = vadd.f32 %v9697_v53, %v9696_v16 }
 0xc04   :  { %v8063_v44 = vpack.c.bf16 %v9698_v47, %v9695_v31 }
 0xc06   :  { %v9699_v20 = vpop.f32.mrb[100].mxu1  ;;  %8169 = vmatpush1.bf16.msra.mxu0 %v8063_v44 }
 0xc07   :  { %v9700_v57 = vpop.f32.mrb[101].mxu1  ;;  %8170 = vmatprep.subr.bf16.mxu0 %v16306_v55 }
 0xc08   :  { %v9701_v7 = vadd.f32 %v9700_v57, %v9699_v20  ;;  %v9702_v15 = vpop.f32.mrb[102].mxu1  ;;  %v10398_v57 = vld [vmem:[%s15498_s6 + $0x1e0] ss:$8 sps:$4 sm:$0xff]  }
 0xc09   :  { %v9703_v62 = vpop.f32.mrb[103].mxu1 }
 0xc0a   :  { %v9704_v29 = vadd.f32 %v9703_v62, %v9702_v15  ;;  %v10406_v15 = vld [vmem:[%s15498_s6 + $0x204] ss:$8 sps:$4 sm:$0xff]   ;;  %v10404_v62 = vld [vmem:[%s15498_s6 + $0x200] ss:$8 sps:$4 sm:$0xff]  }
 0xc0c   :  { %v8064_v63 = vpack.c.bf16 %v9704_v29, %v9701_v7  ;;  %v10403_v7 = vld [vmem:[%s15498_s6 + $0x1f4] ss:$8 sps:$4 sm:$0xff]  }
 0xc0d   :  { %v10409_v29 = vld [vmem:[%s15498_s6 + $0x214] ss:$8 sps:$4 sm:$0xff]  }
 0xc0e   :  { %v9705_v51 = vpop.f32.mrb[104].mxu1  ;;  %8171 = vmatpush1.bf16.msra.mxu0 %v8064_v63  ;;  %v10407_v63 = vld [vmem:[%s15498_s6 + $0x210] ss:$8 sps:$4 sm:$0xff]  }
 0xc0f   :  { %v9706_v22 = vpop.f32.mrb[105].mxu1  ;;  %8172 = vmatprep.subr.bf16.mxu0 %v16306_v55 }
 0xc10   :  { %v9707_v41 = vadd.f32 %v9706_v22, %v9705_v51  ;;  %v9708_v25 = vpop.f32.mrb[106].mxu1  ;;  %v10412_v51 = vld [vmem:[%s15498_s6 + $0x224] ss:$8 sps:$4 sm:$0xff]   ;;  %v10410_v22 = vld [vmem:[%s15498_s6 + $0x220] ss:$8 sps:$4 sm:$0xff]  }
 0xc11   :  { %v9709_v46 = vpop.f32.mrb[107].mxu1 }
 0xc12   :  { %v9710_v18 = vadd.f32 %v9709_v46, %v9708_v25  ;;  %v10413_v25 = vld [vmem:[%s15498_s6 + $0x230] ss:$8 sps:$4 sm:$0xff]   ;;  %v10418_v46 = vld [vmem:[%s15498_s6 + $0x244] ss:$8 sps:$4 sm:$0xff]  }
 0xc14   :  { %v8065_v49 = vpack.c.bf16 %v9710_v18, %v9707_v41  ;;  %v10415_v41 = vld [vmem:[%s15498_s6 + $0x234] ss:$8 sps:$4 sm:$0xff]  }
 0xc15   :  { %v9322_v18 = vld [vmem:[%s15498_s6 + $0x250] sm:$0xff] }
 0xc16   :  { %v9711_v40 = vpop.f32.mrb[108].mxu1  ;;  %8173 = vmatpush1.bf16.msra.mxu0 %v8065_v49  ;;  %v10416_v49 = vld [vmem:[%s15498_s6 + $0x240] ss:$8 sps:$4 sm:$0xff]  }
 0xc17   :  { %v9712_v21 = vpop.f32.mrb[109].mxu1  ;;  %8174 = vmatprep.subr.bf16.mxu0 %v16306_v55 }
 0xc18   :  { %v9713_v24 = vadd.f32 %v9712_v21, %v9711_v40  ;;  %v9714_v13 = vpop.f32.mrb[110].mxu1  ;;  %v9338_v40 = vcombine.high %v9322_v18, %v9322_v18  ;;  %v9337_v21 = vcombine.low %v9322_v18, %v9322_v18 }
 0xc19   :  { %v9715_v35 = vpop.f32.mrb[111].mxu1 }
 0xc1a   :  { %v9716_v5 = vadd.f32 %v9715_v35, %v9714_v13 }
 0xc1c   :  { %v8066_v34 = vpack.c.bf16 %v9716_v5, %v9713_v24  ;;  %v10421_v24 = vld [vmem:[%s15499_s8] sm:$0xff]  }
 0xc1e   :  { %v9717_v11 = vpop.f32.mrb[112].mxu1  ;;  %8175 = vmatpush1.bf16.msra.mxu0 %v8066_v34  ;;  %v8293_v34 = vpop.permute.xlu1 %8292 }
 0xc1f   :  { %v9718_v0 = vpop.f32.mrb[113].mxu1  ;;  %8176 = vmatprep.subr.bf16.mxu0 %v16306_v55 }
 0xc20   :  { %v9719_v58 = vadd.f32 %v9718_v0, %v9717_v11  ;;  %v9720_v17 = vpop.f32.mrb[114].mxu1 }
 0xc21   :  { %v9721_v36 = vpop.f32.mrb[115].mxu1 }
 0xc22   :  { %v9722_v3 = vadd.f32 %v9721_v36, %v9720_v17  ;;  %v8298_v36 = vpop.permute.xlu0 %8297 }
 0xc24   :  { %v8067_v19 = vpack.c.bf16 %v9722_v3, %v9719_v58 }
 0xc26   :  { %v9723_v56 = vpop.f32.mrb[116].mxu1  ;;  %8177 = vmatpush1.bf16.msra.mxu0 %v8067_v19 }
 0xc27   :  { %v9724_v9 = vpop.f32.mrb[117].mxu1  ;;  %8178 = vmatprep.subr.bf16.mxu0 %v16306_v55 }
 0xc28   :  { %v9725_v28 = vadd.f32 %v9724_v9, %v9723_v56  ;;  %v9726_v23 = vpop.f32.mrb[118].mxu1 }
 0xc29   :  { %v9727_v59 = vpop.f32.mrb[119].mxu1 }
 0xc2a   :  { %v9728_v38 = vadd.f32 %v9727_v59, %v9726_v23 }
 0xc2c   :  { %v8068_v6 = vpack.c.bf16 %v9728_v38, %v9725_v28  ;;  %v8303_v38 = vpop.permute.xlu1 %8302 }
 0xc2e   :  { %v9729_v10 = vpop.f32.mrb[120].mxu1  ;;  %8179 = vmatpush1.bf16.msra.mxu0 %v8068_v6 }
 0xc2f   :  { %v9730_v4 = vpop.f32.mrb[121].mxu1  ;;  %8180 = vmatprep.subr.bf16.mxu0 %v16306_v55 }
 0xc30   :  { %v9731_v50 = vadd.f32 %v9730_v4, %v9729_v10  ;;  %v9732_v48 = vpop.f32.mrb[122].mxu1 }
 0xc31   :  { %v9733_v43 = vpop.f32.mrb[123].mxu1 }
 0xc32   :  { %v9734_v1 = vadd.f32 %v9733_v43, %v9732_v48 }
 0xc34   :  { %v8069_v14 = vpack.c.bf16 %v9734_v1, %v9731_v50  ;;  %v8308_v50 = vpop.permute.xlu0 %8307 }
 0xc36   :  { %v9735_v39 = vpop.f32.mrb[124].mxu1  ;;  %8181 = vmatpush1.bf16.msra.mxu0 %v8069_v14 }
 0xc37   :  { %v9736_v31 = vpop.f32.mrb[125].mxu1  ;;  %8182 = vmatprep.subr.bf16.mxu0 %v16306_v55  ;;  %v10401_v55 = vld [vmem:[%s15498_s6 + $0x1f0] ss:$8 sps:$4 sm:$0xff]  }
 0xc38   :  { %v9737_v16 = vadd.f32 %v9736_v31, %v9735_v39  ;;  %v9738_v53 = vpop.f32.mrb[126].mxu1 }
 0xc39   :  { %v9739_v47 = vpop.f32.mrb[127].mxu1 }
 0xc3a   :  { %v9740_v44 = vadd.f32 %v9739_v47, %v9738_v53 }
 0xc3c   :  { %v8070_v20 = vpack.c.bf16 %v9740_v44, %v9737_v16 }
 0xc3e   :  { %8183 = vmatpush1.bf16.msra.mxu0 %v8070_v20 }
 0xc41   :  { %8197 = vmatmul.mubr.bf16.vlgmr.msra.gmra.mrb[100].mxu0 %v10398_v57 }
 0xc42   :  { %9340 = vmatprep.mubr.msk.bf16.mxu0 %vm6549_vm10, %v10403_v7 }
 0xc49   :  { %8205 = vmatmul.mubr.bf16.gmra.mrb[104].mxu0 %v10401_v55 }
 0xc4a   :  { %9341 = vmatprep.mubr.msk.bf16.mxu0 %vm6549_vm10, %v10406_v15 }
 0xc51   :  { %8213 = vmatmul.mubr.bf16.gmra.mrb[108].mxu0 %v10404_v62 }
 0xc52   :  { %9342 = vmatprep.mubr.msk.bf16.mxu0 %vm6549_vm10, %v10409_v29 }
 0xc59   :  { %8221 = vmatmul.mubr.bf16.gmra.mrb[112].mxu0 %v10407_v63 }
 0xc5a   :  { %9343 = vmatprep.mubr.msk.bf16.mxu0 %vm6549_vm10, %v10412_v51 }
 0xc61   :  { %8229 = vmatmul.mubr.bf16.gmra.mrb[116].mxu0 %v10410_v22 }
 0xc62   :  { %9344 = vmatprep.mubr.msk.bf16.mxu0 %vm6549_vm10, %v10415_v41 }
 0xc69   :  { %8237 = vmatmul.mubr.bf16.gmra.mrb[120].mxu0 %v10413_v25 }
 0xc6a   :  { %9345 = vmatprep.mubr.msk.bf16.mxu0 %vm6549_vm10, %v10418_v46 }
 0xc71   :  { %8245 = vmatmul.mubr.bf16.gmra.mrb[124].mxu0 %v10416_v49 }
 0xc72   :  { %9346 = vmatprep.mubr.msk.bf16.mxu0 %vm6549_vm10, %v9338_v40 }
 0xc79   :  { %8253 = vmatmul.mubr.bf16.gmra.mrb[128].mxu0 %v9337_v21 }
 0xc7a   :  { %9778 = vmatprep.mubr.msk.bf16.mxu0 %vm5123_vm9, %v10421_v24 }
 0xd14   :  { %v8198_v13 = vpop.f32.mrb[100].mxu0 }
 0xd15   :  { %v8260_v35 = vadd.f32 %v8198_v13, %v15326_v33  ;;  %v8200_v5 = vpop.f32.mrb[101].mxu0 }
 0xd16   :  { %v8201_v11 = vpop.f32.mrb[102].mxu0 }
 0xd17   :  { %v8365_v0 = vadd.f32 %v8293_v34, %v8260_v35  ;;  %v8261_v58 = vadd.f32 %v8201_v11, %v15329_v27  ;;  %v8203_v17 = vpop.f32.mrb[103].mxu0 }
 0xd19   :  { %v8366_v3 = vadd.f32 %v8298_v36, %v8261_v58  ;;  %v8380_v19 = vmax.f32 %v8365_v0, 0.0 }
 0xd1b   :  { %v8381_v56 = vmax.f32 %v8366_v3, 0.0 }
 0xd1c   :  { %v8206_v9 = vpop.f32.mrb[104].mxu0 }
 0xd1d   :  { %v8262_v28 = vadd.f32 %v8206_v9, %v15332_v37  ;;  %v8208_v23 = vpop.f32.mrb[105].mxu0  ;;  %v8395_v59 = vpack.c.bf16 %v8381_v56, %v8380_v19  ;;  %v8313_v37 = vpop.permute.xlu1 %8312 }
 0xd1e   :  { %v8209_v6 = vpop.f32.mrb[106].mxu0 }
 0xd1f   :  { %v8367_v10 = vadd.f32 %v8303_v38, %v8262_v28  ;;  %v8263_v33 = vadd.f32 %v8209_v6, %v15335_v30  ;;  %v8211_v4 = vpop.f32.mrb[107].mxu0  ;;  %9762 = vmatprep.subr.bf16.mxu0 %v8395_v59  ;;  %v8318_v30 = vpop.permute.xlu0 %8317 }
 0xd20   :  { %9763 = vmatpush3.bf16.msra.mxu0 %v8395_v59 }
 0xd21   :  { %v8368_v27 = vadd.f32 %v8308_v50, %v8263_v33  ;;  %v8382_v48 = vmax.f32 %v8367_v10, 0.0 }
 0xd23   :  { %v8383_v43 = vmax.f32 %v8368_v27, 0.0 }
 0xd24   :  { %v8214_v1 = vpop.f32.mrb[108].mxu0 }
 0xd25   :  { %v8264_v14 = vadd.f32 %v8214_v1, %v15341_v54  ;;  %v8216_v39 = vpop.f32.mrb[109].mxu0  ;;  %v8396_v31 = vpack.c.bf16 %v8383_v43, %v8382_v48  ;;  %v8323_v54 = vpop.permute.xlu1 %8322 }
 0xd26   :  { %v8217_v16 = vpop.f32.mrb[110].mxu0 }
 0xd27   :  { %v8369_v53 = vadd.f32 %v8313_v37, %v8264_v14  ;;  %v8265_v47 = vadd.f32 %v8217_v16, %v15345_v12  ;;  %v8219_v44 = vpop.f32.mrb[111].mxu0  ;;  %9764 = vmatprep.subr.bf16.mxu0 %v8396_v31  ;;  %v8328_v12 = vpop.permute.xlu0 %8327 }
 0xd28   :  { %9765 = vmatpush3.bf16.msra.mxu0 %v8396_v31 }
 0xd29   :  { %v8370_v20 = vadd.f32 %v8318_v30, %v8265_v47  ;;  %v8384_v57 = vmax.f32 %v8369_v53, 0.0 }
 0xd2b   :  { %v8385_v7 = vmax.f32 %v8370_v20, 0.0 }
 0xd2c   :  { %v8222_v55 = vpop.f32.mrb[112].mxu0 }
 0xd2d   :  { %v8266_v15 = vadd.f32 %v8222_v55, %v15348_v61  ;;  %v8224_v62 = vpop.f32.mrb[113].mxu0  ;;  %v8397_v29 = vpack.c.bf16 %v8385_v7, %v8384_v57  ;;  %v8333_v61 = vpop.permute.xlu1 %8332  ;;  %v10422_v55 = vld [vmem:[%s15499_s8 + $0x8] sm:$0xff]  }
 0xd2e   :  { %v8225_v63 = vpop.f32.mrb[114].mxu0  ;;  %v10425_v62 = vld [vmem:[%s15499_s8 + $0x20] sm:$0xff]  }
 0xd2f   :  { %v8371_v51 = vadd.f32 %v8323_v54, %v8266_v15  ;;  %v8267_v22 = vadd.f32 %v8225_v63, %v15351_v8  ;;  %v8227_v41 = vpop.f32.mrb[115].mxu0  ;;  %9766 = vmatprep.subr.bf16.mxu0 %v8397_v29  ;;  %v8338_v8 = vpop.permute.xlu0 %8337  ;;  %v10424_v15 = vld [vmem:[%s15499_s8 + $0x18] sm:$0xff]   ;;  %v10435_v54 = vmov 0.0  }
 0xd30   :  { %9767 = vmatpush3.bf16.msra.mxu0 %v8397_v29  ;;  %v10426_v29 = vld [vmem:[%s15499_s8 + $0x28] ss:$0 sps:$4 sm:$0x33]   ;;  %9790 = vmatprep.subr.bf16.mxu1 %v10435_v54 }
 0xd31   :  { %v8372_v25 = vadd.f32 %v8328_v12, %v8267_v22  ;;  %v8386_v46 = vmax.f32 %v8371_v51, 0.0  ;;  %9802 = vmatprep.mubr.msk.bf16.mxu1 %vm10436_vm11, %v10435_v54 }
 0xd33   :  { %v8387_v18 = vmax.f32 %v8372_v25, 0.0 }
 0xd34   :  { %v8230_v49 = vpop.f32.mrb[116].mxu0 }
 0xd35   :  { %v8268_v40 = vadd.f32 %v8230_v49, %v15354_v32  ;;  %v8232_v21 = vpop.f32.mrb[117].mxu0  ;;  %v8398_v24 = vpack.c.bf16 %v8387_v18, %v8386_v46  ;;  %v8343_v32 = vpop.permute.xlu1 %8342 }
 0xd36   :  { %v8233_v13 = vpop.f32.mrb[118].mxu0 }
 0xd37   :  { %v8373_v35 = vadd.f32 %v8333_v61, %v8268_v40  ;;  %v8269_v5 = vadd.f32 %v8233_v13, %v15357_v45  ;;  %v8235_v34 = vpop.f32.mrb[119].mxu0  ;;  %9768 = vmatprep.subr.bf16.mxu0 %v8398_v24  ;;  %v8348_v45 = vpop.permute.xlu0 %8347 }
 0xd38   :  { %9769 = vmatpush3.bf16.msra.mxu0 %v8398_v24 }
 0xd39   :  { %v8374_v11 = vadd.f32 %v8338_v8, %v8269_v5  ;;  %v8388_v0 = vmax.f32 %v8373_v35, 0.0 }
 0xd3b   :  { %v8389_v58 = vmax.f32 %v8374_v11, 0.0 }
 0xd3c   :  { %v8238_v17 = vpop.f32.mrb[120].mxu0 }
 0xd3d   :  { %v8270_v36 = vadd.f32 %v8238_v17, %v15360_v26  ;;  %v8240_v3 = vpop.f32.mrb[121].mxu0  ;;  %v8399_v19 = vpack.c.bf16 %v8389_v58, %v8388_v0  ;;  %v8353_v26 = vpop.permute.xlu1 %8352 }
 0xd3e   :  { %v8241_v56 = vpop.f32.mrb[122].mxu0 }
 0xd3f   :  { %v8375_v9 = vadd.f32 %v8343_v32, %v8270_v36  ;;  %v8271_v28 = vadd.f32 %v8241_v56, %v15363_v42  ;;  %v8243_v23 = vpop.f32.mrb[123].mxu0  ;;  %9770 = vmatprep.subr.bf16.mxu0 %v8399_v19  ;;  %v8358_v42 = vpop.permute.xlu0 %8357 }
 0xd40   :  { %9771 = vmatpush3.bf16.msra.mxu0 %v8399_v19 }
 0xd41   :  { %v8376_v59 = vadd.f32 %v8348_v45, %v8271_v28  ;;  %v8390_v38 = vmax.f32 %v8375_v9, 0.0 }
 0xd43   :  { %v8391_v6 = vmax.f32 %v8376_v59, 0.0  ;;  %v8428_v63 = vpop.permute.xlu0 %8427 }
 0xd44   :  { %v8246_v10 = vpop.f32.mrb[124].mxu0 }
 0xd45   :  { %v8272_v33 = vadd.f32 %v8246_v10, %v15366_v60  ;;  %v8248_v4 = vpop.f32.mrb[125].mxu0  ;;  %v8400_v50 = vpack.c.bf16 %v8391_v6, %v8390_v38  ;;  %v8363_v60 = vpop.permute.xlu1 %8362 }
 0xd46   :  { %v8249_v27 = vpop.f32.mrb[126].mxu0 }
 0xd47   :  { %v8377_v48 = vadd.f32 %v8353_v26, %v8272_v33  ;;  %v8273_v43 = vadd.f32 %v8249_v27, %v15369_v52  ;;  %v8251_v1 = vpop.f32.mrb[127].mxu0  ;;  %9772 = vmatprep.subr.bf16.mxu0 %v8400_v50  ;;  %v8438_v22 = vpop.permute.xlu0 %8437 }
 0xd48   :  { %9773 = vmatpush3.bf16.msra.mxu0 %v8400_v50 }
 0xd49   :  { %v8378_v14 = vadd.f32 %v8358_v42, %v8273_v43  ;;  %v8392_v39 = vmax.f32 %v8377_v48, 0.0  ;;  %v8433_v51 = vpop.permute.xlu1 %8432 }
 0xd4b   :  { %v8393_v31 = vmax.f32 %v8378_v14, 0.0  ;;  %v8448_v12 = vpop.permute.xlu0 %8447 }
 0xd4c   :  { %v8254_v37 = vpop.f32.mrb[128].mxu0 }
 0xd4d   :  { %v8274_v16 = vadd.f32 %v8254_v37, %v15372_v2  ;;  %v8256_v53 = vpop.f32.mrb[129].mxu0  ;;  %v8401_v47 = vpack.c.bf16 %v8393_v31, %v8392_v39  ;;  %v10423_v2 = vld [vmem:[%s15499_s8 + $0x10] sm:$0xff]   ;;  %v8443_v41 = vpop.permute.xlu1 %8442 }
 0xd4e   :  { %v8257_v44 = vpop.f32.mrb[130].mxu0 }
 0xd4f   :  { %v8379_v30 = vadd.f32 %v8363_v60, %v8274_v16  ;;  %v8258_v20 = vpop.f32.mrb[131].mxu0  ;;  %9774 = vmatprep.subr.bf16.mxu0 %v8401_v47  ;;  %v8458_v13 = vpop.permute.xlu0 %8457  ;;  %v10427_v44 = vld [vmem:[%s15500_s10] sm:$0x1f]  }
 0xd50   :  { %9775 = vmatpush3.bf16.msra.mxu0 %v8401_v47 }
 0xd51   :  { %v8394_v57 = vmax.f32 %v8379_v30, 0.0  ;;  %v8453_v21 = vpop.permute.xlu1 %8452 }
 0xd53   :  { %v8402_v52 = vpack.c.bf16 %v8394_v57, %v8394_v57  ;;  %v8468_v32 = vpop.permute.xlu0 %8467 }
 0xd55   :  { %9806 = vmatprep.subr.msk.bf16.mxu0 %vm3682_vm7, %v8402_v52  ;;  %v8527_v7 = vsel %vm3682_vm7, %v8402_v52, 0  ;;  %v8463_v36 = vpop.permute.xlu1 %8462 }
 0xd56   :  { %9777 = vmatpush3.bf16.msra.mxu0 %v8527_v7 }
 0xd57   :  { %v8478_v4 = vpop.permute.xlu0 %8477 }
 0xd59   :  { %9779 = vmatmul.mubr.msk.bf16.vlgmr.msra.gmra.mrb[132].mxu0 %vm5123_vm9, %v10422_v55  ;;  %v8473_v42 = vpop.permute.xlu1 %8472 }
 0xd5a   :  { %9782 = vmatprep.mubr.msk.bf16.mxu0 %vm5123_vm9, %v10423_v2 }
 0xd5b   :  { %v8638_v7 = vpop.permute.xlu0 %8637 }
 0xd5d   :  { %v8633_v30 = vpop.permute.xlu1 %8632 }
 0xd61   :  { %9783 = vmatmul.mubr.msk.bf16.gmra.mrb[136].mxu0 %vm5123_vm9, %v10424_v15 }
 0xd62   :  { %9786 = vmatprep.mubr.msk.bf16.mxu0 %vm5123_vm9, %v10425_v62 }
 0xd69   :  { %9787 = vmatmul.mubr.msk.bf16.gmra.mrb[140].mxu0 %vm5123_vm9, %v10426_v29 }
 0xe2c   :  { %v9780_v25 = vpop.f32.mrb[132].mxu0 }
 0xe2d   :  { %v8572_v46 = vadd.f32 %v9780_v25, %v8438_v22  ;;  %v8563_v18 = vpop.f32.mrb[133].mxu0 }
 0xe2e   :  { %v8564_v49 = vadd.f32 %v8563_v18, %v8428_v63  ;;  %v9781_v40 = vpop.f32.mrb[134].mxu0 }
 0xe2f   :  { %v8575_v24 = vadd.f32 %v9781_v40, %v8443_v41  ;;  %v8566_v61 = vpop.f32.mrb[135].mxu0  ;;  %v8611_v5 = vmax.f32 %v8572_v46, 0.0 }
 0xe30   :  { %v8567_v35 = vadd.f32 %v8566_v61, %v8433_v51  ;;  %v8609_v8 = vmax.f32 %v8564_v49, 0.0 }
 0xe31   :  { %v8612_v34 = vmax.f32 %v8575_v24, 0.0 }
 0xe32   :  { %v8610_v11 = vmax.f32 %v8567_v35, 0.0 }
 0xe33   :  { %v8621_v0 = vpack.c.bf16 %v8612_v34, %v8611_v5 }
 0xe34   :  { %v8620_v58 = vpack.c.bf16 %v8610_v11, %v8609_v8  ;;  %v9784_v17 = vpop.f32.mrb[136].mxu0 }
 0xe35   :  { %v8588_v3 = vadd.f32 %v9784_v17, %v8458_v13  ;;  %v8579_v19 = vpop.f32.mrb[137].mxu0 }
 0xe36   :  { %v8580_v56 = vadd.f32 %v8579_v19, %v8448_v12  ;;  %v9785_v9 = vpop.f32.mrb[138].mxu0  ;;  %9791 = vmatpush3.bf16.msra.mxu1 %v8620_v58 }
 0xe37   :  { %v8591_v28 = vadd.f32 %v9785_v9, %v8463_v36  ;;  %v8582_v23 = vpop.f32.mrb[139].mxu0  ;;  %9792 = vmatprep.subr.bf16.mxu1 %v10435_v54  ;;  %v8615_v59 = vmax.f32 %v8588_v3, 0.0 }
 0xe38   :  { %v8583_v45 = vadd.f32 %v8582_v23, %v8453_v21  ;;  %v8613_v6 = vmax.f32 %v8580_v56, 0.0 }
 0xe39   :  { %v8616_v38 = vmax.f32 %v8591_v28, 0.0 }
 0xe3a   :  { %v8614_v10 = vmax.f32 %v8583_v45, 0.0  ;;  %9793 = vmatpush3.bf16.msra.mxu1 %v8621_v0 }
 0xe3b   :  { %v8623_v33 = vpack.c.bf16 %v8616_v38, %v8615_v59  ;;  %9794 = vmatprep.subr.bf16.mxu1 %v10435_v54 }
 0xe3c   :  { %v8622_v50 = vpack.c.bf16 %v8614_v10, %v8613_v6  ;;  %v9788_v26 = vpop.f32.mrb[140].mxu0 }
 0xe3d   :  { %v8604_v27 = vadd.f32 %v9788_v26, %v8478_v4  ;;  %v8595_v48 = vpop.f32.mrb[141].mxu0 }
 0xe3e   :  { %v8596_v43 = vadd.f32 %v8595_v48, %v8468_v32  ;;  %v9789_v1 = vpop.f32.mrb[142].mxu0  ;;  %9795 = vmatpush3.bf16.msra.mxu1 %v8622_v50 }
 0xe3f   :  { %v8598_v14 = vpop.f32.mrb[143].mxu0  ;;  %9796 = vmatprep.subr.bf16.mxu1 %v10435_v54  ;;  %v8619_v31 = vmax.f32 %v8604_v27, 0.0 }
 0xe40   :  { %v8599_v39 = vadd.f32 %v8598_v14, %v8473_v42  ;;  %v8617_v37 = vmax.f32 %v8596_v43, 0.0 }
 0xe41   :  { %v8625_v47 = vpack.c.bf16 %v8619_v31, %v8619_v31 }
 0xe42   :  { %v8618_v16 = vmax.f32 %v8599_v39, 0.0  ;;  %9797 = vmatpush3.bf16.msra.mxu1 %v8623_v33 }
 0xe43   :  { %9798 = vmatprep.subr.bf16.mxu1 %v10435_v54  ;;  %v8651_v60 = vsel %vm8649_vm12, %v8625_v47, 0 }
 0xe44   :  { %v8624_v53 = vpack.c.bf16 %v8618_v16, %v8617_v37 }
 0xe46   :  { %9799 = vmatpush3.bf16.msra.mxu1 %v8624_v53 }
 0xe47   :  { %9800 = vmatprep.subr.bf16.mxu1 %v10435_v54 }
 0xe4a   :  { %9801 = vmatpush3.bf16.msra.mxu1 %v8651_v60 }
 0xe4d   :  { %9803 = vmatmul.mubr.msk.bf16.vlgmr.msra.gmra.mrb[128].mxu1 %vm8645_vm13, %v10427_v44 }
 0xf20   :  { %v8687_v20 = vpop.f32.mrb[128].mxu1 }
 0xf21   :  { %v8688_v57 = vadd.f32 %v8687_v20, %v8633_v30  ;;  %v9804_v52 = vpop.f32.mrb[129].mxu1 }
 0xf22   :  { %v8690_v55 = vpop.f32.mrb[130].mxu1 }
 0xf23   :  { %8695 = vst.msk [vmem:[%s15501_s12] sm:$0xff] %vm8694_vm14, %v8688_v57  ;;  %v8691_v2 = vadd.f32 %v8690_v55, %v8638_v7  ;;  %v9805_v15 = vpop.f32.mrb[131].mxu1 }
 0xf25   :  { %8697 = vst.msk [vmem:[%s15501_s12 + $0x8] sm:$0x3] %vm8696_vm15, %v8691_v2 }

</bundles_post_ra>
